<compile_context>
chip_gen: v5e
topology: v5e:2x2
jax: 0.10.0
libtpu: 0.0.40
codegen_flags: <defaults>
</compile_context>

<pallas_src>
import functools

import numpy as np
import jax
import jax.numpy as jnp
from jax.experimental import pallas as pl
from jax.experimental.pallas import tpu as pltpu


# ----------------------------------------------------------------------------
# Pallas GEMM kernel: out = maybe_relu(A @ B + bias [+ residual])
#   A:(tm,tk) bf16, B:(tk,tn) bf16, bias:(1,tn) f32, residual:(tm,tn) f32,
#   accumulation happens directly in the f32 output block (resident across K).
# ----------------------------------------------------------------------------
def _gemm_kernel(*refs, relu, has_res):
    if has_res:
        a_ref, b_ref, bias_ref, res_ref, o_ref = refs
    else:
        a_ref, b_ref, bias_ref, o_ref = refs
        res_ref = None

    k = pl.program_id(2)

    @pl.when(k == 0)
    def _init():
        o_ref[...] = jnp.zeros_like(o_ref)

    o_ref[...] += jnp.dot(a_ref[...], b_ref[...],
                          preferred_element_type=jnp.float32)

    @pl.when(k == pl.num_programs(2) - 1)
    def _epilogue():
        out = o_ref[...] + bias_ref[...]
        if has_res:
            out = out + res_ref[...]
        if relu:
            out = jnp.maximum(out, 0.0)
        o_ref[...] = out


def _round_up(x, m):
    return ((x + m - 1) // m) * m


def _pick_divisor(dim, candidates):
    """Largest candidate that divides dim exactly; else the full dim (no padding)."""
    for c in candidates:
        if dim % c == 0:
            return c
    return dim


def pallas_matmul(a, b, bias=None, residual=None, relu=False, use_bf16=True):
    """a:(M,K) @ b:(K,N) + bias(N,) [+ residual(M,N)], optional ReLU. f32 output."""
    M, K = a.shape
    K2, N = b.shape
    assert K == K2

    # --- tile selection: avoid operand padding whenever dims already line up ---
    tn = _pick_divisor(N, (256, 128))          # lane-dense output tiles when possible
    tk = _pick_divisor(K, (512, 384, 256, 128))  # MXU-friendly K step, else full K
    if M <= 256:
        tm = M if M % 8 == 0 else _round_up(M, 8)
    else:
        tm = 256
    Mp = _round_up(M, tm)

    a_in = a.astype(jnp.bfloat16) if use_bf16 else a
    b_in = b.astype(jnp.bfloat16) if use_bf16 else b
    if Mp != M:
        a_in = jnp.pad(a_in, ((0, Mp - M), (0, 0)))   # only the M tail, if any

    if bias is None:
        bias2d = jnp.zeros((1, N), jnp.float32)
    else:
        bias2d = bias.reshape(1, N).astype(jnp.float32)

    has_res = residual is not None

    in_specs = [
        pl.BlockSpec((tm, tk), lambda i, j, k: (i, k)),
        pl.BlockSpec((tk, tn), lambda i, j, k: (k, j)),
        pl.BlockSpec((1, tn), lambda i, j, k: (0, j)),
    ]
    operands = [a_in, b_in, bias2d]
    if has_res:
        res = residual.astype(jnp.float32)
        if Mp != M:
            res = jnp.pad(res, ((0, Mp - M), (0, 0)))
        in_specs.append(pl.BlockSpec((tm, tn), lambda i, j, k: (i, j)))
        operands.append(res)

    bytes_accessed = int(a_in.size) * a_in.dtype.itemsize \
        + int(b_in.size) * b_in.dtype.itemsize \
        + Mp * N * 4 * (2 if has_res else 1) + N * 4
    cost = pl.CostEstimate(flops=2 * M * N * K, transcendentals=0,
                           bytes_accessed=bytes_accessed)

    out = pl.pallas_call(
        functools.partial(_gemm_kernel, relu=relu, has_res=has_res),
        out_shape=jax.ShapeDtypeStruct((Mp, N), jnp.float32),
        grid_spec=pltpu.PrefetchScalarGridSpec(
            num_scalar_prefetch=0,
            grid=(Mp // tm, N // tn, K // tk),
            in_specs=in_specs,
            out_specs=pl.BlockSpec((tm, tn), lambda i, j, k: (i, j)),
        ),
        compiler_params=pltpu.CompilerParams(
            dimension_semantics=("parallel", "parallel", "arbitrary"),
            vmem_limit_bytes=32 * 1024 * 1024),
        cost_estimate=cost,
    )(*operands)

    if Mp != M:
        out = out[:M]
    return out


# ----------------------------------------------------------------------------
# Conv2d (NHWC) = patch extraction (glue) + Pallas GEMM (hot path)
# ----------------------------------------------------------------------------
def conv2d_nhwc(x, w_mat, b, k, stride=1, padding=0, dilation=1,
                relu=False, residual=None):
    """x:(N,H,W,C), w_mat:(k*k*C, Cout) prepared at init, b:(Cout,).
    Returns (N,Ho,Wo,Cout)."""
    N, H, W, C = x.shape
    Cout = w_mat.shape[1]
    Ho = (H + 2 * padding - dilation * (k - 1) - 1) // stride + 1
    Wo = (W + 2 * padding - dilation * (k - 1) - 1) // stride + 1

    xp = x if padding == 0 else jnp.pad(
        x, ((0, 0), (padding, padding), (padding, padding), (0, 0)))

    if k == 1:
        A = xp[:, ::stride, ::stride, :].reshape(N * Ho * Wo, C)
    else:
        # TODO(synk): patch extraction still materializes k*k shifted activation
        # copies in HBM; fusing the tap loop into the kernel's K grid axis would
        # need data-dependent element-offset windows (manual DMA), left for later.
        cols = []
        for i in range(k):
            for j in range(k):
                hi, wi = i * dilation, j * dilation
                cols.append(xp[:, hi:hi + (Ho - 1) * stride + 1:stride,
                               wi:wi + (Wo - 1) * stride + 1:stride, :])
        A = jnp.concatenate(cols, axis=-1).reshape(N * Ho * Wo, k * k * C)

    res_flat = None
    if residual is not None:
        res_flat = residual.reshape(N * Ho * Wo, Cout)

    out = pallas_matmul(A, w_mat, bias=b, residual=res_flat, relu=relu)
    return out.reshape(N, Ho, Wo, Cout)


# TODO(synk): 3x3/s2 max-pool is a tiny memory-bound reduction kept in plain JAX;
# the conv GEMMs (the hot path) are in the Pallas kernel.
def maxpool_3x3_s2_p1(x):  # NHWC
    N, H, W, C = x.shape
    Ho = (H + 2 - 3) // 2 + 1
    Wo = (W + 2 - 3) // 2 + 1
    xp = jnp.pad(x, ((0, 0), (1, 1), (1, 1), (0, 0)), constant_values=-jnp.inf)
    out = None
    for i in range(3):
        for j in range(3):
            v = xp[:, i:i + 2 * (Ho - 1) + 1:2, j:j + 2 * (Wo - 1) + 1:2, :]
            out = v if out is None else jnp.maximum(out, v)
    return out


# ----------------------------------------------------------------------------
# Bilinear upsample (align_corners=True) as one Pallas GEMM with kron(Mh, Mw)
# ----------------------------------------------------------------------------
def _bilinear_matrix(out_size, in_size):
    M = np.zeros((out_size, in_size), np.float32)
    if in_size == 1 or out_size == 1:
        M[:, 0] = 1.0
        return M
    src = np.arange(out_size) * (in_size - 1) / (out_size - 1)
    i0 = np.floor(src).astype(np.int64)
    i1 = np.minimum(i0 + 1, in_size - 1)
    w1 = (src - i0).astype(np.float32)
    M[np.arange(out_size), i0] += (1.0 - w1)
    M[np.arange(out_size), i1] += w1
    return M


def upsample_bilinear_nhwc_to_nchw(x, out_h, out_w):
    """x:(N,h,w,C) -> (N,C,out_h,out_w), align_corners=True bilinear."""
    N, h, w, C = x.shape
    W_up = jnp.asarray(np.kron(_bilinear_matrix(out_h, h),
                               _bilinear_matrix(out_w, w)))        # (H*W, h*w)
    cols = x.reshape(N, h * w, C).transpose(1, 0, 2).reshape(h * w, N * C)
    out = pallas_matmul(W_up, cols, use_bf16=False)                # (H*W, N*C)
    return out.reshape(out_h, out_w, N, C).transpose(2, 3, 0, 1)   # -> NCHW


# ----------------------------------------------------------------------------
# Parameters (deterministic synthetic init; BatchNorm folded, GEMM layout, bf16)
# ----------------------------------------------------------------------------
def _fold_bn(w, gamma, beta, mean, var, eps=1e-5):
    scale = gamma / jnp.sqrt(var + eps)
    return w * scale[:, None, None, None], beta - mean * scale


def init_params(key, num_classes):
    keys = iter(jax.random.split(key, 128))

    def conv_bn(cout, cin, k):
        w = jax.random.normal(next(keys), (cout, cin, k, k), jnp.float32) * 0.05
        gamma = 1.0 + 0.1 * jax.random.normal(next(keys), (cout,), jnp.float32)
        beta = 0.02 * jax.random.normal(next(keys), (cout,), jnp.float32)
        mean = 0.02 * jax.random.normal(next(keys), (cout,), jnp.float32)
        var = 1.0 + 0.1 * jax.random.uniform(next(keys), (cout,), jnp.float32)
        wf, bf = _fold_bn(w, gamma, beta, mean, var)
        # GEMM-ready layout (k*k*Cin, Cout), bf16 once at init (row = tap*Cin + cin).
        w_mat = wf.transpose(2, 3, 1, 0).reshape(k * k * cin, cout)
        return w_mat.astype(jnp.bfloat16), bf

    def block(cin, cout, with_down):
        p = {'conv1': conv_bn(cout, cin, 3), 'conv2': conv_bn(cout, cout, 3)}
        if with_down:
            p['down'] = conv_bn(cout, cin, 1)
        return p

    fc_w = jax.random.normal(next(keys), (num_classes, 512, 1, 1),
                             jnp.float32) * 0.01
    fc_mat = fc_w.transpose(2, 3, 1, 0).reshape(512, num_classes)

    params = {
        'conv1': conv_bn(64, 3, 7),
        'layer1': [block(64, 64, False), block(64, 64, False)],
        'layer2': [block(64, 128, True), block(128, 128, False)],
        'layer3': [block(128, 256, True), block(256, 256, False)],
        'layer4': [block(256, 512, True), block(512, 512, False)],
        # fc = Conv2d(512, num_classes, 1), normal(0, 0.01) weight, zero bias
        'fc': (fc_mat.astype(jnp.bfloat16),
               jnp.zeros((num_classes,), jnp.float32)),
    }
    return params


# ----------------------------------------------------------------------------
# Forward pass (ResNet-18, output_stride=16: layer4 uses stride=1, dilation=2)
# ----------------------------------------------------------------------------
def basic_block(x, p, stride, dilation):
    if 'down' in p:
        residual = conv2d_nhwc(x, *p['down'], k=1, stride=stride)
    else:
        residual = x
    out = conv2d_nhwc(x, *p['conv1'], k=3, stride=stride,
                      padding=dilation, dilation=dilation, relu=True)
    # conv2 + bn2 + residual add + relu, fused in the GEMM epilogue
    out = conv2d_nhwc(out, *p['conv2'], k=3, stride=1,
                      padding=dilation, dilation=dilation, relu=True,
                      residual=residual)
    return out


def resnet18_16s_forward(params, x):
    H, W = x.shape[2], x.shape[3]
    x = x.transpose(0, 2, 3, 1)                       # NCHW -> NHWC once
    out = conv2d_nhwc(x, *params['conv1'], k=7, stride=2, padding=3, relu=True)
    out = maxpool_3x3_s2_p1(out)
    for name, stride, dil in (('layer1', 1, 1), ('layer2', 2, 1),
                              ('layer3', 2, 1), ('layer4', 1, 2)):
        b0, b1 = params[name]
        out = basic_block(out, b0, stride, dil)
        out = basic_block(out, b1, 1, dil)
    fc_w, fc_b = params['fc']
    out = conv2d_nhwc(out, fc_w, fc_b, k=1)
    # nn.functional.upsample_bilinear (align_corners=True), returns NCHW
    return upsample_bilinear_nhwc_to_nchw(out, H, W)


if __name__ == "__main__":
    num_classes = 16
    key = jax.random.PRNGKey(0)
    k_param, k_in = jax.random.split(key)
    params = init_params(k_param, num_classes)

    # small input consistent with the module: NCHW, 3 input channels
    x = jax.random.normal(k_in, (2, 3, 32, 32), jnp.float32)

    fwd = jax.jit(resnet18_16s_forward)
    y = jax.block_until_ready(fwd(params, x))

    assert y.shape == (2, num_classes, 32, 32), y.shape
    assert bool(jnp.all(jnp.isfinite(y)))
    print("KERNEL_OK")
</pallas_src>

<mosaic_0001>
module attributes {stable_mosaic.version = 11 : i64} {
  func.func @_gemm_kernel(%arg0: i32, %arg1: i32, %arg2: i32, %arg3: memref<256x147xbf16, #tpu.memory_space<vmem>>, %arg4: memref<147x64xbf16, #tpu.memory_space<vmem>>, %arg5: memref<1x64xf32, #tpu.memory_space<vmem>>, %arg6: memref<256x64xf32, #tpu.memory_space<vmem>>) attributes {dimension_semantics = [#tpu.dimension_semantics<parallel>, #tpu.dimension_semantics<parallel>, #tpu.dimension_semantics<arbitrary>], iteration_bounds = array<i64: 2, 1, 1>, scalar_prefetch = 0 : i64, scratch_operands = 0 : i64, tpu.core_type = #tpu.core_type<tc>, window_params = [{transform_indices = @transform_0, window_bounds = array<i64: 256, 147>}, {transform_indices = @transform_1, window_bounds = array<i64: 147, 64>}, {transform_indices = @transform_2, window_bounds = array<i64: 1, 64>}, {transform_indices = @transform_3, window_bounds = array<i64: 256, 64>}]} {
    %c0_i32 = arith.constant 0 : i32
    %0 = arith.cmpi eq, %arg2, %c0_i32 : i32
    %1 = arith.extui %0 : i1 to i32
    %c0_i32_0 = arith.constant 0 : i32
    %2 = arith.cmpi ne, %1, %c0_i32_0 : i32
    scf.if %2 {
      %cst_10 = arith.constant 0.000000e+00 : f32
      %12 = vector.broadcast %cst_10 : f32 to vector<256x64xf32>
      %c0_11 = arith.constant 0 : index
      %c0_12 = arith.constant 0 : index
      %13 = vector.load %arg6[%c0_11, %c0_12] : memref<256x64xf32, #tpu.memory_space<vmem>>, vector<256x64xf32>
      tpu.vector_store %arg6[%c0_11, %c0_12], %12 {strides = array<i32>} : memref<256x64xf32, #tpu.memory_space<vmem>>, vector<256x64xf32>,
    } else {
    }
    %c0 = arith.constant 0 : index
    %c0_1 = arith.constant 0 : index
    %3 = vector.load %arg6[%c0, %c0_1] : memref<256x64xf32, #tpu.memory_space<vmem>>, vector<256x64xf32>
    %c0_2 = arith.constant 0 : index
    %c0_3 = arith.constant 0 : index
    %4 = vector.load %arg3[%c0_2, %c0_3] : memref<256x147xbf16, #tpu.memory_space<vmem>>, vector<256x147xbf16>
    %c0_4 = arith.constant 0 : index
    %c0_5 = arith.constant 0 : index
    %5 = vector.load %arg4[%c0_4, %c0_5] : memref<147x64xbf16, #tpu.memory_space<vmem>>, vector<147x64xbf16>
    %cst = arith.constant dense<0.000000e+00> : vector<256x64xf32>
    %6 = tpu.matmul %4, %5, %cst {dimension_numbers = #tpu.dot_dimension_numbers<[1], [0], [0], [1], [0, 0, 1, 1], [], []>} : vector<256x147xbf16>, vector<147x64xbf16>, vector<256x64xf32> -> vector<256x64xf32>
    %7 = arith.addf %3, %6 : vector<256x64xf32>
    %c0_6 = arith.constant 0 : index
    %c0_7 = arith.constant 0 : index
    %8 = vector.load %arg6[%c0_6, %c0_7] : memref<256x64xf32, #tpu.memory_space<vmem>>, vector<256x64xf32>
    tpu.vector_store %arg6[%c0_6, %c0_7], %7 {strides = array<i32>} : memref<256x64xf32, #tpu.memory_space<vmem>>, vector<256x64xf32>,
    %c0_i32_8 = arith.constant 0 : i32
    %9 = arith.cmpi eq, %arg2, %c0_i32_8 : i32
    %10 = arith.extui %9 : i1 to i32
    %c0_i32_9 = arith.constant 0 : i32
    %11 = arith.cmpi ne, %10, %c0_i32_9 : i32
    scf.if %11 {
      %c0_10 = arith.constant 0 : index
      %c0_11 = arith.constant 0 : index
      %12 = vector.load %arg6[%c0_10, %c0_11] : memref<256x64xf32, #tpu.memory_space<vmem>>, vector<256x64xf32>
      %c0_12 = arith.constant 0 : index
      %c0_13 = arith.constant 0 : index
      %13 = vector.load %arg5[%c0_12, %c0_13] : memref<1x64xf32, #tpu.memory_space<vmem>>, vector<1x64xf32>
      %14 = vector.broadcast %13 : vector<1x64xf32> to vector<256x64xf32>
      %15 = arith.addf %12, %14 : vector<256x64xf32>
      %cst_14 = arith.constant 0.000000e+00 : f32
      %16 = vector.broadcast %cst_14 : f32 to vector<256x64xf32>
      %17 = arith.maximumf %15, %16 : vector<256x64xf32>
      %c0_15 = arith.constant 0 : index
      %c0_16 = arith.constant 0 : index
      %18 = vector.load %arg6[%c0_15, %c0_16] : memref<256x64xf32, #tpu.memory_space<vmem>>, vector<256x64xf32>
      tpu.vector_store %arg6[%c0_15, %c0_16], %17 {strides = array<i32>} : memref<256x64xf32, #tpu.memory_space<vmem>>, vector<256x64xf32>,
    } else {
    }
    return
  }
  func.func @transform_0(%arg0: i32, %arg1: i32, %arg2: i32) -> (i32, i32) {
    %c0_i32 = arith.constant 0 : i32
    return %arg0, %arg2 : i32, i32
  }
  func.func @transform_1(%arg0: i32, %arg1: i32, %arg2: i32) -> (i32, i32) {
    %c0_i32 = arith.constant 0 : i32
    return %arg2, %arg1 : i32, i32
  }
  func.func @transform_2(%arg0: i32, %arg1: i32, %arg2: i32) -> (i32, i32) {
    %c0_i32 = arith.constant 0 : i32
    %c0_i32_0 = arith.constant 0 : i32
    return %c0_i32, %arg1 : i32, i32
  }
  func.func @transform_3(%arg0: i32, %arg1: i32, %arg2: i32) -> (i32, i32) {
    %c0_i32 = arith.constant 0 : i32
    return %arg0, %arg1 : i32, i32
  }
}

module attributes {stable_mosaic.version = 11 : i64} {
  func.func @_gemm_kernel(%arg0: i32, %arg1: i32, %arg2: i32, %arg3: memref<128x576xbf16, #tpu.memory_space<vmem>>, %arg4: memref<576x64xbf16, #tpu.memory_space<vmem>>, %arg5: memref<1x64xf32, #tpu.memory_space<vmem>>, %arg6: memref<128x64xf32, #tpu.memory_space<vmem>>) attributes {dimension_semantics = [#tpu.dimension_semantics<parallel>, #tpu.dimension_semantics<parallel>, #tpu.dimension_semantics<arbitrary>], iteration_bounds = array<i64: 1, 1, 1>, scalar_prefetch = 0 : i64, scratch_operands = 0 : i64, tpu.core_type = #tpu.core_type<tc>, window_params = [{transform_indices = @transform_0, window_bounds = array<i64: 128, 576>}, {transform_indices = @transform_1, window_bounds = array<i64: 576, 64>}, {transform_indices = @transform_2, window_bounds = array<i64: 1, 64>}, {transform_indices = @transform_3, window_bounds = array<i64: 128, 64>}]} {
    %c0_i32 = arith.constant 0 : i32
    %0 = arith.cmpi eq, %arg2, %c0_i32 : i32
    %1 = arith.extui %0 : i1 to i32
    %c0_i32_0 = arith.constant 0 : i32
    %2 = arith.cmpi ne, %1, %c0_i32_0 : i32
    scf.if %2 {
      %cst_10 = arith.constant 0.000000e+00 : f32
      %12 = vector.broadcast %cst_10 : f32 to vector<128x64xf32>
      %c0_11 = arith.constant 0 : index
      %c0_12 = arith.constant 0 : index
      %13 = vector.load %arg6[%c0_11, %c0_12] : memref<128x64xf32, #tpu.memory_space<vmem>>, vector<128x64xf32>
      tpu.vector_store %arg6[%c0_11, %c0_12], %12 {strides = array<i32>} : memref<128x64xf32, #tpu.memory_space<vmem>>, vector<128x64xf32>,
    } else {
    }
    %c0 = arith.constant 0 : index
    %c0_1 = arith.constant 0 : index
    %3 = vector.load %arg6[%c0, %c0_1] : memref<128x64xf32, #tpu.memory_space<vmem>>, vector<128x64xf32>
    %c0_2 = arith.constant 0 : index
    %c0_3 = arith.constant 0 : index
    %4 = vector.load %arg3[%c0_2, %c0_3] : memref<128x576xbf16, #tpu.memory_space<vmem>>, vector<128x576xbf16>
    %c0_4 = arith.constant 0 : index
    %c0_5 = arith.constant 0 : index
    %5 = vector.load %arg4[%c0_4, %c0_5] : memref<576x64xbf16, #tpu.memory_space<vmem>>, vector<576x64xbf16>
    %cst = arith.constant dense<0.000000e+00> : vector<128x64xf32>
    %6 = tpu.matmul %4, %5, %cst {dimension_numbers = #tpu.dot_dimension_numbers<[1], [0], [0], [1], [0, 0, 1, 1], [], []>} : vector<128x576xbf16>, vector<576x64xbf16>, vector<128x64xf32> -> vector<128x64xf32>
    %7 = arith.addf %3, %6 : vector<128x64xf32>
    %c0_6 = arith.constant 0 : index
    %c0_7 = arith.constant 0 : index
    %8 = vector.load %arg6[%c0_6, %c0_7] : memref<128x64xf32, #tpu.memory_space<vmem>>, vector<128x64xf32>
    tpu.vector_store %arg6[%c0_6, %c0_7], %7 {strides = array<i32>} : memref<128x64xf32, #tpu.memory_space<vmem>>, vector<128x64xf32>,
    %c0_i32_8 = arith.constant 0 : i32
    %9 = arith.cmpi eq, %arg2, %c0_i32_8 : i32
    %10 = arith.extui %9 : i1 to i32
    %c0_i32_9 = arith.constant 0 : i32
    %11 = arith.cmpi ne, %10, %c0_i32_9 : i32
    scf.if %11 {
      %c0_10 = arith.constant 0 : index
      %c0_11 = arith.constant 0 : index
      %12 = vector.load %arg6[%c0_10, %c0_11] : memref<128x64xf32, #tpu.memory_space<vmem>>, vector<128x64xf32>
      %c0_12 = arith.constant 0 : index
      %c0_13 = arith.constant 0 : index
      %13 = vector.load %arg5[%c0_12, %c0_13] : memref<1x64xf32, #tpu.memory_space<vmem>>, vector<1x64xf32>
      %14 = vector.broadcast %13 : vector<1x64xf32> to vector<128x64xf32>
      %15 = arith.addf %12, %14 : vector<128x64xf32>
      %cst_14 = arith.constant 0.000000e+00 : f32
      %16 = vector.broadcast %cst_14 : f32 to vector<128x64xf32>
      %17 = arith.maximumf %15, %16 : vector<128x64xf32>
      %c0_15 = arith.constant 0 : index
      %c0_16 = arith.constant 0 : index
      %18 = vector.load %arg6[%c0_15, %c0_16] : memref<128x64xf32, #tpu.memory_space<vmem>>, vector<128x64xf32>
      tpu.vector_store %arg6[%c0_15, %c0_16], %17 {strides = array<i32>} : memref<128x64xf32, #tpu.memory_space<vmem>>, vector<128x64xf32>,
    } else {
    }
    return
  }
  func.func @transform_0(%arg0: i32, %arg1: i32, %arg2: i32) -> (i32, i32) {
    %c0_i32 = arith.constant 0 : i32
    return %arg0, %arg2 : i32, i32
  }
  func.func @transform_1(%arg0: i32, %arg1: i32, %arg2: i32) -> (i32, i32) {
    %c0_i32 = arith.constant 0 : i32
    return %arg2, %arg1 : i32, i32
  }
  func.func @transform_2(%arg0: i32, %arg1: i32, %arg2: i32) -> (i32, i32) {
    %c0_i32 = arith.constant 0 : i32
    %c0_i32_0 = arith.constant 0 : i32
    return %c0_i32, %arg1 : i32, i32
  }
  func.func @transform_3(%arg0: i32, %arg1: i32, %arg2: i32) -> (i32, i32) {
    %c0_i32 = arith.constant 0 : i32
    return %arg0, %arg1 : i32, i32
  }
}

module attributes {stable_mosaic.version = 11 : i64} {
  func.func @_gemm_kernel(%arg0: i32, %arg1: i32, %arg2: i32, %arg3: memref<128x576xbf16, #tpu.memory_space<vmem>>, %arg4: memref<576x64xbf16, #tpu.memory_space<vmem>>, %arg5: memref<1x64xf32, #tpu.memory_space<vmem>>, %arg6: memref<128x64xf32, #tpu.memory_space<vmem>>, %arg7: memref<128x64xf32, #tpu.memory_space<vmem>>) attributes {dimension_semantics = [#tpu.dimension_semantics<parallel>, #tpu.dimension_semantics<parallel>, #tpu.dimension_semantics<arbitrary>], iteration_bounds = array<i64: 1, 1, 1>, scalar_prefetch = 0 : i64, scratch_operands = 0 : i64, tpu.core_type = #tpu.core_type<tc>, window_params = [{transform_indices = @transform_0, window_bounds = array<i64: 128, 576>}, {transform_indices = @transform_1, window_bounds = array<i64: 576, 64>}, {transform_indices = @transform_2, window_bounds = array<i64: 1, 64>}, {transform_indices = @transform_3, window_bounds = array<i64: 128, 64>}, {transform_indices = @transform_4, window_bounds = array<i64: 128, 64>}]} {
    %c0_i32 = arith.constant 0 : i32
    %0 = arith.cmpi eq, %arg2, %c0_i32 : i32
    %1 = arith.extui %0 : i1 to i32
    %c0_i32_0 = arith.constant 0 : i32
    %2 = arith.cmpi ne, %1, %c0_i32_0 : i32
    scf.if %2 {
      %cst_10 = arith.constant 0.000000e+00 : f32
      %12 = vector.broadcast %cst_10 : f32 to vector<128x64xf32>
      %c0_11 = arith.constant 0 : index
      %c0_12 = arith.constant 0 : index
      %13 = vector.load %arg7[%c0_11, %c0_12] : memref<128x64xf32, #tpu.memory_space<vmem>>, vector<128x64xf32>
      tpu.vector_store %arg7[%c0_11, %c0_12], %12 {strides = array<i32>} : memref<128x64xf32, #tpu.memory_space<vmem>>, vector<128x64xf32>,
    } else {
    }
    %c0 = arith.constant 0 : index
    %c0_1 = arith.constant 0 : index
    %3 = vector.load %arg7[%c0, %c0_1] : memref<128x64xf32, #tpu.memory_space<vmem>>, vector<128x64xf32>
    %c0_2 = arith.constant 0 : index
    %c0_3 = arith.constant 0 : index
    %4 = vector.load %arg3[%c0_2, %c0_3] : memref<128x576xbf16, #tpu.memory_space<vmem>>, vector<128x576xbf16>
    %c0_4 = arith.constant 0 : index
    %c0_5 = arith.constant 0 : index
    %5 = vector.load %arg4[%c0_4, %c0_5] : memref<576x64xbf16, #tpu.memory_space<vmem>>, vector<576x64xbf16>
    %cst = arith.constant dense<0.000000e+00> : vector<128x64xf32>
    %6 = tpu.matmul %4, %5, %cst {dimension_numbers = #tpu.dot_dimension_numbers<[1], [0], [0], [1], [0, 0, 1, 1], [], []>} : vector<128x576xbf16>, vector<576x64xbf16>, vector<128x64xf32> -> vector<128x64xf32>
    %7 = arith.addf %3, %6 : vector<128x64xf32>
    %c0_6 = arith.constant 0 : index
    %c0_7 = arith.constant 0 : index
    %8 = vector.load %arg7[%c0_6, %c0_7] : memref<128x64xf32, #tpu.memory_space<vmem>>, vector<128x64xf32>
    tpu.vector_store %arg7[%c0_6, %c0_7], %7 {strides = array<i32>} : memref<128x64xf32, #tpu.memory_space<vmem>>, vector<128x64xf32>,
    %c0_i32_8 = arith.constant 0 : i32
    %9 = arith.cmpi eq, %arg2, %c0_i32_8 : i32
    %10 = arith.extui %9 : i1 to i32
    %c0_i32_9 = arith.constant 0 : i32
    %11 = arith.cmpi ne, %10, %c0_i32_9 : i32
    scf.if %11 {
      %c0_10 = arith.constant 0 : index
      %c0_11 = arith.constant 0 : index
      %12 = vector.load %arg7[%c0_10, %c0_11] : memref<128x64xf32, #tpu.memory_space<vmem>>, vector<128x64xf32>
      %c0_12 = arith.constant 0 : index
      %c0_13 = arith.constant 0 : index
      %13 = vector.load %arg5[%c0_12, %c0_13] : memref<1x64xf32, #tpu.memory_space<vmem>>, vector<1x64xf32>
      %14 = vector.broadcast %13 : vector<1x64xf32> to vector<128x64xf32>
      %15 = arith.addf %12, %14 : vector<128x64xf32>
      %c0_14 = arith.constant 0 : index
      %c0_15 = arith.constant 0 : index
      %16 = vector.load %arg6[%c0_14, %c0_15] : memref<128x64xf32, #tpu.memory_space<vmem>>, vector<128x64xf32>
      %17 = arith.addf %15, %16 : vector<128x64xf32>
      %cst_16 = arith.constant 0.000000e+00 : f32
      %18 = vector.broadcast %cst_16 : f32 to vector<128x64xf32>
      %19 = arith.maximumf %17, %18 : vector<128x64xf32>
      %c0_17 = arith.constant 0 : index
      %c0_18 = arith.constant 0 : index
      %20 = vector.load %arg7[%c0_17, %c0_18] : memref<128x64xf32, #tpu.memory_space<vmem>>, vector<128x64xf32>
      tpu.vector_store %arg7[%c0_17, %c0_18], %19 {strides = array<i32>} : memref<128x64xf32, #tpu.memory_space<vmem>>, vector<128x64xf32>,
    } else {
    }
    return
  }
  func.func @transform_0(%arg0: i32, %arg1: i32, %arg2: i32) -> (i32, i32) {
    %c0_i32 = arith.constant 0 : i32
    return %arg0, %arg2 : i32, i32
  }
  func.func @transform_1(%arg0: i32, %arg1: i32, %arg2: i32) -> (i32, i32) {
    %c0_i32 = arith.constant 0 : i32
    return %arg2, %arg1 : i32, i32
  }
  func.func @transform_2(%arg0: i32, %arg1: i32, %arg2: i32) -> (i32, i32) {
    %c0_i32 = arith.constant 0 : i32
    %c0_i32_0 = arith.constant 0 : i32
    return %c0_i32, %arg1 : i32, i32
  }
  func.func @transform_3(%arg0: i32, %arg1: i32, %arg2: i32) -> (i32, i32) {
    %c0_i32 = arith.constant 0 : i32
    return %arg0, %arg1 : i32, i32
  }
  func.func @transform_4(%arg0: i32, %arg1: i32, %arg2: i32) -> (i32, i32) {
    %c0_i32 = arith.constant 0 : i32
    return %arg0, %arg1 : i32, i32
  }
}

module attributes {stable_mosaic.version = 11 : i64} {
  func.func @_gemm_kernel(%arg0: i32, %arg1: i32, %arg2: i32, %arg3: memref<32x576xbf16, #tpu.memory_space<vmem>>, %arg4: memref<576x128xbf16, #tpu.memory_space<vmem>>, %arg5: memref<1x128xf32, #tpu.memory_space<vmem>>, %arg6: memref<32x128xf32, #tpu.memory_space<vmem>>) attributes {dimension_semantics = [#tpu.dimension_semantics<parallel>, #tpu.dimension_semantics<parallel>, #tpu.dimension_semantics<arbitrary>], iteration_bounds = array<i64: 1, 1, 1>, scalar_prefetch = 0 : i64, scratch_operands = 0 : i64, tpu.core_type = #tpu.core_type<tc>, window_params = [{transform_indices = @transform_0, window_bounds = array<i64: 32, 576>}, {transform_indices = @transform_1, window_bounds = array<i64: 576, 128>}, {transform_indices = @transform_2, window_bounds = array<i64: 1, 128>}, {transform_indices = @transform_3, window_bounds = array<i64: 32, 128>}]} {
    %c0_i32 = arith.constant 0 : i32
    %0 = arith.cmpi eq, %arg2, %c0_i32 : i32
    %1 = arith.extui %0 : i1 to i32
    %c0_i32_0 = arith.constant 0 : i32
    %2 = arith.cmpi ne, %1, %c0_i32_0 : i32
    scf.if %2 {
      %cst_10 = arith.constant 0.000000e+00 : f32
      %12 = vector.broadcast %cst_10 : f32 to vector<32x128xf32>
      %c0_11 = arith.constant 0 : index
      %c0_12 = arith.constant 0 : index
      %13 = vector.load %arg6[%c0_11, %c0_12] : memref<32x128xf32, #tpu.memory_space<vmem>>, vector<32x128xf32>
      tpu.vector_store %arg6[%c0_11, %c0_12], %12 {strides = array<i32>} : memref<32x128xf32, #tpu.memory_space<vmem>>, vector<32x128xf32>,
    } else {
    }
    %c0 = arith.constant 0 : index
    %c0_1 = arith.constant 0 : index
    %3 = vector.load %arg6[%c0, %c0_1] : memref<32x128xf32, #tpu.memory_space<vmem>>, vector<32x128xf32>
    %c0_2 = arith.constant 0 : index
    %c0_3 = arith.constant 0 : index
    %4 = vector.load %arg3[%c0_2, %c0_3] : memref<32x576xbf16, #tpu.memory_space<vmem>>, vector<32x576xbf16>
    %c0_4 = arith.constant 0 : index
    %c0_5 = arith.constant 0 : index
    %5 = vector.load %arg4[%c0_4, %c0_5] : memref<576x128xbf16, #tpu.memory_space<vmem>>, vector<576x128xbf16>
    %cst = arith.constant dense<0.000000e+00> : vector<32x128xf32>
    %6 = tpu.matmul %4, %5, %cst {dimension_numbers = #tpu.dot_dimension_numbers<[1], [0], [0], [1], [0, 0, 1, 1], [], []>} : vector<32x576xbf16>, vector<576x128xbf16>, vector<32x128xf32> -> vector<32x128xf32>
    %7 = arith.addf %3, %6 : vector<32x128xf32>
    %c0_6 = arith.constant 0 : index
    %c0_7 = arith.constant 0 : index
    %8 = vector.load %arg6[%c0_6, %c0_7] : memref<32x128xf32, #tpu.memory_space<vmem>>, vector<32x128xf32>
    tpu.vector_store %arg6[%c0_6, %c0_7], %7 {strides = array<i32>} : memref<32x128xf32, #tpu.memory_space<vmem>>, vector<32x128xf32>,
    %c0_i32_8 = arith.constant 0 : i32
    %9 = arith.cmpi eq, %arg2, %c0_i32_8 : i32
    %10 = arith.extui %9 : i1 to i32
    %c0_i32_9 = arith.constant 0 : i32
    %11 = arith.cmpi ne, %10, %c0_i32_9 : i32
    scf.if %11 {
      %c0_10 = arith.constant 0 : index
      %c0_11 = arith.constant 0 : index
      %12 = vector.load %arg6[%c0_10, %c0_11] : memref<32x128xf32, #tpu.memory_space<vmem>>, vector<32x128xf32>
      %c0_12 = arith.constant 0 : index
      %c0_13 = arith.constant 0 : index
      %13 = vector.load %arg5[%c0_12, %c0_13] : memref<1x128xf32, #tpu.memory_space<vmem>>, vector<1x128xf32>
      %14 = vector.broadcast %13 : vector<1x128xf32> to vector<32x128xf32>
      %15 = arith.addf %12, %14 : vector<32x128xf32>
      %cst_14 = arith.constant 0.000000e+00 : f32
      %16 = vector.broadcast %cst_14 : f32 to vector<32x128xf32>
      %17 = arith.maximumf %15, %16 : vector<32x128xf32>
      %c0_15 = arith.constant 0 : index
      %c0_16 = arith.constant 0 : index
      %18 = vector.load %arg6[%c0_15, %c0_16] : memref<32x128xf32, #tpu.memory_space<vmem>>, vector<32x128xf32>
      tpu.vector_store %arg6[%c0_15, %c0_16], %17 {strides = array<i32>} : memref<32x128xf32, #tpu.memory_space<vmem>>, vector<32x128xf32>,
    } else {
    }
    return
  }
  func.func @transform_0(%arg0: i32, %arg1: i32, %arg2: i32) -> (i32, i32) {
    %c0_i32 = arith.constant 0 : i32
    return %arg0, %arg2 : i32, i32
  }
  func.func @transform_1(%arg0: i32, %arg1: i32, %arg2: i32) -> (i32, i32) {
    %c0_i32 = arith.constant 0 : i32
    return %arg2, %arg1 : i32, i32
  }
  func.func @transform_2(%arg0: i32, %arg1: i32, %arg2: i32) -> (i32, i32) {
    %c0_i32 = arith.constant 0 : i32
    %c0_i32_0 = arith.constant 0 : i32
    return %c0_i32, %arg1 : i32, i32
  }
  func.func @transform_3(%arg0: i32, %arg1: i32, %arg2: i32) -> (i32, i32) {
    %c0_i32 = arith.constant 0 : i32
    return %arg0, %arg1 : i32, i32
  }
}

module attributes {stable_mosaic.version = 11 : i64} {
  func.func @_gemm_kernel(%arg0: i32, %arg1: i32, %arg2: i32, %arg3: memref<32x64xbf16, #tpu.memory_space<vmem>>, %arg4: memref<64x128xbf16, #tpu.memory_space<vmem>>, %arg5: memref<1x128xf32, #tpu.memory_space<vmem>>, %arg6: memref<32x128xf32, #tpu.memory_space<vmem>>) attributes {dimension_semantics = [#tpu.dimension_semantics<parallel>, #tpu.dimension_semantics<parallel>, #tpu.dimension_semantics<arbitrary>], iteration_bounds = array<i64: 1, 1, 1>, scalar_prefetch = 0 : i64, scratch_operands = 0 : i64, tpu.core_type = #tpu.core_type<tc>, window_params = [{transform_indices = @transform_0, window_bounds = array<i64: 32, 64>}, {transform_indices = @transform_1, window_bounds = array<i64: 64, 128>}, {transform_indices = @transform_2, window_bounds = array<i64: 1, 128>}, {transform_indices = @transform_3, window_bounds = array<i64: 32, 128>}]} {
    %c0_i32 = arith.constant 0 : i32
    %0 = arith.cmpi eq, %arg2, %c0_i32 : i32
    %1 = arith.extui %0 : i1 to i32
    %c0_i32_0 = arith.constant 0 : i32
    %2 = arith.cmpi ne, %1, %c0_i32_0 : i32
    scf.if %2 {
      %cst_10 = arith.constant 0.000000e+00 : f32
      %12 = vector.broadcast %cst_10 : f32 to vector<32x128xf32>
      %c0_11 = arith.constant 0 : index
      %c0_12 = arith.constant 0 : index
      %13 = vector.load %arg6[%c0_11, %c0_12] : memref<32x128xf32, #tpu.memory_space<vmem>>, vector<32x128xf32>
      tpu.vector_store %arg6[%c0_11, %c0_12], %12 {strides = array<i32>} : memref<32x128xf32, #tpu.memory_space<vmem>>, vector<32x128xf32>,
    } else {
    }
    %c0 = arith.constant 0 : index
    %c0_1 = arith.constant 0 : index
    %3 = vector.load %arg6[%c0, %c0_1] : memref<32x128xf32, #tpu.memory_space<vmem>>, vector<32x128xf32>
    %c0_2 = arith.constant 0 : index
    %c0_3 = arith.constant 0 : index
    %4 = vector.load %arg3[%c0_2, %c0_3] : memref<32x64xbf16, #tpu.memory_space<vmem>>, vector<32x64xbf16>
    %c0_4 = arith.constant 0 : index
    %c0_5 = arith.constant 0 : index
    %5 = vector.load %arg4[%c0_4, %c0_5] : memref<64x128xbf16, #tpu.memory_space<vmem>>, vector<64x128xbf16>
    %cst = arith.constant dense<0.000000e+00> : vector<32x128xf32>
    %6 = tpu.matmul %4, %5, %cst {dimension_numbers = #tpu.dot_dimension_numbers<[1], [0], [0], [1], [0, 0, 1, 1], [], []>} : vector<32x64xbf16>, vector<64x128xbf16>, vector<32x128xf32> -> vector<32x128xf32>
    %7 = arith.addf %3, %6 : vector<32x128xf32>
    %c0_6 = arith.constant 0 : index
    %c0_7 = arith.constant 0 : index
    %8 = vector.load %arg6[%c0_6, %c0_7] : memref<32x128xf32, #tpu.memory_space<vmem>>, vector<32x128xf32>
    tpu.vector_store %arg6[%c0_6, %c0_7], %7 {strides = array<i32>} : memref<32x128xf32, #tpu.memory_space<vmem>>, vector<32x128xf32>,
    %c0_i32_8 = arith.constant 0 : i32
    %9 = arith.cmpi eq, %arg2, %c0_i32_8 : i32
    %10 = arith.extui %9 : i1 to i32
    %c0_i32_9 = arith.constant 0 : i32
    %11 = arith.cmpi ne, %10, %c0_i32_9 : i32
    scf.if %11 {
      %c0_10 = arith.constant 0 : index
      %c0_11 = arith.constant 0 : index
      %12 = vector.load %arg6[%c0_10, %c0_11] : memref<32x128xf32, #tpu.memory_space<vmem>>, vector<32x128xf32>
      %c0_12 = arith.constant 0 : index
      %c0_13 = arith.constant 0 : index
      %13 = vector.load %arg5[%c0_12, %c0_13] : memref<1x128xf32, #tpu.memory_space<vmem>>, vector<1x128xf32>
      %14 = vector.broadcast %13 : vector<1x128xf32> to vector<32x128xf32>
      %15 = arith.addf %12, %14 : vector<32x128xf32>
      %c0_14 = arith.constant 0 : index
      %c0_15 = arith.constant 0 : index
      %16 = vector.load %arg6[%c0_14, %c0_15] : memref<32x128xf32, #tpu.memory_space<vmem>>, vector<32x128xf32>
      tpu.vector_store %arg6[%c0_14, %c0_15], %15 {strides = array<i32>} : memref<32x128xf32, #tpu.memory_space<vmem>>, vector<32x128xf32>,
    } else {
    }
    return
  }
  func.func @transform_0(%arg0: i32, %arg1: i32, %arg2: i32) -> (i32, i32) {
    %c0_i32 = arith.constant 0 : i32
    return %arg0, %arg2 : i32, i32
  }
  func.func @transform_1(%arg0: i32, %arg1: i32, %arg2: i32) -> (i32, i32) {
    %c0_i32 = arith.constant 0 : i32
    return %arg2, %arg1 : i32, i32
  }
  func.func @transform_2(%arg0: i32, %arg1: i32, %arg2: i32) -> (i32, i32) {
    %c0_i32 = arith.constant 0 : i32
    %c0_i32_0 = arith.constant 0 : i32
    return %c0_i32, %arg1 : i32, i32
  }
  func.func @transform_3(%arg0: i32, %arg1: i32, %arg2: i32) -> (i32, i32) {
    %c0_i32 = arith.constant 0 : i32
    return %arg0, %arg1 : i32, i32
  }
}

module attributes {stable_mosaic.version = 11 : i64} {
  func.func @_gemm_kernel(%arg0: i32, %arg1: i32, %arg2: i32, %arg3: memref<32x384xbf16, #tpu.memory_space<vmem>>, %arg4: memref<384x128xbf16, #tpu.memory_space<vmem>>, %arg5: memref<1x128xf32, #tpu.memory_space<vmem>>, %arg6: memref<32x128xf32, #tpu.memory_space<vmem>>) attributes {dimension_semantics = [#tpu.dimension_semantics<parallel>, #tpu.dimension_semantics<parallel>, #tpu.dimension_semantics<arbitrary>], iteration_bounds = array<i64: 1, 1, 3>, scalar_prefetch = 0 : i64, scratch_operands = 0 : i64, tpu.core_type = #tpu.core_type<tc>, window_params = [{transform_indices = @transform_0, window_bounds = array<i64: 32, 384>}, {transform_indices = @transform_1, window_bounds = array<i64: 384, 128>}, {transform_indices = @transform_2, window_bounds = array<i64: 1, 128>}, {transform_indices = @transform_3, window_bounds = array<i64: 32, 128>}]} {
    %c0_i32 = arith.constant 0 : i32
    %0 = arith.cmpi eq, %arg2, %c0_i32 : i32
    %1 = arith.extui %0 : i1 to i32
    %c0_i32_0 = arith.constant 0 : i32
    %2 = arith.cmpi ne, %1, %c0_i32_0 : i32
    scf.if %2 {
      %cst_9 = arith.constant 0.000000e+00 : f32
      %12 = vector.broadcast %cst_9 : f32 to vector<32x128xf32>
      %c0_10 = arith.constant 0 : index
      %c0_11 = arith.constant 0 : index
      %13 = vector.load %arg6[%c0_10, %c0_11] : memref<32x128xf32, #tpu.memory_space<vmem>>, vector<32x128xf32>
      tpu.vector_store %arg6[%c0_10, %c0_11], %12 {strides = array<i32>} : memref<32x128xf32, #tpu.memory_space<vmem>>, vector<32x128xf32>,
    } else {
    }
    %c0 = arith.constant 0 : index
    %c0_1 = arith.constant 0 : index
    %3 = vector.load %arg6[%c0, %c0_1] : memref<32x128xf32, #tpu.memory_space<vmem>>, vector<32x128xf32>
    %c0_2 = arith.constant 0 : index
    %c0_3 = arith.constant 0 : index
    %4 = vector.load %arg3[%c0_2, %c0_3] : memref<32x384xbf16, #tpu.memory_space<vmem>>, vector<32x384xbf16>
    %c0_4 = arith.constant 0 : index
    %c0_5 = arith.constant 0 : index
    %5 = vector.load %arg4[%c0_4, %c0_5] : memref<384x128xbf16, #tpu.memory_space<vmem>>, vector<384x128xbf16>
    %cst = arith.constant dense<0.000000e+00> : vector<32x128xf32>
    %6 = tpu.matmul %4, %5, %cst {dimension_numbers = #tpu.dot_dimension_numbers<[1], [0], [0], [1], [0, 0, 1, 1], [], []>} : vector<32x384xbf16>, vector<384x128xbf16>, vector<32x128xf32> -> vector<32x128xf32>
    %7 = arith.addf %3, %6 : vector<32x128xf32>
    %c0_6 = arith.constant 0 : index
    %c0_7 = arith.constant 0 : index
    %8 = vector.load %arg6[%c0_6, %c0_7] : memref<32x128xf32, #tpu.memory_space<vmem>>, vector<32x128xf32>
    tpu.vector_store %arg6[%c0_6, %c0_7], %7 {strides = array<i32>} : memref<32x128xf32, #tpu.memory_space<vmem>>, vector<32x128xf32>,
    %c2_i32 = arith.constant 2 : i32
    %9 = arith.cmpi eq, %arg2, %c2_i32 : i32
    %10 = arith.extui %9 : i1 to i32
    %c0_i32_8 = arith.constant 0 : i32
    %11 = arith.cmpi ne, %10, %c0_i32_8 : i32
    scf.if %11 {
      %c0_9 = arith.constant 0 : index
      %c0_10 = arith.constant 0 : index
      %12 = vector.load %arg6[%c0_9, %c0_10] : memref<32x128xf32, #tpu.memory_space<vmem>>, vector<32x128xf32>
      %c0_11 = arith.constant 0 : index
      %c0_12 = arith.constant 0 : index
      %13 = vector.load %arg5[%c0_11, %c0_12] : memref<1x128xf32, #tpu.memory_space<vmem>>, vector<1x128xf32>
      %14 = vector.broadcast %13 : vector<1x128xf32> to vector<32x128xf32>
      %15 = arith.addf %12, %14 : vector<32x128xf32>
      %cst_13 = arith.constant 0.000000e+00 : f32
      %16 = vector.broadcast %cst_13 : f32 to vector<32x128xf32>
      %17 = arith.maximumf %15, %16 : vector<32x128xf32>
      %c0_14 = arith.constant 0 : index
      %c0_15 = arith.constant 0 : index
      %18 = vector.load %arg6[%c0_14, %c0_15] : memref<32x128xf32, #tpu.memory_space<vmem>>, vector<32x128xf32>
      tpu.vector_store %arg6[%c0_14, %c0_15], %17 {strides = array<i32>} : memref<32x128xf32, #tpu.memory_space<vmem>>, vector<32x128xf32>,
    } else {
    }
    return
  }
  func.func @transform_0(%arg0: i32, %arg1: i32, %arg2: i32) -> (i32, i32) {
    %c0_i32 = arith.constant 0 : i32
    return %arg0, %arg2 : i32, i32
  }
  func.func @transform_1(%arg0: i32, %arg1: i32, %arg2: i32) -> (i32, i32) {
    %c0_i32 = arith.constant 0 : i32
    return %arg2, %arg1 : i32, i32
  }
  func.func @transform_2(%arg0: i32, %arg1: i32, %arg2: i32) -> (i32, i32) {
    %c0_i32 = arith.constant 0 : i32
    %c0_i32_0 = arith.constant 0 : i32
    return %c0_i32, %arg1 : i32, i32
  }
  func.func @transform_3(%arg0: i32, %arg1: i32, %arg2: i32) -> (i32, i32) {
    %c0_i32 = arith.constant 0 : i32
    return %arg0, %arg1 : i32, i32
  }
}

module attributes {stable_mosaic.version = 11 : i64} {
  func.func @_gemm_kernel(%arg0: i32, %arg1: i32, %arg2: i32, %arg3: memref<32x384xbf16, #tpu.memory_space<vmem>>, %arg4: memref<384x128xbf16, #tpu.memory_space<vmem>>, %arg5: memref<1x128xf32, #tpu.memory_space<vmem>>, %arg6: memref<32x128xf32, #tpu.memory_space<vmem>>, %arg7: memref<32x128xf32, #tpu.memory_space<vmem>>) attributes {dimension_semantics = [#tpu.dimension_semantics<parallel>, #tpu.dimension_semantics<parallel>, #tpu.dimension_semantics<arbitrary>], iteration_bounds = array<i64: 1, 1, 3>, scalar_prefetch = 0 : i64, scratch_operands = 0 : i64, tpu.core_type = #tpu.core_type<tc>, window_params = [{transform_indices = @transform_0, window_bounds = array<i64: 32, 384>}, {transform_indices = @transform_1, window_bounds = array<i64: 384, 128>}, {transform_indices = @transform_2, window_bounds = array<i64: 1, 128>}, {transform_indices = @transform_3, window_bounds = array<i64: 32, 128>}, {transform_indices = @transform_4, window_bounds = array<i64: 32, 128>}]} {
    %c0_i32 = arith.constant 0 : i32
    %0 = arith.cmpi eq, %arg2, %c0_i32 : i32
    %1 = arith.extui %0 : i1 to i32
    %c0_i32_0 = arith.constant 0 : i32
    %2 = arith.cmpi ne, %1, %c0_i32_0 : i32
    scf.if %2 {
      %cst_9 = arith.constant 0.000000e+00 : f32
      %12 = vector.broadcast %cst_9 : f32 to vector<32x128xf32>
      %c0_10 = arith.constant 0 : index
      %c0_11 = arith.constant 0 : index
      %13 = vector.load %arg7[%c0_10, %c0_11] : memref<32x128xf32, #tpu.memory_space<vmem>>, vector<32x128xf32>
      tpu.vector_store %arg7[%c0_10, %c0_11], %12 {strides = array<i32>} : memref<32x128xf32, #tpu.memory_space<vmem>>, vector<32x128xf32>,
    } else {
    }
    %c0 = arith.constant 0 : index
    %c0_1 = arith.constant 0 : index
    %3 = vector.load %arg7[%c0, %c0_1] : memref<32x128xf32, #tpu.memory_space<vmem>>, vector<32x128xf32>
    %c0_2 = arith.constant 0 : index
    %c0_3 = arith.constant 0 : index
    %4 = vector.load %arg3[%c0_2, %c0_3] : memref<32x384xbf16, #tpu.memory_space<vmem>>, vector<32x384xbf16>
    %c0_4 = arith.constant 0 : index
    %c0_5 = arith.constant 0 : index
    %5 = vector.load %arg4[%c0_4, %c0_5] : memref<384x128xbf16, #tpu.memory_space<vmem>>, vector<384x128xbf16>
    %cst = arith.constant dense<0.000000e+00> : vector<32x128xf32>
    %6 = tpu.matmul %4, %5, %cst {dimension_numbers = #tpu.dot_dimension_numbers<[1], [0], [0], [1], [0, 0, 1, 1], [], []>} : vector<32x384xbf16>, vector<384x128xbf16>, vector<32x128xf32> -> vector<32x128xf32>
    %7 = arith.addf %3, %6 : vector<32x128xf32>
    %c0_6 = arith.constant 0 : index
    %c0_7 = arith.constant 0 : index
    %8 = vector.load %arg7[%c0_6, %c0_7] : memref<32x128xf32, #tpu.memory_space<vmem>>, vector<32x128xf32>
    tpu.vector_store %arg7[%c0_6, %c0_7], %7 {strides = array<i32>} : memref<32x128xf32, #tpu.memory_space<vmem>>, vector<32x128xf32>,
    %c2_i32 = arith.constant 2 : i32
    %9 = arith.cmpi eq, %arg2, %c2_i32 : i32
    %10 = arith.extui %9 : i1 to i32
    %c0_i32_8 = arith.constant 0 : i32
    %11 = arith.cmpi ne, %10, %c0_i32_8 : i32
    scf.if %11 {
      %c0_9 = arith.constant 0 : index
      %c0_10 = arith.constant 0 : index
      %12 = vector.load %arg7[%c0_9, %c0_10] : memref<32x128xf32, #tpu.memory_space<vmem>>, vector<32x128xf32>
      %c0_11 = arith.constant 0 : index
      %c0_12 = arith.constant 0 : index
      %13 = vector.load %arg5[%c0_11, %c0_12] : memref<1x128xf32, #tpu.memory_space<vmem>>, vector<1x128xf32>
      %14 = vector.broadcast %13 : vector<1x128xf32> to vector<32x128xf32>
      %15 = arith.addf %12, %14 : vector<32x128xf32>
      %c0_13 = arith.constant 0 : index
      %c0_14 = arith.constant 0 : index
      %16 = vector.load %arg6[%c0_13, %c0_14] : memref<32x128xf32, #tpu.memory_space<vmem>>, vector<32x128xf32>
      %17 = arith.addf %15, %16 : vector<32x128xf32>
      %cst_15 = arith.constant 0.000000e+00 : f32
      %18 = vector.broadcast %cst_15 : f32 to vector<32x128xf32>
      %19 = arith.maximumf %17, %18 : vector<32x128xf32>
      %c0_16 = arith.constant 0 : index
      %c0_17 = arith.constant 0 : index
      %20 = vector.load %arg7[%c0_16, %c0_17] : memref<32x128xf32, #tpu.memory_space<vmem>>, vector<32x128xf32>
      tpu.vector_store %arg7[%c0_16, %c0_17], %19 {strides = array<i32>} : memref<32x128xf32, #tpu.memory_space<vmem>>, vector<32x128xf32>,
    } else {
    }
    return
  }
  func.func @transform_0(%arg0: i32, %arg1: i32, %arg2: i32) -> (i32, i32) {
    %c0_i32 = arith.constant 0 : i32
    return %arg0, %arg2 : i32, i32
  }
  func.func @transform_1(%arg0: i32, %arg1: i32, %arg2: i32) -> (i32, i32) {
    %c0_i32 = arith.constant 0 : i32
    return %arg2, %arg1 : i32, i32
  }
  func.func @transform_2(%arg0: i32, %arg1: i32, %arg2: i32) -> (i32, i32) {
    %c0_i32 = arith.constant 0 : i32
    %c0_i32_0 = arith.constant 0 : i32
    return %c0_i32, %arg1 : i32, i32
  }
  func.func @transform_3(%arg0: i32, %arg1: i32, %arg2: i32) -> (i32, i32) {
    %c0_i32 = arith.constant 0 : i32
    return %arg0, %arg1 : i32, i32
  }
  func.func @transform_4(%arg0: i32, %arg1: i32, %arg2: i32) -> (i32, i32) {
    %c0_i32 = arith.constant 0 : i32
    return %arg0, %arg1 : i32, i32
  }
}

module attributes {stable_mosaic.version = 11 : i64} {
  func.func @_gemm_kernel(%arg0: i32, %arg1: i32, %arg2: i32, %arg3: memref<8x384xbf16, #tpu.memory_space<vmem>>, %arg4: memref<384x256xbf16, #tpu.memory_space<vmem>>, %arg5: memref<1x256xf32, #tpu.memory_space<vmem>>, %arg6: memref<8x256xf32, #tpu.memory_space<vmem>>) attributes {dimension_semantics = [#tpu.dimension_semantics<parallel>, #tpu.dimension_semantics<parallel>, #tpu.dimension_semantics<arbitrary>], iteration_bounds = array<i64: 1, 1, 3>, scalar_prefetch = 0 : i64, scratch_operands = 0 : i64, tpu.core_type = #tpu.core_type<tc>, window_params = [{transform_indices = @transform_0, window_bounds = array<i64: 8, 384>}, {transform_indices = @transform_1, window_bounds = array<i64: 384, 256>}, {transform_indices = @transform_2, window_bounds = array<i64: 1, 256>}, {transform_indices = @transform_3, window_bounds = array<i64: 8, 256>}]} {
    %c0_i32 = arith.constant 0 : i32
    %0 = arith.cmpi eq, %arg2, %c0_i32 : i32
    %1 = arith.extui %0 : i1 to i32
    %c0_i32_0 = arith.constant 0 : i32
    %2 = arith.cmpi ne, %1, %c0_i32_0 : i32
    scf.if %2 {
      %cst_9 = arith.constant 0.000000e+00 : f32
      %12 = vector.broadcast %cst_9 : f32 to vector<8x256xf32>
      %c0_10 = arith.constant 0 : index
      %c0_11 = arith.constant 0 : index
      %13 = vector.load %arg6[%c0_10, %c0_11] : memref<8x256xf32, #tpu.memory_space<vmem>>, vector<8x256xf32>
      tpu.vector_store %arg6[%c0_10, %c0_11], %12 {strides = array<i32>} : memref<8x256xf32, #tpu.memory_space<vmem>>, vector<8x256xf32>,
    } else {
    }
    %c0 = arith.constant 0 : index
    %c0_1 = arith.constant 0 : index
    %3 = vector.load %arg6[%c0, %c0_1] : memref<8x256xf32, #tpu.memory_space<vmem>>, vector<8x256xf32>
    %c0_2 = arith.constant 0 : index
    %c0_3 = arith.constant 0 : index
    %4 = vector.load %arg3[%c0_2, %c0_3] : memref<8x384xbf16, #tpu.memory_space<vmem>>, vector<8x384xbf16>
    %c0_4 = arith.constant 0 : index
    %c0_5 = arith.constant 0 : index
    %5 = vector.load %arg4[%c0_4, %c0_5] : memref<384x256xbf16, #tpu.memory_space<vmem>>, vector<384x256xbf16>
    %cst = arith.constant dense<0.000000e+00> : vector<8x256xf32>
    %6 = tpu.matmul %4, %5, %cst {dimension_numbers = #tpu.dot_dimension_numbers<[1], [0], [0], [1], [0, 0, 1, 1], [], []>} : vector<8x384xbf16>, vector<384x256xbf16>, vector<8x256xf32> -> vector<8x256xf32>
    %7 = arith.addf %3, %6 : vector<8x256xf32>
    %c0_6 = arith.constant 0 : index
    %c0_7 = arith.constant 0 : index
    %8 = vector.load %arg6[%c0_6, %c0_7] : memref<8x256xf32, #tpu.memory_space<vmem>>, vector<8x256xf32>
    tpu.vector_store %arg6[%c0_6, %c0_7], %7 {strides = array<i32>} : memref<8x256xf32, #tpu.memory_space<vmem>>, vector<8x256xf32>,
    %c2_i32 = arith.constant 2 : i32
    %9 = arith.cmpi eq, %arg2, %c2_i32 : i32
    %10 = arith.extui %9 : i1 to i32
    %c0_i32_8 = arith.constant 0 : i32
    %11 = arith.cmpi ne, %10, %c0_i32_8 : i32
    scf.if %11 {
      %c0_9 = arith.constant 0 : index
      %c0_10 = arith.constant 0 : index
      %12 = vector.load %arg6[%c0_9, %c0_10] : memref<8x256xf32, #tpu.memory_space<vmem>>, vector<8x256xf32>
      %c0_11 = arith.constant 0 : index
      %c0_12 = arith.constant 0 : index
      %13 = vector.load %arg5[%c0_11, %c0_12] : memref<1x256xf32, #tpu.memory_space<vmem>>, vector<1x256xf32>
      %14 = vector.broadcast %13 : vector<1x256xf32> to vector<8x256xf32>
      %15 = arith.addf %12, %14 : vector<8x256xf32>
      %cst_13 = arith.constant 0.000000e+00 : f32
      %16 = vector.broadcast %cst_13 : f32 to vector<8x256xf32>
      %17 = arith.maximumf %15, %16 : vector<8x256xf32>
      %c0_14 = arith.constant 0 : index
      %c0_15 = arith.constant 0 : index
      %18 = vector.load %arg6[%c0_14, %c0_15] : memref<8x256xf32, #tpu.memory_space<vmem>>, vector<8x256xf32>
      tpu.vector_store %arg6[%c0_14, %c0_15], %17 {strides = array<i32>} : memref<8x256xf32, #tpu.memory_space<vmem>>, vector<8x256xf32>,
    } else {
    }
    return
  }
  func.func @transform_0(%arg0: i32, %arg1: i32, %arg2: i32) -> (i32, i32) {
    %c0_i32 = arith.constant 0 : i32
    return %arg0, %arg2 : i32, i32
  }
  func.func @transform_1(%arg0: i32, %arg1: i32, %arg2: i32) -> (i32, i32) {
    %c0_i32 = arith.constant 0 : i32
    return %arg2, %arg1 : i32, i32
  }
  func.func @transform_2(%arg0: i32, %arg1: i32, %arg2: i32) -> (i32, i32) {
    %c0_i32 = arith.constant 0 : i32
    %c0_i32_0 = arith.constant 0 : i32
    return %c0_i32, %arg1 : i32, i32
  }
  func.func @transform_3(%arg0: i32, %arg1: i32, %arg2: i32) -> (i32, i32) {
    %c0_i32 = arith.constant 0 : i32
    return %arg0, %arg1 : i32, i32
  }
}

module attributes {stable_mosaic.version = 11 : i64} {
  func.func @_gemm_kernel(%arg0: i32, %arg1: i32, %arg2: i32, %arg3: memref<8x384xbf16, #tpu.memory_space<vmem>>, %arg4: memref<384x256xbf16, #tpu.memory_space<vmem>>, %arg5: memref<1x256xf32, #tpu.memory_space<vmem>>, %arg6: memref<8x256xf32, #tpu.memory_space<vmem>>, %arg7: memref<8x256xf32, #tpu.memory_space<vmem>>) attributes {dimension_semantics = [#tpu.dimension_semantics<parallel>, #tpu.dimension_semantics<parallel>, #tpu.dimension_semantics<arbitrary>], iteration_bounds = array<i64: 1, 1, 6>, scalar_prefetch = 0 : i64, scratch_operands = 0 : i64, tpu.core_type = #tpu.core_type<tc>, window_params = [{transform_indices = @transform_0, window_bounds = array<i64: 8, 384>}, {transform_indices = @transform_1, window_bounds = array<i64: 384, 256>}, {transform_indices = @transform_2, window_bounds = array<i64: 1, 256>}, {transform_indices = @transform_3, window_bounds = array<i64: 8, 256>}, {transform_indices = @transform_4, window_bounds = array<i64: 8, 256>}]} {
    %c0_i32 = arith.constant 0 : i32
    %0 = arith.cmpi eq, %arg2, %c0_i32 : i32
    %1 = arith.extui %0 : i1 to i32
    %c0_i32_0 = arith.constant 0 : i32
    %2 = arith.cmpi ne, %1, %c0_i32_0 : i32
    scf.if %2 {
      %cst_9 = arith.constant 0.000000e+00 : f32
      %12 = vector.broadcast %cst_9 : f32 to vector<8x256xf32>
      %c0_10 = arith.constant 0 : index
      %c0_11 = arith.constant 0 : index
      %13 = vector.load %arg7[%c0_10, %c0_11] : memref<8x256xf32, #tpu.memory_space<vmem>>, vector<8x256xf32>
      tpu.vector_store %arg7[%c0_10, %c0_11], %12 {strides = array<i32>} : memref<8x256xf32, #tpu.memory_space<vmem>>, vector<8x256xf32>,
    } else {
    }
    %c0 = arith.constant 0 : index
    %c0_1 = arith.constant 0 : index
    %3 = vector.load %arg7[%c0, %c0_1] : memref<8x256xf32, #tpu.memory_space<vmem>>, vector<8x256xf32>
    %c0_2 = arith.constant 0 : index
    %c0_3 = arith.constant 0 : index
    %4 = vector.load %arg3[%c0_2, %c0_3] : memref<8x384xbf16, #tpu.memory_space<vmem>>, vector<8x384xbf16>
    %c0_4 = arith.constant 0 : index
    %c0_5 = arith.constant 0 : index
    %5 = vector.load %arg4[%c0_4, %c0_5] : memref<384x256xbf16, #tpu.memory_space<vmem>>, vector<384x256xbf16>
    %cst = arith.constant dense<0.000000e+00> : vector<8x256xf32>
    %6 = tpu.matmul %4, %5, %cst {dimension_numbers = #tpu.dot_dimension_numbers<[1], [0], [0], [1], [0, 0, 1, 1], [], []>} : vector<8x384xbf16>, vector<384x256xbf16>, vector<8x256xf32> -> vector<8x256xf32>
    %7 = arith.addf %3, %6 : vector<8x256xf32>
    %c0_6 = arith.constant 0 : index
    %c0_7 = arith.constant 0 : index
    %8 = vector.load %arg7[%c0_6, %c0_7] : memref<8x256xf32, #tpu.memory_space<vmem>>, vector<8x256xf32>
    tpu.vector_store %arg7[%c0_6, %c0_7], %7 {strides = array<i32>} : memref<8x256xf32, #tpu.memory_space<vmem>>, vector<8x256xf32>,
    %c5_i32 = arith.constant 5 : i32
    %9 = arith.cmpi eq, %arg2, %c5_i32 : i32
    %10 = arith.extui %9 : i1 to i32
    %c0_i32_8 = arith.constant 0 : i32
    %11 = arith.cmpi ne, %10, %c0_i32_8 : i32
    scf.if %11 {
      %c0_9 = arith.constant 0 : index
      %c0_10 = arith.constant 0 : index
      %12 = vector.load %arg7[%c0_9, %c0_10] : memref<8x256xf32, #tpu.memory_space<vmem>>, vector<8x256xf32>
      %c0_11 = arith.constant 0 : index
      %c0_12 = arith.constant 0 : index
      %13 = vector.load %arg5[%c0_11, %c0_12] : memref<1x256xf32, #tpu.memory_space<vmem>>, vector<1x256xf32>
      %14 = vector.broadcast %13 : vector<1x256xf32> to vector<8x256xf32>
      %15 = arith.addf %12, %14 : vector<8x256xf32>
      %c0_13 = arith.constant 0 : index
      %c0_14 = arith.constant 0 : index
      %16 = vector.load %arg6[%c0_13, %c0_14] : memref<8x256xf32, #tpu.memory_space<vmem>>, vector<8x256xf32>
      %17 = arith.addf %15, %16 : vector<8x256xf32>
      %cst_15 = arith.constant 0.000000e+00 : f32
      %18 = vector.broadcast %cst_15 : f32 to vector<8x256xf32>
      %19 = arith.maximumf %17, %18 : vector<8x256xf32>
      %c0_16 = arith.constant 0 : index
      %c0_17 = arith.constant 0 : index
      %20 = vector.load %arg7[%c0_16, %c0_17] : memref<8x256xf32, #tpu.memory_space<vmem>>, vector<8x256xf32>
      tpu.vector_store %arg7[%c0_16, %c0_17], %19 {strides = array<i32>} : memref<8x256xf32, #tpu.memory_space<vmem>>, vector<8x256xf32>,
    } else {
    }
    return
  }
  func.func @transform_0(%arg0: i32, %arg1: i32, %arg2: i32) -> (i32, i32) {
    %c0_i32 = arith.constant 0 : i32
    return %arg0, %arg2 : i32, i32
  }
  func.func @transform_1(%arg0: i32, %arg1: i32, %arg2: i32) -> (i32, i32) {
    %c0_i32 = arith.constant 0 : i32
    return %arg2, %arg1 : i32, i32
  }
  func.func @transform_2(%arg0: i32, %arg1: i32, %arg2: i32) -> (i32, i32) {
    %c0_i32 = arith.constant 0 : i32
    %c0_i32_0 = arith.constant 0 : i32
    return %c0_i32, %arg1 : i32, i32
  }
  func.func @transform_3(%arg0: i32, %arg1: i32, %arg2: i32) -> (i32, i32) {
    %c0_i32 = arith.constant 0 : i32
    return %arg0, %arg1 : i32, i32
  }
  func.func @transform_4(%arg0: i32, %arg1: i32, %arg2: i32) -> (i32, i32) {
    %c0_i32 = arith.constant 0 : i32
    return %arg0, %arg1 : i32, i32
  }
}

module attributes {stable_mosaic.version = 11 : i64} {
  func.func @_gemm_kernel(%arg0: i32, %arg1: i32, %arg2: i32, %arg3: memref<8x384xbf16, #tpu.memory_space<vmem>>, %arg4: memref<384x256xbf16, #tpu.memory_space<vmem>>, %arg5: memref<1x256xf32, #tpu.memory_space<vmem>>, %arg6: memref<8x256xf32, #tpu.memory_space<vmem>>) attributes {dimension_semantics = [#tpu.dimension_semantics<parallel>, #tpu.dimension_semantics<parallel>, #tpu.dimension_semantics<arbitrary>], iteration_bounds = array<i64: 1, 1, 6>, scalar_prefetch = 0 : i64, scratch_operands = 0 : i64, tpu.core_type = #tpu.core_type<tc>, window_params = [{transform_indices = @transform_0, window_bounds = array<i64: 8, 384>}, {transform_indices = @transform_1, window_bounds = array<i64: 384, 256>}, {transform_indices = @transform_2, window_bounds = array<i64: 1, 256>}, {transform_indices = @transform_3, window_bounds = array<i64: 8, 256>}]} {
    %c0_i32 = arith.constant 0 : i32
    %0 = arith.cmpi eq, %arg2, %c0_i32 : i32
    %1 = arith.extui %0 : i1 to i32
    %c0_i32_0 = arith.constant 0 : i32
    %2 = arith.cmpi ne, %1, %c0_i32_0 : i32
    scf.if %2 {
      %cst_9 = arith.constant 0.000000e+00 : f32
      %12 = vector.broadcast %cst_9 : f32 to vector<8x256xf32>
      %c0_10 = arith.constant 0 : index
      %c0_11 = arith.constant 0 : index
      %13 = vector.load %arg6[%c0_10, %c0_11] : memref<8x256xf32, #tpu.memory_space<vmem>>, vector<8x256xf32>
      tpu.vector_store %arg6[%c0_10, %c0_11], %12 {strides = array<i32>} : memref<8x256xf32, #tpu.memory_space<vmem>>, vector<8x256xf32>,
    } else {
    }
    %c0 = arith.constant 0 : index
    %c0_1 = arith.constant 0 : index
    %3 = vector.load %arg6[%c0, %c0_1] : memref<8x256xf32, #tpu.memory_space<vmem>>, vector<8x256xf32>
    %c0_2 = arith.constant 0 : index
    %c0_3 = arith.constant 0 : index
    %4 = vector.load %arg3[%c0_2, %c0_3] : memref<8x384xbf16, #tpu.memory_space<vmem>>, vector<8x384xbf16>
    %c0_4 = arith.constant 0 : index
    %c0_5 = arith.constant 0 : index
    %5 = vector.load %arg4[%c0_4, %c0_5] : memref<384x256xbf16, #tpu.memory_space<vmem>>, vector<384x256xbf16>
    %cst = arith.constant dense<0.000000e+00> : vector<8x256xf32>
    %6 = tpu.matmul %4, %5, %cst {dimension_numbers = #tpu.dot_dimension_numbers<[1], [0], [0], [1], [0, 0, 1, 1], [], []>} : vector<8x384xbf16>, vector<384x256xbf16>, vector<8x256xf32> -> vector<8x256xf32>
    %7 = arith.addf %3, %6 : vector<8x256xf32>
    %c0_6 = arith.constant 0 : index
    %c0_7 = arith.constant 0 : index
    %8 = vector.load %arg6[%c0_6, %c0_7] : memref<8x256xf32, #tpu.memory_space<vmem>>, vector<8x256xf32>
    tpu.vector_store %arg6[%c0_6, %c0_7], %7 {strides = array<i32>} : memref<8x256xf32, #tpu.memory_space<vmem>>, vector<8x256xf32>,
    %c5_i32 = arith.constant 5 : i32
    %9 = arith.cmpi eq, %arg2, %c5_i32 : i32
    %10 = arith.extui %9 : i1 to i32
    %c0_i32_8 = arith.constant 0 : i32
    %11 = arith.cmpi ne, %10, %c0_i32_8 : i32
    scf.if %11 {
      %c0_9 = arith.constant 0 : index
      %c0_10 = arith.constant 0 : index
      %12 = vector.load %arg6[%c0_9, %c0_10] : memref<8x256xf32, #tpu.memory_space<vmem>>, vector<8x256xf32>
      %c0_11 = arith.constant 0 : index
      %c0_12 = arith.constant 0 : index
      %13 = vector.load %arg5[%c0_11, %c0_12] : memref<1x256xf32, #tpu.memory_space<vmem>>, vector<1x256xf32>
      %14 = vector.broadcast %13 : vector<1x256xf32> to vector<8x256xf32>
      %15 = arith.addf %12, %14 : vector<8x256xf32>
      %cst_13 = arith.constant 0.000000e+00 : f32
      %16 = vector.broadcast %cst_13 : f32 to vector<8x256xf32>
      %17 = arith.maximumf %15, %16 : vector<8x256xf32>
      %c0_14 = arith.constant 0 : index
      %c0_15 = arith.constant 0 : index
      %18 = vector.load %arg6[%c0_14, %c0_15] : memref<8x256xf32, #tpu.memory_space<vmem>>, vector<8x256xf32>
      tpu.vector_store %arg6[%c0_14, %c0_15], %17 {strides = array<i32>} : memref<8x256xf32, #tpu.memory_space<vmem>>, vector<8x256xf32>,
    } else {
    }
    return
  }
  func.func @transform_0(%arg0: i32, %arg1: i32, %arg2: i32) -> (i32, i32) {
    %c0_i32 = arith.constant 0 : i32
    return %arg0, %arg2 : i32, i32
  }
  func.func @transform_1(%arg0: i32, %arg1: i32, %arg2: i32) -> (i32, i32) {
    %c0_i32 = arith.constant 0 : i32
    return %arg2, %arg1 : i32, i32
  }
  func.func @transform_2(%arg0: i32, %arg1: i32, %arg2: i32) -> (i32, i32) {
    %c0_i32 = arith.constant 0 : i32
    %c0_i32_0 = arith.constant 0 : i32
    return %c0_i32, %arg1 : i32, i32
  }
  func.func @transform_3(%arg0: i32, %arg1: i32, %arg2: i32) -> (i32, i32) {
    %c0_i32 = arith.constant 0 : i32
    return %arg0, %arg1 : i32, i32
  }
}

module attributes {stable_mosaic.version = 11 : i64} {
  func.func @_gemm_kernel(%arg0: i32, %arg1: i32, %arg2: i32, %arg3: memref<8x128xbf16, #tpu.memory_space<vmem>>, %arg4: memref<128x256xbf16, #tpu.memory_space<vmem>>, %arg5: memref<1x256xf32, #tpu.memory_space<vmem>>, %arg6: memref<8x256xf32, #tpu.memory_space<vmem>>) attributes {dimension_semantics = [#tpu.dimension_semantics<parallel>, #tpu.dimension_semantics<parallel>, #tpu.dimension_semantics<arbitrary>], iteration_bounds = array<i64: 1, 1, 1>, scalar_prefetch = 0 : i64, scratch_operands = 0 : i64, tpu.core_type = #tpu.core_type<tc>, window_params = [{transform_indices = @transform_0, window_bounds = array<i64: 8, 128>}, {transform_indices = @transform_1, window_bounds = array<i64: 128, 256>}, {transform_indices = @transform_2, window_bounds = array<i64: 1, 256>}, {transform_indices = @transform_3, window_bounds = array<i64: 8, 256>}]} {
    %c0_i32 = arith.constant 0 : i32
    %0 = arith.cmpi eq, %arg2, %c0_i32 : i32
    %1 = arith.extui %0 : i1 to i32
    %c0_i32_0 = arith.constant 0 : i32
    %2 = arith.cmpi ne, %1, %c0_i32_0 : i32
    scf.if %2 {
      %cst_10 = arith.constant 0.000000e+00 : f32
      %12 = vector.broadcast %cst_10 : f32 to vector<8x256xf32>
      %c0_11 = arith.constant 0 : index
      %c0_12 = arith.constant 0 : index
      %13 = vector.load %arg6[%c0_11, %c0_12] : memref<8x256xf32, #tpu.memory_space<vmem>>, vector<8x256xf32>
      tpu.vector_store %arg6[%c0_11, %c0_12], %12 {strides = array<i32>} : memref<8x256xf32, #tpu.memory_space<vmem>>, vector<8x256xf32>,
    } else {
    }
    %c0 = arith.constant 0 : index
    %c0_1 = arith.constant 0 : index
    %3 = vector.load %arg6[%c0, %c0_1] : memref<8x256xf32, #tpu.memory_space<vmem>>, vector<8x256xf32>
    %c0_2 = arith.constant 0 : index
    %c0_3 = arith.constant 0 : index
    %4 = vector.load %arg3[%c0_2, %c0_3] : memref<8x128xbf16, #tpu.memory_space<vmem>>, vector<8x128xbf16>
    %c0_4 = arith.constant 0 : index
    %c0_5 = arith.constant 0 : index
    %5 = vector.load %arg4[%c0_4, %c0_5] : memref<128x256xbf16, #tpu.memory_space<vmem>>, vector<128x256xbf16>
    %cst = arith.constant dense<0.000000e+00> : vector<8x256xf32>
    %6 = tpu.matmul %4, %5, %cst {dimension_numbers = #tpu.dot_dimension_numbers<[1], [0], [0], [1], [0, 0, 1, 1], [], []>} : vector<8x128xbf16>, vector<128x256xbf16>, vector<8x256xf32> -> vector<8x256xf32>
    %7 = arith.addf %3, %6 : vector<8x256xf32>
    %c0_6 = arith.constant 0 : index
    %c0_7 = arith.constant 0 : index
    %8 = vector.load %arg6[%c0_6, %c0_7] : memref<8x256xf32, #tpu.memory_space<vmem>>, vector<8x256xf32>
    tpu.vector_store %arg6[%c0_6, %c0_7], %7 {strides = array<i32>} : memref<8x256xf32, #tpu.memory_space<vmem>>, vector<8x256xf32>,
    %c0_i32_8 = arith.constant 0 : i32
    %9 = arith.cmpi eq, %arg2, %c0_i32_8 : i32
    %10 = arith.extui %9 : i1 to i32
    %c0_i32_9 = arith.constant 0 : i32
    %11 = arith.cmpi ne, %10, %c0_i32_9 : i32
    scf.if %11 {
      %c0_10 = arith.constant 0 : index
      %c0_11 = arith.constant 0 : index
      %12 = vector.load %arg6[%c0_10, %c0_11] : memref<8x256xf32, #tpu.memory_space<vmem>>, vector<8x256xf32>
      %c0_12 = arith.constant 0 : index
      %c0_13 = arith.constant 0 : index
      %13 = vector.load %arg5[%c0_12, %c0_13] : memref<1x256xf32, #tpu.memory_space<vmem>>, vector<1x256xf32>
      %14 = vector.broadcast %13 : vector<1x256xf32> to vector<8x256xf32>
      %15 = arith.addf %12, %14 : vector<8x256xf32>
      %c0_14 = arith.constant 0 : index
      %c0_15 = arith.constant 0 : index
      %16 = vector.load %arg6[%c0_14, %c0_15] : memref<8x256xf32, #tpu.memory_space<vmem>>, vector<8x256xf32>
      tpu.vector_store %arg6[%c0_14, %c0_15], %15 {strides = array<i32>} : memref<8x256xf32, #tpu.memory_space<vmem>>, vector<8x256xf32>,
    } else {
    }
    return
  }
  func.func @transform_0(%arg0: i32, %arg1: i32, %arg2: i32) -> (i32, i32) {
    %c0_i32 = arith.constant 0 : i32
    return %arg0, %arg2 : i32, i32
  }
  func.func @transform_1(%arg0: i32, %arg1: i32, %arg2: i32) -> (i32, i32) {
    %c0_i32 = arith.constant 0 : i32
    return %arg2, %arg1 : i32, i32
  }
  func.func @transform_2(%arg0: i32, %arg1: i32, %arg2: i32) -> (i32, i32) {
    %c0_i32 = arith.constant 0 : i32
    %c0_i32_0 = arith.constant 0 : i32
    return %c0_i32, %arg1 : i32, i32
  }
  func.func @transform_3(%arg0: i32, %arg1: i32, %arg2: i32) -> (i32, i32) {
    %c0_i32 = arith.constant 0 : i32
    return %arg0, %arg1 : i32, i32
  }
}

module attributes {stable_mosaic.version = 11 : i64} {
  func.func @_gemm_kernel(%arg0: i32, %arg1: i32, %arg2: i32, %arg3: memref<8x384xbf16, #tpu.memory_space<vmem>>, %arg4: memref<384x256xbf16, #tpu.memory_space<vmem>>, %arg5: memref<1x256xf32, #tpu.memory_space<vmem>>, %arg6: memref<8x256xf32, #tpu.memory_space<vmem>>) attributes {dimension_semantics = [#tpu.dimension_semantics<parallel>, #tpu.dimension_semantics<parallel>, #tpu.dimension_semantics<arbitrary>], iteration_bounds = array<i64: 1, 2, 6>, scalar_prefetch = 0 : i64, scratch_operands = 0 : i64, tpu.core_type = #tpu.core_type<tc>, window_params = [{transform_indices = @transform_0, window_bounds = array<i64: 8, 384>}, {transform_indices = @transform_1, window_bounds = array<i64: 384, 256>}, {transform_indices = @transform_2, window_bounds = array<i64: 1, 256>}, {transform_indices = @transform_3, window_bounds = array<i64: 8, 256>}]} {
    %c0_i32 = arith.constant 0 : i32
    %0 = arith.cmpi eq, %arg2, %c0_i32 : i32
    %1 = arith.extui %0 : i1 to i32
    %c0_i32_0 = arith.constant 0 : i32
    %2 = arith.cmpi ne, %1, %c0_i32_0 : i32
    scf.if %2 {
      %cst_9 = arith.constant 0.000000e+00 : f32
      %12 = vector.broadcast %cst_9 : f32 to vector<8x256xf32>
      %c0_10 = arith.constant 0 : index
      %c0_11 = arith.constant 0 : index
      %13 = vector.load %arg6[%c0_10, %c0_11] : memref<8x256xf32, #tpu.memory_space<vmem>>, vector<8x256xf32>
      tpu.vector_store %arg6[%c0_10, %c0_11], %12 {strides = array<i32>} : memref<8x256xf32, #tpu.memory_space<vmem>>, vector<8x256xf32>,
    } else {
    }
    %c0 = arith.constant 0 : index
    %c0_1 = arith.constant 0 : index
    %3 = vector.load %arg6[%c0, %c0_1] : memref<8x256xf32, #tpu.memory_space<vmem>>, vector<8x256xf32>
    %c0_2 = arith.constant 0 : index
    %c0_3 = arith.constant 0 : index
    %4 = vector.load %arg3[%c0_2, %c0_3] : memref<8x384xbf16, #tpu.memory_space<vmem>>, vector<8x384xbf16>
    %c0_4 = arith.constant 0 : index
    %c0_5 = arith.constant 0 : index
    %5 = vector.load %arg4[%c0_4, %c0_5] : memref<384x256xbf16, #tpu.memory_space<vmem>>, vector<384x256xbf16>
    %cst = arith.constant dense<0.000000e+00> : vector<8x256xf32>
    %6 = tpu.matmul %4, %5, %cst {dimension_numbers = #tpu.dot_dimension_numbers<[1], [0], [0], [1], [0, 0, 1, 1], [], []>} : vector<8x384xbf16>, vector<384x256xbf16>, vector<8x256xf32> -> vector<8x256xf32>
    %7 = arith.addf %3, %6 : vector<8x256xf32>
    %c0_6 = arith.constant 0 : index
    %c0_7 = arith.constant 0 : index
    %8 = vector.load %arg6[%c0_6, %c0_7] : memref<8x256xf32, #tpu.memory_space<vmem>>, vector<8x256xf32>
    tpu.vector_store %arg6[%c0_6, %c0_7], %7 {strides = array<i32>} : memref<8x256xf32, #tpu.memory_space<vmem>>, vector<8x256xf32>,
    %c5_i32 = arith.constant 5 : i32
    %9 = arith.cmpi eq, %arg2, %c5_i32 : i32
    %10 = arith.extui %9 : i1 to i32
    %c0_i32_8 = arith.constant 0 : i32
    %11 = arith.cmpi ne, %10, %c0_i32_8 : i32
    scf.if %11 {
      %c0_9 = arith.constant 0 : index
      %c0_10 = arith.constant 0 : index
      %12 = vector.load %arg6[%c0_9, %c0_10] : memref<8x256xf32, #tpu.memory_space<vmem>>, vector<8x256xf32>
      %c0_11 = arith.constant 0 : index
      %c0_12 = arith.constant 0 : index
      %13 = vector.load %arg5[%c0_11, %c0_12] : memref<1x256xf32, #tpu.memory_space<vmem>>, vector<1x256xf32>
      %14 = vector.broadcast %13 : vector<1x256xf32> to vector<8x256xf32>
      %15 = arith.addf %12, %14 : vector<8x256xf32>
      %cst_13 = arith.constant 0.000000e+00 : f32
      %16 = vector.broadcast %cst_13 : f32 to vector<8x256xf32>
      %17 = arith.maximumf %15, %16 : vector<8x256xf32>
      %c0_14 = arith.constant 0 : index
      %c0_15 = arith.constant 0 : index
      %18 = vector.load %arg6[%c0_14, %c0_15] : memref<8x256xf32, #tpu.memory_space<vmem>>, vector<8x256xf32>
      tpu.vector_store %arg6[%c0_14, %c0_15], %17 {strides = array<i32>} : memref<8x256xf32, #tpu.memory_space<vmem>>, vector<8x256xf32>,
    } else {
    }
    return
  }
  func.func @transform_0(%arg0: i32, %arg1: i32, %arg2: i32) -> (i32, i32) {
    %c0_i32 = arith.constant 0 : i32
    return %arg0, %arg2 : i32, i32
  }
  func.func @transform_1(%arg0: i32, %arg1: i32, %arg2: i32) -> (i32, i32) {
    %c0_i32 = arith.constant 0 : i32
    return %arg2, %arg1 : i32, i32
  }
  func.func @transform_2(%arg0: i32, %arg1: i32, %arg2: i32) -> (i32, i32) {
    %c0_i32 = arith.constant 0 : i32
    %c0_i32_0 = arith.constant 0 : i32
    return %c0_i32, %arg1 : i32, i32
  }
  func.func @transform_3(%arg0: i32, %arg1: i32, %arg2: i32) -> (i32, i32) {
    %c0_i32 = arith.constant 0 : i32
    return %arg0, %arg1 : i32, i32
  }
}

module attributes {stable_mosaic.version = 11 : i64} {
  func.func @_gemm_kernel(%arg0: i32, %arg1: i32, %arg2: i32, %arg3: memref<8x256xbf16, #tpu.memory_space<vmem>>, %arg4: memref<256x256xbf16, #tpu.memory_space<vmem>>, %arg5: memref<1x256xf32, #tpu.memory_space<vmem>>, %arg6: memref<8x256xf32, #tpu.memory_space<vmem>>) attributes {dimension_semantics = [#tpu.dimension_semantics<parallel>, #tpu.dimension_semantics<parallel>, #tpu.dimension_semantics<arbitrary>], iteration_bounds = array<i64: 1, 2, 1>, scalar_prefetch = 0 : i64, scratch_operands = 0 : i64, tpu.core_type = #tpu.core_type<tc>, window_params = [{transform_indices = @transform_0, window_bounds = array<i64: 8, 256>}, {transform_indices = @transform_1, window_bounds = array<i64: 256, 256>}, {transform_indices = @transform_2, window_bounds = array<i64: 1, 256>}, {transform_indices = @transform_3, window_bounds = array<i64: 8, 256>}]} {
    %c0_i32 = arith.constant 0 : i32
    %0 = arith.cmpi eq, %arg2, %c0_i32 : i32
    %1 = arith.extui %0 : i1 to i32
    %c0_i32_0 = arith.constant 0 : i32
    %2 = arith.cmpi ne, %1, %c0_i32_0 : i32
    scf.if %2 {
      %cst_10 = arith.constant 0.000000e+00 : f32
      %12 = vector.broadcast %cst_10 : f32 to vector<8x256xf32>
      %c0_11 = arith.constant 0 : index
      %c0_12 = arith.constant 0 : index
      %13 = vector.load %arg6[%c0_11, %c0_12] : memref<8x256xf32, #tpu.memory_space<vmem>>, vector<8x256xf32>
      tpu.vector_store %arg6[%c0_11, %c0_12], %12 {strides = array<i32>} : memref<8x256xf32, #tpu.memory_space<vmem>>, vector<8x256xf32>,
    } else {
    }
    %c0 = arith.constant 0 : index
    %c0_1 = arith.constant 0 : index
    %3 = vector.load %arg6[%c0, %c0_1] : memref<8x256xf32, #tpu.memory_space<vmem>>, vector<8x256xf32>
    %c0_2 = arith.constant 0 : index
    %c0_3 = arith.constant 0 : index
    %4 = vector.load %arg3[%c0_2, %c0_3] : memref<8x256xbf16, #tpu.memory_space<vmem>>, vector<8x256xbf16>
    %c0_4 = arith.constant 0 : index
    %c0_5 = arith.constant 0 : index
    %5 = vector.load %arg4[%c0_4, %c0_5] : memref<256x256xbf16, #tpu.memory_space<vmem>>, vector<256x256xbf16>
    %cst = arith.constant dense<0.000000e+00> : vector<8x256xf32>
    %6 = tpu.matmul %4, %5, %cst {dimension_numbers = #tpu.dot_dimension_numbers<[1], [0], [0], [1], [0, 0, 1, 1], [], []>} : vector<8x256xbf16>, vector<256x256xbf16>, vector<8x256xf32> -> vector<8x256xf32>
    %7 = arith.addf %3, %6 : vector<8x256xf32>
    %c0_6 = arith.constant 0 : index
    %c0_7 = arith.constant 0 : index
    %8 = vector.load %arg6[%c0_6, %c0_7] : memref<8x256xf32, #tpu.memory_space<vmem>>, vector<8x256xf32>
    tpu.vector_store %arg6[%c0_6, %c0_7], %7 {strides = array<i32>} : memref<8x256xf32, #tpu.memory_space<vmem>>, vector<8x256xf32>,
    %c0_i32_8 = arith.constant 0 : i32
    %9 = arith.cmpi eq, %arg2, %c0_i32_8 : i32
    %10 = arith.extui %9 : i1 to i32
    %c0_i32_9 = arith.constant 0 : i32
    %11 = arith.cmpi ne, %10, %c0_i32_9 : i32
    scf.if %11 {
      %c0_10 = arith.constant 0 : index
      %c0_11 = arith.constant 0 : index
      %12 = vector.load %arg6[%c0_10, %c0_11] : memref<8x256xf32, #tpu.memory_space<vmem>>, vector<8x256xf32>
      %c0_12 = arith.constant 0 : index
      %c0_13 = arith.constant 0 : index
      %13 = vector.load %arg5[%c0_12, %c0_13] : memref<1x256xf32, #tpu.memory_space<vmem>>, vector<1x256xf32>
      %14 = vector.broadcast %13 : vector<1x256xf32> to vector<8x256xf32>
      %15 = arith.addf %12, %14 : vector<8x256xf32>
      %c0_14 = arith.constant 0 : index
      %c0_15 = arith.constant 0 : index
      %16 = vector.load %arg6[%c0_14, %c0_15] : memref<8x256xf32, #tpu.memory_space<vmem>>, vector<8x256xf32>
      tpu.vector_store %arg6[%c0_14, %c0_15], %15 {strides = array<i32>} : memref<8x256xf32, #tpu.memory_space<vmem>>, vector<8x256xf32>,
    } else {
    }
    return
  }
  func.func @transform_0(%arg0: i32, %arg1: i32, %arg2: i32) -> (i32, i32) {
    %c0_i32 = arith.constant 0 : i32
    return %arg0, %arg2 : i32, i32
  }
  func.func @transform_1(%arg0: i32, %arg1: i32, %arg2: i32) -> (i32, i32) {
    %c0_i32 = arith.constant 0 : i32
    return %arg2, %arg1 : i32, i32
  }
  func.func @transform_2(%arg0: i32, %arg1: i32, %arg2: i32) -> (i32, i32) {
    %c0_i32 = arith.constant 0 : i32
    %c0_i32_0 = arith.constant 0 : i32
    return %c0_i32, %arg1 : i32, i32
  }
  func.func @transform_3(%arg0: i32, %arg1: i32, %arg2: i32) -> (i32, i32) {
    %c0_i32 = arith.constant 0 : i32
    return %arg0, %arg1 : i32, i32
  }
}

module attributes {stable_mosaic.version = 11 : i64} {
  func.func @_gemm_kernel(%arg0: i32, %arg1: i32, %arg2: i32, %arg3: memref<8x512xbf16, #tpu.memory_space<vmem>>, %arg4: memref<512x256xbf16, #tpu.memory_space<vmem>>, %arg5: memref<1x256xf32, #tpu.memory_space<vmem>>, %arg6: memref<8x256xf32, #tpu.memory_space<vmem>>, %arg7: memref<8x256xf32, #tpu.memory_space<vmem>>) attributes {dimension_semantics = [#tpu.dimension_semantics<parallel>, #tpu.dimension_semantics<parallel>, #tpu.dimension_semantics<arbitrary>], iteration_bounds = array<i64: 1, 2, 9>, scalar_prefetch = 0 : i64, scratch_operands = 0 : i64, tpu.core_type = #tpu.core_type<tc>, window_params = [{transform_indices = @transform_0, window_bounds = array<i64: 8, 512>}, {transform_indices = @transform_1, window_bounds = array<i64: 512, 256>}, {transform_indices = @transform_2, window_bounds = array<i64: 1, 256>}, {transform_indices = @transform_3, window_bounds = array<i64: 8, 256>}, {transform_indices = @transform_4, window_bounds = array<i64: 8, 256>}]} {
    %c0_i32 = arith.constant 0 : i32
    %0 = arith.cmpi eq, %arg2, %c0_i32 : i32
    %1 = arith.extui %0 : i1 to i32
    %c0_i32_0 = arith.constant 0 : i32
    %2 = arith.cmpi ne, %1, %c0_i32_0 : i32
    scf.if %2 {
      %cst_9 = arith.constant 0.000000e+00 : f32
      %12 = vector.broadcast %cst_9 : f32 to vector<8x256xf32>
      %c0_10 = arith.constant 0 : index
      %c0_11 = arith.constant 0 : index
      %13 = vector.load %arg7[%c0_10, %c0_11] : memref<8x256xf32, #tpu.memory_space<vmem>>, vector<8x256xf32>
      tpu.vector_store %arg7[%c0_10, %c0_11], %12 {strides = array<i32>} : memref<8x256xf32, #tpu.memory_space<vmem>>, vector<8x256xf32>,
    } else {
    }
    %c0 = arith.constant 0 : index
    %c0_1 = arith.constant 0 : index
    %3 = vector.load %arg7[%c0, %c0_1] : memref<8x256xf32, #tpu.memory_space<vmem>>, vector<8x256xf32>
    %c0_2 = arith.constant 0 : index
    %c0_3 = arith.constant 0 : index
    %4 = vector.load %arg3[%c0_2, %c0_3] : memref<8x512xbf16, #tpu.memory_space<vmem>>, vector<8x512xbf16>
    %c0_4 = arith.constant 0 : index
    %c0_5 = arith.constant 0 : index
    %5 = vector.load %arg4[%c0_4, %c0_5] : memref<512x256xbf16, #tpu.memory_space<vmem>>, vector<512x256xbf16>
    %cst = arith.constant dense<0.000000e+00> : vector<8x256xf32>
    %6 = tpu.matmul %4, %5, %cst {dimension_numbers = #tpu.dot_dimension_numbers<[1], [0], [0], [1], [0, 0, 1, 1], [], []>} : vector<8x512xbf16>, vector<512x256xbf16>, vector<8x256xf32> -> vector<8x256xf32>
    %7 = arith.addf %3, %6 : vector<8x256xf32>
    %c0_6 = arith.constant 0 : index
    %c0_7 = arith.constant 0 : index
    %8 = vector.load %arg7[%c0_6, %c0_7] : memref<8x256xf32, #tpu.memory_space<vmem>>, vector<8x256xf32>
    tpu.vector_store %arg7[%c0_6, %c0_7], %7 {strides = array<i32>} : memref<8x256xf32, #tpu.memory_space<vmem>>, vector<8x256xf32>,
    %c8_i32 = arith.constant 8 : i32
    %9 = arith.cmpi eq, %arg2, %c8_i32 : i32
    %10 = arith.extui %9 : i1 to i32
    %c0_i32_8 = arith.constant 0 : i32
    %11 = arith.cmpi ne, %10, %c0_i32_8 : i32
    scf.if %11 {
      %c0_9 = arith.constant 0 : index
      %c0_10 = arith.constant 0 : index
      %12 = vector.load %arg7[%c0_9, %c0_10] : memref<8x256xf32, #tpu.memory_space<vmem>>, vector<8x256xf32>
      %c0_11 = arith.constant 0 : index
      %c0_12 = arith.constant 0 : index
      %13 = vector.load %arg5[%c0_11, %c0_12] : memref<1x256xf32, #tpu.memory_space<vmem>>, vector<1x256xf32>
      %14 = vector.broadcast %13 : vector<1x256xf32> to vector<8x256xf32>
      %15 = arith.addf %12, %14 : vector<8x256xf32>
      %c0_13 = arith.constant 0 : index
      %c0_14 = arith.constant 0 : index
      %16 = vector.load %arg6[%c0_13, %c0_14] : memref<8x256xf32, #tpu.memory_space<vmem>>, vector<8x256xf32>
      %17 = arith.addf %15, %16 : vector<8x256xf32>
      %cst_15 = arith.constant 0.000000e+00 : f32
      %18 = vector.broadcast %cst_15 : f32 to vector<8x256xf32>
      %19 = arith.maximumf %17, %18 : vector<8x256xf32>
      %c0_16 = arith.constant 0 : index
      %c0_17 = arith.constant 0 : index
      %20 = vector.load %arg7[%c0_16, %c0_17] : memref<8x256xf32, #tpu.memory_space<vmem>>, vector<8x256xf32>
      tpu.vector_store %arg7[%c0_16, %c0_17], %19 {strides = array<i32>} : memref<8x256xf32, #tpu.memory_space<vmem>>, vector<8x256xf32>,
    } else {
    }
    return
  }
  func.func @transform_0(%arg0: i32, %arg1: i32, %arg2: i32) -> (i32, i32) {
    %c0_i32 = arith.constant 0 : i32
    return %arg0, %arg2 : i32, i32
  }
  func.func @transform_1(%arg0: i32, %arg1: i32, %arg2: i32) -> (i32, i32) {
    %c0_i32 = arith.constant 0 : i32
    return %arg2, %arg1 : i32, i32
  }
  func.func @transform_2(%arg0: i32, %arg1: i32, %arg2: i32) -> (i32, i32) {
    %c0_i32 = arith.constant 0 : i32
    %c0_i32_0 = arith.constant 0 : i32
    return %c0_i32, %arg1 : i32, i32
  }
  func.func @transform_3(%arg0: i32, %arg1: i32, %arg2: i32) -> (i32, i32) {
    %c0_i32 = arith.constant 0 : i32
    return %arg0, %arg1 : i32, i32
  }
  func.func @transform_4(%arg0: i32, %arg1: i32, %arg2: i32) -> (i32, i32) {
    %c0_i32 = arith.constant 0 : i32
    return %arg0, %arg1 : i32, i32
  }
}

module attributes {stable_mosaic.version = 11 : i64} {
  func.func @_gemm_kernel(%arg0: i32, %arg1: i32, %arg2: i32, %arg3: memref<8x512xbf16, #tpu.memory_space<vmem>>, %arg4: memref<512x256xbf16, #tpu.memory_space<vmem>>, %arg5: memref<1x256xf32, #tpu.memory_space<vmem>>, %arg6: memref<8x256xf32, #tpu.memory_space<vmem>>) attributes {dimension_semantics = [#tpu.dimension_semantics<parallel>, #tpu.dimension_semantics<parallel>, #tpu.dimension_semantics<arbitrary>], iteration_bounds = array<i64: 1, 2, 9>, scalar_prefetch = 0 : i64, scratch_operands = 0 : i64, tpu.core_type = #tpu.core_type<tc>, window_params = [{transform_indices = @transform_0, window_bounds = array<i64: 8, 512>}, {transform_indices = @transform_1, window_bounds = array<i64: 512, 256>}, {transform_indices = @transform_2, window_bounds = array<i64: 1, 256>}, {transform_indices = @transform_3, window_bounds = array<i64: 8, 256>}]} {
    %c0_i32 = arith.constant 0 : i32
    %0 = arith.cmpi eq, %arg2, %c0_i32 : i32
    %1 = arith.extui %0 : i1 to i32
    %c0_i32_0 = arith.constant 0 : i32
    %2 = arith.cmpi ne, %1, %c0_i32_0 : i32
    scf.if %2 {
      %cst_9 = arith.constant 0.000000e+00 : f32
      %12 = vector.broadcast %cst_9 : f32 to vector<8x256xf32>
      %c0_10 = arith.constant 0 : index
      %c0_11 = arith.constant 0 : index
      %13 = vector.load %arg6[%c0_10, %c0_11] : memref<8x256xf32, #tpu.memory_space<vmem>>, vector<8x256xf32>
      tpu.vector_store %arg6[%c0_10, %c0_11], %12 {strides = array<i32>} : memref<8x256xf32, #tpu.memory_space<vmem>>, vector<8x256xf32>,
    } else {
    }
    %c0 = arith.constant 0 : index
    %c0_1 = arith.constant 0 : index
    %3 = vector.load %arg6[%c0, %c0_1] : memref<8x256xf32, #tpu.memory_space<vmem>>, vector<8x256xf32>
    %c0_2 = arith.constant 0 : index
    %c0_3 = arith.constant 0 : index
    %4 = vector.load %arg3[%c0_2, %c0_3] : memref<8x512xbf16, #tpu.memory_space<vmem>>, vector<8x512xbf16>
    %c0_4 = arith.constant 0 : index
    %c0_5 = arith.constant 0 : index
    %5 = vector.load %arg4[%c0_4, %c0_5] : memref<512x256xbf16, #tpu.memory_space<vmem>>, vector<512x256xbf16>
    %cst = arith.constant dense<0.000000e+00> : vector<8x256xf32>
    %6 = tpu.matmul %4, %5, %cst {dimension_numbers = #tpu.dot_dimension_numbers<[1], [0], [0], [1], [0, 0, 1, 1], [], []>} : vector<8x512xbf16>, vector<512x256xbf16>, vector<8x256xf32> -> vector<8x256xf32>
    %7 = arith.addf %3, %6 : vector<8x256xf32>
    %c0_6 = arith.constant 0 : index
    %c0_7 = arith.constant 0 : index
    %8 = vector.load %arg6[%c0_6, %c0_7] : memref<8x256xf32, #tpu.memory_space<vmem>>, vector<8x256xf32>
    tpu.vector_store %arg6[%c0_6, %c0_7], %7 {strides = array<i32>} : memref<8x256xf32, #tpu.memory_space<vmem>>, vector<8x256xf32>,
    %c8_i32 = arith.constant 8 : i32
    %9 = arith.cmpi eq, %arg2, %c8_i32 : i32
    %10 = arith.extui %9 : i1 to i32
    %c0_i32_8 = arith.constant 0 : i32
    %11 = arith.cmpi ne, %10, %c0_i32_8 : i32
    scf.if %11 {
      %c0_9 = arith.constant 0 : index
      %c0_10 = arith.constant 0 : index
      %12 = vector.load %arg6[%c0_9, %c0_10] : memref<8x256xf32, #tpu.memory_space<vmem>>, vector<8x256xf32>
      %c0_11 = arith.constant 0 : index
      %c0_12 = arith.constant 0 : index
      %13 = vector.load %arg5[%c0_11, %c0_12] : memref<1x256xf32, #tpu.memory_space<vmem>>, vector<1x256xf32>
      %14 = vector.broadcast %13 : vector<1x256xf32> to vector<8x256xf32>
      %15 = arith.addf %12, %14 : vector<8x256xf32>
      %cst_13 = arith.constant 0.000000e+00 : f32
      %16 = vector.broadcast %cst_13 : f32 to vector<8x256xf32>
      %17 = arith.maximumf %15, %16 : vector<8x256xf32>
      %c0_14 = arith.constant 0 : index
      %c0_15 = arith.constant 0 : index
      %18 = vector.load %arg6[%c0_14, %c0_15] : memref<8x256xf32, #tpu.memory_space<vmem>>, vector<8x256xf32>
      tpu.vector_store %arg6[%c0_14, %c0_15], %17 {strides = array<i32>} : memref<8x256xf32, #tpu.memory_space<vmem>>, vector<8x256xf32>,
    } else {
    }
    return
  }
  func.func @transform_0(%arg0: i32, %arg1: i32, %arg2: i32) -> (i32, i32) {
    %c0_i32 = arith.constant 0 : i32
    return %arg0, %arg2 : i32, i32
  }
  func.func @transform_1(%arg0: i32, %arg1: i32, %arg2: i32) -> (i32, i32) {
    %c0_i32 = arith.constant 0 : i32
    return %arg2, %arg1 : i32, i32
  }
  func.func @transform_2(%arg0: i32, %arg1: i32, %arg2: i32) -> (i32, i32) {
    %c0_i32 = arith.constant 0 : i32
    %c0_i32_0 = arith.constant 0 : i32
    return %c0_i32, %arg1 : i32, i32
  }
  func.func @transform_3(%arg0: i32, %arg1: i32, %arg2: i32) -> (i32, i32) {
    %c0_i32 = arith.constant 0 : i32
    return %arg0, %arg1 : i32, i32
  }
}

module attributes {stable_mosaic.version = 11 : i64} {
  func.func @_gemm_kernel(%arg0: i32, %arg1: i32, %arg2: i32, %arg3: memref<8x512xbf16, #tpu.memory_space<vmem>>, %arg4: memref<512x16xbf16, #tpu.memory_space<vmem>>, %arg5: memref<1x16xf32, #tpu.memory_space<vmem>>, %arg6: memref<8x16xf32, #tpu.memory_space<vmem>>) attributes {dimension_semantics = [#tpu.dimension_semantics<parallel>, #tpu.dimension_semantics<parallel>, #tpu.dimension_semantics<arbitrary>], iteration_bounds = array<i64: 1, 1, 1>, scalar_prefetch = 0 : i64, scratch_operands = 0 : i64, tpu.core_type = #tpu.core_type<tc>, window_params = [{transform_indices = @transform_0, window_bounds = array<i64: 8, 512>}, {transform_indices = @transform_1, window_bounds = array<i64: 512, 16>}, {transform_indices = @transform_2, window_bounds = array<i64: 1, 16>}, {transform_indices = @transform_3, window_bounds = array<i64: 8, 16>}]} {
    %c0_i32 = arith.constant 0 : i32
    %0 = arith.cmpi eq, %arg2, %c0_i32 : i32
    %1 = arith.extui %0 : i1 to i32
    %c0_i32_0 = arith.constant 0 : i32
    %2 = arith.cmpi ne, %1, %c0_i32_0 : i32
    scf.if %2 {
      %cst_10 = arith.constant 0.000000e+00 : f32
      %12 = vector.broadcast %cst_10 : f32 to vector<8x16xf32>
      %c0_11 = arith.constant 0 : index
      %c0_12 = arith.constant 0 : index
      %13 = vector.load %arg6[%c0_11, %c0_12] : memref<8x16xf32, #tpu.memory_space<vmem>>, vector<8x16xf32>
      tpu.vector_store %arg6[%c0_11, %c0_12], %12 {strides = array<i32>} : memref<8x16xf32, #tpu.memory_space<vmem>>, vector<8x16xf32>,
    } else {
    }
    %c0 = arith.constant 0 : index
    %c0_1 = arith.constant 0 : index
    %3 = vector.load %arg6[%c0, %c0_1] : memref<8x16xf32, #tpu.memory_space<vmem>>, vector<8x16xf32>
    %c0_2 = arith.constant 0 : index
    %c0_3 = arith.constant 0 : index
    %4 = vector.load %arg3[%c0_2, %c0_3] : memref<8x512xbf16, #tpu.memory_space<vmem>>, vector<8x512xbf16>
    %c0_4 = arith.constant 0 : index
    %c0_5 = arith.constant 0 : index
    %5 = vector.load %arg4[%c0_4, %c0_5] : memref<512x16xbf16, #tpu.memory_space<vmem>>, vector<512x16xbf16>
    %cst = arith.constant dense<0.000000e+00> : vector<8x16xf32>
    %6 = tpu.matmul %4, %5, %cst {dimension_numbers = #tpu.dot_dimension_numbers<[1], [0], [0], [1], [0, 0, 1, 1], [], []>} : vector<8x512xbf16>, vector<512x16xbf16>, vector<8x16xf32> -> vector<8x16xf32>
    %7 = arith.addf %3, %6 : vector<8x16xf32>
    %c0_6 = arith.constant 0 : index
    %c0_7 = arith.constant 0 : index
    %8 = vector.load %arg6[%c0_6, %c0_7] : memref<8x16xf32, #tpu.memory_space<vmem>>, vector<8x16xf32>
    tpu.vector_store %arg6[%c0_6, %c0_7], %7 {strides = array<i32>} : memref<8x16xf32, #tpu.memory_space<vmem>>, vector<8x16xf32>,
    %c0_i32_8 = arith.constant 0 : i32
    %9 = arith.cmpi eq, %arg2, %c0_i32_8 : i32
    %10 = arith.extui %9 : i1 to i32
    %c0_i32_9 = arith.constant 0 : i32
    %11 = arith.cmpi ne, %10, %c0_i32_9 : i32
    scf.if %11 {
      %c0_10 = arith.constant 0 : index
      %c0_11 = arith.constant 0 : index
      %12 = vector.load %arg6[%c0_10, %c0_11] : memref<8x16xf32, #tpu.memory_space<vmem>>, vector<8x16xf32>
      %c0_12 = arith.constant 0 : index
      %c0_13 = arith.constant 0 : index
      %13 = vector.load %arg5[%c0_12, %c0_13] : memref<1x16xf32, #tpu.memory_space<vmem>>, vector<1x16xf32>
      %14 = vector.broadcast %13 : vector<1x16xf32> to vector<8x16xf32>
      %15 = arith.addf %12, %14 : vector<8x16xf32>
      %c0_14 = arith.constant 0 : index
      %c0_15 = arith.constant 0 : index
      %16 = vector.load %arg6[%c0_14, %c0_15] : memref<8x16xf32, #tpu.memory_space<vmem>>, vector<8x16xf32>
      tpu.vector_store %arg6[%c0_14, %c0_15], %15 {strides = array<i32>} : memref<8x16xf32, #tpu.memory_space<vmem>>, vector<8x16xf32>,
    } else {
    }
    return
  }
  func.func @transform_0(%arg0: i32, %arg1: i32, %arg2: i32) -> (i32, i32) {
    %c0_i32 = arith.constant 0 : i32
    return %arg0, %arg2 : i32, i32
  }
  func.func @transform_1(%arg0: i32, %arg1: i32, %arg2: i32) -> (i32, i32) {
    %c0_i32 = arith.constant 0 : i32
    return %arg2, %arg1 : i32, i32
  }
  func.func @transform_2(%arg0: i32, %arg1: i32, %arg2: i32) -> (i32, i32) {
    %c0_i32 = arith.constant 0 : i32
    %c0_i32_0 = arith.constant 0 : i32
    return %c0_i32, %arg1 : i32, i32
  }
  func.func @transform_3(%arg0: i32, %arg1: i32, %arg2: i32) -> (i32, i32) {
    %c0_i32 = arith.constant 0 : i32
    return %arg0, %arg1 : i32, i32
  }
}

module attributes {stable_mosaic.version = 11 : i64} {
  func.func @_gemm_kernel(%arg0: i32, %arg1: i32, %arg2: i32, %arg3: memref<256x4xf32, #tpu.memory_space<vmem>>, %arg4: memref<4x32xf32, #tpu.memory_space<vmem>>, %arg5: memref<1x32xf32, #tpu.memory_space<vmem>>, %arg6: memref<256x32xf32, #tpu.memory_space<vmem>>) attributes {dimension_semantics = [#tpu.dimension_semantics<parallel>, #tpu.dimension_semantics<parallel>, #tpu.dimension_semantics<arbitrary>], iteration_bounds = array<i64: 4, 1, 1>, scalar_prefetch = 0 : i64, scratch_operands = 0 : i64, tpu.core_type = #tpu.core_type<tc>, window_params = [{transform_indices = @transform_0, window_bounds = array<i64: 256, 4>}, {transform_indices = @transform_1, window_bounds = array<i64: 4, 32>}, {transform_indices = @transform_2, window_bounds = array<i64: 1, 32>}, {transform_indices = @transform_3, window_bounds = array<i64: 256, 32>}]} {
    %c0_i32 = arith.constant 0 : i32
    %0 = arith.cmpi eq, %arg2, %c0_i32 : i32
    %1 = arith.extui %0 : i1 to i32
    %c0_i32_0 = arith.constant 0 : i32
    %2 = arith.cmpi ne, %1, %c0_i32_0 : i32
    scf.if %2 {
      %cst_10 = arith.constant 0.000000e+00 : f32
      %12 = vector.broadcast %cst_10 : f32 to vector<256x32xf32>
      %c0_11 = arith.constant 0 : index
      %c0_12 = arith.constant 0 : index
      %13 = vector.load %arg6[%c0_11, %c0_12] : memref<256x32xf32, #tpu.memory_space<vmem>>, vector<256x32xf32>
      tpu.vector_store %arg6[%c0_11, %c0_12], %12 {strides = array<i32>} : memref<256x32xf32, #tpu.memory_space<vmem>>, vector<256x32xf32>,
    } else {
    }
    %c0 = arith.constant 0 : index
    %c0_1 = arith.constant 0 : index
    %3 = vector.load %arg6[%c0, %c0_1] : memref<256x32xf32, #tpu.memory_space<vmem>>, vector<256x32xf32>
    %c0_2 = arith.constant 0 : index
    %c0_3 = arith.constant 0 : index
    %4 = vector.load %arg3[%c0_2, %c0_3] : memref<256x4xf32, #tpu.memory_space<vmem>>, vector<256x4xf32>
    %c0_4 = arith.constant 0 : index
    %c0_5 = arith.constant 0 : index
    %5 = vector.load %arg4[%c0_4, %c0_5] : memref<4x32xf32, #tpu.memory_space<vmem>>, vector<4x32xf32>
    %cst = arith.constant dense<0.000000e+00> : vector<256x32xf32>
    %6 = tpu.matmul %4, %5, %cst {dimension_numbers = #tpu.dot_dimension_numbers<[1], [0], [0], [1], [0, 0, 1, 1], [], []>} : vector<256x4xf32>, vector<4x32xf32>, vector<256x32xf32> -> vector<256x32xf32>
    %7 = arith.addf %3, %6 : vector<256x32xf32>
    %c0_6 = arith.constant 0 : index
    %c0_7 = arith.constant 0 : index
    %8 = vector.load %arg6[%c0_6, %c0_7] : memref<256x32xf32, #tpu.memory_space<vmem>>, vector<256x32xf32>
    tpu.vector_store %arg6[%c0_6, %c0_7], %7 {strides = array<i32>} : memref<256x32xf32, #tpu.memory_space<vmem>>, vector<256x32xf32>,
    %c0_i32_8 = arith.constant 0 : i32
    %9 = arith.cmpi eq, %arg2, %c0_i32_8 : i32
    %10 = arith.extui %9 : i1 to i32
    %c0_i32_9 = arith.constant 0 : i32
    %11 = arith.cmpi ne, %10, %c0_i32_9 : i32
    scf.if %11 {
      %c0_10 = arith.constant 0 : index
      %c0_11 = arith.constant 0 : index
      %12 = vector.load %arg6[%c0_10, %c0_11] : memref<256x32xf32, #tpu.memory_space<vmem>>, vector<256x32xf32>
      %c0_12 = arith.constant 0 : index
      %c0_13 = arith.constant 0 : index
      %13 = vector.load %arg5[%c0_12, %c0_13] : memref<1x32xf32, #tpu.memory_space<vmem>>, vector<1x32xf32>
      %14 = vector.broadcast %13 : vector<1x32xf32> to vector<256x32xf32>
      %15 = arith.addf %12, %14 : vector<256x32xf32>
      %c0_14 = arith.constant 0 : index
      %c0_15 = arith.constant 0 : index
      %16 = vector.load %arg6[%c0_14, %c0_15] : memref<256x32xf32, #tpu.memory_space<vmem>>, vector<256x32xf32>
      tpu.vector_store %arg6[%c0_14, %c0_15], %15 {strides = array<i32>} : memref<256x32xf32, #tpu.memory_space<vmem>>, vector<256x32xf32>,
    } else {
    }
    return
  }
  func.func @transform_0(%arg0: i32, %arg1: i32, %arg2: i32) -> (i32, i32) {
    %c0_i32 = arith.constant 0 : i32
    return %arg0, %arg2 : i32, i32
  }
  func.func @transform_1(%arg0: i32, %arg1: i32, %arg2: i32) -> (i32, i32) {
    %c0_i32 = arith.constant 0 : i32
    return %arg2, %arg1 : i32, i32
  }
  func.func @transform_2(%arg0: i32, %arg1: i32, %arg2: i32) -> (i32, i32) {
    %c0_i32 = arith.constant 0 : i32
    %c0_i32_0 = arith.constant 0 : i32
    return %c0_i32, %arg1 : i32, i32
  }
  func.func @transform_3(%arg0: i32, %arg1: i32, %arg2: i32) -> (i32, i32) {
    %c0_i32 = arith.constant 0 : i32
    return %arg0, %arg1 : i32, i32
  }
}

</mosaic_0001>

<bundles_post_ra>
// kernel: resnet18_16s_forward.22
= control target key start
LH: loop header
LB: loop body
LE: loop exit
PB: predicated region body
PF: predicated region fallthrough
CT: control target
= control target key end

     0   :  { %s1456_s12 = smov 0   ;;  %s1458_s13 = smov 0   ;;  %s1909_s0 = inlined_call_operand.vmem [shape: bf16[512,147], index: 0, kind: input, shape index: {}]   ;;  %s1910_s1 = inlined_call_operand.vmem [shape: bf16[147,64], index: 1, kind: input, shape index: {}]   ;;  %s1911_s2 = inlined_call_operand.vmem [shape: f32[1,64], index: 2, kind: input, shape index: {}]   ;;  %s1912_s3 = inlined_call_operand.vmem [shape: f32[512,64], index: 3, kind: output, shape index: {}]  }
   0x1   :  { %s1460_s14 = smov 0  }
   0x2 LB: > { %s32_s15 = sadd.s32 1, %s1428_s13  ;;  %p1143_p0 = scmp.ge.s32.totalorder %s1432_s14, 1  ;;  %s1432_s14 = sphi %s1460_s14, %s13_s14   ;;  %s1428_s13 = sphi %s1458_s13, %s1914_s13   ;;  %s1424_s12 = sphi %s1456_s12, %s1913_s12  }
   0x3   : > { %p34_p1 = scmp.ge.s32.totalorder %s32_s15, 2  ;;  %p191_p2 = scmp.lt.s32.totalorder %s1432_s14, 3 }
   0x5   : > { %s1916_s15 = smov (%p34_p1, %s32_s15), 0  ;;  %p192_p3 = pnand %p1143_p0, %p191_p2 }
   0x6   : > { %s1144_s20 = sshll.u32 (!%p192_p3), %s1424_s12, 5 }
   0x7   : > { %195 = sbr.rel (%p192_p3) target bundleno = 313 (0x139), region = 32  ;;  %p236_p4 = scmp.lt.s32.totalorder (!%p192_p3), %s1144_s20, 63 }
   0xc   : > { %v1371_v0 = vld [vmem:[%s1910_s1 + $0x38] sm:$0xff]  ;;  %v387_v1 = vld [vmem:[%s1910_s1 + $0x48] sm:$0x3]  ;;  %vm638_vm0 = vcmask 1040384   ;;  %vm639_vm1 = vcmask 1041408   ;;  %v1370_v3 = vld [vmem:[%s1910_s1 + $0x30] sm:$0xff] }
   0xd   : > { %v569_v2 = vunpack.c.l.b16 %v387_v1  ;;  %645 = vmatpush.bf16.msra.mxu0 %v1371_v0  ;;  %1373 = vmatpush.bf16.msra.mxu2 %v1371_v0  ;;  %v1434_v4 = vmov 65535   ;;  %s1918_s20 = smov (!%p236_p4, %s1144_s20), 63  ;;  %v1369_v9 = vld [vmem:[%s1910_s1 + $0x28] sm:$0xff]  ;;  %v1372_v10 = vld [vmem:[%s1910_s1 + $0x40] sm:$0xff]  ;;  %vm589_vm2 = vcmask 154624   ;;  %v1367_v18 = vld [vmem:[%s1910_s1 + $0x18] sm:$0xff] }
   0xe   : > { %v640_v5 = vsel %vm638_vm0, 4294967295, %v1434_v4  ;;  %s1331_s25 = sshll.u32 %s1918_s20, 3  ;;  %v1368_v14 = vld [vmem:[%s1910_s1 + $0x20] sm:$0xff]  ;;  %v1366_v19 = vld [vmem:[%s1910_s1 + $0x10] sm:$0xff]  ;;  %v1365_v20 = vld [vmem:[%s1910_s1 + $0x8] sm:$0xff]  ;;  %vm272_vm3 = vcmask 523264  }
   0xf   : > { %v579_v6 = vpack.c.b16 %v569_v2, %v569_v2  ;;  %v641_v7 = vsel %vm639_vm1, %v640_v5, 0  ;;  %s1497_s30 = scalar_lea.vmem %s1909_s0, %s1331_s25  ;;  %v1364_v26 = vld [vmem:[%s1910_s1] sm:$0xff]  ;;  %s1585_s19 = scalar_lea.vmem %s1912_s3, %s1331_s25 }
  0x10   : > { %v1332_v11 = vld [vmem:[%s1497_s30 + $0x4] sm:$0xf]  ;;  %v1153_v12 = vld [vmem:[%s1497_s30 + $0x8] sm:$0xf0]  ;;  %v1350_v15 = vld [vmem:[%s1497_s30 + $0x94] sm:$0xf] }
  0x11   : > { %v643_v8 = vand.u32 %v641_v7, %v579_v6  ;;  %646 = vmatpush.bf16.msra.mxu0 %v1370_v3  ;;  %1374 = vmatpush.bf16.msra.mxu2 %v1370_v3  ;;  %v1156_v13 = vor.u32 %v1332_v11, %v1153_v12  ;;  %v1225_v16 = vld [vmem:[%s1497_s30 + $0x98] sm:$0xf0]  ;;  %v1334_v21 = vld [vmem:[%s1497_s30 + $0x14] sm:$0xf]  ;;  %v1352_v23 = vld [vmem:[%s1497_s30 + $0xa4] sm:$0xf] }
  0x12   : > { %v1228_v17 = vor.u32 %v1350_v15, %v1225_v16  ;;  %v1161_v22 = vld [vmem:[%s1497_s30 + $0x18] sm:$0xf0]  ;;  %v1233_v24 = vld [vmem:[%s1497_s30 + $0xa8] sm:$0xf0]  ;;  %v1151_v27 = vld [vmem:[%s1497_s30] sm:$0xf] }
  0x13   : > { %740 = vmatpush.bf16.msra.mxu1 %v643_v8  ;;  %1381 = vmatpush.bf16.msra.mxu3 %v643_v8  ;;  %v1164_v25 = vor.u32 %v1334_v21, %v1161_v22  ;;  %v1333_v28 = vld [vmem:[%s1497_s30 + $0x4] sm:$0xf0]  ;;  %v1215_v29 = vld [vmem:[%s1497_s30 + $0x80] sm:$0xf]  ;;  %v1236_v31 = vor.u32 %v1352_v23, %v1233_v24  ;;  %v1336_v34 = vld [vmem:[%s1497_s30 + $0x24] sm:$0xf] }
  0x14   : > { %v1349_v30 = vld [vmem:[%s1497_s30 + $0x84] sm:$0xf0]  ;;  %v1152_v32 = vor.u32 %v1333_v28, %v1151_v27  ;;  %v1169_v35 = vld [vmem:[%s1497_s30 + $0x28] sm:$0xf0]  ;;  %v1354_v36 = vld [vmem:[%s1497_s30 + $0xb4] sm:$0xf] }
  0x15   : > { %647 = vmatpush.bf16.msra.mxu0 %v1369_v9  ;;  %1375 = vmatpush.bf16.msra.mxu2 %v1369_v9  ;;  %v1216_v33 = vor.u32 %v1349_v30, %v1215_v29  ;;  %v1241_v37 = vld [vmem:[%s1497_s30 + $0xb8] sm:$0xf0]  ;;  %v1172_v38 = vor.u32 %v1336_v34, %v1169_v35  ;;  %v1159_v39 = vld [vmem:[%s1497_s30 + $0x10] sm:$0xf]  ;;  %v1335_v40 = vld [vmem:[%s1497_s30 + $0x14] sm:$0xf0] }
  0x16   : > { %v1223_v41 = vld [vmem:[%s1497_s30 + $0x90] sm:$0xf]  ;;  %v1351_v42 = vld [vmem:[%s1497_s30 + $0x94] sm:$0xf0]  ;;  %v1244_v43 = vor.u32 %v1354_v36, %v1241_v37  ;;  %v1160_v44 = vor.u32 %v1335_v40, %v1159_v39  ;;  %v1338_v46 = vld [vmem:[%s1497_s30 + $0x34] sm:$0xf] }
  0x17   : > { %741 = vmatpush.bf16.msra.mxu1 %v1372_v10  ;;  %1382 = vmatpush.bf16.msra.mxu3 %v1372_v10  ;;  %v1224_v45 = vor.u32 %v1351_v42, %v1223_v41  ;;  %v1177_v47 = vld [vmem:[%s1497_s30 + $0x38] sm:$0xf0]  ;;  %v1356_v48 = vld [vmem:[%s1497_s30 + $0xc4] sm:$0xf]  ;;  %v1249_v49 = vld [vmem:[%s1497_s30 + $0xc8] sm:$0xf0] }
  0x18   : > { %v1180_v50 = vor.u32 %v1338_v46, %v1177_v47  ;;  %v1167_v51 = vld [vmem:[%s1497_s30 + $0x20] sm:$0xf]  ;;  %v1337_v52 = vld [vmem:[%s1497_s30 + $0x24] sm:$0xf0]  ;;  %v1252_v55 = vor.u32 %v1356_v48, %v1249_v49  ;;  %v1340_v58 = vld [vmem:[%s1497_s30 + $0x44] sm:$0xf] }
  0x19   : > { %648 = vmatpush.bf16.msra.mxu0 %v1368_v14  ;;  %1376 = vmatpush.bf16.msra.mxu2 %v1368_v14  ;;  %v1231_v53 = vld [vmem:[%s1497_s30 + $0xa0] sm:$0xf]  ;;  %v1353_v54 = vld [vmem:[%s1497_s30 + $0xa4] sm:$0xf0]  ;;  %v1168_v56 = vor.u32 %v1337_v52, %v1167_v51  ;;  %v1185_v59 = vld [vmem:[%s1497_s30 + $0x48] sm:$0xf0] }
  0x1a   : > { %1313 = vmatmul.msk.bf16.vlgmr.msra.gmra.mxu1 %vm589_vm2, %v1156_v13  ;;  %1322 = vmatmul.msk.bf16.vlgmr.msra.gmra.mxu3 %vm589_vm2, %v1228_v17  ;;  %v1232_v57 = vor.u32 %v1353_v54, %v1231_v53  ;;  %v1358_v60 = vld [vmem:[%s1497_s30 + $0xd4] sm:$0xf]  ;;  %v1257_v61 = vld [vmem:[%s1497_s30 + $0xd8] sm:$0xf0]  ;;  %v1188_v62 = vor.u32 %v1340_v58, %v1185_v59  ;;  %v1175_v63 = vld [vmem:[%s1497_s30 + $0x30] sm:$0xf] }
  0x1b   : > { %v1339_v0 = vld [vmem:[%s1497_s30 + $0x34] sm:$0xf0]  ;;  %v1239_v1 = vld [vmem:[%s1497_s30 + $0xb0] sm:$0xf]  ;;  %v1260_v3 = vor.u32 %v1358_v60, %v1257_v61  ;;  %v1342_v6 = vld [vmem:[%s1497_s30 + $0x54] sm:$0xf] }
  0x1c   : > { %v1355_v2 = vld [vmem:[%s1497_s30 + $0xb4] sm:$0xf0]  ;;  %v1176_v4 = vor.u32 %v1339_v0, %v1175_v63  ;;  %v1193_v7 = vld [vmem:[%s1497_s30 + $0x58] sm:$0xf0]  ;;  %v1360_v8 = vld [vmem:[%s1497_s30 + $0xe4] sm:$0xf] }
  0x1d   : > { %649 = vmatpush.bf16.msra.mxu0 %v1367_v18  ;;  %1377 = vmatpush.bf16.msra.mxu2 %v1367_v18  ;;  %v1240_v5 = vor.u32 %v1355_v2, %v1239_v1  ;;  %v1265_v9 = vld [vmem:[%s1497_s30 + $0xe8] sm:$0xf0]  ;;  %v1196_v10 = vor.u32 %v1342_v6, %v1193_v7  ;;  %v1183_v11 = vld [vmem:[%s1497_s30 + $0x40] sm:$0xf]  ;;  %v1341_v12 = vld [vmem:[%s1497_s30 + $0x44] sm:$0xf0] }
  0x1e   : > { %v1247_v13 = vld [vmem:[%s1497_s30 + $0xc0] sm:$0xf]  ;;  %v1357_v14 = vld [vmem:[%s1497_s30 + $0xc4] sm:$0xf0]  ;;  %v1268_v15 = vor.u32 %v1360_v8, %v1265_v9  ;;  %v1184_v16 = vor.u32 %v1341_v12, %v1183_v11  ;;  %v1344_v18 = vld [vmem:[%s1497_s30 + $0x64] sm:$0xf] }
  0x1f   : > { %v1248_v17 = vor.u32 %v1357_v14, %v1247_v13  ;;  %v1273_v21 = vld [vmem:[%s1497_s30 + $0xf8] sm:$0xf0]  ;;  %v1191_v23 = vld [vmem:[%s1497_s30 + $0x50] sm:$0xf]  ;;  %v1343_v24 = vld [vmem:[%s1497_s30 + $0x54] sm:$0xf0] }
  0x20   : > { %v1192_v28 = vor.u32 %v1343_v24, %v1191_v23  ;;  %v1346_v30 = vld [vmem:[%s1497_s30 + $0x74] sm:$0xf]  ;;  %v1345_v34 = vld [vmem:[%s1497_s30 + $0x64] sm:$0xf0]  ;;  %v1435_v35 = vmov 0.0  }
  0x21   : > { %650 = vmatpush.bf16.msra.mxu0 %v1366_v19  ;;  %1378 = vmatpush.bf16.msra.mxu2 %v1366_v19  ;;  %v1201_v19 = vld [vmem:[%s1497_s30 + $0x68] sm:$0xf0]  ;;  %273 = vst.msk [vmem:[%s1585_s19] sm:$0xff] %vm272_vm3, %v1435_v35  ;;  %v1263_v36 = vld [vmem:[%s1497_s30 + $0xe0] sm:$0xf] }
  0x22   : > { %v1204_v22 = vor.u32 %v1344_v18, %v1201_v19  ;;  %v1361_v37 = vld [vmem:[%s1497_s30 + $0xe4] sm:$0xf0]  ;;  %274 = vst.msk [vmem:[%s1585_s19 + $0x8] sm:$0xff] %vm272_vm3, %v1435_v35  ;;  %v1348_v40 = vld [vmem:[%s1497_s30 + $0x84] sm:$0xf] }
  0x23   : > { %275 = vst.msk [vmem:[%s1585_s19 + $0x10] sm:$0xff] %vm272_vm3, %v1435_v35  ;;  %v1264_v39 = vor.u32 %v1361_v37, %v1263_v36  ;;  %v1217_v41 = vld [vmem:[%s1497_s30 + $0x88] sm:$0xf0]  ;;  %v1271_v46 = vld [vmem:[%s1497_s30 + $0xf0] sm:$0xf] }
  0x24   : > { %276 = vst.msk [vmem:[%s1585_s19 + $0x18] sm:$0xff] %vm272_vm3, %v1435_v35  ;;  %v1220_v42 = vor.u32 %v1348_v40, %v1217_v41  ;;  %v1363_v47 = vld [vmem:[%s1497_s30 + $0xf4] sm:$0xf0] }
  0x25   : > { %651 = vmatpush.bf16.msra.mxu0 %v1365_v20  ;;  %1379 = vmatpush.bf16.msra.mxu2 %v1365_v20  ;;  %v1362_v20 = vld [vmem:[%s1497_s30 + $0xf4] sm:$0xf]  ;;  %277 = vst.msk [vmem:[%s1585_s19 + $0x20] sm:$0xff] %vm272_vm3, %v1435_v35  ;;  %v1272_v49 = vor.u32 %v1363_v47, %v1271_v46 }
  0x26   : > { %v1276_v27 = vor.u32 %v1362_v20, %v1273_v21  ;;  %278 = vst.msk [vmem:[%s1585_s19 + $0x28] sm:$0xff] %vm272_vm3, %v1435_v35 }
  0x27   : > { %279 = vst.msk [vmem:[%s1585_s19 + $0x30] sm:$0xff] %vm272_vm3, %v1435_v35 }
  0x28   : > { %280 = vst.msk [vmem:[%s1585_s19 + $0x38] sm:$0xff] %vm272_vm3, %v1435_v35  ;;  %v305_v53 = vld [vmem:[%s1585_s19] sm:$0xff] }
  0x29   : > { %652 = vmatpush.bf16.msra.mxu0 %v1364_v26  ;;  %1380 = vmatpush.bf16.msra.mxu2 %v1364_v26  ;;  %v1359_v26 = vld [vmem:[%s1497_s30 + $0xd4] sm:$0xf0]  ;;  %281 = vst.msk [vmem:[%s1585_s19 + $0x40] sm:$0xff] %vm272_vm3, %v1435_v35  ;;  %v306_v60 = vld [vmem:[%s1585_s19 + $0x8] sm:$0xff] }
  0x2a   : > { %1314 = vmatmul.msk.bf16.gmra.mxu1 %vm589_vm2, %v1164_v25  ;;  %1323 = vmatmul.msk.bf16.gmra.mxu3 %vm589_vm2, %v1236_v31  ;;  %v1255_v25 = vld [vmem:[%s1497_s30 + $0xd0] sm:$0xf]  ;;  %v1209_v31 = vld [vmem:[%s1497_s30 + $0x78] sm:$0xf0]  ;;  %282 = vst.msk [vmem:[%s1585_s19 + $0x48] sm:$0xff] %vm272_vm3, %v1435_v35 }
  0x2b   : > { %v1256_v29 = vor.u32 %v1359_v26, %v1255_v25  ;;  %283 = vst.msk [vmem:[%s1585_s19 + $0x50] sm:$0xff] %vm272_vm3, %v1435_v35  ;;  %v307_v6 = vld [vmem:[%s1585_s19 + $0x10] sm:$0xff]  ;;  %v308_v18 = vld [vmem:[%s1585_s19 + $0x18] sm:$0xff] }
  0x2c   : > { %653 = vmatmul.bf16.vlgmr.msra.gmra.mxu0 %v1152_v32  ;;  %693 = vmatmul.bf16.vlgmr.msra.gmra.mxu2 %v1216_v33  ;;  %v1212_v32 = vor.u32 %v1346_v30, %v1209_v31  ;;  %v1199_v33 = vld [vmem:[%s1497_s30 + $0x60] sm:$0xf]  ;;  %284 = vst.msk [vmem:[%s1585_s19 + $0x58] sm:$0xff] %vm272_vm3, %v1435_v35 }
  0x2d   : > { %285 = vst.msk [vmem:[%s1585_s19 + $0x60] sm:$0xff] %vm272_vm3, %v1435_v35  ;;  %v309_v31 = vld [vmem:[%s1585_s19 + $0x20] sm:$0xff]  ;;  %v310_v47 = vld [vmem:[%s1585_s19 + $0x28] sm:$0xff] }
  0x2e   : > { %286 = vst.msk [vmem:[%s1585_s19 + $0x68] sm:$0xff] %vm272_vm3, %v1435_v35 }
  0x2f   : > { %287 = vst.msk [vmem:[%s1585_s19 + $0x70] sm:$0xff] %vm272_vm3, %v1435_v35 }
  0x30   : > { %288 = vst.msk [vmem:[%s1585_s19 + $0x78] sm:$0xff] %vm272_vm3, %v1435_v35 }
  0x31   : > { %289 = vst.msk [vmem:[%s1585_s19 + $0x80] sm:$0xff] %vm272_vm3, %v1435_v35 }
  0x32   : > { %290 = vst.msk [vmem:[%s1585_s19 + $0x88] sm:$0xff] %vm272_vm3, %v1435_v35 }
  0x33   : > { %291 = vst.msk [vmem:[%s1585_s19 + $0x90] sm:$0xff] %vm272_vm3, %v1435_v35 }
  0x34   : > { %292 = vst.msk [vmem:[%s1585_s19 + $0x98] sm:$0xff] %vm272_vm3, %v1435_v35 }
  0x35   : > { %293 = vst.msk [vmem:[%s1585_s19 + $0xa0] sm:$0xff] %vm272_vm3, %v1435_v35 }
  0x36   : > { %294 = vst.msk [vmem:[%s1585_s19 + $0xa8] sm:$0xff] %vm272_vm3, %v1435_v35 }
  0x37   : > { %295 = vst.msk [vmem:[%s1585_s19 + $0xb0] sm:$0xff] %vm272_vm3, %v1435_v35 }
  0x38   : > { %296 = vst.msk [vmem:[%s1585_s19 + $0xb8] sm:$0xff] %vm272_vm3, %v1435_v35 }
  0x39   : > { %297 = vst.msk [vmem:[%s1585_s19 + $0xc0] sm:$0xff] %vm272_vm3, %v1435_v35 }
  0x3a   : > { %1315 = vmatmul.msk.bf16.gmra.mxu1 %vm589_vm2, %v1172_v38  ;;  %1324 = vmatmul.msk.bf16.gmra.mxu3 %vm589_vm2, %v1244_v43  ;;  %v1200_v38 = vor.u32 %v1345_v34, %v1199_v33  ;;  %v1207_v43 = vld [vmem:[%s1497_s30 + $0x70] sm:$0xf]  ;;  %298 = vst.msk [vmem:[%s1585_s19 + $0xc8] sm:$0xff] %vm272_vm3, %v1435_v35 }
  0x3b   : > { %299 = vst.msk [vmem:[%s1585_s19 + $0xd0] sm:$0xff] %vm272_vm3, %v1435_v35 }
  0x3c   : > { %658 = vmatmul.bf16.gmra.mxu0 %v1160_v44  ;;  %698 = vmatmul.bf16.gmra.mxu2 %v1224_v45  ;;  %v1347_v44 = vld [vmem:[%s1497_s30 + $0x74] sm:$0xf0]  ;;  %300 = vst.msk [vmem:[%s1585_s19 + $0xd8] sm:$0xff] %vm272_vm3, %v1435_v35 }
  0x3d   : > { %v1208_v48 = vor.u32 %v1347_v44, %v1207_v43  ;;  %301 = vst.msk [vmem:[%s1585_s19 + $0xe0] sm:$0xff] %vm272_vm3, %v1435_v35  ;;  %v325_v44 = vld [vmem:[%s1585_s19 + $0xa0] sm:$0xff] }
  0x3e   : > { %302 = vst.msk [vmem:[%s1585_s19 + $0xe8] sm:$0xff] %vm272_vm3, %v1435_v35 }
  0x3f   : > { %303 = vst.msk [vmem:[%s1585_s19 + $0xf0] sm:$0xff] %vm272_vm3, %v1435_v35 }
  0x40   : > { %304 = vst.msk [vmem:[%s1585_s19 + $0xf8] sm:$0xff] %vm272_vm3, %v1435_v35 }
  0x4a   : > { %1316 = vmatmul.msk.bf16.gmra.mxu1 %vm589_vm2, %v1180_v50  ;;  %1325 = vmatmul.msk.bf16.gmra.mxu3 %vm589_vm2, %v1252_v55 }
  0x4c   : > { %663 = vmatmul.bf16.gmra.mxu0 %v1168_v56  ;;  %703 = vmatmul.bf16.gmra.mxu2 %v1232_v57 }
  0x5a   : > { %1317 = vmatmul.msk.bf16.gmra.mxu1 %vm589_vm2, %v1188_v62  ;;  %1326 = vmatmul.msk.bf16.gmra.mxu3 %vm589_vm2, %v1260_v3  ;;  %v1674_v62 = vld [vmem:[%s1911_s2] ss:$0 sm:$0xff] }
  0x5c   : > { %668 = vmatmul.bf16.gmra.mxu0 %v1176_v4  ;;  %708 = vmatmul.bf16.gmra.mxu2 %v1240_v5 }
  0x6a   : > { %1318 = vmatmul.msk.bf16.gmra.mxu1 %vm589_vm2, %v1196_v10  ;;  %1327 = vmatmul.msk.bf16.gmra.mxu3 %vm589_vm2, %v1268_v15  ;;  %v323_v15 = vld [vmem:[%s1585_s19 + $0x90] sm:$0xff] }
  0x6c   : > { %673 = vmatmul.bf16.gmra.mxu0 %v1184_v16  ;;  %713 = vmatmul.bf16.gmra.mxu2 %v1248_v17 }
  0x7a   : > { %1319 = vmatmul.msk.bf16.gmra.mxu1 %vm589_vm2, %v1204_v22  ;;  %1328 = vmatmul.msk.bf16.gmra.mxu3 %vm589_vm2, %v1276_v27 }
  0x7c   : > { %678 = vmatmul.bf16.gmra.mxu0 %v1192_v28  ;;  %718 = vmatmul.bf16.gmra.mxu2 %v1256_v29  ;;  %v324_v28 = vld [vmem:[%s1585_s19 + $0x98] sm:$0xff] }
  0x8a   : > { %1320 = vmatmul.msk.bf16.gmra.mxu1 %vm589_vm2, %v1212_v32 }
  0x8c   : > { %683 = vmatmul.bf16.gmra.mxu0 %v1200_v38  ;;  %723 = vmatmul.bf16.gmra.mxu2 %v1264_v39 }
  0x97   : > { %v743_v45 = vpop.f32.mrf.mxu1 }
  0x9a   : > { %1321 = vmatmul.msk.bf16.gmra.mxu1 %vm589_vm2, %v1220_v42 }
  0x9c   : > { %688 = vmatmul.bf16.gmra.mxu0 %v1208_v48  ;;  %728 = vmatmul.bf16.gmra.mxu2 %v1272_v49 }
  0x9d   : > { %v788_v52 = vpop.f32.mrf.mxu3 }
  0x9f   : > { %v745_v50 = vpop.f32.mrf.mxu1 }
  0xa5   : > { %v790_v59 = vpop.f32.mrf.mxu3 }
  0xa7   : > { %v748_v51 = vpop.f32.mrf.mxu1 }
  0xa9   : > { %v654_v54 = vpop.f32.mrf.mxu0 }
  0xaa   : > { %v744_v55 = vadd.f32 %v743_v45, %v654_v54 }
  0xac   : > { %v823_v56 = vadd.f32 %v744_v55, %v305_v53 }
  0xad   : > { %v793_v9 = vpop.f32.mrf.mxu3 }
  0xae   : > { %856 = vst.msk [vmem:[%s1585_s19] sm:$0xff] %vm272_vm3, %v823_v56 }
  0xaf   : > { %v750_v57 = vpop.f32.mrf.mxu1  ;;  %v1668_v58 = vpop.f32.mrf.mxu2 }
  0xb1   : > { %v656_v61 = vpop.f32.mrf.mxu0 }
  0xb2   : > { %v746_v63 = vadd.f32 %v745_v50, %v656_v61 }
  0xb4   : > { %v824_v0 = vadd.f32 %v746_v63, %v306_v60  ;;  %v326_v60 = vld [vmem:[%s1585_s19 + $0xa8] sm:$0xff] }
  0xb5   : > { %v891_v1 = vld [vmem:[%s1585_s19] sm:$0xff]  ;;  %v795_v23 = vpop.f32.mrf.mxu3 }
  0xb6   : > { %v927_v2 = vadd.f32 %v1674_v62, %v891_v1  ;;  %857 = vst.msk [vmem:[%s1585_s19 + $0x8] sm:$0xff] %vm272_vm3, %v824_v0  ;;  %v311_v1 = vld [vmem:[%s1585_s19 + $0x30] sm:$0xff] }
  0xb7   : > { %v753_v3 = vpop.f32.mrf.mxu1  ;;  %v1680_v5 = vpop.f32.mrf.mxu2 }
  0xb8   : > { %v959_v4 = vmax.f32 %v927_v2, 0.0 }
  0xb9   : > { %v659_v7 = vpop.f32.mrf.mxu0 }
  0xba   : > { %991 = vst.msk [vmem:[%s1585_s19] sm:$0xff] %vm272_vm3, %v959_v4  ;;  %v749_v8 = vadd.f32 %v748_v51, %v659_v7 }
  0xbc   : > { %v825_v10 = vadd.f32 %v749_v8, %v307_v6 }
  0xbd   : > { %v892_v11 = vld [vmem:[%s1585_s19 + $0x8] sm:$0xff]  ;;  %v798_v41 = vpop.f32.mrf.mxu3 }
  0xbe   : > { %v928_v12 = vadd.f32 %v1674_v62, %v892_v11  ;;  %858 = vst.msk [vmem:[%s1585_s19 + $0x10] sm:$0xff] %vm272_vm3, %v825_v10 }
  0xbf   : > { %v755_v13 = vpop.f32.mrf.mxu1  ;;  %v699_v16 = vpop.f32.mrf.mxu2 }
  0xc0   : > { %v960_v14 = vmax.f32 %v928_v12, 0.0  ;;  %v789_v17 = vadd.f32 %v788_v52, %v699_v16 }
  0xc1   : > { %v661_v19 = vpop.f32.mrf.mxu0 }
  0xc2   : > { %992 = vst.msk [vmem:[%s1585_s19 + $0x8] sm:$0xff] %vm272_vm3, %v960_v14  ;;  %v751_v20 = vadd.f32 %v750_v57, %v661_v19  ;;  %v841_v21 = vadd.f32 %v789_v17, %v323_v15  ;;  %v327_v14 = vld [vmem:[%s1585_s19 + $0xb0] sm:$0xff]  ;;  %v312_v17 = vld [vmem:[%s1585_s19 + $0x38] sm:$0xff] }
  0xc4   : > { %v826_v22 = vadd.f32 %v751_v20, %v308_v18  ;;  %874 = vst.msk [vmem:[%s1585_s19 + $0x90] sm:$0xff] %vm272_vm3, %v841_v21 }
  0xc5   : > { %v893_v24 = vld [vmem:[%s1585_s19 + $0x10] sm:$0xff]  ;;  %v800_v63 = vpop.f32.mrf.mxu3 }
  0xc6   : > { %v929_v25 = vadd.f32 %v1674_v62, %v893_v24  ;;  %859 = vst.msk [vmem:[%s1585_s19 + $0x18] sm:$0xff] %vm272_vm3, %v826_v22 }
  0xc7   : > { %v758_v26 = vpop.f32.mrf.mxu1  ;;  %v701_v29 = vpop.f32.mrf.mxu2 }
  0xc8   : > { %v961_v27 = vmax.f32 %v929_v25, 0.0  ;;  %v791_v30 = vadd.f32 %v790_v59, %v701_v29 }
  0xc9   : > { %v664_v32 = vpop.f32.mrf.mxu0 }
  0xca   : > { %993 = vst.msk [vmem:[%s1585_s19 + $0x10] sm:$0xff] %vm272_vm3, %v961_v27  ;;  %v754_v33 = vadd.f32 %v753_v3, %v664_v32  ;;  %v842_v34 = vadd.f32 %v791_v30, %v324_v28  ;;  %v328_v30 = vld [vmem:[%s1585_s19 + $0xb8] sm:$0xff] }
  0xcb   : > { %v909_v35 = vld [vmem:[%s1585_s19 + $0x90] sm:$0xff] }
  0xcc   : > { %v827_v36 = vadd.f32 %v754_v33, %v309_v31  ;;  %v945_v37 = vadd.f32 %v1674_v62, %v909_v35  ;;  %875 = vst.msk [vmem:[%s1585_s19 + $0x98] sm:$0xff] %vm272_vm3, %v842_v34  ;;  %v313_v33 = vld [vmem:[%s1585_s19 + $0x40] sm:$0xff] }
  0xcd   : > { %v894_v38 = vld [vmem:[%s1585_s19 + $0x18] sm:$0xff]  ;;  %v803_v20 = vpop.f32.mrf.mxu3 }
  0xce   : > { %v930_v39 = vadd.f32 %v1674_v62, %v894_v38  ;;  %860 = vst.msk [vmem:[%s1585_s19 + $0x20] sm:$0xff] %vm272_vm3, %v827_v36  ;;  %v977_v42 = vmax.f32 %v945_v37, 0.0 }
  0xcf   : > { %v760_v40 = vpop.f32.mrf.mxu1  ;;  %v704_v45 = vpop.f32.mrf.mxu2 }
  0xd0   : > { %v962_v43 = vmax.f32 %v930_v39, 0.0  ;;  %1009 = vst.msk [vmem:[%s1585_s19 + $0x90] sm:$0xff] %vm272_vm3, %v977_v42  ;;  %v794_v46 = vadd.f32 %v793_v9, %v704_v45 }
  0xd1   : > { %v666_v48 = vpop.f32.mrf.mxu0 }
  0xd2   : > { %994 = vst.msk [vmem:[%s1585_s19 + $0x18] sm:$0xff] %vm272_vm3, %v962_v43  ;;  %v756_v49 = vadd.f32 %v755_v13, %v666_v48  ;;  %v843_v50 = vadd.f32 %v794_v46, %v325_v44  ;;  %v329_v46 = vld [vmem:[%s1585_s19 + $0xc0] sm:$0xff] }
  0xd3   : > { %v910_v51 = vld [vmem:[%s1585_s19 + $0x98] sm:$0xff] }
  0xd4   : > { %v828_v52 = vadd.f32 %v756_v49, %v310_v47  ;;  %v946_v53 = vadd.f32 %v1674_v62, %v910_v51  ;;  %876 = vst.msk [vmem:[%s1585_s19 + $0xa0] sm:$0xff] %vm272_vm3, %v843_v50  ;;  %v314_v49 = vld [vmem:[%s1585_s19 + $0x48] sm:$0xff] }
  0xd5   : > { %v895_v54 = vld [vmem:[%s1585_s19 + $0x20] sm:$0xff]  ;;  %v805_v39 = vpop.f32.mrf.mxu3 }
  0xd6   : > { %v931_v55 = vadd.f32 %v1674_v62, %v895_v54  ;;  %861 = vst.msk [vmem:[%s1585_s19 + $0x28] sm:$0xff] %vm272_vm3, %v828_v52  ;;  %v978_v57 = vmax.f32 %v946_v53, 0.0 }
  0xd7   : > { %v763_v56 = vpop.f32.mrf.mxu1  ;;  %v706_v61 = vpop.f32.mrf.mxu2 }
  0xd8   : > { %v963_v59 = vmax.f32 %v931_v55, 0.0  ;;  %1010 = vst.msk [vmem:[%s1585_s19 + $0x98] sm:$0xff] %vm272_vm3, %v978_v57  ;;  %v796_v0 = vadd.f32 %v795_v23, %v706_v61 }
  0xd9   : > { %v669_v2 = vpop.f32.mrf.mxu0 }
  0xda   : > { %995 = vst.msk [vmem:[%s1585_s19 + $0x20] sm:$0xff] %vm272_vm3, %v963_v59  ;;  %v759_v3 = vadd.f32 %v758_v26, %v669_v2  ;;  %v844_v4 = vadd.f32 %v796_v0, %v326_v60  ;;  %v330_v0 = vld [vmem:[%s1585_s19 + $0xc8] sm:$0xff] }
  0xdb   : > { %v911_v6 = vld [vmem:[%s1585_s19 + $0xa0] sm:$0xff] }
  0xdc   : > { %v829_v7 = vadd.f32 %v759_v3, %v311_v1  ;;  %v947_v8 = vadd.f32 %v1674_v62, %v911_v6  ;;  %877 = vst.msk [vmem:[%s1585_s19 + $0xa8] sm:$0xff] %vm272_vm3, %v844_v4  ;;  %v315_v3 = vld [vmem:[%s1585_s19 + $0x50] sm:$0xff] }
  0xdd   : > { %v896_v9 = vld [vmem:[%s1585_s19 + $0x28] sm:$0xff]  ;;  %v808_v60 = vpop.f32.mrf.mxu3 }
  0xde   : > { %v932_v10 = vadd.f32 %v1674_v62, %v896_v9  ;;  %862 = vst.msk [vmem:[%s1585_s19 + $0x30] sm:$0xff] %vm272_vm3, %v829_v7  ;;  %v979_v12 = vmax.f32 %v947_v8, 0.0 }
  0xdf   : > { %v765_v11 = vpop.f32.mrf.mxu1  ;;  %v709_v15 = vpop.f32.mrf.mxu2 }
  0xe0   : > { %v964_v13 = vmax.f32 %v932_v10, 0.0  ;;  %1011 = vst.msk [vmem:[%s1585_s19 + $0xa0] sm:$0xff] %vm272_vm3, %v979_v12  ;;  %v799_v16 = vadd.f32 %v798_v41, %v709_v15 }
  0xe1   : > { %v671_v18 = vpop.f32.mrf.mxu0 }
  0xe2   : > { %996 = vst.msk [vmem:[%s1585_s19 + $0x28] sm:$0xff] %vm272_vm3, %v964_v13  ;;  %v761_v19 = vadd.f32 %v760_v40, %v671_v18  ;;  %v845_v21 = vadd.f32 %v799_v16, %v327_v14  ;;  %v331_v16 = vld [vmem:[%s1585_s19 + $0xd0] sm:$0xff] }
  0xe3   : > { %v912_v22 = vld [vmem:[%s1585_s19 + $0xa8] sm:$0xff] }
  0xe4   : > { %v830_v23 = vadd.f32 %v761_v19, %v312_v17  ;;  %v948_v24 = vadd.f32 %v1674_v62, %v912_v22  ;;  %878 = vst.msk [vmem:[%s1585_s19 + $0xb0] sm:$0xff] %vm272_vm3, %v845_v21 }
  0xe5   : > { %v897_v25 = vld [vmem:[%s1585_s19 + $0x30] sm:$0xff]  ;;  %v810_v18 = vpop.f32.mrf.mxu3 }
  0xe6   : > { %v933_v26 = vadd.f32 %v1674_v62, %v897_v25  ;;  %863 = vst.msk [vmem:[%s1585_s19 + $0x38] sm:$0xff] %vm272_vm3, %v830_v23  ;;  %v980_v28 = vmax.f32 %v948_v24, 0.0 }
  0xe7   : > { %v768_v27 = vpop.f32.mrf.mxu1  ;;  %v711_v31 = vpop.f32.mrf.mxu2 }
  0xe8   : > { %v965_v29 = vmax.f32 %v933_v26, 0.0  ;;  %1012 = vst.msk [vmem:[%s1585_s19 + $0xa8] sm:$0xff] %vm272_vm3, %v980_v28  ;;  %v801_v32 = vadd.f32 %v800_v63, %v711_v31 }
  0xe9   : > { %v674_v34 = vpop.f32.mrf.mxu0 }
  0xea   : > { %997 = vst.msk [vmem:[%s1585_s19 + $0x30] sm:$0xff] %vm272_vm3, %v965_v29  ;;  %v764_v35 = vadd.f32 %v763_v56, %v674_v34  ;;  %v846_v36 = vadd.f32 %v801_v32, %v328_v30  ;;  %v332_v32 = vld [vmem:[%s1585_s19 + $0xd8] sm:$0xff] }
  0xeb   : > { %v913_v37 = vld [vmem:[%s1585_s19 + $0xb0] sm:$0xff] }
  0xec   : > { %v831_v38 = vadd.f32 %v764_v35, %v313_v33  ;;  %v949_v40 = vadd.f32 %v1674_v62, %v913_v37  ;;  %879 = vst.msk [vmem:[%s1585_s19 + $0xb8] sm:$0xff] %vm272_vm3, %v846_v36  ;;  %v317_v35 = vld [vmem:[%s1585_s19 + $0x60] sm:$0xff] }
  0xed   : > { %v898_v41 = vld [vmem:[%s1585_s19 + $0x38] sm:$0xff]  ;;  %v813_v37 = vpop.f32.mrf.mxu3 }
  0xee   : > { %v934_v42 = vadd.f32 %v1674_v62, %v898_v41  ;;  %864 = vst.msk [vmem:[%s1585_s19 + $0x40] sm:$0xff] %vm272_vm3, %v831_v38  ;;  %v981_v44 = vmax.f32 %v949_v40, 0.0 }
  0xef   : > { %v770_v43 = vpop.f32.mrf.mxu1  ;;  %v714_v47 = vpop.f32.mrf.mxu2 }
  0xf0   : > { %v966_v45 = vmax.f32 %v934_v42, 0.0  ;;  %1013 = vst.msk [vmem:[%s1585_s19 + $0xb0] sm:$0xff] %vm272_vm3, %v981_v44  ;;  %v804_v48 = vadd.f32 %v803_v20, %v714_v47  ;;  %v316_v20 = vld [vmem:[%s1585_s19 + $0x58] sm:$0xff] }
  0xf1   : > { %v676_v50 = vpop.f32.mrf.mxu0 }
  0xf2   : > { %998 = vst.msk [vmem:[%s1585_s19 + $0x38] sm:$0xff] %vm272_vm3, %v966_v45  ;;  %v766_v51 = vadd.f32 %v765_v11, %v676_v50  ;;  %v847_v52 = vadd.f32 %v804_v48, %v329_v46  ;;  %v333_v48 = vld [vmem:[%s1585_s19 + $0xe0] sm:$0xff] }
  0xf3   : > { %v914_v53 = vld [vmem:[%s1585_s19 + $0xb8] sm:$0xff] }
  0xf4   : > { %v832_v54 = vadd.f32 %v766_v51, %v314_v49  ;;  %v950_v55 = vadd.f32 %v1674_v62, %v914_v53  ;;  %880 = vst.msk [vmem:[%s1585_s19 + $0xc0] sm:$0xff] %vm272_vm3, %v847_v52  ;;  %v318_v51 = vld [vmem:[%s1585_s19 + $0x68] sm:$0xff] }
  0xf5   : > { %v899_v56 = vld [vmem:[%s1585_s19 + $0x40] sm:$0xff] }
  0xf6   : > { %v935_v57 = vadd.f32 %v1674_v62, %v899_v56  ;;  %865 = vst.msk [vmem:[%s1585_s19 + $0x48] sm:$0xff] %vm272_vm3, %v832_v54  ;;  %v982_v61 = vmax.f32 %v950_v55, 0.0  ;;  %v815_v56 = vpop.f32.mrf.mxu3 }
  0xf7   : > { %v773_v59 = vpop.f32.mrf.mxu1  ;;  %v716_v1 = vpop.f32.mrf.mxu2 }
  0xf8   : > { %v967_v63 = vmax.f32 %v935_v57, 0.0  ;;  %1014 = vst.msk [vmem:[%s1585_s19 + $0xb8] sm:$0xff] %vm272_vm3, %v982_v61  ;;  %v806_v2 = vadd.f32 %v805_v39, %v716_v1 }
  0xf9   : > { %v679_v4 = vpop.f32.mrf.mxu0 }
  0xfa   : > { %999 = vst.msk [vmem:[%s1585_s19 + $0x40] sm:$0xff] %vm272_vm3, %v967_v63  ;;  %v769_v6 = vadd.f32 %v768_v27, %v679_v4  ;;  %v848_v7 = vadd.f32 %v806_v2, %v330_v0  ;;  %v321_v63 = vld [vmem:[%s1585_s19 + $0x80] sm:$0xff]  ;;  %v334_v4 = vld [vmem:[%s1585_s19 + $0xe8] sm:$0xff] }
  0xfb   : > { %v915_v8 = vld [vmem:[%s1585_s19 + $0xc0] sm:$0xff] }
  0xfc   : > { %v833_v9 = vadd.f32 %v769_v6, %v315_v3  ;;  %v951_v10 = vadd.f32 %v1674_v62, %v915_v8  ;;  %881 = vst.msk [vmem:[%s1585_s19 + $0xc8] sm:$0xff] %vm272_vm3, %v848_v7 }
  0xfd   : > { %v900_v11 = vld [vmem:[%s1585_s19 + $0x48] sm:$0xff] }
  0xfe   : > { %v936_v12 = vadd.f32 %v1674_v62, %v900_v11  ;;  %866 = vst.msk [vmem:[%s1585_s19 + $0x50] sm:$0xff] %vm272_vm3, %v833_v9  ;;  %v983_v14 = vmax.f32 %v951_v10, 0.0  ;;  %v319_v9 = vld [vmem:[%s1585_s19 + $0x70] sm:$0xff] }
  0xff   : > { %v775_v13 = vpop.f32.mrf.mxu1  ;;  %v719_v17 = vpop.f32.mrf.mxu2 }
 0x100   : > { %v968_v15 = vmax.f32 %v936_v12, 0.0  ;;  %1015 = vst.msk [vmem:[%s1585_s19 + $0xc0] sm:$0xff] %vm272_vm3, %v983_v14  ;;  %v809_v19 = vadd.f32 %v808_v60, %v719_v17  ;;  %v818_v17 = vpop.f32.mrf.mxu3 }
 0x101   : > { %v681_v21 = vpop.f32.mrf.mxu0 }
 0x102   : > { %1000 = vst.msk [vmem:[%s1585_s19 + $0x48] sm:$0xff] %vm272_vm3, %v968_v15  ;;  %v771_v22 = vadd.f32 %v770_v43, %v681_v21  ;;  %v849_v23 = vadd.f32 %v809_v19, %v331_v16 }
 0x103   : > { %v916_v24 = vld [vmem:[%s1585_s19 + $0xc8] sm:$0xff] }
 0x104   : > { %v834_v25 = vadd.f32 %v771_v22, %v316_v20  ;;  %v952_v26 = vadd.f32 %v1674_v62, %v916_v24  ;;  %882 = vst.msk [vmem:[%s1585_s19 + $0xd0] sm:$0xff] %vm272_vm3, %v849_v23  ;;  %v335_v23 = vld [vmem:[%s1585_s19 + $0xf0] sm:$0xff] }
 0x105   : > { %v901_v27 = vld [vmem:[%s1585_s19 + $0x50] sm:$0xff] }
 0x106   : > { %v937_v28 = vadd.f32 %v1674_v62, %v901_v27  ;;  %867 = vst.msk [vmem:[%s1585_s19 + $0x58] sm:$0xff] %vm272_vm3, %v834_v25  ;;  %v984_v30 = vmax.f32 %v952_v26, 0.0  ;;  %v320_v27 = vld [vmem:[%s1585_s19 + $0x78] sm:$0xff] }
 0x107   : > { %v778_v29 = vpop.f32.mrf.mxu1  ;;  %v721_v33 = vpop.f32.mrf.mxu2 }
 0x108   : > { %v969_v31 = vmax.f32 %v937_v28, 0.0  ;;  %1016 = vst.msk [vmem:[%s1585_s19 + $0xc8] sm:$0xff] %vm272_vm3, %v984_v30  ;;  %v811_v34 = vadd.f32 %v810_v18, %v721_v33  ;;  %v322_v18 = vld [vmem:[%s1585_s19 + $0x88] sm:$0xff] }
 0x109   : > { %v684_v36 = vpop.f32.mrf.mxu0 }
 0x10a   : > { %1001 = vst.msk [vmem:[%s1585_s19 + $0x50] sm:$0xff] %vm272_vm3, %v969_v31  ;;  %v774_v38 = vadd.f32 %v773_v59, %v684_v36  ;;  %v850_v39 = vadd.f32 %v811_v34, %v332_v32 }
 0x10b   : > { %v917_v40 = vld [vmem:[%s1585_s19 + $0xd0] sm:$0xff] }
 0x10c   : > { %v835_v41 = vadd.f32 %v774_v38, %v317_v35  ;;  %v953_v42 = vadd.f32 %v1674_v62, %v917_v40  ;;  %883 = vst.msk [vmem:[%s1585_s19 + $0xd8] sm:$0xff] %vm272_vm3, %v850_v39  ;;  %v820_v40 = vpop.f32.mrf.mxu3 }
 0x10d   : > { %v902_v43 = vld [vmem:[%s1585_s19 + $0x58] sm:$0xff] }
 0x10e   : > { %v938_v44 = vadd.f32 %v1674_v62, %v902_v43  ;;  %868 = vst.msk [vmem:[%s1585_s19 + $0x60] sm:$0xff] %vm272_vm3, %v835_v41  ;;  %v985_v46 = vmax.f32 %v953_v42, 0.0  ;;  %v336_v41 = vld [vmem:[%s1585_s19 + $0xf8] sm:$0xff] }
 0x10f   : > { %v780_v45 = vpop.f32.mrf.mxu1  ;;  %v724_v49 = vpop.f32.mrf.mxu2 }
 0x110   : > { %v970_v47 = vmax.f32 %v938_v44, 0.0  ;;  %1017 = vst.msk [vmem:[%s1585_s19 + $0xd0] sm:$0xff] %vm272_vm3, %v985_v46  ;;  %v814_v50 = vadd.f32 %v813_v37, %v724_v49 }
 0x111   : > { %v686_v52 = vpop.f32.mrf.mxu0 }
 0x112   : > { %1002 = vst.msk [vmem:[%s1585_s19 + $0x58] sm:$0xff] %vm272_vm3, %v970_v47  ;;  %v776_v53 = vadd.f32 %v775_v13, %v686_v52  ;;  %v851_v54 = vadd.f32 %v814_v50, %v333_v48 }
 0x113   : > { %v918_v55 = vld [vmem:[%s1585_s19 + $0xd8] sm:$0xff] }
 0x114   : > { %v836_v57 = vadd.f32 %v776_v53, %v318_v51  ;;  %v954_v59 = vadd.f32 %v1674_v62, %v918_v55  ;;  %884 = vst.msk [vmem:[%s1585_s19 + $0xe0] sm:$0xff] %vm272_vm3, %v851_v54 }
 0x115   : > { %v903_v60 = vld [vmem:[%s1585_s19 + $0x60] sm:$0xff] }
 0x116   : > { %v939_v61 = vadd.f32 %v1674_v62, %v903_v60  ;;  %869 = vst.msk [vmem:[%s1585_s19 + $0x68] sm:$0xff] %vm272_vm3, %v836_v57  ;;  %v986_v1 = vmax.f32 %v954_v59, 0.0 }
 0x117   : > { %v783_v0 = vpop.f32.mrf.mxu1  ;;  %v726_v6 = vpop.f32.mrf.mxu2 }
 0x118   : > { %v784_v2 = vadd.f32 %v783_v0, %v1668_v58  ;;  %v971_v3 = vmax.f32 %v939_v61, 0.0  ;;  %1018 = vst.msk [vmem:[%s1585_s19 + $0xd8] sm:$0xff] %vm272_vm3, %v986_v1  ;;  %v816_v8 = vadd.f32 %v815_v56, %v726_v6 }
 0x119   : > { %v689_v10 = vpop.f32.mrf.mxu0 }
 0x11a   : > { %v839_v7 = vadd.f32 %v784_v2, %v321_v63  ;;  %1003 = vst.msk [vmem:[%s1585_s19 + $0x60] sm:$0xff] %vm272_vm3, %v971_v3  ;;  %v779_v11 = vadd.f32 %v778_v29, %v689_v10  ;;  %v852_v58 = vadd.f32 %v816_v8, %v334_v4 }
 0x11b   : > { %v919_v12 = vld [vmem:[%s1585_s19 + $0xe0] sm:$0xff] }
 0x11c   : > { %872 = vst.msk [vmem:[%s1585_s19 + $0x80] sm:$0xff] %vm272_vm3, %v839_v7  ;;  %v837_v13 = vadd.f32 %v779_v11, %v319_v9  ;;  %v955_v14 = vadd.f32 %v1674_v62, %v919_v12 }
 0x11d   : > { %v904_v15 = vld [vmem:[%s1585_s19 + $0x68] sm:$0xff]  ;;  %885 = vst.msk [vmem:[%s1585_s19 + $0xe8] sm:$0xff] %vm272_vm3, %v852_v58 }
 0x11e   : > { %v940_v16 = vadd.f32 %v1674_v62, %v904_v15  ;;  %870 = vst.msk [vmem:[%s1585_s19 + $0x70] sm:$0xff] %vm272_vm3, %v837_v13  ;;  %v987_v20 = vmax.f32 %v955_v14, 0.0 }
 0x11f   : > { %v785_v19 = vpop.f32.mrf.mxu1  ;;  %v729_v24 = vpop.f32.mrf.mxu2 }
 0x120   : > { %v786_v21 = vadd.f32 %v785_v19, %v1680_v5  ;;  %v972_v22 = vmax.f32 %v940_v16, 0.0  ;;  %1019 = vst.msk [vmem:[%s1585_s19 + $0xe0] sm:$0xff] %vm272_vm3, %v987_v20  ;;  %v819_v26 = vadd.f32 %v818_v17, %v729_v24 }
 0x121   : > { %v691_v28 = vpop.f32.mrf.mxu0 }
 0x122   : > { %v840_v25 = vadd.f32 %v786_v21, %v322_v18  ;;  %1004 = vst.msk [vmem:[%s1585_s19 + $0x68] sm:$0xff] %vm272_vm3, %v972_v22  ;;  %v781_v30 = vadd.f32 %v780_v45, %v691_v28  ;;  %v853_v31 = vadd.f32 %v819_v26, %v335_v23 }
 0x123   : > { %v907_v29 = vld [vmem:[%s1585_s19 + $0x80] sm:$0xff] }
 0x124   : > { %v943_v5 = vadd.f32 %v1674_v62, %v907_v29  ;;  %873 = vst.msk [vmem:[%s1585_s19 + $0x88] sm:$0xff] %vm272_vm3, %v840_v25  ;;  %v920_v32 = vld [vmem:[%s1585_s19 + $0xe8] sm:$0xff]  ;;  %v838_v33 = vadd.f32 %v781_v30, %v320_v27 }
 0x125   : > { %v956_v35 = vadd.f32 %v1674_v62, %v920_v32  ;;  %v905_v36 = vld [vmem:[%s1585_s19 + $0x70] sm:$0xff]  ;;  %886 = vst.msk [vmem:[%s1585_s19 + $0xf0] sm:$0xff] %vm272_vm3, %v853_v31 }
 0x126   : > { %v975_v34 = vmax.f32 %v943_v5, 0.0  ;;  %v941_v37 = vadd.f32 %v1674_v62, %v905_v36  ;;  %871 = vst.msk [vmem:[%s1585_s19 + $0x78] sm:$0xff] %vm272_vm3, %v838_v33 }
 0x127   : > { %v988_v38 = vmax.f32 %v956_v35, 0.0  ;;  %v731_v42 = vpop.f32.mrf.mxu2 }
 0x128   : > { %1007 = vst.msk [vmem:[%s1585_s19 + $0x80] sm:$0xff] %vm272_vm3, %v975_v34  ;;  %v973_v39 = vmax.f32 %v941_v37, 0.0  ;;  %v821_v43 = vadd.f32 %v820_v40, %v731_v42 }
 0x129   : > { %1020 = vst.msk [vmem:[%s1585_s19 + $0xe8] sm:$0xff] %vm272_vm3, %v988_v38 }
 0x12a   : > { %1005 = vst.msk [vmem:[%s1585_s19 + $0x70] sm:$0xff] %vm272_vm3, %v973_v39  ;;  %v854_v46 = vadd.f32 %v821_v43, %v336_v41 }
 0x12b   : > { %v908_v44 = vld [vmem:[%s1585_s19 + $0x88] sm:$0xff] }
 0x12c   : > { %v944_v45 = vadd.f32 %v1674_v62, %v908_v44  ;;  %v921_v47 = vld [vmem:[%s1585_s19 + $0xf0] sm:$0xff]  ;;  %887 = vst.msk [vmem:[%s1585_s19 + $0xf8] sm:$0xff] %vm272_vm3, %v854_v46 }
 0x12d   : > { %v957_v49 = vadd.f32 %v1674_v62, %v921_v47  ;;  %v906_v50 = vld [vmem:[%s1585_s19 + $0x78] sm:$0xff] }
 0x12e   : > { %v976_v48 = vmax.f32 %v944_v45, 0.0  ;;  %v942_v51 = vadd.f32 %v1674_v62, %v906_v50 }
 0x12f   : > { %v989_v52 = vmax.f32 %v957_v49, 0.0 }
 0x130   : > { %1008 = vst.msk [vmem:[%s1585_s19 + $0x88] sm:$0xff] %vm272_vm3, %v976_v48  ;;  %v974_v53 = vmax.f32 %v942_v51, 0.0 }
 0x131   : > { %1021 = vst.msk [vmem:[%s1585_s19 + $0xf0] sm:$0xff] %vm272_vm3, %v989_v52 }
 0x132   : > { %1006 = vst.msk [vmem:[%s1585_s19 + $0x78] sm:$0xff] %vm272_vm3, %v974_v53 }
 0x133   : > { %v922_v54 = vld [vmem:[%s1585_s19 + $0xf8] sm:$0xff] }
 0x134   : > { %v958_v55 = vadd.f32 %v1674_v62, %v922_v54 }
 0x136   : > { %v990_v56 = vmax.f32 %v958_v55, 0.0 }
 0x138   : > { %1022 = vst.msk [vmem:[%s1585_s19 + $0xf8] sm:$0xff] %vm272_vm3, %v990_v56 }
 0x139 PF: > { %s13_s14 = sadd.s32 1, %s1432_s14   ;;  %s1913_s12 = smov %s1428_s13 }
 0x13a   : > { %p10_p5 = scmp.ge.s32.totalorder %s13_s14, 4   ;;  %s1914_s13 = smov %s1916_s15 }
 0x13c   :  { %12 = sbr.rel (!%p10_p5) target bundleno = 2 (0x2), region = 76 }

// kernel: resnet18_16s_forward.23
= control target key start
LH: loop header
LB: loop body
LE: loop exit
PB: predicated region body
PF: predicated region fallthrough
CT: control target
= control target key end

     0   :  { %vm19_vm0 = vcmask 523264   ;;  %s2101_s1 = inlined_call_operand.vmem [shape: bf16[576,64], index: 1, kind: input, shape index: {}]   ;;  %s2102_s0 = inlined_call_operand.vmem [shape: bf16[128,576], index: 0, kind: input, shape index: {}]   ;;  %s2103_s2 = inlined_call_operand.vmem [shape: f32[1,64], index: 2, kind: input, shape index: {}]   ;;  %s2104_s3 = inlined_call_operand.vmem [shape: f32[128,64], index: 3, kind: output, shape index: {}]  }
   0x1   :  { %v1324_v0 = vld [vmem:[%s2101_s1 + $0x38] sm:$0xff]  ;;  %v1323_v1 = vld [vmem:[%s2101_s1 + $0x30] sm:$0xff]  ;;  %v1322_v2 = vld [vmem:[%s2101_s1 + $0x28] sm:$0xff] }
   0x2   :  { %1353 = vmatpush.bf16.msra.mxu1 %v1324_v0  ;;  %1354 = vmatpush.bf16.msra.mxu2 %v1324_v0  ;;  %v1321_v3 = vld [vmem:[%s2101_s1 + $0x20] sm:$0xff]  ;;  %v1320_v4 = vld [vmem:[%s2101_s1 + $0x18] sm:$0xff]  ;;  %v1319_v5 = vld [vmem:[%s2101_s1 + $0x10] sm:$0xff] }
   0x3   :  { %1355 = vmatpush.bf16.msra.mxu3 %v1324_v0  ;;  %613 = vmatpush.bf16.msra.mxu0 %v1324_v0  ;;  %v1318_v6 = vld [vmem:[%s2101_s1 + $0x8] sm:$0xff]  ;;  %v1317_v7 = vld [vmem:[%s2101_s1] sm:$0xff]  ;;  %v1007_v8 = vld [vmem:[%s2102_s0 + $0x50] sm:$0xf] }
   0x4   :  { %v1289_v9 = vld [vmem:[%s2102_s0 + $0x60] sm:$0xf0]  ;;  %v1047_v10 = vld [vmem:[%s2102_s0 + $0xa0] sm:$0xf]  ;;  %v1299_v11 = vld [vmem:[%s2102_s0 + $0xb0] sm:$0xf0] }
   0x5   :  { %v1087_v12 = vld [vmem:[%s2102_s0 + $0xf0] sm:$0xf]  ;;  %v1309_v13 = vld [vmem:[%s2102_s0 + $0x100] sm:$0xf0]  ;;  %v967_v14 = vld [vmem:[%s2102_s0] sm:$0xf]  ;;  %v1008_v18 = vor.u32 %v1289_v9, %v1007_v8  ;;  %v1048_v19 = vor.u32 %v1299_v11, %v1047_v10 }
   0x6   :  { %1356 = vmatpush.bf16.msra.mxu1 %v1323_v1  ;;  %1357 = vmatpush.bf16.msra.mxu2 %v1323_v1  ;;  %v1279_v15 = vld [vmem:[%s2102_s0 + $0x10] sm:$0xf0]  ;;  %v1340_v16 = vld [vmem:[%s2101_s1 + $0xb8] sm:$0xff]  ;;  %v1088_v20 = vor.u32 %v1309_v13, %v1087_v12  ;;  %v1338_v28 = vld [vmem:[%s2101_s1 + $0xa8] sm:$0xff] }
   0x7   :  { %1358 = vmatpush.bf16.msra.mxu3 %v1323_v1  ;;  %614 = vmatpush.bf16.msra.mxu0 %v1323_v1  ;;  %v1332_v17 = vld [vmem:[%s2101_s1 + $0x78] sm:$0xff]  ;;  %v968_v21 = vor.u32 %v1279_v15, %v967_v14  ;;  %v1339_v24 = vld [vmem:[%s2101_s1 + $0xb0] sm:$0xff]  ;;  %v1330_v29 = vld [vmem:[%s2101_s1 + $0x68] sm:$0xff] }
   0x8   :  { %v1348_v22 = vld [vmem:[%s2101_s1 + $0xf8] sm:$0xff]  ;;  %v1331_v25 = vld [vmem:[%s2101_s1 + $0x70] sm:$0xff]  ;;  %v1346_v30 = vld [vmem:[%s2101_s1 + $0xe8] sm:$0xff] }
   0x9   :  { %v1352_v23 = vld [vmem:[%s2101_s1 + $0x118] sm:$0xff]  ;;  %v1347_v26 = vld [vmem:[%s2101_s1 + $0xf0] sm:$0xff]  ;;  %v1350_v31 = vld [vmem:[%s2101_s1 + $0x108] sm:$0xff] }
   0xa   :  { %1359 = vmatpush.bf16.msra.mxu1 %v1322_v2  ;;  %1360 = vmatpush.bf16.msra.mxu2 %v1322_v2  ;;  %v1351_v27 = vld [vmem:[%s2101_s1 + $0x110] sm:$0xff]  ;;  %v1337_v32 = vld [vmem:[%s2101_s1 + $0xa0] sm:$0xff]  ;;  %v1027_v35 = vld [vmem:[%s2102_s0 + $0x78] sm:$0xf] }
   0xb   :  { %1361 = vmatpush.bf16.msra.mxu3 %v1322_v2  ;;  %615 = vmatpush.bf16.msra.mxu0 %v1322_v2  ;;  %v1329_v33 = vld [vmem:[%s2101_s1 + $0x60] sm:$0xff]  ;;  %v1294_v36 = vld [vmem:[%s2102_s0 + $0x88] sm:$0xf0]  ;;  %v1067_v37 = vld [vmem:[%s2102_s0 + $0xc8] sm:$0xf] }
   0xc   :  { %v1345_v34 = vld [vmem:[%s2101_s1 + $0xe0] sm:$0xff]  ;;  %v1304_v38 = vld [vmem:[%s2102_s0 + $0xd8] sm:$0xf0]  ;;  %v1107_v39 = vld [vmem:[%s2102_s0 + $0x118] sm:$0xf]  ;;  %v1028_v46 = vor.u32 %v1294_v36, %v1027_v35 }
   0xd   :  { %v1314_v40 = vld [vmem:[%s2102_s0 + $0x128] sm:$0xf0]  ;;  %v987_v41 = vld [vmem:[%s2102_s0 + $0x28] sm:$0xf]  ;;  %v1284_v42 = vld [vmem:[%s2102_s0 + $0x38] sm:$0xf0]  ;;  %v1068_v47 = vor.u32 %v1304_v38, %v1067_v37 }
   0xe   :  { %1362 = vmatpush.bf16.msra.mxu1 %v1321_v3  ;;  %1363 = vmatpush.bf16.msra.mxu2 %v1321_v3  ;;  %v1349_v43 = vld [vmem:[%s2101_s1 + $0x100] sm:$0xff]  ;;  %v1336_v44 = vld [vmem:[%s2101_s1 + $0x98] sm:$0xff]  ;;  %v1108_v48 = vor.u32 %v1314_v40, %v1107_v39  ;;  %v988_v49 = vor.u32 %v1284_v42, %v987_v41  ;;  %v1335_v51 = vld [vmem:[%s2101_s1 + $0x90] sm:$0xff] }
   0xf   :  { %1364 = vmatpush.bf16.msra.mxu3 %v1321_v3  ;;  %616 = vmatpush.bf16.msra.mxu0 %v1321_v3  ;;  %v1328_v45 = vld [vmem:[%s2101_s1 + $0x58] sm:$0xff]  ;;  %v1327_v52 = vld [vmem:[%s2101_s1 + $0x50] sm:$0xff]  ;;  %v1334_v54 = vld [vmem:[%s2101_s1 + $0x88] sm:$0xff] }
  0x10   :  { %v1344_v50 = vld [vmem:[%s2101_s1 + $0xd8] sm:$0xff]  ;;  %v1343_v53 = vld [vmem:[%s2101_s1 + $0xd0] sm:$0xff]  ;;  %v1326_v55 = vld [vmem:[%s2101_s1 + $0x48] sm:$0xff] }
  0x11   :  { %v1342_v56 = vld [vmem:[%s2101_s1 + $0xc8] sm:$0xff]  ;;  %v1333_v57 = vld [vmem:[%s2101_s1 + $0x80] sm:$0xff]  ;;  %v969_v61 = vld [vmem:[%s2102_s0 + $0x14] sm:$0xf0] }
  0x12   :  { %1365 = vmatpush.bf16.msra.mxu1 %v1320_v4  ;;  %1366 = vmatpush.bf16.msra.mxu2 %v1320_v4  ;;  %v1325_v58 = vld [vmem:[%s2101_s1 + $0x40] sm:$0xff]  ;;  %v975_v62 = vld [vmem:[%s2102_s0 + $0x8] sm:$0xf]  ;;  %v1280_v63 = vld [vmem:[%s2102_s0 + $0x18] sm:$0xf0] }
  0x13   :  { %1367 = vmatpush.bf16.msra.mxu3 %v1320_v4  ;;  %617 = vmatpush.bf16.msra.mxu0 %v1320_v4  ;;  %v1341_v59 = vld [vmem:[%s2101_s1 + $0xc0] sm:$0xff]  ;;  %v1278_v0 = vld [vmem:[%s2102_s0 + $0xc] sm:$0xf]  ;;  %v983_v2 = vld [vmem:[%s2102_s0 + $0x10] sm:$0xf] }
  0x14   :  { %v1277_v60 = vld [vmem:[%s2102_s0 + $0x4] sm:$0xf]  ;;  %v977_v1 = vld [vmem:[%s2102_s0 + $0x1c] sm:$0xf0]  ;;  %v1282_v8 = vld [vmem:[%s2102_s0 + $0x2c] sm:$0xf] }
  0x15   :  { %v1281_v3 = vld [vmem:[%s2102_s0 + $0x20] sm:$0xf0]  ;;  %v972_v4 = vor.u32 %v1277_v60, %v969_v61  ;;  %v989_v9 = vld [vmem:[%s2102_s0 + $0x3c] sm:$0xf0]  ;;  %v995_v10 = vld [vmem:[%s2102_s0 + $0x30] sm:$0xf] }
  0x16   :  { %1368 = vmatpush.bf16.msra.mxu1 %v1319_v5  ;;  %1369 = vmatpush.bf16.msra.mxu2 %v1319_v5  ;;  %v1285_v11 = vld [vmem:[%s2102_s0 + $0x40] sm:$0xf0]  ;;  %v1283_v12 = vld [vmem:[%s2102_s0 + $0x34] sm:$0xf]  ;;  %v997_v13 = vld [vmem:[%s2102_s0 + $0x44] sm:$0xf0] }
  0x17   :  { %1370 = vmatpush.bf16.msra.mxu3 %v1319_v5  ;;  %618 = vmatpush.bf16.msra.mxu0 %v1319_v5  ;;  %v976_v5 = vor.u32 %v1280_v63, %v975_v62  ;;  %v1003_v14 = vld [vmem:[%s2102_s0 + $0x38] sm:$0xf]  ;;  %v1286_v15 = vld [vmem:[%s2102_s0 + $0x48] sm:$0xf0]  ;;  %v1295_v35 = vld [vmem:[%s2102_s0 + $0x90] sm:$0xf0] }
  0x18   :  { %v1293_v36 = vld [vmem:[%s2102_s0 + $0x84] sm:$0xf]  ;;  %v1037_v37 = vld [vmem:[%s2102_s0 + $0x94] sm:$0xf0]  ;;  %v1043_v38 = vld [vmem:[%s2102_s0 + $0x88] sm:$0xf] }
  0x19   :  { %v1296_v39 = vld [vmem:[%s2102_s0 + $0x98] sm:$0xf0]  ;;  %v1040_v42 = vor.u32 %v1293_v36, %v1037_v37  ;;  %v1303_v60 = vld [vmem:[%s2102_s0 + $0xd4] sm:$0xf]  ;;  %v1077_v61 = vld [vmem:[%s2102_s0 + $0xe4] sm:$0xf0] }
  0x1a   :  { %1371 = vmatpush.bf16.msra.mxu1 %v1318_v6  ;;  %1372 = vmatpush.bf16.msra.mxu2 %v1318_v6  ;;  %v1083_v62 = vld [vmem:[%s2102_s0 + $0xd8] sm:$0xf]  ;;  %v1306_v63 = vld [vmem:[%s2102_s0 + $0xe8] sm:$0xf0] }
  0x1b   :  { %1373 = vmatpush.bf16.msra.mxu3 %v1318_v6  ;;  %619 = vmatpush.bf16.msra.mxu0 %v1318_v6  ;;  %v980_v6 = vor.u32 %v1278_v0, %v977_v1 }
  0x1e   :  { %1374 = vmatpush.bf16.msra.mxu1 %v1317_v7  ;;  %1375 = vmatpush.bf16.msra.mxu2 %v1317_v7 }
  0x1f   :  { %1376 = vmatpush.bf16.msra.mxu3 %v1317_v7  ;;  %620 = vmatpush.bf16.msra.mxu0 %v1317_v7  ;;  %v984_v7 = vor.u32 %v1281_v3, %v983_v2  ;;  %v1080_v2 = vor.u32 %v1303_v60, %v1077_v61  ;;  %v1084_v3 = vor.u32 %v1306_v63, %v1083_v62 }
  0x21   :  { %631 = vmatmul.bf16.vlgmr.msra.gmra.mxu1 %v1008_v18  ;;  %641 = vmatmul.bf16.vlgmr.msra.gmra.mxu2 %v1048_v19  ;;  %v1000_v18 = vor.u32 %v1283_v12, %v997_v13  ;;  %v1004_v19 = vor.u32 %v1286_v15, %v1003_v14 }
  0x22   :  { %711 = vmatpush.bf16.msrb.mxu2 %v1340_v16  ;;  %662 = vmatpush.bf16.msrb.mxu1 %v1332_v17  ;;  %v992_v16 = vor.u32 %v1282_v8, %v989_v9  ;;  %v996_v17 = vor.u32 %v1285_v11, %v995_v10  ;;  %v1308_v8 = vld [vmem:[%s2102_s0 + $0xfc] sm:$0xf]  ;;  %v1097_v9 = vld [vmem:[%s2102_s0 + $0x10c] sm:$0xf0]  ;;  %v1103_v10 = vld [vmem:[%s2102_s0 + $0x100] sm:$0xf] }
  0x23   :  { %651 = vmatmul.bf16.vlgmr.msra.gmra.mxu3 %v1088_v20  ;;  %621 = vmatmul.bf16.vlgmr.msra.gmra.mxu0 %v968_v21  ;;  %v1287_v20 = vld [vmem:[%s2102_s0 + $0x54] sm:$0xf]  ;;  %v1009_v21 = vld [vmem:[%s2102_s0 + $0x64] sm:$0xf0]  ;;  %v1100_v15 = vor.u32 %v1308_v8, %v1097_v9 }
  0x24   :  { %760 = vmatpush.bf16.msrb.mxu3 %v1348_v22  ;;  %813 = vmatpush.bf16.msrb.mxu0 %v1352_v23  ;;  %v1015_v22 = vld [vmem:[%s2102_s0 + $0x58] sm:$0xf]  ;;  %v1290_v23 = vld [vmem:[%s2102_s0 + $0x68] sm:$0xf0]  ;;  %v1311_v11 = vld [vmem:[%s2102_s0 + $0x110] sm:$0xf0] }
  0x26   :  { %712 = vmatpush.bf16.msrb.mxu2 %v1339_v24  ;;  %663 = vmatpush.bf16.msrb.mxu1 %v1331_v25  ;;  %v1288_v24 = vld [vmem:[%s2102_s0 + $0x5c] sm:$0xf]  ;;  %v1017_v25 = vld [vmem:[%s2102_s0 + $0x6c] sm:$0xf0] }
  0x28   :  { %761 = vmatpush.bf16.msrb.mxu3 %v1347_v26  ;;  %814 = vmatpush.bf16.msrb.mxu0 %v1351_v27  ;;  %v1023_v26 = vld [vmem:[%s2102_s0 + $0x60] sm:$0xf]  ;;  %v1291_v27 = vld [vmem:[%s2102_s0 + $0x70] sm:$0xf0] }
  0x2a   :  { %713 = vmatpush.bf16.msrb.mxu2 %v1338_v28  ;;  %664 = vmatpush.bf16.msrb.mxu1 %v1330_v29  ;;  %v1012_v28 = vor.u32 %v1287_v20, %v1009_v21  ;;  %v1016_v29 = vor.u32 %v1290_v23, %v1015_v22  ;;  %v1312_v23 = vld [vmem:[%s2102_s0 + $0x11c] sm:$0xf] }
  0x2c   :  { %762 = vmatpush.bf16.msrb.mxu3 %v1346_v30  ;;  %815 = vmatpush.bf16.msrb.mxu0 %v1350_v31  ;;  %v1020_v30 = vor.u32 %v1288_v24, %v1017_v25  ;;  %v1024_v31 = vor.u32 %v1291_v27, %v1023_v26  ;;  %v1109_v24 = vld [vmem:[%s2102_s0 + $0x12c] sm:$0xf0]  ;;  %v1115_v25 = vld [vmem:[%s2102_s0 + $0x120] sm:$0xf]  ;;  %v1315_v26 = vld [vmem:[%s2102_s0 + $0x130] sm:$0xf0] }
  0x2d   :  { %v1313_v27 = vld [vmem:[%s2102_s0 + $0x124] sm:$0xf] }
  0x2e   :  { %714 = vmatpush.bf16.msrb.mxu2 %v1337_v32  ;;  %665 = vmatpush.bf16.msrb.mxu1 %v1329_v33  ;;  %v1292_v32 = vld [vmem:[%s2102_s0 + $0x7c] sm:$0xf]  ;;  %v1029_v33 = vld [vmem:[%s2102_s0 + $0x8c] sm:$0xf0] }
  0x2f   :  { %v1032_v40 = vor.u32 %v1292_v32, %v1029_v33  ;;  %v1112_v33 = vor.u32 %v1312_v23, %v1109_v24 }
  0x30   :  { %763 = vmatpush.bf16.msrb.mxu3 %v1345_v34  ;;  %816 = vmatpush.bf16.msrb.mxu0 %v1349_v43  ;;  %v1035_v34 = vld [vmem:[%s2102_s0 + $0x80] sm:$0xf]  ;;  %v1044_v43 = vor.u32 %v1296_v39, %v1043_v38 }
  0x31   :  { %636 = vmatmul.bf16.gmra.mxu1 %v1028_v46  ;;  %646 = vmatmul.bf16.gmra.mxu2 %v1068_v47  ;;  %v1036_v41 = vor.u32 %v1295_v35, %v1035_v34  ;;  %v1055_v46 = vld [vmem:[%s2102_s0 + $0xa8] sm:$0xf]  ;;  %v1300_v47 = vld [vmem:[%s2102_s0 + $0xb8] sm:$0xf0]  ;;  %v1116_v34 = vor.u32 %v1315_v26, %v1115_v25 }
  0x32   :  { %715 = vmatpush.bf16.msrb.mxu2 %v1336_v44  ;;  %666 = vmatpush.bf16.msrb.mxu1 %v1328_v45  ;;  %v1297_v44 = vld [vmem:[%s2102_s0 + $0xa4] sm:$0xf]  ;;  %v1049_v45 = vld [vmem:[%s2102_s0 + $0xb4] sm:$0xf0] }
  0x33   :  { %656 = vmatmul.bf16.gmra.mxu3 %v1108_v48  ;;  %626 = vmatmul.bf16.gmra.mxu0 %v988_v49  ;;  %v1298_v48 = vld [vmem:[%s2102_s0 + $0xac] sm:$0xf]  ;;  %v1057_v49 = vld [vmem:[%s2102_s0 + $0xbc] sm:$0xf0] }
  0x34   :  { %764 = vmatpush.bf16.msrb.mxu3 %v1344_v50  ;;  %v1063_v50 = vld [vmem:[%s2102_s0 + $0xb0] sm:$0xf] }
  0x36   :  { %716 = vmatpush.bf16.msrb.mxu2 %v1335_v51  ;;  %667 = vmatpush.bf16.msrb.mxu1 %v1327_v52  ;;  %v1301_v51 = vld [vmem:[%s2102_s0 + $0xc0] sm:$0xf0]  ;;  %v1052_v52 = vor.u32 %v1297_v44, %v1049_v45 }
  0x38   :  { %765 = vmatpush.bf16.msrb.mxu3 %v1343_v53  ;;  %v1056_v53 = vor.u32 %v1300_v47, %v1055_v46 }
  0x3a   :  { %717 = vmatpush.bf16.msrb.mxu2 %v1334_v54  ;;  %668 = vmatpush.bf16.msrb.mxu1 %v1326_v55  ;;  %v1060_v54 = vor.u32 %v1298_v48, %v1057_v49  ;;  %v1064_v55 = vor.u32 %v1301_v51, %v1063_v50 }
  0x3c   :  { %766 = vmatpush.bf16.msrb.mxu3 %v1342_v56  ;;  %v1302_v56 = vld [vmem:[%s2102_s0 + $0xcc] sm:$0xf] }
  0x3e   :  { %718 = vmatpush.bf16.msrb.mxu2 %v1333_v57  ;;  %669 = vmatpush.bf16.msrb.mxu1 %v1325_v58  ;;  %v1069_v57 = vld [vmem:[%s2102_s0 + $0xdc] sm:$0xf0]  ;;  %v1075_v58 = vld [vmem:[%s2102_s0 + $0xd0] sm:$0xf] }
  0x3f   :  { %v1072_v0 = vor.u32 %v1302_v56, %v1069_v57 }
  0x40   :  { %767 = vmatpush.bf16.msrb.mxu3 %v1341_v59  ;;  %v1305_v59 = vld [vmem:[%s2102_s0 + $0xe0] sm:$0xf0] }
  0x41   :  { %670 = vmatmul.bf16.vlgmr.msrb.gmra.mxu1 %v972_v4  ;;  %719 = vmatmul.bf16.vlgmr.msrb.gmra.mxu2 %v976_v5  ;;  %v1076_v1 = vor.u32 %v1305_v59, %v1075_v58  ;;  %v1307_v4 = vld [vmem:[%s2102_s0 + $0xf4] sm:$0xf]  ;;  %v1089_v5 = vld [vmem:[%s2102_s0 + $0x104] sm:$0xf0] }
  0x42   :  { %v1092_v12 = vor.u32 %v1307_v4, %v1089_v5 }
  0x43   :  { %768 = vmatmul.bf16.vlgmr.msrb.gmra.mxu3 %v980_v6  ;;  %1269 = vmatmul.msk.bf16.vlgmr.msrb.gmra.mxu0 %vm19_vm0, %v984_v7  ;;  %v1095_v6 = vld [vmem:[%s2102_s0 + $0xf8] sm:$0xf]  ;;  %v1310_v7 = vld [vmem:[%s2102_s0 + $0x108] sm:$0xf0] }
  0x44   :  { %v1096_v13 = vor.u32 %v1310_v7, %v1095_v6 }
  0x51   :  { %675 = vmatmul.bf16.gmra.mxu1 %v992_v16  ;;  %724 = vmatmul.bf16.gmra.mxu2 %v996_v17  ;;  %v1104_v16 = vor.u32 %v1311_v11, %v1103_v10 }
  0x53   :  { %773 = vmatmul.bf16.gmra.mxu3 %v1000_v18  ;;  %1270 = vmatmul.msk.bf16.gmra.mxu0 %vm19_vm0, %v1004_v19  ;;  %v1379_v19 = vmov 0.0  }
  0x54   :  { %20 = vst.msk [vmem:[%s2104_s3] sm:$0xff] %vm19_vm0, %v1379_v19 }
  0x55   :  { %21 = vst.msk [vmem:[%s2104_s3 + $0x8] sm:$0xff] %vm19_vm0, %v1379_v19 }
  0x56   :  { %22 = vst.msk [vmem:[%s2104_s3 + $0x10] sm:$0xff] %vm19_vm0, %v1379_v19 }
  0x57   :  { %23 = vst.msk [vmem:[%s2104_s3 + $0x18] sm:$0xff] %vm19_vm0, %v1379_v19 }
  0x58   :  { %24 = vst.msk [vmem:[%s2104_s3 + $0x20] sm:$0xff] %vm19_vm0, %v1379_v19 }
  0x59   :  { %25 = vst.msk [vmem:[%s2104_s3 + $0x28] sm:$0xff] %vm19_vm0, %v1379_v19 }
  0x5a   :  { %26 = vst.msk [vmem:[%s2104_s3 + $0x30] sm:$0xff] %vm19_vm0, %v1379_v19 }
  0x5b   :  { %27 = vst.msk [vmem:[%s2104_s3 + $0x38] sm:$0xff] %vm19_vm0, %v1379_v19 }
  0x5c   :  { %28 = vst.msk [vmem:[%s2104_s3 + $0x40] sm:$0xff] %vm19_vm0, %v1379_v19 }
  0x5d   :  { %29 = vst.msk [vmem:[%s2104_s3 + $0x48] sm:$0xff] %vm19_vm0, %v1379_v19 }
  0x5e   :  { %30 = vst.msk [vmem:[%s2104_s3 + $0x50] sm:$0xff] %vm19_vm0, %v1379_v19 }
  0x5f   :  { %31 = vst.msk [vmem:[%s2104_s3 + $0x58] sm:$0xff] %vm19_vm0, %v1379_v19 }
  0x60   :  { %32 = vst.msk [vmem:[%s2104_s3 + $0x60] sm:$0xff] %vm19_vm0, %v1379_v19 }
  0x61   :  { %680 = vmatmul.bf16.gmra.mxu1 %v1012_v28  ;;  %729 = vmatmul.bf16.gmra.mxu2 %v1016_v29  ;;  %v1117_v28 = vld [vmem:[%s2102_s0 + $0x134] sm:$0xf0]  ;;  %v1123_v29 = vld [vmem:[%s2102_s0 + $0x128] sm:$0xf]  ;;  %33 = vst.msk [vmem:[%s2104_s3 + $0x68] sm:$0xff] %vm19_vm0, %v1379_v19 }
  0x62   :  { %v1120_v36 = vor.u32 %v1313_v27, %v1117_v28  ;;  %34 = vst.msk [vmem:[%s2104_s3 + $0x70] sm:$0xff] %vm19_vm0, %v1379_v19 }
  0x63   :  { %778 = vmatmul.bf16.gmra.mxu3 %v1020_v30  ;;  %1271 = vmatmul.msk.bf16.gmra.mxu0 %vm19_vm0, %v1024_v31  ;;  %v1316_v30 = vld [vmem:[%s2102_s0 + $0x138] sm:$0xf0]  ;;  %35 = vst.msk [vmem:[%s2104_s3 + $0x78] sm:$0xff] %vm19_vm0, %v1379_v19 }
  0x64   :  { %v1124_v37 = vor.u32 %v1316_v30, %v1123_v29 }
  0x71   :  { %685 = vmatmul.bf16.gmra.mxu1 %v1032_v40  ;;  %734 = vmatmul.bf16.gmra.mxu2 %v1036_v41 }
  0x73   :  { %783 = vmatmul.bf16.gmra.mxu3 %v1040_v42  ;;  %1272 = vmatmul.msk.bf16.gmra.mxu0 %vm19_vm0, %v1044_v43 }
  0x81   :  { %690 = vmatmul.bf16.gmra.mxu1 %v1052_v52  ;;  %739 = vmatmul.bf16.gmra.mxu2 %v1056_v53 }
  0x83   :  { %788 = vmatmul.bf16.gmra.mxu3 %v1060_v54  ;;  %1273 = vmatmul.msk.bf16.gmra.mxu0 %vm19_vm0, %v1064_v55  ;;  %v36_v54 = vld [vmem:[%s2104_s3] sm:$0xff] }
  0x91   :  { %695 = vmatmul.bf16.gmra.mxu1 %v1072_v0  ;;  %744 = vmatmul.bf16.gmra.mxu2 %v1076_v1  ;;  %v37_v0 = vld [vmem:[%s2104_s3 + $0x8] sm:$0xff]  ;;  %v1857_v1 = vld [vmem:[%s2103_s2] ss:$0 sm:$0xff] }
  0x93   :  { %793 = vmatmul.bf16.gmra.mxu3 %v1080_v2  ;;  %1274 = vmatmul.msk.bf16.gmra.mxu0 %vm19_vm0, %v1084_v3 }
  0x9e   :  { %v1730_v14 = vpop.f32.mrf.mxu1 }
  0xa0   :  { %v622_v17 = vpop.f32.mrf.mxu0 }
  0xa1   :  { %700 = vmatmul.bf16.gmra.mxu1 %v1092_v12  ;;  %749 = vmatmul.bf16.gmra.mxu2 %v1096_v13 }
  0xa3   :  { %798 = vmatmul.bf16.gmra.mxu3 %v1100_v15  ;;  %1275 = vmatmul.msk.bf16.gmra.mxu0 %vm19_vm0, %v1104_v16  ;;  %v38_v15 = vld [vmem:[%s2104_s3 + $0x10] sm:$0xff] }
  0xa4   :  { %v1733_v18 = vpop.f32.mrf.mxu2 }
  0xa6   :  { %v1739_v20 = vpop.f32.mrf.mxu3  ;;  %v1745_v21 = vpop.f32.mrf.mxu1 }
  0xa8   :  { %v624_v22 = vpop.f32.mrf.mxu0 }
  0xac   :  { %v1795_v31 = vpop.f32.mrf.mxu2 }
  0xae   :  { %v1801_v32 = vpop.f32.mrf.mxu3  ;;  %v1807_v35 = vpop.f32.mrf.mxu1 }
  0xb0   :  { %v627_v38 = vpop.f32.mrf.mxu0 }
  0xb1   :  { %705 = vmatmul.bf16.gmra.mxu1 %v1112_v33  ;;  %754 = vmatmul.bf16.gmra.mxu2 %v1116_v34  ;;  %v39_v33 = vld [vmem:[%s2104_s3 + $0x18] sm:$0xff] }
  0xb3   :  { %803 = vmatmul.bf16.gmra.mxu3 %v1120_v36  ;;  %1276 = vmatmul.msk.bf16.gmra.mxu0 %vm19_vm0, %v1124_v37 }
  0xb4   :  { %v1834_v39 = vpop.f32.mrf.mxu2 }
  0xb6   :  { %v1836_v40 = vpop.f32.mrf.mxu3  ;;  %v1838_v41 = vpop.f32.mrf.mxu1 }
  0xb8   :  { %v629_v42 = vpop.f32.mrf.mxu0 }
  0xbc   :  { %v1840_v43 = vpop.f32.mrf.mxu2 }
  0xbe   :  { %v1842_v44 = vpop.f32.mrf.mxu3  ;;  %v671_v45 = vpop.f32.mrf.mxu1 }
  0xbf   :  { %v672_v47 = vadd.f32 %v671_v45, %v622_v17 }
  0xc0   :  { %v818_v46 = vpop.f32.mrf.mxu0 }
  0xc4   :  { %v720_v48 = vpop.f32.mrf.mxu2 }
  0xc5   :  { %v721_v49 = vadd.f32 %v720_v48, %v672_v47 }
  0xc6   :  { %v769_v50 = vpop.f32.mrf.mxu3  ;;  %v673_v51 = vpop.f32.mrf.mxu1 }
  0xc7   :  { %v770_v52 = vadd.f32 %v769_v50, %v721_v49  ;;  %v674_v57 = vadd.f32 %v673_v51, %v624_v22 }
  0xc8   :  { %v820_v53 = vpop.f32.mrf.mxu0 }
  0xc9   :  { %v819_v55 = vadd.f32 %v818_v46, %v770_v52 }
  0xcb   :  { %v858_v56 = vadd.f32 %v819_v55, %v36_v54 }
  0xcc   :  { %v722_v58 = vpop.f32.mrf.mxu2 }
  0xcd   :  { %874 = vst.msk [vmem:[%s2104_s3] sm:$0xff] %vm19_vm0, %v858_v56  ;;  %v723_v59 = vadd.f32 %v722_v58, %v674_v57 }
  0xce   :  { %v771_v60 = vpop.f32.mrf.mxu3  ;;  %v676_v61 = vpop.f32.mrf.mxu1 }
  0xcf   :  { %v772_v62 = vadd.f32 %v771_v60, %v723_v59  ;;  %v677_v4 = vadd.f32 %v676_v61, %v627_v38 }
  0xd0   :  { %v823_v63 = vpop.f32.mrf.mxu0 }
  0xd1   :  { %v821_v2 = vadd.f32 %v820_v53, %v772_v62 }
  0xd3   :  { %v859_v3 = vadd.f32 %v821_v2, %v37_v0 }
  0xd4   :  { %v893_v5 = vld [vmem:[%s2104_s3] sm:$0xff]  ;;  %v725_v6 = vpop.f32.mrf.mxu2 }
  0xd5   :  { %v913_v7 = vadd.f32 %v1857_v1, %v893_v5  ;;  %875 = vst.msk [vmem:[%s2104_s3 + $0x8] sm:$0xff] %vm19_vm0, %v859_v3  ;;  %v726_v8 = vadd.f32 %v725_v6, %v677_v4 }
  0xd6   :  { %v774_v9 = vpop.f32.mrf.mxu3  ;;  %v678_v10 = vpop.f32.mrf.mxu1 }
  0xd7   :  { %v929_v11 = vmax.f32 %v913_v7, 0.0  ;;  %v775_v12 = vadd.f32 %v774_v9, %v726_v8  ;;  %v679_v19 = vadd.f32 %v678_v10, %v629_v42 }
  0xd8   :  { %v825_v13 = vpop.f32.mrf.mxu0 }
  0xd9   :  { %945 = vst.msk [vmem:[%s2104_s3] sm:$0xff] %vm19_vm0, %v929_v11  ;;  %v824_v16 = vadd.f32 %v823_v63, %v775_v12 }
  0xdb   :  { %v860_v17 = vadd.f32 %v824_v16, %v38_v15 }
  0xdc   :  { %v894_v22 = vld [vmem:[%s2104_s3 + $0x8] sm:$0xff]  ;;  %v727_v23 = vpop.f32.mrf.mxu2 }
  0xdd   :  { %v914_v24 = vadd.f32 %v1857_v1, %v894_v22  ;;  %876 = vst.msk [vmem:[%s2104_s3 + $0x10] sm:$0xff] %vm19_vm0, %v860_v17  ;;  %v728_v25 = vadd.f32 %v727_v23, %v679_v19 }
  0xde   :  { %v776_v26 = vpop.f32.mrf.mxu3  ;;  %v681_v27 = vpop.f32.mrf.mxu1 }
  0xdf   :  { %v930_v28 = vmax.f32 %v914_v24, 0.0  ;;  %v777_v29 = vadd.f32 %v776_v26, %v728_v25  ;;  %v682_v37 = vadd.f32 %v681_v27, %v1730_v14  ;;  %v40_v14 = vld [vmem:[%s2104_s3 + $0x20] sm:$0xff] }
  0xe0   :  { %v828_v30 = vpop.f32.mrf.mxu0 }
  0xe1   :  { %946 = vst.msk [vmem:[%s2104_s3 + $0x8] sm:$0xff] %vm19_vm0, %v930_v28  ;;  %v826_v34 = vadd.f32 %v825_v13, %v777_v29 }
  0xe3   :  { %v861_v36 = vadd.f32 %v826_v34, %v39_v33 }
  0xe4   :  { %v895_v38 = vld [vmem:[%s2104_s3 + $0x10] sm:$0xff]  ;;  %v730_v42 = vpop.f32.mrf.mxu2 }
  0xe5   :  { %v915_v45 = vadd.f32 %v1857_v1, %v895_v38  ;;  %877 = vst.msk [vmem:[%s2104_s3 + $0x18] sm:$0xff] %vm19_vm0, %v861_v36  ;;  %v731_v46 = vadd.f32 %v730_v42, %v682_v37 }
  0xe6   :  { %v779_v47 = vpop.f32.mrf.mxu3  ;;  %v683_v48 = vpop.f32.mrf.mxu1 }
  0xe7   :  { %v931_v49 = vmax.f32 %v915_v45, 0.0  ;;  %v780_v50 = vadd.f32 %v779_v47, %v731_v46  ;;  %v684_v54 = vadd.f32 %v683_v48, %v1745_v21  ;;  %v41_v21 = vld [vmem:[%s2104_s3 + $0x28] sm:$0xff] }
  0xe8   :  { %v830_v51 = vpop.f32.mrf.mxu0 }
  0xe9   :  { %947 = vst.msk [vmem:[%s2104_s3 + $0x10] sm:$0xff] %vm19_vm0, %v931_v49  ;;  %v829_v52 = vadd.f32 %v828_v30, %v780_v50 }
  0xeb   :  { %v862_v53 = vadd.f32 %v829_v52, %v40_v14 }
  0xec   :  { %v896_v55 = vld [vmem:[%s2104_s3 + $0x18] sm:$0xff]  ;;  %v732_v56 = vpop.f32.mrf.mxu2 }
  0xed   :  { %v916_v57 = vadd.f32 %v1857_v1, %v896_v55  ;;  %878 = vst.msk [vmem:[%s2104_s3 + $0x20] sm:$0xff] %vm19_vm0, %v862_v53  ;;  %v733_v58 = vadd.f32 %v732_v56, %v684_v54 }
  0xee   :  { %v781_v59 = vpop.f32.mrf.mxu3  ;;  %v686_v60 = vpop.f32.mrf.mxu1 }
  0xef   :  { %v932_v61 = vmax.f32 %v916_v57, 0.0  ;;  %v782_v62 = vadd.f32 %v781_v59, %v733_v58  ;;  %v687_v3 = vadd.f32 %v686_v60, %v1807_v35  ;;  %v42_v35 = vld [vmem:[%s2104_s3 + $0x30] sm:$0xff] }
  0xf0   :  { %v833_v63 = vpop.f32.mrf.mxu0 }
  0xf1   :  { %948 = vst.msk [vmem:[%s2104_s3 + $0x18] sm:$0xff] %vm19_vm0, %v932_v61  ;;  %v831_v0 = vadd.f32 %v830_v51, %v782_v62 }
  0xf3   :  { %v863_v2 = vadd.f32 %v831_v0, %v41_v21 }
  0xf4   :  { %v897_v4 = vld [vmem:[%s2104_s3 + $0x20] sm:$0xff]  ;;  %v735_v5 = vpop.f32.mrf.mxu2 }
  0xf5   :  { %v917_v6 = vadd.f32 %v1857_v1, %v897_v4  ;;  %879 = vst.msk [vmem:[%s2104_s3 + $0x28] sm:$0xff] %vm19_vm0, %v863_v2  ;;  %v736_v7 = vadd.f32 %v735_v5, %v687_v3 }
  0xf6   :  { %v784_v8 = vpop.f32.mrf.mxu3  ;;  %v688_v9 = vpop.f32.mrf.mxu1 }
  0xf7   :  { %v933_v10 = vmax.f32 %v917_v6, 0.0  ;;  %v785_v11 = vadd.f32 %v784_v8, %v736_v7  ;;  %v689_v16 = vadd.f32 %v688_v9, %v1838_v41  ;;  %v43_v41 = vld [vmem:[%s2104_s3 + $0x38] sm:$0xff] }
  0xf8   :  { %v835_v12 = vpop.f32.mrf.mxu0 }
  0xf9   :  { %949 = vst.msk [vmem:[%s2104_s3 + $0x20] sm:$0xff] %vm19_vm0, %v933_v10  ;;  %v834_v13 = vadd.f32 %v833_v63, %v785_v11 }
  0xfb   :  { %v864_v15 = vadd.f32 %v834_v13, %v42_v35 }
  0xfc   :  { %v898_v17 = vld [vmem:[%s2104_s3 + $0x28] sm:$0xff]  ;;  %v737_v19 = vpop.f32.mrf.mxu2 }
  0xfd   :  { %v918_v22 = vadd.f32 %v1857_v1, %v898_v17  ;;  %880 = vst.msk [vmem:[%s2104_s3 + $0x30] sm:$0xff] %vm19_vm0, %v864_v15  ;;  %v738_v23 = vadd.f32 %v737_v19, %v689_v16 }
  0xfe   :  { %v786_v24 = vpop.f32.mrf.mxu3  ;;  %v691_v25 = vpop.f32.mrf.mxu1 }
  0xff   :  { %v934_v26 = vmax.f32 %v918_v22, 0.0  ;;  %v787_v27 = vadd.f32 %v786_v24, %v738_v23  ;;  %v692_v33 = vadd.f32 %v691_v25, %v1733_v18  ;;  %v44_v18 = vld [vmem:[%s2104_s3 + $0x40] sm:$0xff] }
 0x100   :  { %v838_v28 = vpop.f32.mrf.mxu0 }
 0x101   :  { %950 = vst.msk [vmem:[%s2104_s3 + $0x28] sm:$0xff] %vm19_vm0, %v934_v26  ;;  %v836_v29 = vadd.f32 %v835_v12, %v787_v27 }
 0x103   :  { %v865_v30 = vadd.f32 %v836_v29, %v43_v41 }
 0x104   :  { %v899_v34 = vld [vmem:[%s2104_s3 + $0x30] sm:$0xff]  ;;  %v740_v36 = vpop.f32.mrf.mxu2 }
 0x105   :  { %v919_v37 = vadd.f32 %v1857_v1, %v899_v34  ;;  %881 = vst.msk [vmem:[%s2104_s3 + $0x38] sm:$0xff] %vm19_vm0, %v865_v30  ;;  %v741_v38 = vadd.f32 %v740_v36, %v692_v33 }
 0x106   :  { %v789_v42 = vpop.f32.mrf.mxu3  ;;  %v693_v45 = vpop.f32.mrf.mxu1 }
 0x107   :  { %v935_v46 = vmax.f32 %v919_v37, 0.0  ;;  %v790_v47 = vadd.f32 %v789_v42, %v741_v38  ;;  %v694_v51 = vadd.f32 %v693_v45, %v1795_v31  ;;  %v45_v31 = vld [vmem:[%s2104_s3 + $0x48] sm:$0xff] }
 0x108   :  { %v840_v48 = vpop.f32.mrf.mxu0 }
 0x109   :  { %951 = vst.msk [vmem:[%s2104_s3 + $0x30] sm:$0xff] %vm19_vm0, %v935_v46  ;;  %v839_v49 = vadd.f32 %v838_v28, %v790_v47 }
 0x10b   :  { %v866_v50 = vadd.f32 %v839_v49, %v44_v18 }
 0x10c   :  { %v900_v14 = vld [vmem:[%s2104_s3 + $0x38] sm:$0xff]  ;;  %v742_v52 = vpop.f32.mrf.mxu2 }
 0x10d   :  { %v920_v53 = vadd.f32 %v1857_v1, %v900_v14  ;;  %882 = vst.msk [vmem:[%s2104_s3 + $0x40] sm:$0xff] %vm19_vm0, %v866_v50  ;;  %v743_v54 = vadd.f32 %v742_v52, %v694_v51 }
 0x10e   :  { %v791_v55 = vpop.f32.mrf.mxu3  ;;  %v696_v56 = vpop.f32.mrf.mxu1 }
 0x10f   :  { %v936_v57 = vmax.f32 %v920_v53, 0.0  ;;  %v792_v58 = vadd.f32 %v791_v55, %v743_v54  ;;  %v697_v62 = vadd.f32 %v696_v56, %v1834_v39  ;;  %v46_v39 = vld [vmem:[%s2104_s3 + $0x50] sm:$0xff] }
 0x110   :  { %v843_v59 = vpop.f32.mrf.mxu0 }
 0x111   :  { %952 = vst.msk [vmem:[%s2104_s3 + $0x38] sm:$0xff] %vm19_vm0, %v936_v57  ;;  %v841_v60 = vadd.f32 %v840_v48, %v792_v58 }
 0x113   :  { %v867_v61 = vadd.f32 %v841_v60, %v45_v31 }
 0x114   :  { %v901_v63 = vld [vmem:[%s2104_s3 + $0x40] sm:$0xff]  ;;  %v745_v21 = vpop.f32.mrf.mxu2 }
 0x115   :  { %v921_v0 = vadd.f32 %v1857_v1, %v901_v63  ;;  %883 = vst.msk [vmem:[%s2104_s3 + $0x48] sm:$0xff] %vm19_vm0, %v867_v61  ;;  %v746_v2 = vadd.f32 %v745_v21, %v697_v62 }
 0x116   :  { %v794_v3 = vpop.f32.mrf.mxu3  ;;  %v698_v4 = vpop.f32.mrf.mxu1 }
 0x117   :  { %v937_v5 = vmax.f32 %v921_v0, 0.0  ;;  %v795_v6 = vadd.f32 %v794_v3, %v746_v2  ;;  %v699_v10 = vadd.f32 %v698_v4, %v1840_v43  ;;  %v47_v43 = vld [vmem:[%s2104_s3 + $0x58] sm:$0xff] }
 0x118   :  { %v845_v7 = vpop.f32.mrf.mxu0 }
 0x119   :  { %953 = vst.msk [vmem:[%s2104_s3 + $0x40] sm:$0xff] %vm19_vm0, %v937_v5  ;;  %v844_v8 = vadd.f32 %v843_v59, %v795_v6 }
 0x11b   :  { %v868_v9 = vadd.f32 %v844_v8, %v46_v39 }
 0x11c   :  { %v902_v11 = vld [vmem:[%s2104_s3 + $0x48] sm:$0xff]  ;;  %v747_v12 = vpop.f32.mrf.mxu2 }
 0x11d   :  { %v922_v35 = vadd.f32 %v1857_v1, %v902_v11  ;;  %884 = vst.msk [vmem:[%s2104_s3 + $0x50] sm:$0xff] %vm19_vm0, %v868_v9  ;;  %v748_v13 = vadd.f32 %v747_v12, %v699_v10 }
 0x11e   :  { %v796_v15 = vpop.f32.mrf.mxu3  ;;  %v701_v16 = vpop.f32.mrf.mxu1 }
 0x11f   :  { %v938_v17 = vmax.f32 %v922_v35, 0.0  ;;  %v797_v19 = vadd.f32 %v796_v15, %v748_v13  ;;  %v702_v25 = vadd.f32 %v701_v16, %v1739_v20  ;;  %v48_v20 = vld [vmem:[%s2104_s3 + $0x60] sm:$0xff] }
 0x120   :  { %v848_v23 = vpop.f32.mrf.mxu0 }
 0x121   :  { %954 = vst.msk [vmem:[%s2104_s3 + $0x48] sm:$0xff] %vm19_vm0, %v938_v17  ;;  %v846_v22 = vadd.f32 %v845_v7, %v797_v19 }
 0x123   :  { %v869_v24 = vadd.f32 %v846_v22, %v47_v43 }
 0x124   :  { %v903_v26 = vld [vmem:[%s2104_s3 + $0x50] sm:$0xff]  ;;  %v750_v27 = vpop.f32.mrf.mxu2 }
 0x125   :  { %v923_v28 = vadd.f32 %v1857_v1, %v903_v26  ;;  %885 = vst.msk [vmem:[%s2104_s3 + $0x58] sm:$0xff] %vm19_vm0, %v869_v24  ;;  %v751_v41 = vadd.f32 %v750_v27, %v702_v25 }
 0x126   :  { %v799_v29 = vpop.f32.mrf.mxu3  ;;  %v703_v30 = vpop.f32.mrf.mxu1 }
 0x127   :  { %v939_v33 = vmax.f32 %v923_v28, 0.0  ;;  %v800_v34 = vadd.f32 %v799_v29, %v751_v41  ;;  %v704_v38 = vadd.f32 %v703_v30, %v1801_v32  ;;  %v49_v32 = vld [vmem:[%s2104_s3 + $0x68] sm:$0xff] }
 0x128   :  { %v850_v45 = vpop.f32.mrf.mxu0 }
 0x129   :  { %955 = vst.msk [vmem:[%s2104_s3 + $0x50] sm:$0xff] %vm19_vm0, %v939_v33  ;;  %v849_v36 = vadd.f32 %v848_v23, %v800_v34 }
 0x12b   :  { %v870_v37 = vadd.f32 %v849_v36, %v48_v20 }
 0x12c   :  { %v904_v42 = vld [vmem:[%s2104_s3 + $0x58] sm:$0xff]  ;;  %v752_v46 = vpop.f32.mrf.mxu2 }
 0x12d   :  { %v924_v47 = vadd.f32 %v1857_v1, %v904_v42  ;;  %886 = vst.msk [vmem:[%s2104_s3 + $0x60] sm:$0xff] %vm19_vm0, %v870_v37  ;;  %v753_v48 = vadd.f32 %v752_v46, %v704_v38 }
 0x12e   :  { %v801_v18 = vpop.f32.mrf.mxu3  ;;  %v706_v49 = vpop.f32.mrf.mxu1 }
 0x12f   :  { %v940_v50 = vmax.f32 %v924_v47, 0.0  ;;  %v802_v51 = vadd.f32 %v801_v18, %v753_v48  ;;  %v707_v53 = vadd.f32 %v706_v49, %v1836_v40  ;;  %v50_v40 = vld [vmem:[%s2104_s3 + $0x70] sm:$0xff] }
 0x130   :  { %v853_v59 = vpop.f32.mrf.mxu0 }
 0x131   :  { %956 = vst.msk [vmem:[%s2104_s3 + $0x58] sm:$0xff] %vm19_vm0, %v940_v50  ;;  %v851_v14 = vadd.f32 %v850_v45, %v802_v51 }
 0x133   :  { %v871_v52 = vadd.f32 %v851_v14, %v49_v32 }
 0x134   :  { %v905_v54 = vld [vmem:[%s2104_s3 + $0x60] sm:$0xff]  ;;  %v755_v55 = vpop.f32.mrf.mxu2 }
 0x135   :  { %v925_v56 = vadd.f32 %v1857_v1, %v905_v54  ;;  %887 = vst.msk [vmem:[%s2104_s3 + $0x68] sm:$0xff] %vm19_vm0, %v871_v52  ;;  %v756_v57 = vadd.f32 %v755_v55, %v707_v53 }
 0x136   :  { %v804_v58 = vpop.f32.mrf.mxu3  ;;  %v708_v61 = vpop.f32.mrf.mxu1 }
 0x137   :  { %v941_v31 = vmax.f32 %v925_v56, 0.0  ;;  %v805_v60 = vadd.f32 %v804_v58, %v756_v57  ;;  %v709_v21 = vadd.f32 %v708_v61, %v1842_v44  ;;  %v51_v44 = vld [vmem:[%s2104_s3 + $0x78] sm:$0xff] }
 0x138   :  { %v855_v7 = vpop.f32.mrf.mxu0 }
 0x139   :  { %957 = vst.msk [vmem:[%s2104_s3 + $0x60] sm:$0xff] %vm19_vm0, %v941_v31  ;;  %v854_v62 = vadd.f32 %v853_v59, %v805_v60 }
 0x13b   :  { %v872_v63 = vadd.f32 %v854_v62, %v50_v40 }
 0x13c   :  { %v906_v0 = vld [vmem:[%s2104_s3 + $0x68] sm:$0xff]  ;;  %v757_v2 = vpop.f32.mrf.mxu2 }
 0x13d   :  { %v926_v3 = vadd.f32 %v1857_v1, %v906_v0  ;;  %888 = vst.msk [vmem:[%s2104_s3 + $0x70] sm:$0xff] %vm19_vm0, %v872_v63  ;;  %v758_v4 = vadd.f32 %v757_v2, %v709_v21 }
 0x13e   :  { %v806_v5 = vpop.f32.mrf.mxu3 }
 0x13f   :  { %v942_v6 = vmax.f32 %v926_v3, 0.0  ;;  %v807_v39 = vadd.f32 %v806_v5, %v758_v4 }
 0x141   :  { %958 = vst.msk [vmem:[%s2104_s3 + $0x68] sm:$0xff] %vm19_vm0, %v942_v6  ;;  %v856_v8 = vadd.f32 %v855_v7, %v807_v39 }
 0x143   :  { %v873_v9 = vadd.f32 %v856_v8, %v51_v44 }
 0x144   :  { %v907_v10 = vld [vmem:[%s2104_s3 + $0x70] sm:$0xff] }
 0x145   :  { %v927_v11 = vadd.f32 %v1857_v1, %v907_v10  ;;  %889 = vst.msk [vmem:[%s2104_s3 + $0x78] sm:$0xff] %vm19_vm0, %v873_v9 }
 0x147   :  { %v943_v12 = vmax.f32 %v927_v11, 0.0 }
 0x149   :  { %959 = vst.msk [vmem:[%s2104_s3 + $0x70] sm:$0xff] %vm19_vm0, %v943_v12 }
 0x14c   :  { %v908_v35 = vld [vmem:[%s2104_s3 + $0x78] sm:$0xff] }
 0x14d   :  { %v928_v13 = vadd.f32 %v1857_v1, %v908_v35 }
 0x14f   :  { %v944_v15 = vmax.f32 %v928_v13, 0.0 }
 0x151   :  { %960 = vst.msk [vmem:[%s2104_s3 + $0x78] sm:$0xff] %vm19_vm0, %v944_v15 }

// kernel: resnet18_16s_forward.24
= control target key start
LH: loop header
LB: loop body
LE: loop exit
PB: predicated region body
PF: predicated region fallthrough
CT: control target
= control target key end

     0   :  { %vm22_vm0 = vcmask 523264   ;;  %s2189_s1 = inlined_call_operand.vmem [shape: bf16[576,64], index: 1, kind: input, shape index: {}]   ;;  %s2190_s0 = inlined_call_operand.vmem [shape: bf16[128,576], index: 0, kind: input, shape index: {}]   ;;  %s2191_s2 = inlined_call_operand.vmem [shape: f32[1,64], index: 2, kind: input, shape index: {}]   ;;  %s2192_s4 = inlined_call_operand.vmem [shape: f32[128,64], index: 4, kind: output, shape index: {}]   ;;  %s2193_s3 = inlined_call_operand.vmem [shape: f32[128,64], index: 3, kind: input, shape index: {}]  }
   0x1   :  { %v1359_v0 = vld [vmem:[%s2189_s1 + $0x38] sm:$0xff]  ;;  %v1358_v1 = vld [vmem:[%s2189_s1 + $0x30] sm:$0xff]  ;;  %v1357_v2 = vld [vmem:[%s2189_s1 + $0x28] sm:$0xff] }
   0x2   :  { %1388 = vmatpush.bf16.msra.mxu1 %v1359_v0  ;;  %1389 = vmatpush.bf16.msra.mxu2 %v1359_v0  ;;  %v1356_v3 = vld [vmem:[%s2189_s1 + $0x20] sm:$0xff]  ;;  %v1355_v4 = vld [vmem:[%s2189_s1 + $0x18] sm:$0xff]  ;;  %v1354_v5 = vld [vmem:[%s2189_s1 + $0x10] sm:$0xff] }
   0x3   :  { %1390 = vmatpush.bf16.msra.mxu3 %v1359_v0  ;;  %616 = vmatpush.bf16.msra.mxu0 %v1359_v0  ;;  %v1353_v6 = vld [vmem:[%s2189_s1 + $0x8] sm:$0xff]  ;;  %v1352_v7 = vld [vmem:[%s2189_s1] sm:$0xff]  ;;  %v1042_v8 = vld [vmem:[%s2190_s0 + $0x50] sm:$0xf] }
   0x4   :  { %v1324_v9 = vld [vmem:[%s2190_s0 + $0x60] sm:$0xf0]  ;;  %v1082_v10 = vld [vmem:[%s2190_s0 + $0xa0] sm:$0xf]  ;;  %v1334_v11 = vld [vmem:[%s2190_s0 + $0xb0] sm:$0xf0] }
   0x5   :  { %v1122_v12 = vld [vmem:[%s2190_s0 + $0xf0] sm:$0xf]  ;;  %v1344_v13 = vld [vmem:[%s2190_s0 + $0x100] sm:$0xf0]  ;;  %v1002_v14 = vld [vmem:[%s2190_s0] sm:$0xf]  ;;  %v1043_v18 = vor.u32 %v1324_v9, %v1042_v8  ;;  %v1083_v19 = vor.u32 %v1334_v11, %v1082_v10 }
   0x6   :  { %1391 = vmatpush.bf16.msra.mxu1 %v1358_v1  ;;  %1392 = vmatpush.bf16.msra.mxu2 %v1358_v1  ;;  %v1314_v15 = vld [vmem:[%s2190_s0 + $0x10] sm:$0xf0]  ;;  %v1375_v16 = vld [vmem:[%s2189_s1 + $0xb8] sm:$0xff]  ;;  %v1123_v20 = vor.u32 %v1344_v13, %v1122_v12  ;;  %v1373_v28 = vld [vmem:[%s2189_s1 + $0xa8] sm:$0xff] }
   0x7   :  { %1393 = vmatpush.bf16.msra.mxu3 %v1358_v1  ;;  %617 = vmatpush.bf16.msra.mxu0 %v1358_v1  ;;  %v1367_v17 = vld [vmem:[%s2189_s1 + $0x78] sm:$0xff]  ;;  %v1003_v21 = vor.u32 %v1314_v15, %v1002_v14  ;;  %v1374_v24 = vld [vmem:[%s2189_s1 + $0xb0] sm:$0xff]  ;;  %v1365_v29 = vld [vmem:[%s2189_s1 + $0x68] sm:$0xff] }
   0x8   :  { %v1383_v22 = vld [vmem:[%s2189_s1 + $0xf8] sm:$0xff]  ;;  %v1366_v25 = vld [vmem:[%s2189_s1 + $0x70] sm:$0xff]  ;;  %v1381_v30 = vld [vmem:[%s2189_s1 + $0xe8] sm:$0xff] }
   0x9   :  { %v1387_v23 = vld [vmem:[%s2189_s1 + $0x118] sm:$0xff]  ;;  %v1382_v26 = vld [vmem:[%s2189_s1 + $0xf0] sm:$0xff]  ;;  %v1385_v31 = vld [vmem:[%s2189_s1 + $0x108] sm:$0xff] }
   0xa   :  { %1394 = vmatpush.bf16.msra.mxu1 %v1357_v2  ;;  %1395 = vmatpush.bf16.msra.mxu2 %v1357_v2  ;;  %v1386_v27 = vld [vmem:[%s2189_s1 + $0x110] sm:$0xff]  ;;  %v1372_v32 = vld [vmem:[%s2189_s1 + $0xa0] sm:$0xff]  ;;  %v1062_v35 = vld [vmem:[%s2190_s0 + $0x78] sm:$0xf] }
   0xb   :  { %1396 = vmatpush.bf16.msra.mxu3 %v1357_v2  ;;  %618 = vmatpush.bf16.msra.mxu0 %v1357_v2  ;;  %v1364_v33 = vld [vmem:[%s2189_s1 + $0x60] sm:$0xff]  ;;  %v1329_v36 = vld [vmem:[%s2190_s0 + $0x88] sm:$0xf0]  ;;  %v1102_v37 = vld [vmem:[%s2190_s0 + $0xc8] sm:$0xf] }
   0xc   :  { %v1380_v34 = vld [vmem:[%s2189_s1 + $0xe0] sm:$0xff]  ;;  %v1339_v38 = vld [vmem:[%s2190_s0 + $0xd8] sm:$0xf0]  ;;  %v1142_v39 = vld [vmem:[%s2190_s0 + $0x118] sm:$0xf]  ;;  %v1063_v46 = vor.u32 %v1329_v36, %v1062_v35 }
   0xd   :  { %v1349_v40 = vld [vmem:[%s2190_s0 + $0x128] sm:$0xf0]  ;;  %v1022_v41 = vld [vmem:[%s2190_s0 + $0x28] sm:$0xf]  ;;  %v1319_v42 = vld [vmem:[%s2190_s0 + $0x38] sm:$0xf0]  ;;  %v1103_v47 = vor.u32 %v1339_v38, %v1102_v37 }
   0xe   :  { %1397 = vmatpush.bf16.msra.mxu1 %v1356_v3  ;;  %1398 = vmatpush.bf16.msra.mxu2 %v1356_v3  ;;  %v1384_v43 = vld [vmem:[%s2189_s1 + $0x100] sm:$0xff]  ;;  %v1371_v44 = vld [vmem:[%s2189_s1 + $0x98] sm:$0xff]  ;;  %v1143_v48 = vor.u32 %v1349_v40, %v1142_v39  ;;  %v1023_v49 = vor.u32 %v1319_v42, %v1022_v41  ;;  %v1370_v51 = vld [vmem:[%s2189_s1 + $0x90] sm:$0xff] }
   0xf   :  { %1399 = vmatpush.bf16.msra.mxu3 %v1356_v3  ;;  %619 = vmatpush.bf16.msra.mxu0 %v1356_v3  ;;  %v1363_v45 = vld [vmem:[%s2189_s1 + $0x58] sm:$0xff]  ;;  %v1362_v52 = vld [vmem:[%s2189_s1 + $0x50] sm:$0xff]  ;;  %v1369_v54 = vld [vmem:[%s2189_s1 + $0x88] sm:$0xff] }
  0x10   :  { %v1379_v50 = vld [vmem:[%s2189_s1 + $0xd8] sm:$0xff]  ;;  %v1378_v53 = vld [vmem:[%s2189_s1 + $0xd0] sm:$0xff]  ;;  %v1361_v55 = vld [vmem:[%s2189_s1 + $0x48] sm:$0xff] }
  0x11   :  { %v1377_v56 = vld [vmem:[%s2189_s1 + $0xc8] sm:$0xff]  ;;  %v1368_v57 = vld [vmem:[%s2189_s1 + $0x80] sm:$0xff]  ;;  %v1004_v61 = vld [vmem:[%s2190_s0 + $0x14] sm:$0xf0] }
  0x12   :  { %1400 = vmatpush.bf16.msra.mxu1 %v1355_v4  ;;  %1401 = vmatpush.bf16.msra.mxu2 %v1355_v4  ;;  %v1360_v58 = vld [vmem:[%s2189_s1 + $0x40] sm:$0xff]  ;;  %v1010_v62 = vld [vmem:[%s2190_s0 + $0x8] sm:$0xf]  ;;  %v1315_v63 = vld [vmem:[%s2190_s0 + $0x18] sm:$0xf0] }
  0x13   :  { %1402 = vmatpush.bf16.msra.mxu3 %v1355_v4  ;;  %620 = vmatpush.bf16.msra.mxu0 %v1355_v4  ;;  %v1376_v59 = vld [vmem:[%s2189_s1 + $0xc0] sm:$0xff]  ;;  %v1313_v0 = vld [vmem:[%s2190_s0 + $0xc] sm:$0xf]  ;;  %v1018_v2 = vld [vmem:[%s2190_s0 + $0x10] sm:$0xf] }
  0x14   :  { %v1312_v60 = vld [vmem:[%s2190_s0 + $0x4] sm:$0xf]  ;;  %v1012_v1 = vld [vmem:[%s2190_s0 + $0x1c] sm:$0xf0]  ;;  %v1317_v8 = vld [vmem:[%s2190_s0 + $0x2c] sm:$0xf] }
  0x15   :  { %v1316_v3 = vld [vmem:[%s2190_s0 + $0x20] sm:$0xf0]  ;;  %v1007_v4 = vor.u32 %v1312_v60, %v1004_v61  ;;  %v1024_v9 = vld [vmem:[%s2190_s0 + $0x3c] sm:$0xf0]  ;;  %v1030_v10 = vld [vmem:[%s2190_s0 + $0x30] sm:$0xf] }
  0x16   :  { %1403 = vmatpush.bf16.msra.mxu1 %v1354_v5  ;;  %1404 = vmatpush.bf16.msra.mxu2 %v1354_v5  ;;  %v1320_v11 = vld [vmem:[%s2190_s0 + $0x40] sm:$0xf0]  ;;  %v1318_v12 = vld [vmem:[%s2190_s0 + $0x34] sm:$0xf]  ;;  %v1032_v13 = vld [vmem:[%s2190_s0 + $0x44] sm:$0xf0] }
  0x17   :  { %1405 = vmatpush.bf16.msra.mxu3 %v1354_v5  ;;  %621 = vmatpush.bf16.msra.mxu0 %v1354_v5  ;;  %v1011_v5 = vor.u32 %v1315_v63, %v1010_v62  ;;  %v1038_v14 = vld [vmem:[%s2190_s0 + $0x38] sm:$0xf]  ;;  %v1321_v15 = vld [vmem:[%s2190_s0 + $0x48] sm:$0xf0]  ;;  %v1330_v35 = vld [vmem:[%s2190_s0 + $0x90] sm:$0xf0] }
  0x18   :  { %v1328_v36 = vld [vmem:[%s2190_s0 + $0x84] sm:$0xf]  ;;  %v1072_v37 = vld [vmem:[%s2190_s0 + $0x94] sm:$0xf0]  ;;  %v1078_v38 = vld [vmem:[%s2190_s0 + $0x88] sm:$0xf] }
  0x19   :  { %v1331_v39 = vld [vmem:[%s2190_s0 + $0x98] sm:$0xf0]  ;;  %v1075_v42 = vor.u32 %v1328_v36, %v1072_v37  ;;  %v1338_v60 = vld [vmem:[%s2190_s0 + $0xd4] sm:$0xf]  ;;  %v1112_v61 = vld [vmem:[%s2190_s0 + $0xe4] sm:$0xf0] }
  0x1a   :  { %1406 = vmatpush.bf16.msra.mxu1 %v1353_v6  ;;  %1407 = vmatpush.bf16.msra.mxu2 %v1353_v6  ;;  %v1118_v62 = vld [vmem:[%s2190_s0 + $0xd8] sm:$0xf]  ;;  %v1341_v63 = vld [vmem:[%s2190_s0 + $0xe8] sm:$0xf0] }
  0x1b   :  { %1408 = vmatpush.bf16.msra.mxu3 %v1353_v6  ;;  %622 = vmatpush.bf16.msra.mxu0 %v1353_v6  ;;  %v1015_v6 = vor.u32 %v1313_v0, %v1012_v1 }
  0x1e   :  { %1409 = vmatpush.bf16.msra.mxu1 %v1352_v7  ;;  %1410 = vmatpush.bf16.msra.mxu2 %v1352_v7 }
  0x1f   :  { %1411 = vmatpush.bf16.msra.mxu3 %v1352_v7  ;;  %623 = vmatpush.bf16.msra.mxu0 %v1352_v7  ;;  %v1019_v7 = vor.u32 %v1316_v3, %v1018_v2  ;;  %v1115_v2 = vor.u32 %v1338_v60, %v1112_v61  ;;  %v1119_v3 = vor.u32 %v1341_v63, %v1118_v62 }
  0x21   :  { %634 = vmatmul.bf16.vlgmr.msra.gmra.mxu1 %v1043_v18  ;;  %644 = vmatmul.bf16.vlgmr.msra.gmra.mxu2 %v1083_v19  ;;  %v1035_v18 = vor.u32 %v1318_v12, %v1032_v13  ;;  %v1039_v19 = vor.u32 %v1321_v15, %v1038_v14 }
  0x22   :  { %714 = vmatpush.bf16.msrb.mxu2 %v1375_v16  ;;  %665 = vmatpush.bf16.msrb.mxu1 %v1367_v17  ;;  %v1027_v16 = vor.u32 %v1317_v8, %v1024_v9  ;;  %v1031_v17 = vor.u32 %v1320_v11, %v1030_v10  ;;  %v1343_v8 = vld [vmem:[%s2190_s0 + $0xfc] sm:$0xf]  ;;  %v1132_v9 = vld [vmem:[%s2190_s0 + $0x10c] sm:$0xf0]  ;;  %v1138_v10 = vld [vmem:[%s2190_s0 + $0x100] sm:$0xf] }
  0x23   :  { %654 = vmatmul.bf16.vlgmr.msra.gmra.mxu3 %v1123_v20  ;;  %624 = vmatmul.bf16.vlgmr.msra.gmra.mxu0 %v1003_v21  ;;  %v1322_v20 = vld [vmem:[%s2190_s0 + $0x54] sm:$0xf]  ;;  %v1044_v21 = vld [vmem:[%s2190_s0 + $0x64] sm:$0xf0]  ;;  %v1135_v15 = vor.u32 %v1343_v8, %v1132_v9 }
  0x24   :  { %763 = vmatpush.bf16.msrb.mxu3 %v1383_v22  ;;  %816 = vmatpush.bf16.msrb.mxu0 %v1387_v23  ;;  %v1050_v22 = vld [vmem:[%s2190_s0 + $0x58] sm:$0xf]  ;;  %v1325_v23 = vld [vmem:[%s2190_s0 + $0x68] sm:$0xf0]  ;;  %v1346_v11 = vld [vmem:[%s2190_s0 + $0x110] sm:$0xf0] }
  0x26   :  { %715 = vmatpush.bf16.msrb.mxu2 %v1374_v24  ;;  %666 = vmatpush.bf16.msrb.mxu1 %v1366_v25  ;;  %v1323_v24 = vld [vmem:[%s2190_s0 + $0x5c] sm:$0xf]  ;;  %v1052_v25 = vld [vmem:[%s2190_s0 + $0x6c] sm:$0xf0] }
  0x28   :  { %764 = vmatpush.bf16.msrb.mxu3 %v1382_v26  ;;  %817 = vmatpush.bf16.msrb.mxu0 %v1386_v27  ;;  %v1058_v26 = vld [vmem:[%s2190_s0 + $0x60] sm:$0xf]  ;;  %v1326_v27 = vld [vmem:[%s2190_s0 + $0x70] sm:$0xf0] }
  0x2a   :  { %716 = vmatpush.bf16.msrb.mxu2 %v1373_v28  ;;  %667 = vmatpush.bf16.msrb.mxu1 %v1365_v29  ;;  %v1047_v28 = vor.u32 %v1322_v20, %v1044_v21  ;;  %v1051_v29 = vor.u32 %v1325_v23, %v1050_v22  ;;  %v1347_v23 = vld [vmem:[%s2190_s0 + $0x11c] sm:$0xf] }
  0x2c   :  { %765 = vmatpush.bf16.msrb.mxu3 %v1381_v30  ;;  %818 = vmatpush.bf16.msrb.mxu0 %v1385_v31  ;;  %v1055_v30 = vor.u32 %v1323_v24, %v1052_v25  ;;  %v1059_v31 = vor.u32 %v1326_v27, %v1058_v26  ;;  %v1144_v24 = vld [vmem:[%s2190_s0 + $0x12c] sm:$0xf0]  ;;  %v1150_v25 = vld [vmem:[%s2190_s0 + $0x120] sm:$0xf]  ;;  %v1350_v26 = vld [vmem:[%s2190_s0 + $0x130] sm:$0xf0] }
  0x2d   :  { %v1348_v27 = vld [vmem:[%s2190_s0 + $0x124] sm:$0xf] }
  0x2e   :  { %717 = vmatpush.bf16.msrb.mxu2 %v1372_v32  ;;  %668 = vmatpush.bf16.msrb.mxu1 %v1364_v33  ;;  %v1327_v32 = vld [vmem:[%s2190_s0 + $0x7c] sm:$0xf]  ;;  %v1064_v33 = vld [vmem:[%s2190_s0 + $0x8c] sm:$0xf0] }
  0x2f   :  { %v1067_v40 = vor.u32 %v1327_v32, %v1064_v33  ;;  %v1147_v33 = vor.u32 %v1347_v23, %v1144_v24 }
  0x30   :  { %766 = vmatpush.bf16.msrb.mxu3 %v1380_v34  ;;  %819 = vmatpush.bf16.msrb.mxu0 %v1384_v43  ;;  %v1070_v34 = vld [vmem:[%s2190_s0 + $0x80] sm:$0xf]  ;;  %v1079_v43 = vor.u32 %v1331_v39, %v1078_v38 }
  0x31   :  { %639 = vmatmul.bf16.gmra.mxu1 %v1063_v46  ;;  %649 = vmatmul.bf16.gmra.mxu2 %v1103_v47  ;;  %v1071_v41 = vor.u32 %v1330_v35, %v1070_v34  ;;  %v1090_v46 = vld [vmem:[%s2190_s0 + $0xa8] sm:$0xf]  ;;  %v1335_v47 = vld [vmem:[%s2190_s0 + $0xb8] sm:$0xf0]  ;;  %v1151_v34 = vor.u32 %v1350_v26, %v1150_v25 }
  0x32   :  { %718 = vmatpush.bf16.msrb.mxu2 %v1371_v44  ;;  %669 = vmatpush.bf16.msrb.mxu1 %v1363_v45  ;;  %v1332_v44 = vld [vmem:[%s2190_s0 + $0xa4] sm:$0xf]  ;;  %v1084_v45 = vld [vmem:[%s2190_s0 + $0xb4] sm:$0xf0]  ;;  %v933_v25 = vld [vmem:[%s2193_s3 + $0x8] sm:$0xff] }
  0x33   :  { %659 = vmatmul.bf16.gmra.mxu3 %v1143_v48  ;;  %629 = vmatmul.bf16.gmra.mxu0 %v1023_v49  ;;  %v1333_v48 = vld [vmem:[%s2190_s0 + $0xac] sm:$0xf]  ;;  %v1092_v49 = vld [vmem:[%s2190_s0 + $0xbc] sm:$0xf0] }
  0x34   :  { %767 = vmatpush.bf16.msrb.mxu3 %v1379_v50  ;;  %v1098_v50 = vld [vmem:[%s2190_s0 + $0xb0] sm:$0xf] }
  0x36   :  { %719 = vmatpush.bf16.msrb.mxu2 %v1370_v51  ;;  %670 = vmatpush.bf16.msrb.mxu1 %v1362_v52  ;;  %v1336_v51 = vld [vmem:[%s2190_s0 + $0xc0] sm:$0xf0]  ;;  %v1087_v52 = vor.u32 %v1332_v44, %v1084_v45 }
  0x38   :  { %768 = vmatpush.bf16.msrb.mxu3 %v1378_v53  ;;  %v1091_v53 = vor.u32 %v1335_v47, %v1090_v46 }
  0x3a   :  { %720 = vmatpush.bf16.msrb.mxu2 %v1369_v54  ;;  %671 = vmatpush.bf16.msrb.mxu1 %v1361_v55  ;;  %v1095_v54 = vor.u32 %v1333_v48, %v1092_v49  ;;  %v1099_v55 = vor.u32 %v1336_v51, %v1098_v50 }
  0x3c   :  { %769 = vmatpush.bf16.msrb.mxu3 %v1377_v56  ;;  %v1337_v56 = vld [vmem:[%s2190_s0 + $0xcc] sm:$0xf] }
  0x3e   :  { %721 = vmatpush.bf16.msrb.mxu2 %v1368_v57  ;;  %672 = vmatpush.bf16.msrb.mxu1 %v1360_v58  ;;  %v1104_v57 = vld [vmem:[%s2190_s0 + $0xdc] sm:$0xf0]  ;;  %v1110_v58 = vld [vmem:[%s2190_s0 + $0xd0] sm:$0xf] }
  0x3f   :  { %v1107_v0 = vor.u32 %v1337_v56, %v1104_v57 }
  0x40   :  { %770 = vmatpush.bf16.msrb.mxu3 %v1376_v59  ;;  %v1340_v59 = vld [vmem:[%s2190_s0 + $0xe0] sm:$0xf0] }
  0x41   :  { %673 = vmatmul.bf16.vlgmr.msrb.gmra.mxu1 %v1007_v4  ;;  %722 = vmatmul.bf16.vlgmr.msrb.gmra.mxu2 %v1011_v5  ;;  %v1111_v1 = vor.u32 %v1340_v59, %v1110_v58  ;;  %v1342_v4 = vld [vmem:[%s2190_s0 + $0xf4] sm:$0xf]  ;;  %v1124_v5 = vld [vmem:[%s2190_s0 + $0x104] sm:$0xf0] }
  0x42   :  { %v1127_v12 = vor.u32 %v1342_v4, %v1124_v5 }
  0x43   :  { %771 = vmatmul.bf16.vlgmr.msrb.gmra.mxu3 %v1015_v6  ;;  %1304 = vmatmul.msk.bf16.vlgmr.msrb.gmra.mxu0 %vm22_vm0, %v1019_v7  ;;  %v1130_v6 = vld [vmem:[%s2190_s0 + $0xf8] sm:$0xf]  ;;  %v1345_v7 = vld [vmem:[%s2190_s0 + $0x108] sm:$0xf0] }
  0x44   :  { %v1131_v13 = vor.u32 %v1345_v7, %v1130_v6  ;;  %v932_v6 = vld [vmem:[%s2193_s3] sm:$0xff] }
  0x51   :  { %678 = vmatmul.bf16.gmra.mxu1 %v1027_v16  ;;  %727 = vmatmul.bf16.gmra.mxu2 %v1031_v17  ;;  %v1139_v16 = vor.u32 %v1346_v11, %v1138_v10 }
  0x53   :  { %776 = vmatmul.bf16.gmra.mxu3 %v1035_v18  ;;  %1305 = vmatmul.msk.bf16.gmra.mxu0 %vm22_vm0, %v1039_v19  ;;  %v1414_v19 = vmov 0.0  }
  0x54   :  { %23 = vst.msk [vmem:[%s2192_s4] sm:$0xff] %vm22_vm0, %v1414_v19 }
  0x55   :  { %24 = vst.msk [vmem:[%s2192_s4 + $0x8] sm:$0xff] %vm22_vm0, %v1414_v19 }
  0x56   :  { %25 = vst.msk [vmem:[%s2192_s4 + $0x10] sm:$0xff] %vm22_vm0, %v1414_v19 }
  0x57   :  { %26 = vst.msk [vmem:[%s2192_s4 + $0x18] sm:$0xff] %vm22_vm0, %v1414_v19 }
  0x58   :  { %27 = vst.msk [vmem:[%s2192_s4 + $0x20] sm:$0xff] %vm22_vm0, %v1414_v19 }
  0x59   :  { %28 = vst.msk [vmem:[%s2192_s4 + $0x28] sm:$0xff] %vm22_vm0, %v1414_v19 }
  0x5a   :  { %29 = vst.msk [vmem:[%s2192_s4 + $0x30] sm:$0xff] %vm22_vm0, %v1414_v19 }
  0x5b   :  { %30 = vst.msk [vmem:[%s2192_s4 + $0x38] sm:$0xff] %vm22_vm0, %v1414_v19 }
  0x5c   :  { %31 = vst.msk [vmem:[%s2192_s4 + $0x40] sm:$0xff] %vm22_vm0, %v1414_v19 }
  0x5d   :  { %32 = vst.msk [vmem:[%s2192_s4 + $0x48] sm:$0xff] %vm22_vm0, %v1414_v19 }
  0x5e   :  { %33 = vst.msk [vmem:[%s2192_s4 + $0x50] sm:$0xff] %vm22_vm0, %v1414_v19 }
  0x5f   :  { %34 = vst.msk [vmem:[%s2192_s4 + $0x58] sm:$0xff] %vm22_vm0, %v1414_v19 }
  0x60   :  { %35 = vst.msk [vmem:[%s2192_s4 + $0x60] sm:$0xff] %vm22_vm0, %v1414_v19 }
  0x61   :  { %683 = vmatmul.bf16.gmra.mxu1 %v1047_v28  ;;  %732 = vmatmul.bf16.gmra.mxu2 %v1051_v29  ;;  %v1152_v28 = vld [vmem:[%s2190_s0 + $0x134] sm:$0xf0]  ;;  %v1158_v29 = vld [vmem:[%s2190_s0 + $0x128] sm:$0xf]  ;;  %36 = vst.msk [vmem:[%s2192_s4 + $0x68] sm:$0xff] %vm22_vm0, %v1414_v19 }
  0x62   :  { %v1155_v36 = vor.u32 %v1348_v27, %v1152_v28  ;;  %37 = vst.msk [vmem:[%s2192_s4 + $0x70] sm:$0xff] %vm22_vm0, %v1414_v19 }
  0x63   :  { %781 = vmatmul.bf16.gmra.mxu3 %v1055_v30  ;;  %1306 = vmatmul.msk.bf16.gmra.mxu0 %vm22_vm0, %v1059_v31  ;;  %v1351_v30 = vld [vmem:[%s2190_s0 + $0x138] sm:$0xf0]  ;;  %38 = vst.msk [vmem:[%s2192_s4 + $0x78] sm:$0xff] %vm22_vm0, %v1414_v19 }
  0x64   :  { %v1159_v37 = vor.u32 %v1351_v30, %v1158_v29 }
  0x71   :  { %688 = vmatmul.bf16.gmra.mxu1 %v1067_v40  ;;  %737 = vmatmul.bf16.gmra.mxu2 %v1071_v41 }
  0x73   :  { %786 = vmatmul.bf16.gmra.mxu3 %v1075_v42  ;;  %1307 = vmatmul.msk.bf16.gmra.mxu0 %vm22_vm0, %v1079_v43 }
  0x81   :  { %693 = vmatmul.bf16.gmra.mxu1 %v1087_v52  ;;  %742 = vmatmul.bf16.gmra.mxu2 %v1091_v53 }
  0x83   :  { %791 = vmatmul.bf16.gmra.mxu3 %v1095_v54  ;;  %1308 = vmatmul.msk.bf16.gmra.mxu0 %vm22_vm0, %v1099_v55  ;;  %v39_v54 = vld [vmem:[%s2192_s4] sm:$0xff] }
  0x91   :  { %698 = vmatmul.bf16.gmra.mxu1 %v1107_v0  ;;  %747 = vmatmul.bf16.gmra.mxu2 %v1111_v1  ;;  %v40_v0 = vld [vmem:[%s2192_s4 + $0x8] sm:$0xff]  ;;  %v1897_v1 = vld [vmem:[%s2191_s2] ss:$0 sm:$0xff] }
  0x93   :  { %796 = vmatmul.bf16.gmra.mxu3 %v1115_v2  ;;  %1309 = vmatmul.msk.bf16.gmra.mxu0 %vm22_vm0, %v1119_v3 }
  0x9e   :  { %v1770_v14 = vpop.f32.mrf.mxu1 }
  0xa0   :  { %v625_v17 = vpop.f32.mrf.mxu0 }
  0xa1   :  { %703 = vmatmul.bf16.gmra.mxu1 %v1127_v12  ;;  %752 = vmatmul.bf16.gmra.mxu2 %v1131_v13 }
  0xa3   :  { %801 = vmatmul.bf16.gmra.mxu3 %v1135_v15  ;;  %1310 = vmatmul.msk.bf16.gmra.mxu0 %vm22_vm0, %v1139_v16  ;;  %v41_v16 = vld [vmem:[%s2192_s4 + $0x10] sm:$0xff] }
  0xa4   :  { %v1773_v18 = vpop.f32.mrf.mxu2 }
  0xa6   :  { %v1779_v20 = vpop.f32.mrf.mxu3  ;;  %v1785_v21 = vpop.f32.mrf.mxu1 }
  0xa8   :  { %v627_v22 = vpop.f32.mrf.mxu0 }
  0xac   :  { %v1835_v31 = vpop.f32.mrf.mxu2 }
  0xae   :  { %v1841_v32 = vpop.f32.mrf.mxu3  ;;  %v1847_v35 = vpop.f32.mrf.mxu1 }
  0xb0   :  { %v630_v38 = vpop.f32.mrf.mxu0 }
  0xb1   :  { %708 = vmatmul.bf16.gmra.mxu1 %v1147_v33  ;;  %757 = vmatmul.bf16.gmra.mxu2 %v1151_v34 }
  0xb3   :  { %806 = vmatmul.bf16.gmra.mxu3 %v1155_v36  ;;  %1311 = vmatmul.msk.bf16.gmra.mxu0 %vm22_vm0, %v1159_v37  ;;  %v42_v37 = vld [vmem:[%s2192_s4 + $0x18] sm:$0xff] }
  0xb4   :  { %v1874_v39 = vpop.f32.mrf.mxu2 }
  0xb6   :  { %v1876_v40 = vpop.f32.mrf.mxu3  ;;  %v1878_v41 = vpop.f32.mrf.mxu1 }
  0xb8   :  { %v632_v42 = vpop.f32.mrf.mxu0 }
  0xbc   :  { %v1880_v43 = vpop.f32.mrf.mxu2 }
  0xbe   :  { %v1882_v44 = vpop.f32.mrf.mxu3  ;;  %v674_v45 = vpop.f32.mrf.mxu1 }
  0xbf   :  { %v675_v47 = vadd.f32 %v674_v45, %v625_v17 }
  0xc0   :  { %v821_v46 = vpop.f32.mrf.mxu0 }
  0xc4   :  { %v723_v48 = vpop.f32.mrf.mxu2 }
  0xc5   :  { %v724_v49 = vadd.f32 %v723_v48, %v675_v47  ;;  %v934_v48 = vld [vmem:[%s2193_s3 + $0x10] sm:$0xff] }
  0xc6   :  { %v772_v50 = vpop.f32.mrf.mxu3  ;;  %v676_v51 = vpop.f32.mrf.mxu1 }
  0xc7   :  { %v773_v52 = vadd.f32 %v772_v50, %v724_v49  ;;  %v677_v57 = vadd.f32 %v676_v51, %v627_v22 }
  0xc8   :  { %v823_v53 = vpop.f32.mrf.mxu0 }
  0xc9   :  { %v822_v55 = vadd.f32 %v821_v46, %v773_v52 }
  0xcb   :  { %v861_v56 = vadd.f32 %v822_v55, %v39_v54 }
  0xcc   :  { %v725_v58 = vpop.f32.mrf.mxu2 }
  0xcd   :  { %877 = vst.msk [vmem:[%s2192_s4] sm:$0xff] %vm22_vm0, %v861_v56  ;;  %v726_v59 = vadd.f32 %v725_v58, %v677_v57  ;;  %v43_v56 = vld [vmem:[%s2192_s4 + $0x20] sm:$0xff] }
  0xce   :  { %v774_v60 = vpop.f32.mrf.mxu3  ;;  %v679_v61 = vpop.f32.mrf.mxu1 }
  0xcf   :  { %v775_v62 = vadd.f32 %v774_v60, %v726_v59  ;;  %v680_v4 = vadd.f32 %v679_v61, %v630_v38 }
  0xd0   :  { %v826_v63 = vpop.f32.mrf.mxu0 }
  0xd1   :  { %v824_v2 = vadd.f32 %v823_v53, %v775_v62  ;;  %v935_v62 = vld [vmem:[%s2193_s3 + $0x18] sm:$0xff] }
  0xd3   :  { %v862_v3 = vadd.f32 %v824_v2, %v40_v0 }
  0xd4   :  { %v896_v5 = vld [vmem:[%s2192_s4] sm:$0xff]  ;;  %v728_v7 = vpop.f32.mrf.mxu2 }
  0xd5   :  { %v916_v8 = vadd.f32 %v1897_v1, %v896_v5  ;;  %878 = vst.msk [vmem:[%s2192_s4 + $0x8] sm:$0xff] %vm22_vm0, %v862_v3  ;;  %v729_v9 = vadd.f32 %v728_v7, %v680_v4  ;;  %v44_v7 = vld [vmem:[%s2192_s4 + $0x28] sm:$0xff] }
  0xd6   :  { %v777_v10 = vpop.f32.mrf.mxu3  ;;  %v681_v11 = vpop.f32.mrf.mxu1 }
  0xd7   :  { %v948_v12 = vadd.f32 %v932_v6, %v916_v8  ;;  %v778_v13 = vadd.f32 %v777_v10, %v729_v9  ;;  %v682_v23 = vadd.f32 %v681_v11, %v632_v42 }
  0xd8   :  { %v828_v15 = vpop.f32.mrf.mxu0 }
  0xd9   :  { %v964_v17 = vmax.f32 %v948_v12, 0.0  ;;  %v827_v19 = vadd.f32 %v826_v63, %v778_v13  ;;  %v936_v13 = vld [vmem:[%s2193_s3 + $0x20] sm:$0xff] }
  0xdb   :  { %980 = vst.msk [vmem:[%s2192_s4] sm:$0xff] %vm22_vm0, %v964_v17  ;;  %v863_v22 = vadd.f32 %v827_v19, %v41_v16 }
  0xdc   :  { %v897_v24 = vld [vmem:[%s2192_s4 + $0x8] sm:$0xff]  ;;  %v730_v26 = vpop.f32.mrf.mxu2 }
  0xdd   :  { %v917_v27 = vadd.f32 %v1897_v1, %v897_v24  ;;  %879 = vst.msk [vmem:[%s2192_s4 + $0x10] sm:$0xff] %vm22_vm0, %v863_v22  ;;  %v731_v28 = vadd.f32 %v730_v26, %v682_v23 }
  0xde   :  { %v779_v29 = vpop.f32.mrf.mxu3  ;;  %v684_v30 = vpop.f32.mrf.mxu1 }
  0xdf   :  { %v949_v33 = vadd.f32 %v933_v25, %v917_v27  ;;  %v780_v34 = vadd.f32 %v779_v29, %v731_v28  ;;  %v685_v46 = vadd.f32 %v684_v30, %v1770_v14  ;;  %v45_v25 = vld [vmem:[%s2192_s4 + $0x30] sm:$0xff] }
  0xe0   :  { %v831_v36 = vpop.f32.mrf.mxu0 }
  0xe1   :  { %v965_v38 = vmax.f32 %v949_v33, 0.0  ;;  %v829_v42 = vadd.f32 %v828_v15, %v780_v34  ;;  %v937_v33 = vld [vmem:[%s2193_s3 + $0x28] sm:$0xff] }
  0xe3   :  { %981 = vst.msk [vmem:[%s2192_s4 + $0x8] sm:$0xff] %vm22_vm0, %v965_v38  ;;  %v864_v45 = vadd.f32 %v829_v42, %v42_v37 }
  0xe4   :  { %v898_v47 = vld [vmem:[%s2192_s4 + $0x10] sm:$0xff]  ;;  %v733_v49 = vpop.f32.mrf.mxu2 }
  0xe5   :  { %v918_v50 = vadd.f32 %v1897_v1, %v898_v47  ;;  %880 = vst.msk [vmem:[%s2192_s4 + $0x18] sm:$0xff] %vm22_vm0, %v864_v45  ;;  %v734_v51 = vadd.f32 %v733_v49, %v685_v46  ;;  %v46_v47 = vld [vmem:[%s2192_s4 + $0x38] sm:$0xff] }
  0xe6   :  { %v782_v52 = vpop.f32.mrf.mxu3  ;;  %v686_v53 = vpop.f32.mrf.mxu1 }
  0xe7   :  { %v950_v14 = vadd.f32 %v934_v48, %v918_v50  ;;  %v783_v54 = vadd.f32 %v782_v52, %v734_v51  ;;  %v687_v60 = vadd.f32 %v686_v53, %v1785_v21  ;;  %v938_v53 = vld [vmem:[%s2193_s3 + $0x30] sm:$0xff] }
  0xe8   :  { %v833_v55 = vpop.f32.mrf.mxu0 }
  0xe9   :  { %v966_v57 = vmax.f32 %v950_v14, 0.0  ;;  %v832_v58 = vadd.f32 %v831_v36, %v783_v54 }
  0xeb   :  { %982 = vst.msk [vmem:[%s2192_s4 + $0x10] sm:$0xff] %vm22_vm0, %v966_v57  ;;  %v865_v59 = vadd.f32 %v832_v58, %v43_v56 }
  0xec   :  { %v899_v61 = vld [vmem:[%s2192_s4 + $0x18] sm:$0xff]  ;;  %v735_v63 = vpop.f32.mrf.mxu2 }
  0xed   :  { %v919_v0 = vadd.f32 %v1897_v1, %v899_v61  ;;  %881 = vst.msk [vmem:[%s2192_s4 + $0x20] sm:$0xff] %vm22_vm0, %v865_v59  ;;  %v736_v2 = vadd.f32 %v735_v63, %v687_v60  ;;  %v47_v60 = vld [vmem:[%s2192_s4 + $0x40] sm:$0xff] }
  0xee   :  { %v784_v3 = vpop.f32.mrf.mxu3  ;;  %v689_v4 = vpop.f32.mrf.mxu1 }
  0xef   :  { %v951_v21 = vadd.f32 %v935_v62, %v919_v0  ;;  %v785_v5 = vadd.f32 %v784_v3, %v736_v2  ;;  %v690_v11 = vadd.f32 %v689_v4, %v1847_v35  ;;  %v939_v3 = vld [vmem:[%s2193_s3 + $0x38] sm:$0xff] }
  0xf0   :  { %v836_v6 = vpop.f32.mrf.mxu0 }
  0xf1   :  { %v967_v8 = vmax.f32 %v951_v21, 0.0  ;;  %v834_v9 = vadd.f32 %v833_v55, %v785_v5 }
  0xf3   :  { %983 = vst.msk [vmem:[%s2192_s4 + $0x18] sm:$0xff] %vm22_vm0, %v967_v8  ;;  %v866_v10 = vadd.f32 %v834_v9, %v44_v7 }
  0xf4   :  { %v900_v12 = vld [vmem:[%s2192_s4 + $0x20] sm:$0xff]  ;;  %v738_v15 = vpop.f32.mrf.mxu2 }
  0xf5   :  { %v920_v16 = vadd.f32 %v1897_v1, %v900_v12  ;;  %882 = vst.msk [vmem:[%s2192_s4 + $0x28] sm:$0xff] %vm22_vm0, %v866_v10  ;;  %v739_v17 = vadd.f32 %v738_v15, %v690_v11  ;;  %v48_v10 = vld [vmem:[%s2192_s4 + $0x48] sm:$0xff] }
  0xf6   :  { %v787_v19 = vpop.f32.mrf.mxu3  ;;  %v691_v22 = vpop.f32.mrf.mxu1 }
  0xf7   :  { %v952_v35 = vadd.f32 %v936_v13, %v920_v16  ;;  %v788_v23 = vadd.f32 %v787_v19, %v739_v17  ;;  %v692_v29 = vadd.f32 %v691_v22, %v1878_v41  ;;  %v940_v17 = vld [vmem:[%s2193_s3 + $0x40] sm:$0xff] }
  0xf8   :  { %v838_v24 = vpop.f32.mrf.mxu0 }
  0xf9   :  { %v968_v26 = vmax.f32 %v952_v35, 0.0  ;;  %v837_v27 = vadd.f32 %v836_v6, %v788_v23 }
  0xfb   :  { %984 = vst.msk [vmem:[%s2192_s4 + $0x20] sm:$0xff] %vm22_vm0, %v968_v26  ;;  %v867_v28 = vadd.f32 %v837_v27, %v45_v25  ;;  %v49_v26 = vld [vmem:[%s2192_s4 + $0x50] sm:$0xff] }
  0xfc   :  { %v901_v30 = vld [vmem:[%s2192_s4 + $0x28] sm:$0xff]  ;;  %v740_v34 = vpop.f32.mrf.mxu2 }
  0xfd   :  { %v921_v36 = vadd.f32 %v1897_v1, %v901_v30  ;;  %883 = vst.msk [vmem:[%s2192_s4 + $0x30] sm:$0xff] %vm22_vm0, %v867_v28  ;;  %v741_v37 = vadd.f32 %v740_v34, %v692_v29 }
  0xfe   :  { %v789_v38 = vpop.f32.mrf.mxu3  ;;  %v694_v42 = vpop.f32.mrf.mxu1 }
  0xff   :  { %v953_v41 = vadd.f32 %v937_v33, %v921_v36  ;;  %v790_v45 = vadd.f32 %v789_v38, %v741_v37  ;;  %v695_v51 = vadd.f32 %v694_v42, %v1773_v18  ;;  %v941_v36 = vld [vmem:[%s2193_s3 + $0x48] sm:$0xff] }
 0x100   :  { %v841_v46 = vpop.f32.mrf.mxu0 }
 0x101   :  { %v969_v48 = vmax.f32 %v953_v41, 0.0  ;;  %v839_v49 = vadd.f32 %v838_v24, %v790_v45 }
 0x103   :  { %985 = vst.msk [vmem:[%s2192_s4 + $0x28] sm:$0xff] %vm22_vm0, %v969_v48  ;;  %v868_v50 = vadd.f32 %v839_v49, %v46_v47  ;;  %v50_v47 = vld [vmem:[%s2192_s4 + $0x58] sm:$0xff] }
 0x104   :  { %v902_v52 = vld [vmem:[%s2192_s4 + $0x30] sm:$0xff]  ;;  %v743_v14 = vpop.f32.mrf.mxu2 }
 0x105   :  { %v922_v54 = vadd.f32 %v1897_v1, %v902_v52  ;;  %884 = vst.msk [vmem:[%s2192_s4 + $0x38] sm:$0xff] %vm22_vm0, %v868_v50  ;;  %v744_v55 = vadd.f32 %v743_v14, %v695_v51  ;;  %v942_v14 = vld [vmem:[%s2193_s3 + $0x50] sm:$0xff] }
 0x106   :  { %v792_v56 = vpop.f32.mrf.mxu3  ;;  %v696_v57 = vpop.f32.mrf.mxu1 }
 0x107   :  { %v954_v18 = vadd.f32 %v938_v53, %v922_v54  ;;  %v793_v58 = vadd.f32 %v792_v56, %v744_v55  ;;  %v697_v0 = vadd.f32 %v696_v57, %v1835_v31 }
 0x108   :  { %v843_v59 = vpop.f32.mrf.mxu0 }
 0x109   :  { %v970_v61 = vmax.f32 %v954_v18, 0.0  ;;  %v842_v62 = vadd.f32 %v841_v46, %v793_v58 }
 0x10b   :  { %986 = vst.msk [vmem:[%s2192_s4 + $0x30] sm:$0xff] %vm22_vm0, %v970_v61  ;;  %v869_v63 = vadd.f32 %v842_v62, %v47_v60 }
 0x10c   :  { %v903_v2 = vld [vmem:[%s2192_s4 + $0x38] sm:$0xff]  ;;  %v745_v4 = vpop.f32.mrf.mxu2 }
 0x10d   :  { %v923_v21 = vadd.f32 %v1897_v1, %v903_v2  ;;  %885 = vst.msk [vmem:[%s2192_s4 + $0x40] sm:$0xff] %vm22_vm0, %v869_v63  ;;  %v746_v5 = vadd.f32 %v745_v4, %v697_v0  ;;  %v943_v2 = vld [vmem:[%s2193_s3 + $0x58] sm:$0xff] }
 0x10e   :  { %v794_v6 = vpop.f32.mrf.mxu3  ;;  %v699_v7 = vpop.f32.mrf.mxu1 }
 0x10f   :  { %v955_v31 = vadd.f32 %v939_v3, %v923_v21  ;;  %v795_v8 = vadd.f32 %v794_v6, %v746_v5  ;;  %v700_v15 = vadd.f32 %v699_v7, %v1874_v39 }
 0x110   :  { %v846_v9 = vpop.f32.mrf.mxu0 }
 0x111   :  { %v971_v11 = vmax.f32 %v955_v31, 0.0  ;;  %v844_v12 = vadd.f32 %v843_v59, %v795_v8  ;;  %v51_v59 = vld [vmem:[%s2192_s4 + $0x60] sm:$0xff]  ;;  %v52_v8 = vld [vmem:[%s2192_s4 + $0x68] sm:$0xff] }
 0x113   :  { %987 = vst.msk [vmem:[%s2192_s4 + $0x38] sm:$0xff] %vm22_vm0, %v971_v11  ;;  %v870_v13 = vadd.f32 %v844_v12, %v48_v10 }
 0x114   :  { %v904_v16 = vld [vmem:[%s2192_s4 + $0x40] sm:$0xff]  ;;  %v748_v19 = vpop.f32.mrf.mxu2 }
 0x115   :  { %v924_v22 = vadd.f32 %v1897_v1, %v904_v16  ;;  %886 = vst.msk [vmem:[%s2192_s4 + $0x48] sm:$0xff] %vm22_vm0, %v870_v13  ;;  %v749_v35 = vadd.f32 %v748_v19, %v700_v15  ;;  %v944_v15 = vld [vmem:[%s2193_s3 + $0x60] sm:$0xff] }
 0x116   :  { %v797_v23 = vpop.f32.mrf.mxu3  ;;  %v701_v24 = vpop.f32.mrf.mxu1 }
 0x117   :  { %v956_v39 = vadd.f32 %v940_v17, %v924_v22  ;;  %v798_v25 = vadd.f32 %v797_v23, %v749_v35  ;;  %v702_v33 = vadd.f32 %v701_v24, %v1880_v43  ;;  %v53_v24 = vld [vmem:[%s2192_s4 + $0x70] sm:$0xff] }
 0x118   :  { %v848_v27 = vpop.f32.mrf.mxu0 }
 0x119   :  { %v972_v28 = vmax.f32 %v956_v39, 0.0  ;;  %v847_v29 = vadd.f32 %v846_v9, %v798_v25 }
 0x11b   :  { %988 = vst.msk [vmem:[%s2192_s4 + $0x40] sm:$0xff] %vm22_vm0, %v972_v28  ;;  %v871_v30 = vadd.f32 %v847_v29, %v49_v26 }
 0x11c   :  { %v905_v34 = vld [vmem:[%s2192_s4 + $0x48] sm:$0xff]  ;;  %v750_v37 = vpop.f32.mrf.mxu2 }
 0x11d   :  { %v925_v38 = vadd.f32 %v1897_v1, %v905_v34  ;;  %887 = vst.msk [vmem:[%s2192_s4 + $0x50] sm:$0xff] %vm22_vm0, %v871_v30  ;;  %v751_v42 = vadd.f32 %v750_v37, %v702_v33  ;;  %v945_v30 = vld [vmem:[%s2193_s3 + $0x68] sm:$0xff] }
 0x11e   :  { %v799_v41 = vpop.f32.mrf.mxu3  ;;  %v704_v45 = vpop.f32.mrf.mxu1 }
 0x11f   :  { %v957_v43 = vadd.f32 %v941_v36, %v925_v38  ;;  %v800_v46 = vadd.f32 %v799_v41, %v751_v42  ;;  %v705_v52 = vadd.f32 %v704_v45, %v1779_v20  ;;  %v54_v41 = vld [vmem:[%s2192_s4 + $0x78] sm:$0xff] }
 0x120   :  { %v851_v50 = vpop.f32.mrf.mxu0 }
 0x121   :  { %v973_v48 = vmax.f32 %v957_v43, 0.0  ;;  %v849_v49 = vadd.f32 %v848_v27, %v800_v46 }
 0x123   :  { %989 = vst.msk [vmem:[%s2192_s4 + $0x48] sm:$0xff] %vm22_vm0, %v973_v48  ;;  %v872_v51 = vadd.f32 %v849_v49, %v50_v47  ;;  %v946_v48 = vld [vmem:[%s2193_s3 + $0x70] sm:$0xff] }
 0x124   :  { %v906_v53 = vld [vmem:[%s2192_s4 + $0x50] sm:$0xff]  ;;  %v753_v54 = vpop.f32.mrf.mxu2 }
 0x125   :  { %v926_v55 = vadd.f32 %v1897_v1, %v906_v53  ;;  %888 = vst.msk [vmem:[%s2192_s4 + $0x58] sm:$0xff] %vm22_vm0, %v872_v51  ;;  %v754_v56 = vadd.f32 %v753_v54, %v705_v52  ;;  %v947_v53 = vld [vmem:[%s2193_s3 + $0x78] sm:$0xff] }
 0x126   :  { %v802_v57 = vpop.f32.mrf.mxu3  ;;  %v706_v18 = vpop.f32.mrf.mxu1 }
 0x127   :  { %v958_v20 = vadd.f32 %v942_v14, %v926_v55  ;;  %v803_v58 = vadd.f32 %v802_v57, %v754_v56  ;;  %v707_v63 = vadd.f32 %v706_v18, %v1841_v32 }
 0x128   :  { %v853_v3 = vpop.f32.mrf.mxu0 }
 0x129   :  { %v974_v60 = vmax.f32 %v958_v20, 0.0  ;;  %v852_v61 = vadd.f32 %v851_v50, %v803_v58 }
 0x12b   :  { %990 = vst.msk [vmem:[%s2192_s4 + $0x50] sm:$0xff] %vm22_vm0, %v974_v60  ;;  %v873_v62 = vadd.f32 %v852_v61, %v51_v59 }
 0x12c   :  { %v907_v0 = vld [vmem:[%s2192_s4 + $0x58] sm:$0xff]  ;;  %v755_v4 = vpop.f32.mrf.mxu2 }
 0x12d   :  { %v927_v21 = vadd.f32 %v1897_v1, %v907_v0  ;;  %889 = vst.msk [vmem:[%s2192_s4 + $0x60] sm:$0xff] %vm22_vm0, %v873_v62  ;;  %v756_v5 = vadd.f32 %v755_v4, %v707_v63 }
 0x12e   :  { %v804_v6 = vpop.f32.mrf.mxu3  ;;  %v709_v32 = vpop.f32.mrf.mxu1 }
 0x12f   :  { %v959_v7 = vadd.f32 %v943_v2, %v927_v21  ;;  %v805_v31 = vadd.f32 %v804_v6, %v756_v5  ;;  %v710_v12 = vadd.f32 %v709_v32, %v1876_v40 }
 0x130   :  { %v856_v35 = vpop.f32.mrf.mxu0 }
 0x131   :  { %v975_v9 = vmax.f32 %v959_v7, 0.0  ;;  %v854_v10 = vadd.f32 %v853_v3, %v805_v31 }
 0x133   :  { %991 = vst.msk [vmem:[%s2192_s4 + $0x58] sm:$0xff] %vm22_vm0, %v975_v9  ;;  %v874_v11 = vadd.f32 %v854_v10, %v52_v8 }
 0x134   :  { %v908_v13 = vld [vmem:[%s2192_s4 + $0x60] sm:$0xff]  ;;  %v758_v16 = vpop.f32.mrf.mxu2 }
 0x135   :  { %v928_v17 = vadd.f32 %v1897_v1, %v908_v13  ;;  %890 = vst.msk [vmem:[%s2192_s4 + $0x68] sm:$0xff] %vm22_vm0, %v874_v11  ;;  %v759_v19 = vadd.f32 %v758_v16, %v710_v12 }
 0x136   :  { %v807_v22 = vpop.f32.mrf.mxu3  ;;  %v711_v39 = vpop.f32.mrf.mxu1 }
 0x137   :  { %v960_v40 = vadd.f32 %v944_v15, %v928_v17  ;;  %v808_v23 = vadd.f32 %v807_v22, %v759_v19  ;;  %v712_v28 = vadd.f32 %v711_v39, %v1882_v44 }
 0x138   :  { %v858_v42 = vpop.f32.mrf.mxu0 }
 0x139   :  { %v976_v25 = vmax.f32 %v960_v40, 0.0  ;;  %v857_v26 = vadd.f32 %v856_v35, %v808_v23 }
 0x13b   :  { %992 = vst.msk [vmem:[%s2192_s4 + $0x60] sm:$0xff] %vm22_vm0, %v976_v25  ;;  %v875_v27 = vadd.f32 %v857_v26, %v53_v24 }
 0x13c   :  { %v909_v29 = vld [vmem:[%s2192_s4 + $0x68] sm:$0xff]  ;;  %v760_v33 = vpop.f32.mrf.mxu2 }
 0x13d   :  { %v929_v34 = vadd.f32 %v1897_v1, %v909_v29  ;;  %891 = vst.msk [vmem:[%s2192_s4 + $0x70] sm:$0xff] %vm22_vm0, %v875_v27  ;;  %v761_v36 = vadd.f32 %v760_v33, %v712_v28 }
 0x13e   :  { %v809_v37 = vpop.f32.mrf.mxu3 }
 0x13f   :  { %v961_v38 = vadd.f32 %v945_v30, %v929_v34  ;;  %v810_v44 = vadd.f32 %v809_v37, %v761_v36 }
 0x141   :  { %v977_v45 = vmax.f32 %v961_v38, 0.0  ;;  %v859_v43 = vadd.f32 %v858_v42, %v810_v44 }
 0x143   :  { %993 = vst.msk [vmem:[%s2192_s4 + $0x68] sm:$0xff] %vm22_vm0, %v977_v45  ;;  %v876_v46 = vadd.f32 %v859_v43, %v54_v41 }
 0x144   :  { %v910_v47 = vld [vmem:[%s2192_s4 + $0x70] sm:$0xff] }
 0x145   :  { %v930_v49 = vadd.f32 %v1897_v1, %v910_v47  ;;  %892 = vst.msk [vmem:[%s2192_s4 + $0x78] sm:$0xff] %vm22_vm0, %v876_v46 }
 0x147   :  { %v962_v50 = vadd.f32 %v946_v48, %v930_v49 }
 0x149   :  { %v978_v51 = vmax.f32 %v962_v50, 0.0 }
 0x14b   :  { %994 = vst.msk [vmem:[%s2192_s4 + $0x70] sm:$0xff] %vm22_vm0, %v978_v51 }
 0x14c   :  { %v911_v52 = vld [vmem:[%s2192_s4 + $0x78] sm:$0xff] }
 0x14d   :  { %v931_v14 = vadd.f32 %v1897_v1, %v911_v52 }
 0x14f   :  { %v963_v54 = vadd.f32 %v947_v53, %v931_v14 }
 0x151   :  { %v979_v55 = vmax.f32 %v963_v54, 0.0 }
 0x153   :  { %995 = vst.msk [vmem:[%s2192_s4 + $0x78] sm:$0xff] %vm22_vm0, %v979_v55 }

// kernel: resnet18_16s_forward.28
= control target key start
LH: loop header
LB: loop body
LE: loop exit
PB: predicated region body
PF: predicated region fallthrough
CT: control target
= control target key end

     0   :  { %vm377_vm0 = vcmask 523264   ;;  %s955_s1 = inlined_call_operand.vmem [shape: bf16[576,128], index: 1, kind: input, shape index: {}]   ;;  %s956_s0 = inlined_call_operand.vmem [shape: bf16[32,576], index: 0, kind: input, shape index: {}]   ;;  %s957_s2 = inlined_call_operand.vmem [shape: f32[1,128], index: 2, kind: input, shape index: {}]   ;;  %s958_s3 = inlined_call_operand.vmem [shape: f32[32,128], index: 3, kind: output, shape index: {}]  }
   0x1   :  { %v717_v0 = vld [vmem:[%s955_s1 + $0x38] sm:$0xff]  ;;  %v716_v4 = vld [vmem:[%s955_s1 + $0x30] sm:$0xff]  ;;  %v715_v8 = vld [vmem:[%s955_s1 + $0x28] sm:$0xff] }
   0x2   :  { %v725_v1 = vld [vmem:[%s955_s1 + $0x78] sm:$0xff]  ;;  %384 = vmatpush.bf16.msra.mxu0 %v717_v0  ;;  %v724_v5 = vld [vmem:[%s955_s1 + $0x70] sm:$0xff]  ;;  %v723_v9 = vld [vmem:[%s955_s1 + $0x68] sm:$0xff] }
   0x3   :  { %v733_v2 = vld [vmem:[%s955_s1 + $0xb8] sm:$0xff]  ;;  %403 = vmatpush.bf16.msra.mxu1 %v725_v1  ;;  %v732_v6 = vld [vmem:[%s955_s1 + $0xb0] sm:$0xff]  ;;  %v731_v10 = vld [vmem:[%s955_s1 + $0xa8] sm:$0xff] }
   0x4   :  { %v741_v3 = vld [vmem:[%s955_s1 + $0xf8] sm:$0xff]  ;;  %422 = vmatpush.bf16.msra.mxu2 %v733_v2  ;;  %v740_v7 = vld [vmem:[%s955_s1 + $0xf0] sm:$0xff]  ;;  %v739_v11 = vld [vmem:[%s955_s1 + $0xe8] sm:$0xff] }
   0x5   :  { %441 = vmatpush.bf16.msra.mxu3 %v741_v3  ;;  %v714_v12 = vld [vmem:[%s955_s1 + $0x20] sm:$0xff]  ;;  %v713_v16 = vld [vmem:[%s955_s1 + $0x18] sm:$0xff]  ;;  %v712_v20 = vld [vmem:[%s955_s1 + $0x10] sm:$0xff] }
   0x6   :  { %385 = vmatpush.bf16.msra.mxu0 %v716_v4  ;;  %v722_v13 = vld [vmem:[%s955_s1 + $0x60] sm:$0xff]  ;;  %v721_v17 = vld [vmem:[%s955_s1 + $0x58] sm:$0xff]  ;;  %v720_v21 = vld [vmem:[%s955_s1 + $0x50] sm:$0xff] }
   0x7   :  { %404 = vmatpush.bf16.msra.mxu1 %v724_v5  ;;  %v730_v14 = vld [vmem:[%s955_s1 + $0xa0] sm:$0xff]  ;;  %v729_v18 = vld [vmem:[%s955_s1 + $0x98] sm:$0xff]  ;;  %v728_v22 = vld [vmem:[%s955_s1 + $0x90] sm:$0xff] }
   0x8   :  { %423 = vmatpush.bf16.msra.mxu2 %v732_v6  ;;  %v738_v15 = vld [vmem:[%s955_s1 + $0xe0] sm:$0xff]  ;;  %v737_v19 = vld [vmem:[%s955_s1 + $0xd8] sm:$0xff]  ;;  %v736_v23 = vld [vmem:[%s955_s1 + $0xd0] sm:$0xff] }
   0x9   :  { %442 = vmatpush.bf16.msra.mxu3 %v740_v7  ;;  %v711_v24 = vld [vmem:[%s955_s1 + $0x8] sm:$0xff]  ;;  %v710_v28 = vld [vmem:[%s955_s1] sm:$0xff]  ;;  %v702_v33 = vld [vmem:[%s956_s0 + $0x10] sm:$0xf0] }
   0xa   :  { %386 = vmatpush.bf16.msra.mxu0 %v715_v8  ;;  %v719_v25 = vld [vmem:[%s955_s1 + $0x48] sm:$0xff]  ;;  %v718_v29 = vld [vmem:[%s955_s1 + $0x40] sm:$0xff]  ;;  %v518_v35 = vld [vmem:[%s956_s0 + $0x14] sm:$0xf0] }
   0xb   :  { %405 = vmatpush.bf16.msra.mxu1 %v723_v9  ;;  %v727_v26 = vld [vmem:[%s955_s1 + $0x88] sm:$0xff]  ;;  %v726_v30 = vld [vmem:[%s955_s1 + $0x80] sm:$0xff]  ;;  %v703_v37 = vld [vmem:[%s956_s0 + $0x18] sm:$0xf0] }
   0xc   :  { %424 = vmatpush.bf16.msra.mxu2 %v731_v10  ;;  %v735_v27 = vld [vmem:[%s955_s1 + $0xc8] sm:$0xff]  ;;  %v734_v31 = vld [vmem:[%s955_s1 + $0xc0] sm:$0xff]  ;;  %v745_v40 = vld [vmem:[%s955_s1 + $0x118] sm:$0xff] }
   0xd   :  { %443 = vmatpush.bf16.msra.mxu3 %v739_v11  ;;  %v516_v32 = vld [vmem:[%s956_s0] sm:$0xf]  ;;  %v700_v34 = vld [vmem:[%s956_s0 + $0x4] sm:$0xf]  ;;  %v524_v36 = vld [vmem:[%s956_s0 + $0x8] sm:$0xf] }
   0xe   :  { %387 = vmatpush.bf16.msra.mxu0 %v714_v12  ;;  %v701_v38 = vld [vmem:[%s956_s0 + $0xc] sm:$0xf]  ;;  %v526_v39 = vld [vmem:[%s956_s0 + $0x1c] sm:$0xf0]  ;;  %v517_v41 = vor.u32 %v702_v33, %v516_v32  ;;  %v521_v42 = vor.u32 %v700_v34, %v518_v35  ;;  %v525_v43 = vor.u32 %v703_v37, %v524_v36  ;;  %v744_v45 = vld [vmem:[%s955_s1 + $0x110] sm:$0xff] }
   0xf   :  { %406 = vmatpush.bf16.msra.mxu1 %v722_v13  ;;  %v529_v44 = vor.u32 %v701_v38, %v526_v39  ;;  %v743_v46 = vld [vmem:[%s955_s1 + $0x108] sm:$0xff]  ;;  %v742_v47 = vld [vmem:[%s955_s1 + $0x100] sm:$0xff]  ;;  %v707_v49 = vld [vmem:[%s956_s0 + $0x38] sm:$0xf0] }
  0x10   :  { %425 = vmatpush.bf16.msra.mxu2 %v730_v14  ;;  %v536_v48 = vld [vmem:[%s956_s0 + $0x28] sm:$0xf]  ;;  %v705_v50 = vld [vmem:[%s956_s0 + $0x2c] sm:$0xf]  ;;  %v538_v51 = vld [vmem:[%s956_s0 + $0x3c] sm:$0xf0] }
  0x11   :  { %444 = vmatpush.bf16.msra.mxu3 %v738_v15  ;;  %v544_v52 = vld [vmem:[%s956_s0 + $0x30] sm:$0xf]  ;;  %v708_v53 = vld [vmem:[%s956_s0 + $0x40] sm:$0xf0]  ;;  %v706_v54 = vld [vmem:[%s956_s0 + $0x34] sm:$0xf]  ;;  %v537_v56 = vor.u32 %v707_v49, %v536_v48  ;;  %v541_v57 = vor.u32 %v705_v50, %v538_v51 }
  0x12   :  { %388 = vmatpush.bf16.msra.mxu0 %v713_v16  ;;  %v546_v55 = vld [vmem:[%s956_s0 + $0x44] sm:$0xf0]  ;;  %v545_v58 = vor.u32 %v708_v53, %v544_v52  ;;  %v532_v60 = vld [vmem:[%s956_s0 + $0x10] sm:$0xf]  ;;  %v704_v61 = vld [vmem:[%s956_s0 + $0x20] sm:$0xf0] }
  0x13   :  { %407 = vmatpush.bf16.msra.mxu1 %v721_v17  ;;  %v549_v59 = vor.u32 %v706_v54, %v546_v55  ;;  %v552_v62 = vld [vmem:[%s956_s0 + $0x38] sm:$0xf]  ;;  %v709_v63 = vld [vmem:[%s956_s0 + $0x48] sm:$0xf0]  ;;  %v533_v0 = vor.u32 %v704_v61, %v532_v60 }
  0x14   :  { %426 = vmatpush.bf16.msra.mxu2 %v729_v18  ;;  %v553_v1 = vor.u32 %v709_v63, %v552_v62 }
  0x15   :  { %445 = vmatpush.bf16.msra.mxu3 %v737_v19 }
  0x16   :  { %389 = vmatpush.bf16.msra.mxu0 %v712_v20 }
  0x17   :  { %408 = vmatpush.bf16.msra.mxu1 %v720_v21 }
  0x18   :  { %427 = vmatpush.bf16.msra.mxu2 %v728_v22 }
  0x19   :  { %446 = vmatpush.bf16.msra.mxu3 %v736_v23 }
  0x1a   :  { %390 = vmatpush.bf16.msra.mxu0 %v711_v24 }
  0x1b   :  { %409 = vmatpush.bf16.msra.mxu1 %v719_v25 }
  0x1c   :  { %428 = vmatpush.bf16.msra.mxu2 %v727_v26 }
  0x1d   :  { %447 = vmatpush.bf16.msra.mxu3 %v735_v27 }
  0x1e   :  { %391 = vmatpush.bf16.msra.mxu0 %v710_v28  ;;  %v751_v28 = vld [vmem:[%s957_s2] ss:$0 sm:$0xff] }
  0x1f   :  { %410 = vmatpush.bf16.msra.mxu1 %v718_v29 }
  0x20   :  { %429 = vmatpush.bf16.msra.mxu2 %v726_v30 }
  0x21   :  { %448 = vmatpush.bf16.msra.mxu3 %v734_v31  ;;  %392 = vmatmul.bf16.vlgmr.msra.gmra.mxu0 %v517_v41 }
  0x22   :  { %464 = vmatpush.bf16.msrb.mxu0 %v745_v40  ;;  %411 = vmatmul.bf16.vlgmr.msra.gmra.mxu1 %v521_v42 }
  0x23   :  { %746 = vmatpush.bf16.msrb.mxu1 %v745_v40  ;;  %430 = vmatmul.bf16.vlgmr.msra.gmra.mxu2 %v525_v43 }
  0x24   :  { %449 = vmatmul.bf16.vlgmr.msra.gmra.mxu3 %v529_v44 }
  0x26   :  { %465 = vmatpush.bf16.msrb.mxu0 %v744_v45 }
  0x27   :  { %747 = vmatpush.bf16.msrb.mxu1 %v744_v45 }
  0x2a   :  { %466 = vmatpush.bf16.msrb.mxu0 %v743_v46 }
  0x2b   :  { %748 = vmatpush.bf16.msrb.mxu1 %v743_v46 }
  0x2e   :  { %467 = vmatpush.bf16.msrb.mxu0 %v742_v47 }
  0x2f   :  { %749 = vmatpush.bf16.msrb.mxu1 %v742_v47 }
  0x31   :  { %397 = vmatmul.bf16.gmra.mxu0 %v537_v56 }
  0x32   :  { %416 = vmatmul.bf16.gmra.mxu1 %v541_v57 }
  0x33   :  { %435 = vmatmul.bf16.gmra.mxu2 %v545_v58 }
  0x34   :  { %454 = vmatmul.bf16.gmra.mxu3 %v549_v59 }
  0x41   :  { %698 = vmatmul.msk.bf16.vlgmr.msrb.gmra.mxu0 %vm377_vm0, %v533_v0 }
  0x42   :  { %699 = vmatmul.msk.bf16.vlgmr.msrb.gmra.mxu1 %vm377_vm0, %v553_v1 }
  0x9e   :  { %v393_v2 = vpop.f32.mrf.mxu0 }
  0x9f   :  { %v412_v3 = vpop.f32.mrf.mxu1 }
  0xa0   :  { %v413_v15 = vadd.f32 %v412_v3, %v393_v2 }
  0xa6   :  { %v431_v4 = vpop.f32.mrf.mxu2  ;;  %v395_v6 = vpop.f32.mrf.mxu0 }
  0xa7   :  { %v450_v5 = vpop.f32.mrf.mxu3  ;;  %v414_v7 = vpop.f32.mrf.mxu1  ;;  %v432_v17 = vadd.f32 %v431_v4, %v413_v15 }
  0xa8   :  { %v415_v25 = vadd.f32 %v414_v7, %v395_v6 }
  0xa9   :  { %v451_v20 = vadd.f32 %v450_v5, %v432_v17 }
  0xae   :  { %v433_v8 = vpop.f32.mrf.mxu2  ;;  %v398_v9 = vpop.f32.mrf.mxu0 }
  0xaf   :  { %v417_v10 = vpop.f32.mrf.mxu1  ;;  %v452_v11 = vpop.f32.mrf.mxu3  ;;  %v434_v30 = vadd.f32 %v433_v8, %v415_v25 }
  0xb0   :  { %v418_v16 = vadd.f32 %v417_v10, %v398_v9 }
  0xb1   :  { %v453_v35 = vadd.f32 %v452_v11, %v434_v30 }
  0xb6   :  { %v436_v12 = vpop.f32.mrf.mxu2  ;;  %v400_v13 = vpop.f32.mrf.mxu0 }
  0xb7   :  { %v419_v14 = vpop.f32.mrf.mxu1  ;;  %v437_v18 = vadd.f32 %v436_v12, %v418_v16  ;;  %v455_v19 = vpop.f32.mrf.mxu3 }
  0xb8   :  { %v420_v26 = vadd.f32 %v419_v14, %v400_v13 }
  0xb9   :  { %v456_v21 = vadd.f32 %v455_v19, %v437_v18 }
  0xbe   :  { %v438_v22 = vpop.f32.mrf.mxu2  ;;  %v469_v23 = vpop.f32.mrf.mxu0 }
  0xbf   :  { %v474_v24 = vpop.f32.mrf.mxu1  ;;  %v470_v27 = vadd.f32 %v469_v23, %v451_v20  ;;  %v439_v31 = vadd.f32 %v438_v22, %v420_v26  ;;  %v457_v34 = vpop.f32.mrf.mxu3 }
  0xc0   :  { %v475_v29 = vadd.f32 %v474_v24, %v456_v21 }
  0xc1   :  { %v498_v32 = vadd.f32 %v751_v28, %v470_v27  ;;  %v458_v36 = vadd.f32 %v457_v34, %v439_v31 }
  0xc2   :  { %v500_v33 = vadd.f32 %v751_v28, %v475_v29 }
  0xc3   :  { %v502_v37 = vmax.f32 %v498_v32, 0.0 }
  0xc4   :  { %v504_v38 = vmax.f32 %v500_v33, 0.0 }
  0xc5   :  { %506 = vst [vmem:[%s958_s3] sm:$0xff] %v502_v37 }
  0xc6   :  { %v471_v39 = vpop.f32.mrf.mxu0  ;;  %508 = vst [vmem:[%s958_s3 + $0x10] sm:$0xff] %v504_v38 }
  0xc7   :  { %v476_v40 = vpop.f32.mrf.mxu1  ;;  %v472_v41 = vadd.f32 %v471_v39, %v453_v35 }
  0xc8   :  { %v477_v42 = vadd.f32 %v476_v40, %v458_v36 }
  0xc9   :  { %v499_v43 = vadd.f32 %v751_v28, %v472_v41 }
  0xca   :  { %v501_v44 = vadd.f32 %v751_v28, %v477_v42 }
  0xcb   :  { %v503_v45 = vmax.f32 %v499_v43, 0.0 }
  0xcc   :  { %v505_v46 = vmax.f32 %v501_v44, 0.0 }
  0xcd   :  { %507 = vst [vmem:[%s958_s3 + $0x8] sm:$0xff] %v503_v45 }
  0xce   :  { %509 = vst [vmem:[%s958_s3 + $0x18] sm:$0xff] %v505_v46 }

// kernel: resnet18_16s_forward.27
= control target key start
LH: loop header
LB: loop body
LE: loop exit
PB: predicated region body
PF: predicated region fallthrough
CT: control target
= control target key end

     0   :  { %vm73_vm0 = vcmask 523264   ;;  %s221_s1 = inlined_call_operand.vmem [shape: bf16[64,128], index: 1, kind: input, shape index: {}]   ;;  %s222_s2 = inlined_call_operand.vmem [shape: f32[1,128], index: 2, kind: input, shape index: {}]   ;;  %s223_s0 = inlined_call_operand.vmem [shape: bf16[32,64], index: 0, kind: input, shape index: {}]   ;;  %s224_s3 = inlined_call_operand.vmem [shape: f32[32,128], index: 3, kind: output, shape index: {}]  }
   0x1   :  { %v161_v0 = vld [vmem:[%s221_s1 + $0x18] sm:$0xff]  ;;  %v160_v1 = vld [vmem:[%s221_s1 + $0x10] sm:$0xff]  ;;  %v159_v2 = vld [vmem:[%s221_s1 + $0x8] sm:$0xff] }
   0x2   :  { %84 = vmatpush.bf16.msra.mxu0 %v161_v0  ;;  %162 = vmatpush.bf16.msra.mxu1 %v161_v0  ;;  %v158_v3 = vld [vmem:[%s221_s1] sm:$0xff]  ;;  %v157_v5 = vld [vmem:[%s223_s0 + $0x8] sm:$0xff] }
   0x3   :  { %v156_v4 = vld [vmem:[%s223_s0] sm:$0xff] }
   0x4   :  { %v167_v6 = vld [vmem:[%s222_s2] ss:$0 sm:$0xff] }
   0x6   :  { %85 = vmatpush.bf16.msra.mxu0 %v160_v1  ;;  %163 = vmatpush.bf16.msra.mxu1 %v160_v1 }
   0xa   :  { %86 = vmatpush.bf16.msra.mxu0 %v159_v2  ;;  %164 = vmatpush.bf16.msra.mxu1 %v159_v2 }
   0xe   :  { %87 = vmatpush.bf16.msra.mxu0 %v158_v3  ;;  %165 = vmatpush.bf16.msra.mxu1 %v158_v3 }
  0x11   :  { %154 = vmatmul.msk.bf16.vlgmr.msra.gmra.mxu0 %vm73_vm0, %v156_v4  ;;  %155 = vmatmul.msk.bf16.vlgmr.msra.gmra.mxu1 %vm73_vm0, %v157_v5 }
  0x8e   :  { %v89_v7 = vpop.f32.mrf.mxu0  ;;  %v94_v8 = vpop.f32.mrf.mxu1 }
  0x8f   :  { %v118_v9 = vadd.f32 %v167_v6, %v89_v7  ;;  %v120_v10 = vadd.f32 %v167_v6, %v94_v8 }
  0x91   :  { %122 = vst [vmem:[%s224_s3] sm:$0xff] %v118_v9 }
  0x92   :  { %124 = vst [vmem:[%s224_s3 + $0x10] sm:$0xff] %v120_v10 }
  0x96   :  { %v91_v11 = vpop.f32.mrf.mxu0  ;;  %v96_v12 = vpop.f32.mrf.mxu1 }
  0x97   :  { %v119_v13 = vadd.f32 %v167_v6, %v91_v11  ;;  %v121_v14 = vadd.f32 %v167_v6, %v96_v12 }
  0x99   :  { %123 = vst [vmem:[%s224_s3 + $0x8] sm:$0xff] %v119_v13 }
  0x9a   :  { %125 = vst [vmem:[%s224_s3 + $0x18] sm:$0xff] %v121_v14 }

// kernel: resnet18_16s_forward.30
= control target key start
LH: loop header
LB: loop body
LE: loop exit
PB: predicated region body
PF: predicated region fallthrough
CT: control target
= control target key end

     0   :  { %s1030_s12 = smov 0   ;;  %s1032_s13 = smov 0   ;;  %s1200_s0 = inlined_call_operand.vmem [shape: bf16[32,1152], index: 0, kind: input, shape index: {}]   ;;  %s1201_s1 = inlined_call_operand.vmem [shape: bf16[1152,128], index: 1, kind: input, shape index: {}]   ;;  %s1202_s2 = inlined_call_operand.vmem [shape: f32[1,128], index: 2, kind: input, shape index: {}]   ;;  %s1203_s3 = inlined_call_operand.vmem [shape: f32[32,128], index: 3, kind: output, shape index: {}]  }
   0x1   :  { %s1034_s14 = smov 0   ;;  %s1036_s15 = smov 0  }
   0x2   :  { %s1038_s16 = smov 0  }
   0x3 LB: > { %s25_s17 = sadd.s32 1, %s1003_s15  ;;  %p48_p1 = scmp.ne.s32.totalorder %s995_s13, %s991_s12  ;;  %s1007_s16 = sphi %s1038_s16, %s13_s16   ;;  %s1003_s15 = sphi %s1036_s15, %s1207_s15   ;;  %s999_s14 = sphi %s1034_s14, %s1206_s14   ;;  %s995_s13 = sphi %s1032_s13, %s1205_s13   ;;  %s991_s12 = sphi %s1030_s12, %s1204_s12  }
   0x4   : > { %p26_p0 = scmp.ge.s32.totalorder %s25_s17, 3  ;;  %p49_p2 = scmp.eq.s32.totalorder %s1007_s16, 0 }
   0x5   : > { %s41_s19 = sadd.s32 1, %s995_s13  ;;  %p748_p5 = scmp.ge.s32.totalorder %s1007_s16, 3 }
   0x6   : > { %s1209_s17 = smov (%p26_p0, %s25_s17), 0  ;;  %p50_p3 = por %p49_p2, %p48_p1 }
   0x7   : > { %s37_s18 = ssub.s32 %s1003_s15, %s1209_s17  ;;  %162 = sbr.rel (%p748_p5) target bundleno = 25 (0x19), region = 20 }
   0x8   : > { %p39_p4 = scmp.eq.s32.totalorder %s37_s18, 0 }
   0xa   : > { %s1065_s20 = scalar_select %p39_p4, %s995_s13, %s41_s19  }
   0xc   : > { %165 = sbr.rel (!%p50_p3) target bundleno = 25 (0x19), region = 24  ;;  %s167_s21 = sand.u32 (%p50_p3), 1, %s995_s13  }
   0xd   : > { %s886_s22 = smul.u32 (%p50_p3), 12, %s1003_s15 }
   0xe   : > { %s925_s23 = smul.u32 (%p50_p3), 48, %s167_s21 }
   0xf   : > { %s175_s26 = scalar_lea.vmem (%p50_p3), %s1200_s0, %s886_s22 }
  0x10   : > { %v190_v0 = vld [vmem:[%s175_s26] sm:$0xff] (%p50_p3)  ;;  %v194_v2 = vld [vmem:[%s175_s26 + $0x48] sm:$0xff] (%p50_p3)  ;;  %s169_s27 = scalar_lea.vmem (%p50_p3), [#allocation2], %s925_s23  ;;  %v754_v6 = vld [vmem:[%s175_s26 + $0x50] sm:$0xf] (%p50_p3) }
  0x11   : > { %v192_v1 = vld [vmem:[%s175_s26 + $0x24] sm:$0xff]  ;;  %191 = vst [vmem:[%s169_s27] sm:$0xff] %v190_v0  ;;  %v196_v3 = vld [vmem:[%s175_s26 + $0x6c] sm:$0xff]  ;;  %v756_v7 = vld [vmem:[%s175_s26 + $0x74] sm:$0xf] }
  0x12   : > { %193 = vst [vmem:[%s169_s27 + $0xc] sm:$0xff] %v192_v1  ;;  %v750_v4 = vld [vmem:[%s175_s26 + $0x8] sm:$0xf]  ;;  %v752_v5 = vld [vmem:[%s175_s26 + $0x2c] sm:$0xf] }
  0x13   : > { %195 = vst [vmem:[%s169_s27 + $0x18] sm:$0xff] %v194_v2 }
  0x14   : > { %197 = vst [vmem:[%s169_s27 + $0x24] sm:$0xff] %v196_v3 }
  0x15   : > { %751 = vst [vmem:[%s169_s27 + $0x8] sm:$0xf] %v750_v4 }
  0x16   : > { %753 = vst [vmem:[%s169_s27 + $0x14] sm:$0xf] %v752_v5 }
  0x17   : > { %755 = vst [vmem:[%s169_s27 + $0x20] sm:$0xf] %v754_v6 }
  0x18   : > { %757 = vst [vmem:[%s169_s27 + $0x2c] sm:$0xf] %v756_v7 }
  0x19 PF: > { %p758_p6 = scmp.ge.s32.totalorder %s1007_s16, 1  ;;  %p230_p7 = scmp.lt.s32.totalorder %s1007_s16, 4 }
  0x1b   : > { %p231_p8 = pnand %p758_p6, %p230_p7 }
  0x1c   : > { %s237_s28 = sand.u32 (!%p231_p8), 1, %s991_s12   ;;  %s276_s29 = smul.u32 (!%p231_p8), 48, %s999_s14 }
  0x1d   : > { %234 = sbr.rel (%p231_p8) target bundleno = 251 (0xfb), region = 54  ;;  %p760_p10 = scmp.ne.s32.totalorder (!%p231_p8), %s999_s14, 0 }
  0x1e   : > { %s926_s30 = smul.u32 (!%p231_p8), 48, %s237_s28  ;;  %p277_p9 = scmp.lt.s32.totalorder (!%p231_p8), %s276_s29, 143 }
  0x20   : > { %s1082_s8 = scalar_lea.vmem (!%p231_p8), [#allocation2], %s926_s30 }
  0x22   : > { %s1211_s29 = smov (!%p277_p9, %s276_s29), 143  ;;  %300 = sbr.rel (%p760_p10) target bundleno = 44 (0x2c), region = 62 }
  0x23   : > { %s759_s4 = sshll.u32 %s1211_s29, 2 }
  0x24   : > { %s1080_s7 = scalar_lea.vmem %s1201_s1, %s759_s4 }
  0x27   : > { %v1009_v8 = vmov 0.0  }
  0x28   : > { %301 = vst [vmem:[%s1203_s3] sm:$0xff] %v1009_v8 }
  0x29   : > { %302 = vst [vmem:[%s1203_s3 + $0x8] sm:$0xff] %v1009_v8 }
  0x2a   : > { %303 = vst [vmem:[%s1203_s3 + $0x10] sm:$0xff] %v1009_v8 }
  0x2b   : > { %304 = vst [vmem:[%s1203_s3 + $0x18] sm:$0xff] %v1009_v8 }
  0x2c PF: > { %v900_v9 = vld [vmem:[%s1080_s7 + $0x38] sm:$0xff]  ;;  %v899_v12 = vld [vmem:[%s1080_s7 + $0x30] sm:$0xff]  ;;  %v898_v15 = vld [vmem:[%s1080_s7 + $0x28] sm:$0xff]  ;;  %p881_p11 = scmp.ne.s32.totalorder %s999_s14, 2 }
  0x2d   : > { %v908_v10 = vld [vmem:[%s1080_s7 + $0x78] sm:$0xff]  ;;  %541 = vmatpush.bf16.msra.mxu0 %v900_v9  ;;  %v907_v13 = vld [vmem:[%s1080_s7 + $0x70] sm:$0xff]  ;;  %917 = vmatpush.bf16.msra.mxu3 %v900_v9  ;;  %v906_v16 = vld [vmem:[%s1080_s7 + $0x68] sm:$0xff] }
  0x2e   : > { %v916_v11 = vld [vmem:[%s1080_s7 + $0xb8] sm:$0xff]  ;;  %560 = vmatpush.bf16.msra.mxu1 %v908_v10  ;;  %v915_v14 = vld [vmem:[%s1080_s7 + $0xb0] sm:$0xff]  ;;  %v914_v17 = vld [vmem:[%s1080_s7 + $0xa8] sm:$0xff] }
  0x2f   : > { %579 = vmatpush.bf16.msra.mxu2 %v916_v11  ;;  %v897_v18 = vld [vmem:[%s1080_s7 + $0x20] sm:$0xff]  ;;  %v896_v21 = vld [vmem:[%s1080_s7 + $0x18] sm:$0xff]  ;;  %v895_v24 = vld [vmem:[%s1080_s7 + $0x10] sm:$0xff] }
  0x30   : > { %v905_v19 = vld [vmem:[%s1080_s7 + $0x60] sm:$0xff]  ;;  %v904_v22 = vld [vmem:[%s1080_s7 + $0x58] sm:$0xff]  ;;  %v903_v25 = vld [vmem:[%s1080_s7 + $0x50] sm:$0xff] }
  0x31   : > { %542 = vmatpush.bf16.msra.mxu0 %v899_v12  ;;  %918 = vmatpush.bf16.msra.mxu3 %v899_v12  ;;  %v913_v20 = vld [vmem:[%s1080_s7 + $0xa0] sm:$0xff]  ;;  %v912_v23 = vld [vmem:[%s1080_s7 + $0x98] sm:$0xff]  ;;  %v911_v26 = vld [vmem:[%s1080_s7 + $0x90] sm:$0xff] }
  0x32   : > { %561 = vmatpush.bf16.msra.mxu1 %v907_v13  ;;  %v894_v27 = vld [vmem:[%s1080_s7 + $0x8] sm:$0xff]  ;;  %v893_v30 = vld [vmem:[%s1080_s7] sm:$0xff]  ;;  %v307_v4 = vld [vmem:[%s1203_s3 + $0x10] sm:$0xff] }
  0x33   : > { %580 = vmatpush.bf16.msra.mxu2 %v915_v14  ;;  %v902_v28 = vld [vmem:[%s1080_s7 + $0x48] sm:$0xff]  ;;  %v901_v31 = vld [vmem:[%s1080_s7 + $0x40] sm:$0xff]  ;;  %v308_v11 = vld [vmem:[%s1203_s3 + $0x18] sm:$0xff] }
  0x34   : > { %v910_v29 = vld [vmem:[%s1080_s7 + $0x88] sm:$0xff]  ;;  %v909_v32 = vld [vmem:[%s1080_s7 + $0x80] sm:$0xff] }
  0x35   : > { %543 = vmatpush.bf16.msra.mxu0 %v898_v15  ;;  %919 = vmatpush.bf16.msra.mxu3 %v898_v15  ;;  %v763_v33 = vld [vmem:[%s1082_s8] sm:$0xf]  ;;  %v888_v34 = vld [vmem:[%s1082_s8 + $0x8] sm:$0xf0]  ;;  %v887_v35 = vld [vmem:[%s1082_s8 + $0x4] sm:$0xf] }
  0x36   : > { %562 = vmatpush.bf16.msra.mxu1 %v906_v16  ;;  %v765_v36 = vld [vmem:[%s1082_s8 + $0xc] sm:$0xf0]  ;;  %v771_v37 = vld [vmem:[%s1082_s8 + $0x8] sm:$0xf]  ;;  %v889_v38 = vld [vmem:[%s1082_s8 + $0x10] sm:$0xf0]  ;;  %v764_v41 = vor.u32 %v888_v34, %v763_v33 }
  0x37   : > { %581 = vmatpush.bf16.msra.mxu2 %v914_v17  ;;  %v775_v39 = vld [vmem:[%s1082_s8 + $0x18] sm:$0xf]  ;;  %v891_v40 = vld [vmem:[%s1082_s8 + $0x20] sm:$0xf0]  ;;  %v768_v42 = vor.u32 %v887_v35, %v765_v36  ;;  %v772_v43 = vor.u32 %v889_v38, %v771_v37  ;;  %v890_v45 = vld [vmem:[%s1082_s8 + $0x1c] sm:$0xf] }
  0x38   : > { %v776_v44 = vor.u32 %v891_v40, %v775_v39  ;;  %v777_v46 = vld [vmem:[%s1082_s8 + $0x24] sm:$0xf0]  ;;  %v783_v47 = vld [vmem:[%s1082_s8 + $0x20] sm:$0xf]  ;;  %v892_v48 = vld [vmem:[%s1082_s8 + $0x28] sm:$0xf0] }
  0x39   : > { %544 = vmatpush.bf16.msra.mxu0 %v897_v18  ;;  %920 = vmatpush.bf16.msra.mxu3 %v897_v18  ;;  %v780_v49 = vor.u32 %v890_v45, %v777_v46  ;;  %v784_v50 = vor.u32 %v892_v48, %v783_v47  ;;  %v305_v54 = vld [vmem:[%s1203_s3] sm:$0xff]  ;;  %v306_v61 = vld [vmem:[%s1203_s3 + $0x8] sm:$0xff] }
  0x3a   : > { %563 = vmatpush.bf16.msra.mxu1 %v905_v19 }
  0x3b   : > { %582 = vmatpush.bf16.msra.mxu2 %v913_v20 }
  0x3d   : > { %545 = vmatpush.bf16.msra.mxu0 %v896_v21  ;;  %921 = vmatpush.bf16.msra.mxu3 %v896_v21 }
  0x3e   : > { %564 = vmatpush.bf16.msra.mxu1 %v904_v22 }
  0x3f   : > { %583 = vmatpush.bf16.msra.mxu2 %v912_v23 }
  0x41   : > { %546 = vmatpush.bf16.msra.mxu0 %v895_v24  ;;  %922 = vmatpush.bf16.msra.mxu3 %v895_v24 }
  0x42   : > { %565 = vmatpush.bf16.msra.mxu1 %v903_v25 }
  0x43   : > { %584 = vmatpush.bf16.msra.mxu2 %v911_v26 }
  0x45   : > { %547 = vmatpush.bf16.msra.mxu0 %v894_v27  ;;  %923 = vmatpush.bf16.msra.mxu3 %v894_v27 }
  0x46   : > { %566 = vmatpush.bf16.msra.mxu1 %v902_v28 }
  0x47   : > { %585 = vmatpush.bf16.msra.mxu2 %v910_v29 }
  0x49   : > { %548 = vmatpush.bf16.msra.mxu0 %v893_v30  ;;  %924 = vmatpush.bf16.msra.mxu3 %v893_v30 }
  0x4a   : > { %567 = vmatpush.bf16.msra.mxu1 %v901_v31 }
  0x4b   : > { %586 = vmatpush.bf16.msra.mxu2 %v909_v32 }
  0x4c   : > { %549 = vmatmul.bf16.vlgmr.msra.gmra.mxu0 %v764_v41  ;;  %554 = vmatmul.bf16.vlgmr.msra.gmra.mxu3 %v776_v44 }
  0x4d   : > { %568 = vmatmul.bf16.vlgmr.msra.gmra.mxu1 %v768_v42 }
  0x4e   : > { %587 = vmatmul.bf16.vlgmr.msra.gmra.mxu2 %v772_v43 }
  0x5d   : > { %573 = vmatmul.bf16.gmra.mxu1 %v780_v49 }
  0x5e   : > { %592 = vmatmul.bf16.gmra.mxu2 %v784_v50 }
  0xc9   : > { %v550_v52 = vpop.f32.mrf.mxu0 }
  0xca   : > { %v569_v51 = vpop.f32.mrf.mxu1 }
  0xcb   : > { %v570_v53 = vadd.f32 %v569_v51, %v550_v52 }
  0xcf   : > { %v555_v2 = vpop.f32.mrf.mxu3 }
  0xd1   : > { %v588_v55 = vpop.f32.mrf.mxu2  ;;  %v552_v59 = vpop.f32.mrf.mxu0 }
  0xd2   : > { %v589_v56 = vadd.f32 %v588_v55, %v570_v53  ;;  %v571_v57 = vpop.f32.mrf.mxu1 }
  0xd3   : > { %v572_v60 = vadd.f32 %v571_v57, %v552_v59 }
  0xd4   : > { %v598_v58 = vadd.f32 %v589_v56, %v305_v54 }
  0xd6   : > { %602 = vst [vmem:[%s1203_s3] sm:$0xff] %v598_v58 }
  0xd7   : > { %v557_v9 = vpop.f32.mrf.mxu3 }
  0xd9   : > { %v590_v62 = vpop.f32.mrf.mxu2 }
  0xda   : > { %v591_v63 = vadd.f32 %v590_v62, %v572_v60  ;;  %v574_v0 = vpop.f32.mrf.mxu1 }
  0xdb   : > { %v575_v3 = vadd.f32 %v574_v0, %v555_v2 }
  0xdc   : > { %v599_v1 = vadd.f32 %v591_v63, %v306_v61 }
  0xde   : > { %603 = vst [vmem:[%s1203_s3 + $0x8] sm:$0xff] %v599_v1 }
  0xe1   : > { %v593_v5 = vpop.f32.mrf.mxu2 }
  0xe2   : > { %v594_v6 = vadd.f32 %v593_v5, %v575_v3  ;;  %v576_v8 = vpop.f32.mrf.mxu1 }
  0xe3   : > { %v577_v10 = vadd.f32 %v576_v8, %v557_v9 }
  0xe4   : > { %v600_v7 = vadd.f32 %v594_v6, %v307_v4 }
  0xe6   : > { %604 = vst [vmem:[%s1203_s3 + $0x10] sm:$0xff] %v600_v7 }
  0xe9   : > { %v595_v12 = vpop.f32.mrf.mxu2 }
  0xea   : > { %v596_v13 = vadd.f32 %v595_v12, %v577_v10  ;;  %609 = sbr.rel (%p881_p11) target bundleno = 251 (0xfb), region = 66 }
  0xec   : > { %v601_v14 = vadd.f32 %v596_v13, %v308_v11 }
  0xee   : > { %605 = vst [vmem:[%s1203_s3 + $0x18] sm:$0xff] %v601_v14 }
  0xef   : > { %v610_v15 = vld [vmem:[%s1203_s3] sm:$0xff]  ;;  %v611_v17 = vld [vmem:[%s1203_s3 + $0x8] sm:$0xff]  ;;  %v612_v18 = vld [vmem:[%s1203_s3 + $0x10] sm:$0xff] }
  0xf0   : > { %v968_v16 = vld [vmem:[%s1202_s2] ss:$0 sm:$0xff] }
  0xf1   : > { %v618_v20 = vadd.f32 %v968_v16, %v610_v15  ;;  %v619_v21 = vadd.f32 %v968_v16, %v611_v17  ;;  %v620_v22 = vadd.f32 %v968_v16, %v612_v18 }
  0xf3   : > { %v622_v24 = vmax.f32 %v618_v20, 0.0  ;;  %v623_v25 = vmax.f32 %v619_v21, 0.0  ;;  %v624_v26 = vmax.f32 %v620_v22, 0.0 }
  0xf5   : > { %v613_v19 = vld [vmem:[%s1203_s3 + $0x18] sm:$0xff]  ;;  %626 = vst [vmem:[%s1203_s3] sm:$0xff] %v622_v24 }
  0xf6   : > { %v621_v23 = vadd.f32 %v968_v16, %v613_v19  ;;  %627 = vst [vmem:[%s1203_s3 + $0x8] sm:$0xff] %v623_v25 }
  0xf7   : > { %628 = vst [vmem:[%s1203_s3 + $0x10] sm:$0xff] %v624_v26 }
  0xf8   : > { %v625_v27 = vmax.f32 %v621_v23, 0.0 }
  0xfa   : > { %629 = vst [vmem:[%s1203_s3 + $0x18] sm:$0xff] %v625_v27 }
  0xfb PF: > { %s13_s16 = sadd.s32 1, %s1007_s16   ;;  %s1204_s12 = smov %s995_s13 }
  0xfc   : > { %p10_p12 = scmp.ge.s32.totalorder %s13_s16, 5   ;;  %s1205_s13 = smov %s1065_s20 }
  0xfd   : > { %s1206_s14 = smov %s1003_s15  ;;  %s1207_s15 = smov %s1209_s17 }
  0xfe   :  { %12 = sbr.rel (!%p10_p12) target bundleno = 3 (0x3), region = 113 }

// kernel: resnet18_16s_forward.29
= control target key start
LH: loop header
LB: loop body
LE: loop exit
PB: predicated region body
PF: predicated region fallthrough
CT: control target
= control target key end

     0   :  { %s1122_s15 = smov 0   ;;  %s1124_s16 = smov 0   ;;  %s1304_s0 = inlined_call_operand.vmem [shape: bf16[32,1152], index: 0, kind: input, shape index: {}]   ;;  %s1305_s1 = inlined_call_operand.vmem [shape: bf16[1152,128], index: 1, kind: input, shape index: {}]   ;;  %s1306_s2 = inlined_call_operand.vmem [shape: f32[1,128], index: 2, kind: input, shape index: {}]   ;;  %s1307_s3 = inlined_call_operand.vmem [shape: f32[32,128], index: 3, kind: input, shape index: {}]   ;;  %s1308_s4 = inlined_call_operand.vmem [shape: f32[32,128], index: 4, kind: output, shape index: {}]  }
   0x1   :  { %s1126_s17 = smov 0   ;;  %s1128_s18 = smov 0  }
   0x2   :  { %s1130_s19 = smov 0  }
   0x3 LB: > { %s26_s20 = sadd.s32 1, %s1090_s18  ;;  %p49_p1 = scmp.ne.s32.totalorder %s1082_s16, %s1078_s15  ;;  %s1094_s19 = sphi %s1130_s19, %s14_s19   ;;  %s1090_s18 = sphi %s1128_s18, %s1312_s18   ;;  %s1086_s17 = sphi %s1126_s17, %s1311_s17   ;;  %s1082_s16 = sphi %s1124_s16, %s1310_s16   ;;  %s1078_s15 = sphi %s1122_s15, %s1309_s15  }
   0x4   : > { %p27_p0 = scmp.ge.s32.totalorder %s26_s20, 3  ;;  %p50_p2 = scmp.eq.s32.totalorder %s1094_s19, 0 }
   0x5   : > { %s42_s22 = sadd.s32 1, %s1082_s16  ;;  %p835_p5 = scmp.ge.s32.totalorder %s1094_s19, 3 }
   0x6   : > { %s1314_s20 = smov (%p27_p0, %s26_s20), 0  ;;  %p51_p3 = por %p50_p2, %p49_p1 }
   0x7   : > { %s38_s21 = ssub.s32 %s1090_s18, %s1314_s20  ;;  %203 = sbr.rel (%p835_p5) target bundleno = 25 (0x19), region = 24 }
   0x8   : > { %p40_p4 = scmp.eq.s32.totalorder %s38_s21, 0 }
   0xa   : > { %s1157_s23 = scalar_select %p40_p4, %s1082_s16, %s42_s22  }
   0xc   : > { %206 = sbr.rel (!%p51_p3) target bundleno = 25 (0x19), region = 28  ;;  %s208_s24 = sand.u32 (%p51_p3), 1, %s1082_s16  }
   0xd   : > { %s973_s25 = smul.u32 (%p51_p3), 12, %s1090_s18 }
   0xe   : > { %s1012_s26 = smul.u32 (%p51_p3), 48, %s208_s24 }
   0xf   : > { %s216_s29 = scalar_lea.vmem (%p51_p3), %s1304_s0, %s973_s25 }
  0x10   : > { %v231_v0 = vld [vmem:[%s216_s29] sm:$0xff] (%p51_p3)  ;;  %v235_v2 = vld [vmem:[%s216_s29 + $0x48] sm:$0xff] (%p51_p3)  ;;  %s210_s30 = scalar_lea.vmem (%p51_p3), [#allocation2], %s1012_s26  ;;  %v841_v6 = vld [vmem:[%s216_s29 + $0x50] sm:$0xf] (%p51_p3) }
  0x11   : > { %v233_v1 = vld [vmem:[%s216_s29 + $0x24] sm:$0xff]  ;;  %232 = vst [vmem:[%s210_s30] sm:$0xff] %v231_v0  ;;  %v237_v3 = vld [vmem:[%s216_s29 + $0x6c] sm:$0xff]  ;;  %v843_v7 = vld [vmem:[%s216_s29 + $0x74] sm:$0xf] }
  0x12   : > { %234 = vst [vmem:[%s210_s30 + $0xc] sm:$0xff] %v233_v1  ;;  %v837_v4 = vld [vmem:[%s216_s29 + $0x8] sm:$0xf]  ;;  %v839_v5 = vld [vmem:[%s216_s29 + $0x2c] sm:$0xf] }
  0x13   : > { %236 = vst [vmem:[%s210_s30 + $0x18] sm:$0xff] %v235_v2 }
  0x14   : > { %238 = vst [vmem:[%s210_s30 + $0x24] sm:$0xff] %v237_v3 }
  0x15   : > { %838 = vst [vmem:[%s210_s30 + $0x8] sm:$0xf] %v837_v4 }
  0x16   : > { %840 = vst [vmem:[%s210_s30 + $0x14] sm:$0xf] %v839_v5 }
  0x17   : > { %842 = vst [vmem:[%s210_s30 + $0x20] sm:$0xf] %v841_v6 }
  0x18   : > { %844 = vst [vmem:[%s210_s30 + $0x2c] sm:$0xf] %v843_v7 }
  0x19 PF: > { %p845_p6 = scmp.ge.s32.totalorder %s1094_s19, 1  ;;  %p271_p7 = scmp.lt.s32.totalorder %s1094_s19, 4 }
  0x1b   : > { %p272_p8 = pnand %p845_p6, %p271_p7 }
  0x1c   : > { %s278_s5 = sand.u32 (!%p272_p8), 1, %s1078_s15   ;;  %s327_s6 = smul.u32 (!%p272_p8), 48, %s1086_s17 }
  0x1d   : > { %275 = sbr.rel (%p272_p8) target bundleno = 253 (0xfd), region = 58  ;;  %p847_p10 = scmp.ne.s32.totalorder (!%p272_p8), %s1086_s17, 0 }
  0x1e   : > { %s1013_s7 = smul.u32 (!%p272_p8), 48, %s278_s5  ;;  %p328_p9 = scmp.lt.s32.totalorder (!%p272_p8), %s327_s6, 143 }
  0x20   : > { %s1174_s12 = scalar_lea.vmem (!%p272_p8), [#allocation2], %s1013_s7 }
  0x22   : > { %s1316_s6 = smov (!%p328_p9, %s327_s6), 143  ;;  %360 = sbr.rel (%p847_p10) target bundleno = 44 (0x2c), region = 66 }
  0x23   : > { %s846_s8 = sshll.u32 %s1316_s6, 2 }
  0x24   : > { %s1172_s11 = scalar_lea.vmem %s1305_s1, %s846_s8 }
  0x27   : > { %v1096_v8 = vmov 0.0  }
  0x28   : > { %361 = vst [vmem:[%s1308_s4] sm:$0xff] %v1096_v8 }
  0x29   : > { %362 = vst [vmem:[%s1308_s4 + $0x8] sm:$0xff] %v1096_v8 }
  0x2a   : > { %363 = vst [vmem:[%s1308_s4 + $0x10] sm:$0xff] %v1096_v8 }
  0x2b   : > { %364 = vst [vmem:[%s1308_s4 + $0x18] sm:$0xff] %v1096_v8 }
  0x2c PF: > { %v987_v9 = vld [vmem:[%s1172_s11 + $0x38] sm:$0xff]  ;;  %v986_v12 = vld [vmem:[%s1172_s11 + $0x30] sm:$0xff]  ;;  %v985_v15 = vld [vmem:[%s1172_s11 + $0x28] sm:$0xff]  ;;  %p968_p11 = scmp.ne.s32.totalorder %s1086_s17, 2 }
  0x2d   : > { %v995_v10 = vld [vmem:[%s1172_s11 + $0x78] sm:$0xff]  ;;  %601 = vmatpush.bf16.msra.mxu0 %v987_v9  ;;  %v994_v13 = vld [vmem:[%s1172_s11 + $0x70] sm:$0xff]  ;;  %1004 = vmatpush.bf16.msra.mxu3 %v987_v9  ;;  %v993_v16 = vld [vmem:[%s1172_s11 + $0x68] sm:$0xff] }
  0x2e   : > { %v1003_v11 = vld [vmem:[%s1172_s11 + $0xb8] sm:$0xff]  ;;  %620 = vmatpush.bf16.msra.mxu1 %v995_v10  ;;  %v1002_v14 = vld [vmem:[%s1172_s11 + $0xb0] sm:$0xff]  ;;  %v1001_v17 = vld [vmem:[%s1172_s11 + $0xa8] sm:$0xff] }
  0x2f   : > { %639 = vmatpush.bf16.msra.mxu2 %v1003_v11  ;;  %v984_v18 = vld [vmem:[%s1172_s11 + $0x20] sm:$0xff]  ;;  %v983_v21 = vld [vmem:[%s1172_s11 + $0x18] sm:$0xff]  ;;  %v982_v24 = vld [vmem:[%s1172_s11 + $0x10] sm:$0xff] }
  0x30   : > { %v992_v19 = vld [vmem:[%s1172_s11 + $0x60] sm:$0xff]  ;;  %v991_v22 = vld [vmem:[%s1172_s11 + $0x58] sm:$0xff]  ;;  %v990_v25 = vld [vmem:[%s1172_s11 + $0x50] sm:$0xff] }
  0x31   : > { %602 = vmatpush.bf16.msra.mxu0 %v986_v12  ;;  %1005 = vmatpush.bf16.msra.mxu3 %v986_v12  ;;  %v1000_v20 = vld [vmem:[%s1172_s11 + $0xa0] sm:$0xff]  ;;  %v999_v23 = vld [vmem:[%s1172_s11 + $0x98] sm:$0xff]  ;;  %v998_v26 = vld [vmem:[%s1172_s11 + $0x90] sm:$0xff] }
  0x32   : > { %621 = vmatpush.bf16.msra.mxu1 %v994_v13  ;;  %v981_v27 = vld [vmem:[%s1172_s11 + $0x8] sm:$0xff]  ;;  %v980_v30 = vld [vmem:[%s1172_s11] sm:$0xff]  ;;  %v367_v4 = vld [vmem:[%s1308_s4 + $0x10] sm:$0xff] }
  0x33   : > { %640 = vmatpush.bf16.msra.mxu2 %v1002_v14  ;;  %v989_v28 = vld [vmem:[%s1172_s11 + $0x48] sm:$0xff]  ;;  %v988_v31 = vld [vmem:[%s1172_s11 + $0x40] sm:$0xff]  ;;  %v368_v11 = vld [vmem:[%s1308_s4 + $0x18] sm:$0xff] }
  0x34   : > { %v997_v29 = vld [vmem:[%s1172_s11 + $0x88] sm:$0xff]  ;;  %v996_v32 = vld [vmem:[%s1172_s11 + $0x80] sm:$0xff] }
  0x35   : > { %603 = vmatpush.bf16.msra.mxu0 %v985_v15  ;;  %1006 = vmatpush.bf16.msra.mxu3 %v985_v15  ;;  %v850_v33 = vld [vmem:[%s1174_s12] sm:$0xf]  ;;  %v975_v34 = vld [vmem:[%s1174_s12 + $0x8] sm:$0xf0]  ;;  %v974_v35 = vld [vmem:[%s1174_s12 + $0x4] sm:$0xf] }
  0x36   : > { %622 = vmatpush.bf16.msra.mxu1 %v993_v16  ;;  %v852_v36 = vld [vmem:[%s1174_s12 + $0xc] sm:$0xf0]  ;;  %v858_v37 = vld [vmem:[%s1174_s12 + $0x8] sm:$0xf]  ;;  %v976_v38 = vld [vmem:[%s1174_s12 + $0x10] sm:$0xf0]  ;;  %v851_v41 = vor.u32 %v975_v34, %v850_v33 }
  0x37   : > { %641 = vmatpush.bf16.msra.mxu2 %v1001_v17  ;;  %v862_v39 = vld [vmem:[%s1174_s12 + $0x18] sm:$0xf]  ;;  %v978_v40 = vld [vmem:[%s1174_s12 + $0x20] sm:$0xf0]  ;;  %v855_v42 = vor.u32 %v974_v35, %v852_v36  ;;  %v859_v43 = vor.u32 %v976_v38, %v858_v37  ;;  %v977_v45 = vld [vmem:[%s1174_s12 + $0x1c] sm:$0xf] }
  0x38   : > { %v863_v44 = vor.u32 %v978_v40, %v862_v39  ;;  %v864_v46 = vld [vmem:[%s1174_s12 + $0x24] sm:$0xf0]  ;;  %v870_v47 = vld [vmem:[%s1174_s12 + $0x20] sm:$0xf]  ;;  %v979_v48 = vld [vmem:[%s1174_s12 + $0x28] sm:$0xf0] }
  0x39   : > { %604 = vmatpush.bf16.msra.mxu0 %v984_v18  ;;  %1007 = vmatpush.bf16.msra.mxu3 %v984_v18  ;;  %v867_v49 = vor.u32 %v977_v45, %v864_v46  ;;  %v871_v50 = vor.u32 %v979_v48, %v870_v47  ;;  %v365_v54 = vld [vmem:[%s1308_s4] sm:$0xff]  ;;  %v366_v61 = vld [vmem:[%s1308_s4 + $0x8] sm:$0xff] }
  0x3a   : > { %623 = vmatpush.bf16.msra.mxu1 %v992_v19 }
  0x3b   : > { %642 = vmatpush.bf16.msra.mxu2 %v1000_v20 }
  0x3d   : > { %605 = vmatpush.bf16.msra.mxu0 %v983_v21  ;;  %1008 = vmatpush.bf16.msra.mxu3 %v983_v21 }
  0x3e   : > { %624 = vmatpush.bf16.msra.mxu1 %v991_v22 }
  0x3f   : > { %643 = vmatpush.bf16.msra.mxu2 %v999_v23 }
  0x41   : > { %606 = vmatpush.bf16.msra.mxu0 %v982_v24  ;;  %1009 = vmatpush.bf16.msra.mxu3 %v982_v24 }
  0x42   : > { %625 = vmatpush.bf16.msra.mxu1 %v990_v25 }
  0x43   : > { %644 = vmatpush.bf16.msra.mxu2 %v998_v26 }
  0x45   : > { %607 = vmatpush.bf16.msra.mxu0 %v981_v27  ;;  %1010 = vmatpush.bf16.msra.mxu3 %v981_v27 }
  0x46   : > { %626 = vmatpush.bf16.msra.mxu1 %v989_v28 }
  0x47   : > { %645 = vmatpush.bf16.msra.mxu2 %v997_v29 }
  0x49   : > { %608 = vmatpush.bf16.msra.mxu0 %v980_v30  ;;  %1011 = vmatpush.bf16.msra.mxu3 %v980_v30 }
  0x4a   : > { %627 = vmatpush.bf16.msra.mxu1 %v988_v31 }
  0x4b   : > { %646 = vmatpush.bf16.msra.mxu2 %v996_v32 }
  0x4c   : > { %609 = vmatmul.bf16.vlgmr.msra.gmra.mxu0 %v851_v41  ;;  %614 = vmatmul.bf16.vlgmr.msra.gmra.mxu3 %v863_v44 }
  0x4d   : > { %628 = vmatmul.bf16.vlgmr.msra.gmra.mxu1 %v855_v42 }
  0x4e   : > { %647 = vmatmul.bf16.vlgmr.msra.gmra.mxu2 %v859_v43 }
  0x5d   : > { %633 = vmatmul.bf16.gmra.mxu1 %v867_v49 }
  0x5e   : > { %652 = vmatmul.bf16.gmra.mxu2 %v871_v50 }
  0xc9   : > { %v610_v52 = vpop.f32.mrf.mxu0 }
  0xca   : > { %v629_v51 = vpop.f32.mrf.mxu1 }
  0xcb   : > { %v630_v53 = vadd.f32 %v629_v51, %v610_v52 }
  0xcf   : > { %v615_v2 = vpop.f32.mrf.mxu3 }
  0xd1   : > { %v648_v55 = vpop.f32.mrf.mxu2  ;;  %v612_v59 = vpop.f32.mrf.mxu0 }
  0xd2   : > { %v649_v56 = vadd.f32 %v648_v55, %v630_v53  ;;  %v631_v57 = vpop.f32.mrf.mxu1 }
  0xd3   : > { %v632_v60 = vadd.f32 %v631_v57, %v612_v59 }
  0xd4   : > { %v658_v58 = vadd.f32 %v649_v56, %v365_v54 }
  0xd6   : > { %662 = vst [vmem:[%s1308_s4] sm:$0xff] %v658_v58 }
  0xd7   : > { %v617_v9 = vpop.f32.mrf.mxu3 }
  0xd9   : > { %v650_v62 = vpop.f32.mrf.mxu2 }
  0xda   : > { %v651_v63 = vadd.f32 %v650_v62, %v632_v60  ;;  %v634_v0 = vpop.f32.mrf.mxu1 }
  0xdb   : > { %v635_v3 = vadd.f32 %v634_v0, %v615_v2 }
  0xdc   : > { %v659_v1 = vadd.f32 %v651_v63, %v366_v61 }
  0xde   : > { %663 = vst [vmem:[%s1308_s4 + $0x8] sm:$0xff] %v659_v1 }
  0xe1   : > { %v653_v5 = vpop.f32.mrf.mxu2 }
  0xe2   : > { %v654_v6 = vadd.f32 %v653_v5, %v635_v3  ;;  %v636_v8 = vpop.f32.mrf.mxu1 }
  0xe3   : > { %v637_v10 = vadd.f32 %v636_v8, %v617_v9 }
  0xe4   : > { %v660_v7 = vadd.f32 %v654_v6, %v367_v4 }
  0xe6   : > { %664 = vst [vmem:[%s1308_s4 + $0x10] sm:$0xff] %v660_v7 }
  0xe9   : > { %v655_v12 = vpop.f32.mrf.mxu2 }
  0xea   : > { %v656_v13 = vadd.f32 %v655_v12, %v637_v10  ;;  %669 = sbr.rel (%p968_p11) target bundleno = 253 (0xfd), region = 70 }
  0xec   : > { %v661_v14 = vadd.f32 %v656_v13, %v368_v11 }
  0xee   : > { %665 = vst [vmem:[%s1308_s4 + $0x18] sm:$0xff] %v661_v14 }
  0xef   : > { %v670_v15 = vld [vmem:[%s1308_s4] sm:$0xff]  ;;  %v671_v18 = vld [vmem:[%s1308_s4 + $0x8] sm:$0xff]  ;;  %v672_v22 = vld [vmem:[%s1308_s4 + $0x10] sm:$0xff] }
  0xf0   : > { %v1055_v16 = vld [vmem:[%s1306_s2] ss:$0 sm:$0xff]  ;;  %v683_v19 = vld [vmem:[%s1307_s3 + $0x8] sm:$0xff]  ;;  %v684_v23 = vld [vmem:[%s1307_s3 + $0x10] sm:$0xff] }
  0xf1   : > { %v682_v17 = vld [vmem:[%s1307_s3] sm:$0xff]  ;;  %v678_v20 = vadd.f32 %v1055_v16, %v670_v15  ;;  %v679_v21 = vadd.f32 %v1055_v16, %v671_v18  ;;  %v680_v25 = vadd.f32 %v1055_v16, %v672_v22  ;;  %v685_v27 = vld [vmem:[%s1307_s3 + $0x18] sm:$0xff] }
  0xf3   : > { %v686_v28 = vadd.f32 %v682_v17, %v678_v20  ;;  %v687_v29 = vadd.f32 %v683_v19, %v679_v21  ;;  %v688_v30 = vadd.f32 %v684_v23, %v680_v25 }
  0xf5   : > { %v673_v24 = vld [vmem:[%s1308_s4 + $0x18] sm:$0xff]  ;;  %v690_v32 = vmax.f32 %v686_v28, 0.0  ;;  %v691_v33 = vmax.f32 %v687_v29, 0.0  ;;  %v692_v34 = vmax.f32 %v688_v30, 0.0 }
  0xf6   : > { %v681_v26 = vadd.f32 %v1055_v16, %v673_v24 }
  0xf7   : > { %694 = vst [vmem:[%s1308_s4] sm:$0xff] %v690_v32 }
  0xf8   : > { %v689_v31 = vadd.f32 %v685_v27, %v681_v26  ;;  %695 = vst [vmem:[%s1308_s4 + $0x8] sm:$0xff] %v691_v33 }
  0xf9   : > { %696 = vst [vmem:[%s1308_s4 + $0x10] sm:$0xff] %v692_v34 }
  0xfa   : > { %v693_v35 = vmax.f32 %v689_v31, 0.0 }
  0xfc   : > { %697 = vst [vmem:[%s1308_s4 + $0x18] sm:$0xff] %v693_v35 }
  0xfd PF: > { %s14_s19 = sadd.s32 1, %s1094_s19   ;;  %s1309_s15 = smov %s1082_s16 }
  0xfe   : > { %p11_p12 = scmp.ge.s32.totalorder %s14_s19, 5   ;;  %s1310_s16 = smov %s1157_s23 }
  0xff   : > { %s1311_s17 = smov %s1090_s18  ;;  %s1312_s18 = smov %s1314_s20 }
 0x100   :  { %13 = sbr.rel (!%p11_p12) target bundleno = 3 (0x3), region = 120 }

// kernel: resnet18_16s_forward.33
= control target key start
LH: loop header
LB: loop body
LE: loop exit
PB: predicated region body
PF: predicated region fallthrough
CT: control target
= control target key end

     0   :  { %s1128_s12 = smov 0   ;;  %s1130_s13 = smov 0   ;;  %s1306_s0 = inlined_call_operand.vmem [shape: bf16[8,1152], index: 0, kind: input, shape index: {}]   ;;  %s1307_s1 = inlined_call_operand.vmem [shape: bf16[1152,256], index: 1, kind: input, shape index: {}]   ;;  %s1308_s2 = inlined_call_operand.vmem [shape: f32[1,256], index: 2, kind: input, shape index: {}]   ;;  %s1309_s3 = inlined_call_operand.vmem [shape: f32[8,256], index: 3, kind: output, shape index: {}]  }
   0x1   :  { %s1132_s14 = smov 0  }
   0x2 LB: > { %s25_s15 = sadd.s32 1, %s1101_s13  ;;  %p807_p0 = scmp.ge.s32.totalorder %s1105_s14, 1  ;;  %s1105_s14 = sphi %s1132_s14, %s13_s14   ;;  %s1101_s13 = sphi %s1130_s13, %s1311_s13   ;;  %s1097_s12 = sphi %s1128_s12, %s1310_s12  }
   0x3   : > { %p26_p1 = scmp.ge.s32.totalorder %s25_s15, 3  ;;  %p194_p2 = scmp.lt.s32.totalorder %s1105_s14, 4 }
   0x5   : > { %s1313_s15 = smov (%p26_p1, %s25_s15), 0  ;;  %p195_p3 = pnand %p807_p0, %p194_p2 }
   0x6   : > { %s240_s16 = smul.u32 (!%p195_p3), 3, %s1097_s12  ;;  %p811_p6 = scmp.ne.s32.totalorder (!%p195_p3), %s1097_s12, 0 }
   0x7   : > { %198 = sbr.rel (%p195_p3) target bundleno = 234 (0xea), region = 32 }
   0x8   : > { %s250_s17 = smul.u32 (!%p195_p3), 48, %s1097_s12  ;;  %p243_p4 = scmp.lt.s32.totalorder (!%p195_p3), %s240_s16, 8 }
   0xa   : > { %p252_p5 = scmp.lt.s32.totalorder (!%p195_p3), %s250_s17, 143 }
   0xc   : > { %s1315_s16 = smov (!%p243_p4, %s240_s16), 8  ;;  %s1317_s17 = smov (!%p252_p5, %s250_s17), 143 }
   0xd   : > { %s808_s18 = sshll.u32 %s1315_s16, 2  ;;  %s1009_s22 = sshll.u32 %s1317_s17, 3 }
   0xe   : > { %s1153_s21 = scalar_lea.vmem %s1306_s0, %s808_s18  ;;  %s1158_s25 = scalar_lea.vmem %s1307_s1, %s1009_s22 }
   0xf   : > { %280 = sbr.rel (%p811_p6) target bundleno = 23 (0x17), region = 36 }
  0x14   : > { %v1107_v0 = vmov 0.0  }
  0x15   : > { %281 = vst [vmem:[%s1309_s3] sm:$0xff] %v1107_v0 }
  0x16   : > { %282 = vst [vmem:[%s1309_s3 + $0x8] sm:$0xff] %v1107_v0 }
  0x17 PF: > { %v870_v1 = vld [vmem:[%s1158_s25 + $0x70] sm:$0xf]  ;;  %v1025_v2 = vld [vmem:[%s1158_s25 + $0x74] sm:$0xf0]  ;;  %v862_v6 = vld [vmem:[%s1158_s25 + $0x60] sm:$0xf] }
  0x18   : > { %v934_v3 = vld [vmem:[%s1158_s25 + $0xf0] sm:$0xf]  ;;  %v871_v4 = vor.u32 %v1025_v2, %v870_v1  ;;  %v1041_v5 = vld [vmem:[%s1158_s25 + $0xf4] sm:$0xf0]  ;;  %v1023_v7 = vld [vmem:[%s1158_s25 + $0x64] sm:$0xf0] }
  0x19   : > { %v935_v8 = vor.u32 %v1041_v5, %v934_v3  ;;  %v926_v9 = vld [vmem:[%s1158_s25 + $0xe0] sm:$0xf]  ;;  %v1039_v10 = vld [vmem:[%s1158_s25 + $0xe4] sm:$0xf0]  ;;  %v863_v11 = vor.u32 %v1023_v7, %v862_v6  ;;  %v854_v12 = vld [vmem:[%s1158_s25 + $0x50] sm:$0xf] }
  0x1a   : > { %586 = vmatpush.bf16.msra.mxu0 %v871_v4  ;;  %v927_v13 = vor.u32 %v1039_v10, %v926_v9  ;;  %v1021_v14 = vld [vmem:[%s1158_s25 + $0x54] sm:$0xf0]  ;;  %v998_v15 = vld [vmem:[%s1158_s25 + $0x170] sm:$0xf]  ;;  %v990_v20 = vld [vmem:[%s1158_s25 + $0x160] sm:$0xf] }
  0x1b   : > { %599 = vmatpush.bf16.msra.mxu1 %v935_v8  ;;  %v1057_v16 = vld [vmem:[%s1158_s25 + $0x174] sm:$0xf0]  ;;  %v918_v17 = vld [vmem:[%s1158_s25 + $0xd0] sm:$0xf]  ;;  %v1055_v21 = vld [vmem:[%s1158_s25 + $0x164] sm:$0xf0]  ;;  %v855_v23 = vor.u32 %v1021_v14, %v854_v12 }
  0x1c   : > { %v1037_v18 = vld [vmem:[%s1158_s25 + $0xd4] sm:$0xf0]  ;;  %v999_v19 = vor.u32 %v1057_v16, %v998_v15  ;;  %v1024_v22 = vld [vmem:[%s1158_s25 + $0x74] sm:$0xf]  ;;  %v846_v24 = vld [vmem:[%s1158_s25 + $0x40] sm:$0xf]  ;;  %v991_v26 = vor.u32 %v1055_v21, %v990_v20 }
  0x1d   : > { %v1019_v25 = vld [vmem:[%s1158_s25 + $0x44] sm:$0xf0]  ;;  %v872_v27 = vld [vmem:[%s1158_s25 + $0x78] sm:$0xf0]  ;;  %v919_v28 = vor.u32 %v1037_v18, %v918_v17  ;;  %v910_v29 = vld [vmem:[%s1158_s25 + $0xc0] sm:$0xf] }
  0x1e   : > { %587 = vmatpush.bf16.msra.mxu0 %v863_v11  ;;  %612 = vmatpush.bf16.msra.mxu2 %v999_v19  ;;  %v1035_v30 = vld [vmem:[%s1158_s25 + $0xc4] sm:$0xf0]  ;;  %v875_v31 = vor.u32 %v1024_v22, %v872_v27  ;;  %v982_v32 = vld [vmem:[%s1158_s25 + $0x150] sm:$0xf]  ;;  %v1053_v33 = vld [vmem:[%s1158_s25 + $0x154] sm:$0xf0]  ;;  %v847_v37 = vor.u32 %v1019_v25, %v846_v24 }
  0x1f   : > { %600 = vmatpush.bf16.msra.mxu1 %v927_v13  ;;  %v1022_v34 = vld [vmem:[%s1158_s25 + $0x64] sm:$0xf]  ;;  %v864_v35 = vld [vmem:[%s1158_s25 + $0x68] sm:$0xf0]  ;;  %v838_v38 = vld [vmem:[%s1158_s25 + $0x30] sm:$0xf]  ;;  %v983_v40 = vor.u32 %v1053_v33, %v982_v32  ;;  %v911_v42 = vor.u32 %v1035_v30, %v910_v29 }
  0x20   : > { %625 = vmatpush.bf16.msra.mxu3 %v875_v31  ;;  %v867_v36 = vor.u32 %v1022_v34, %v864_v35  ;;  %v1017_v39 = vld [vmem:[%s1158_s25 + $0x34] sm:$0xf0]  ;;  %v974_v41 = vld [vmem:[%s1158_s25 + $0x140] sm:$0xf]  ;;  %v1051_v43 = vld [vmem:[%s1158_s25 + $0x144] sm:$0xf0] }
  0x21   : > { %v1020_v44 = vld [vmem:[%s1158_s25 + $0x54] sm:$0xf]  ;;  %v856_v45 = vld [vmem:[%s1158_s25 + $0x58] sm:$0xf0]  ;;  %v902_v46 = vld [vmem:[%s1158_s25 + $0xb0] sm:$0xf]  ;;  %v839_v49 = vor.u32 %v1017_v39, %v838_v38  ;;  %v975_v51 = vor.u32 %v1051_v43, %v974_v41 }
  0x22   : > { %588 = vmatpush.bf16.msra.mxu0 %v855_v23  ;;  %613 = vmatpush.bf16.msra.mxu2 %v991_v26  ;;  %v1033_v47 = vld [vmem:[%s1158_s25 + $0xb4] sm:$0xf0]  ;;  %v859_v48 = vor.u32 %v1020_v44, %v856_v45  ;;  %v830_v50 = vld [vmem:[%s1158_s25 + $0x20] sm:$0xf]  ;;  %v1018_v52 = vld [vmem:[%s1158_s25 + $0x44] sm:$0xf] }
  0x23   : > { %601 = vmatpush.bf16.msra.mxu1 %v919_v28  ;;  %v848_v53 = vld [vmem:[%s1158_s25 + $0x48] sm:$0xf0]  ;;  %v903_v54 = vor.u32 %v1033_v47, %v902_v46  ;;  %v1015_v55 = vld [vmem:[%s1158_s25 + $0x24] sm:$0xf0]  ;;  %v966_v56 = vld [vmem:[%s1158_s25 + $0x130] sm:$0xf] }
  0x24   : > { %626 = vmatpush.bf16.msra.mxu3 %v867_v36  ;;  %v1049_v57 = vld [vmem:[%s1158_s25 + $0x134] sm:$0xf0]  ;;  %v894_v58 = vld [vmem:[%s1158_s25 + $0xa0] sm:$0xf]  ;;  %v1031_v59 = vld [vmem:[%s1158_s25 + $0xa4] sm:$0xf0]  ;;  %v851_v60 = vor.u32 %v1018_v52, %v848_v53  ;;  %v831_v61 = vor.u32 %v1015_v55, %v830_v50 }
  0x25   : > { %v822_v62 = vld [vmem:[%s1158_s25 + $0x10] sm:$0xf]  ;;  %v967_v63 = vor.u32 %v1049_v57, %v966_v56  ;;  %v1016_v0 = vld [vmem:[%s1158_s25 + $0x34] sm:$0xf]  ;;  %v840_v1 = vld [vmem:[%s1158_s25 + $0x38] sm:$0xf0]  ;;  %v895_v2 = vor.u32 %v1031_v59, %v894_v58 }
  0x26   : > { %589 = vmatpush.bf16.msra.mxu0 %v847_v37  ;;  %614 = vmatpush.bf16.msra.mxu2 %v983_v40  ;;  %v1013_v3 = vld [vmem:[%s1158_s25 + $0x14] sm:$0xf0]  ;;  %v958_v4 = vld [vmem:[%s1158_s25 + $0x120] sm:$0xf]  ;;  %v1047_v5 = vld [vmem:[%s1158_s25 + $0x124] sm:$0xf0]  ;;  %v843_v10 = vor.u32 %v1016_v0, %v840_v1 }
  0x27   : > { %602 = vmatpush.bf16.msra.mxu1 %v911_v42  ;;  %v886_v6 = vld [vmem:[%s1158_s25 + $0x90] sm:$0xf]  ;;  %v1029_v7 = vld [vmem:[%s1158_s25 + $0x94] sm:$0xf0]  ;;  %v814_v8 = vld [vmem:[%s1158_s25] sm:$0xf]  ;;  %v823_v11 = vor.u32 %v1013_v3, %v822_v62  ;;  %v959_v12 = vor.u32 %v1047_v5, %v958_v4 }
  0x28   : > { %627 = vmatpush.bf16.msra.mxu3 %v859_v48  ;;  %v1011_v9 = vld [vmem:[%s1158_s25 + $0x4] sm:$0xf0]  ;;  %v1014_v13 = vld [vmem:[%s1158_s25 + $0x24] sm:$0xf]  ;;  %v832_v14 = vld [vmem:[%s1158_s25 + $0x28] sm:$0xf0]  ;;  %v887_v16 = vor.u32 %v1029_v7, %v886_v6 }
  0x29   : > { %v285_v15 = vld [vmem:[%s1153_s21] sm:$0xff]  ;;  %v950_v18 = vld [vmem:[%s1158_s25 + $0x110] sm:$0xf]  ;;  %v1045_v19 = vld [vmem:[%s1158_s25 + $0x114] sm:$0xf0]  ;;  %v835_v25 = vor.u32 %v1014_v13, %v832_v14  ;;  %v815_v27 = vor.u32 %v1011_v9, %v814_v8  ;;  %p1004_p7 = scmp.ne.s32.totalorder %s1097_s12, 2 }
  0x2a   : > { %590 = vmatpush.bf16.msra.mxu0 %v839_v49  ;;  %615 = vmatpush.bf16.msra.mxu2 %v975_v51  ;;  %v878_v17 = vld [vmem:[%s1158_s25 + $0x80] sm:$0xf]  ;;  %v1027_v20 = vld [vmem:[%s1158_s25 + $0x84] sm:$0xf0]  ;;  %v1040_v21 = vld [vmem:[%s1158_s25 + $0xf4] sm:$0xf]  ;;  %v337_v26 = vunpack.c.l.b16 %v285_v15  ;;  %v951_v28 = vor.u32 %v1045_v19, %v950_v18  ;;  %v338_v29 = vunpack.c.h.b16 %v285_v15 }
  0x2b   : > { %603 = vmatpush.bf16.msra.mxu1 %v903_v54  ;;  %v936_v22 = vld [vmem:[%s1158_s25 + $0xf8] sm:$0xf0]  ;;  %v1056_v23 = vld [vmem:[%s1158_s25 + $0x174] sm:$0xf]  ;;  %v286_v32 = vld [vmem:[%s1153_s21 + $0x8] sm:$0xf]  ;;  %v879_v33 = vor.u32 %v1027_v20, %v878_v17 }
  0x2c   : > { %628 = vmatpush.bf16.msra.mxu3 %v851_v60  ;;  %v1000_v24 = vld [vmem:[%s1158_s25 + $0x178] sm:$0xf0]  ;;  %v1012_v30 = vld [vmem:[%s1158_s25 + $0x14] sm:$0xf]  ;;  %v939_v34 = vor.u32 %v1040_v21, %v936_v22  ;;  %v942_v35 = vld [vmem:[%s1158_s25 + $0x100] sm:$0xf]  ;;  %v340_v42 = vpack.c.b16 %v337_v26, %v337_v26  ;;  %v339_v44 = vunpack.c.l.b16 %v286_v32  ;;  %v1239_v45 = vpack.c.b16 %v338_v29, %v338_v29 }
  0x2d   : > { %v824_v31 = vld [vmem:[%s1158_s25 + $0x18] sm:$0xf0]  ;;  %v1043_v36 = vld [vmem:[%s1158_s25 + $0x104] sm:$0xf0]  ;;  %v1003_v37 = vor.u32 %v1056_v23, %v1000_v24  ;;  %v1038_v38 = vld [vmem:[%s1158_s25 + $0xe4] sm:$0xf] }
  0x2e   : > { %591 = vmatpush.bf16.msra.mxu0 %v831_v61  ;;  %616 = vmatpush.bf16.msra.mxu2 %v967_v63  ;;  %v928_v39 = vld [vmem:[%s1158_s25 + $0xe8] sm:$0xf0]  ;;  %v1054_v40 = vld [vmem:[%s1158_s25 + $0x164] sm:$0xf]  ;;  %v827_v43 = vor.u32 %v1012_v30, %v824_v31  ;;  %v943_v46 = vor.u32 %v1043_v36, %v942_v35  ;;  %v1036_v51 = vld [vmem:[%s1158_s25 + $0xd4] sm:$0xf]  ;;  %v342_v55 = vpack.c.b16 %v339_v44, %v339_v44 }
  0x2f   : > { %604 = vmatpush.bf16.msra.mxu1 %v895_v2  ;;  %v992_v41 = vld [vmem:[%s1158_s25 + $0x168] sm:$0xf0]  ;;  %v1010_v47 = vld [vmem:[%s1158_s25 + $0x4] sm:$0xf]  ;;  %v931_v49 = vor.u32 %v1038_v38, %v928_v39  ;;  %v920_v52 = vld [vmem:[%s1158_s25 + $0xd8] sm:$0xf0] }
  0x30   : > { %629 = vmatpush.bf16.msra.mxu3 %v843_v10  ;;  %v816_v48 = vld [vmem:[%s1158_s25 + $0x8] sm:$0xf0]  ;;  %v995_v50 = vor.u32 %v1054_v40, %v992_v41  ;;  %v1052_v53 = vld [vmem:[%s1158_s25 + $0x154] sm:$0xf]  ;;  %v984_v54 = vld [vmem:[%s1158_s25 + $0x158] sm:$0xf0]  ;;  %v923_v57 = vor.u32 %v1036_v51, %v920_v52 }
  0x31   : > { %v819_v56 = vor.u32 %v1010_v47, %v816_v48  ;;  %v987_v58 = vor.u32 %v1052_v53, %v984_v54  ;;  %v1034_v59 = vld [vmem:[%s1158_s25 + $0xc4] sm:$0xf]  ;;  %v912_v60 = vld [vmem:[%s1158_s25 + $0xc8] sm:$0xf0]  ;;  %v1032_v1 = vld [vmem:[%s1158_s25 + $0xb4] sm:$0xf] }
  0x32   : > { %592 = vmatpush.bf16.msra.mxu0 %v823_v11  ;;  %617 = vmatpush.bf16.msra.mxu2 %v959_v12  ;;  %v1050_v61 = vld [vmem:[%s1158_s25 + $0x144] sm:$0xf]  ;;  %v976_v62 = vld [vmem:[%s1158_s25 + $0x148] sm:$0xf0]  ;;  %v915_v63 = vor.u32 %v1034_v59, %v912_v60  ;;  %v904_v2 = vld [vmem:[%s1158_s25 + $0xb8] sm:$0xf0] }
  0x33   : > { %605 = vmatpush.bf16.msra.mxu1 %v887_v16  ;;  %v979_v0 = vor.u32 %v1050_v61, %v976_v62  ;;  %v1048_v3 = vld [vmem:[%s1158_s25 + $0x134] sm:$0xf]  ;;  %v968_v4 = vld [vmem:[%s1158_s25 + $0x138] sm:$0xf0]  ;;  %v907_v5 = vor.u32 %v1032_v1, %v904_v2  ;;  %v1030_v7 = vld [vmem:[%s1158_s25 + $0xa4] sm:$0xf] }
  0x34   : > { %630 = vmatpush.bf16.msra.mxu3 %v835_v25  ;;  %v971_v6 = vor.u32 %v1048_v3, %v968_v4  ;;  %v896_v8 = vld [vmem:[%s1158_s25 + $0xa8] sm:$0xf0]  ;;  %v1046_v9 = vld [vmem:[%s1158_s25 + $0x124] sm:$0xf]  ;;  %v1028_v13 = vld [vmem:[%s1158_s25 + $0x94] sm:$0xf] }
  0x35   : > { %v960_v10 = vld [vmem:[%s1158_s25 + $0x128] sm:$0xf0]  ;;  %v899_v11 = vor.u32 %v1030_v7, %v896_v8  ;;  %v888_v14 = vld [vmem:[%s1158_s25 + $0x98] sm:$0xf0]  ;;  %v1044_v15 = vld [vmem:[%s1158_s25 + $0x114] sm:$0xf] }
  0x36   : > { %593 = vmatpush.bf16.msra.mxu0 %v815_v27  ;;  %618 = vmatpush.bf16.msra.mxu2 %v951_v28  ;;  %v963_v12 = vor.u32 %v1046_v9, %v960_v10  ;;  %v952_v16 = vld [vmem:[%s1158_s25 + $0x118] sm:$0xf0]  ;;  %v891_v17 = vor.u32 %v1028_v13, %v888_v14  ;;  %v1026_v19 = vld [vmem:[%s1158_s25 + $0x84] sm:$0xf]  ;;  %v880_v20 = vld [vmem:[%s1158_s25 + $0x88] sm:$0xf0] }
  0x37   : > { %606 = vmatpush.bf16.msra.mxu1 %v879_v33  ;;  %v955_v18 = vor.u32 %v1044_v15, %v952_v16  ;;  %v1042_v21 = vld [vmem:[%s1158_s25 + $0x104] sm:$0xf]  ;;  %v944_v22 = vld [vmem:[%s1158_s25 + $0x108] sm:$0xf0]  ;;  %v883_v23 = vor.u32 %v1026_v19, %v880_v20 }
  0x38   : > { %631 = vmatpush.bf16.msra.mxu3 %v827_v43  ;;  %v947_v24 = vor.u32 %v1042_v21, %v944_v22  ;;  %v283_v30 = vld [vmem:[%s1309_s3] sm:$0xff]  ;;  %v284_v40 = vld [vmem:[%s1309_s3 + $0x8] sm:$0xff] }
  0x39   : > { %594 = vmatmul.bf16.vlgmr.msra.gmra.mxu0 %v340_v42 }
  0x3a   : > { %638 = vmatpush.bf16.msrb.mxu0 %v939_v34  ;;  %607 = vmatmul.bf16.vlgmr.msra.gmra.mxu1 %v1239_v45 }
  0x3b   : > { %651 = vmatpush.bf16.msrb.mxu1 %v1003_v37  ;;  %619 = vmatpush.bf16.msra.mxu2 %v943_v46 }
  0x3c   : > { %632 = vmatpush.bf16.msra.mxu3 %v819_v56 }
  0x3e   : > { %639 = vmatpush.bf16.msrb.mxu0 %v931_v49  ;;  %620 = vmatmul.bf16.vlgmr.msra.gmra.mxu2 %v342_v55 }
  0x3f   : > { %652 = vmatpush.bf16.msrb.mxu1 %v995_v50  ;;  %633 = vmatmul.bf16.vlgmr.msra.gmra.mxu3 %v340_v42 }
  0x42   : > { %640 = vmatpush.bf16.msrb.mxu0 %v923_v57 }
  0x43   : > { %653 = vmatpush.bf16.msrb.mxu1 %v987_v58 }
  0x46   : > { %641 = vmatpush.bf16.msrb.mxu0 %v915_v63 }
  0x47   : > { %654 = vmatpush.bf16.msrb.mxu1 %v979_v0 }
  0x4a   : > { %642 = vmatpush.bf16.msrb.mxu0 %v907_v5 }
  0x4b   : > { %655 = vmatpush.bf16.msrb.mxu1 %v971_v6 }
  0x4e   : > { %643 = vmatpush.bf16.msrb.mxu0 %v899_v11 }
  0x4f   : > { %656 = vmatpush.bf16.msrb.mxu1 %v963_v12 }
  0x52   : > { %644 = vmatpush.bf16.msrb.mxu0 %v891_v17 }
  0x53   : > { %657 = vmatpush.bf16.msrb.mxu1 %v955_v18 }
  0x56   : > { %645 = vmatpush.bf16.msrb.mxu0 %v883_v23 }
  0x57   : > { %658 = vmatpush.bf16.msrb.mxu1 %v947_v24 }
  0x59   : > { %646 = vmatmul.bf16.vlgmr.msrb.gmra.mxu0 %v1239_v45 }
  0x5a   : > { %659 = vmatmul.bf16.vlgmr.msrb.gmra.mxu1 %v342_v55 }
  0xb6   : > { %v595_v25 = vpop.f32.mrf.mxu0 }
  0xb7   : > { %v608_v26 = vpop.f32.mrf.mxu1 }
  0xb8   : > { %v609_v27 = vadd.f32 %v608_v26, %v595_v25 }
  0xbe   : > { %v597_v28 = vpop.f32.mrf.mxu0 }
  0xbf   : > { %v610_v29 = vpop.f32.mrf.mxu1 }
  0xc1   : > { %v621_v31 = vpop.f32.mrf.mxu2 }
  0xc2   : > { %v622_v32 = vadd.f32 %v621_v31, %v609_v27  ;;  %v634_v34 = vpop.f32.mrf.mxu3 }
  0xc4   : > { %v664_v33 = vadd.f32 %v622_v32, %v283_v30 }
  0xc6   : > { %666 = vst [vmem:[%s1309_s3] sm:$0xff] %v664_v33 }
  0xc9   : > { %v623_v35 = vpop.f32.mrf.mxu2 }
  0xca   : > { %v636_v36 = vpop.f32.mrf.mxu3 }
  0xd6   : > { %v647_v37 = vpop.f32.mrf.mxu0 }
  0xd7   : > { %v648_v38 = vadd.f32 %v647_v37, %v634_v34  ;;  %v660_v39 = vpop.f32.mrf.mxu1 }
  0xd9   : > { %v661_v41 = vadd.f32 %v660_v39, %v648_v38 }
  0xdb   : > { %v665_v42 = vadd.f32 %v661_v41, %v284_v40  ;;  %671 = sbr.rel (%p1004_p7) target bundleno = 234 (0xea), region = 40 }
  0xdd   : > { %667 = vst [vmem:[%s1309_s3 + $0x8] sm:$0xff] %v665_v42 }
  0xde   : > { %v649_v43 = vpop.f32.mrf.mxu0 }
  0xdf   : > { %v662_v44 = vpop.f32.mrf.mxu1 }
  0xe0   : > { %v672_v45 = vld [vmem:[%s1309_s3] sm:$0xff] }
  0xe1   : > { %v674_v46 = vld [vmem:[%s1308_s2] sm:$0x3] }
  0xe2   : > { %v676_v48 = vperm.slane %v674_v46, 0  ;;  %v677_v49 = vperm.slane %v674_v46, 1 }
  0xe4   : > { %v673_v47 = vld [vmem:[%s1309_s3 + $0x8] sm:$0xff]  ;;  %v680_v50 = vadd.f32 %v676_v48, %v672_v45 }
  0xe5   : > { %v681_v51 = vadd.f32 %v677_v49, %v673_v47 }
  0xe6   : > { %v682_v52 = vmax.f32 %v680_v50, 0.0 }
  0xe7   : > { %v683_v53 = vmax.f32 %v681_v51, 0.0 }
  0xe8   : > { %684 = vst [vmem:[%s1309_s3] sm:$0xff] %v682_v52 }
  0xe9   : > { %685 = vst [vmem:[%s1309_s3 + $0x8] sm:$0xff] %v683_v53 }
  0xea PF: > { %s13_s14 = sadd.s32 1, %s1105_s14   ;;  %s1310_s12 = smov %s1101_s13 }
  0xeb   : > { %p10_p8 = scmp.ge.s32.totalorder %s13_s14, 5   ;;  %s1311_s13 = smov %s1313_s15 }
  0xed   :  { %12 = sbr.rel (!%p10_p8) target bundleno = 2 (0x2), region = 76 }

// kernel: resnet18_16s_forward.32
= control target key start
LH: loop header
LB: loop body
LE: loop exit
PB: predicated region body
PF: predicated region fallthrough
CT: control target
= control target key end

     0   :  { %s377_s1 = inlined_call_operand.vmem [shape: bf16[128,256], index: 1, kind: input, shape index: {}]   ;;  %s378_s0 = inlined_call_operand.vmem [shape: bf16[8,128], index: 0, kind: input, shape index: {}]   ;;  %s379_s2 = inlined_call_operand.vmem [shape: f32[1,256], index: 2, kind: input, shape index: {}]   ;;  %s380_s3 = inlined_call_operand.vmem [shape: f32[8,256], index: 3, kind: output, shape index: {}]  }
   0x1   :  { %v226_v0 = vld [vmem:[%s377_s1 + $0x70] sm:$0xf]  ;;  %v247_v1 = vld [vmem:[%s377_s1 + $0x74] sm:$0xf0]  ;;  %v246_v2 = vld [vmem:[%s377_s1 + $0x74] sm:$0xf] }
   0x2   :  { %v227_v3 = vor.u32 %v247_v1, %v226_v0  ;;  %v228_v4 = vld [vmem:[%s377_s1 + $0x78] sm:$0xf0]  ;;  %v218_v5 = vld [vmem:[%s377_s1 + $0x60] sm:$0xf]  ;;  %v245_v6 = vld [vmem:[%s377_s1 + $0x64] sm:$0xf0] }
   0x3   :  { %v231_v7 = vor.u32 %v246_v2, %v228_v4  ;;  %v244_v8 = vld [vmem:[%s377_s1 + $0x64] sm:$0xf]  ;;  %v220_v9 = vld [vmem:[%s377_s1 + $0x68] sm:$0xf0]  ;;  %v219_v10 = vor.u32 %v245_v6, %v218_v5  ;;  %v210_v12 = vld [vmem:[%s377_s1 + $0x50] sm:$0xf] }
   0x4   :  { %119 = vmatpush.bf16.msra.mxu0 %v227_v3  ;;  %v223_v11 = vor.u32 %v244_v8, %v220_v9  ;;  %v243_v13 = vld [vmem:[%s377_s1 + $0x54] sm:$0xf0]  ;;  %v242_v14 = vld [vmem:[%s377_s1 + $0x54] sm:$0xf]  ;;  %v212_v15 = vld [vmem:[%s377_s1 + $0x58] sm:$0xf0] }
   0x5   :  { %132 = vmatpush.bf16.msra.mxu1 %v231_v7  ;;  %v211_v16 = vor.u32 %v243_v13, %v210_v12  ;;  %v215_v17 = vor.u32 %v242_v14, %v212_v15  ;;  %v202_v18 = vld [vmem:[%s377_s1 + $0x40] sm:$0xf]  ;;  %v241_v19 = vld [vmem:[%s377_s1 + $0x44] sm:$0xf0]  ;;  %v240_v20 = vld [vmem:[%s377_s1 + $0x44] sm:$0xf] }
   0x6   :  { %v204_v21 = vld [vmem:[%s377_s1 + $0x48] sm:$0xf0]  ;;  %v203_v22 = vor.u32 %v241_v19, %v202_v18  ;;  %v194_v24 = vld [vmem:[%s377_s1 + $0x30] sm:$0xf]  ;;  %v239_v25 = vld [vmem:[%s377_s1 + $0x34] sm:$0xf0] }
   0x7   :  { %v207_v23 = vor.u32 %v240_v20, %v204_v21  ;;  %v238_v26 = vld [vmem:[%s377_s1 + $0x34] sm:$0xf]  ;;  %v196_v27 = vld [vmem:[%s377_s1 + $0x38] sm:$0xf0]  ;;  %v195_v28 = vor.u32 %v239_v25, %v194_v24  ;;  %v186_v30 = vld [vmem:[%s377_s1 + $0x20] sm:$0xf] }
   0x8   :  { %120 = vmatpush.bf16.msra.mxu0 %v219_v10  ;;  %v199_v29 = vor.u32 %v238_v26, %v196_v27  ;;  %v237_v31 = vld [vmem:[%s377_s1 + $0x24] sm:$0xf0]  ;;  %v236_v32 = vld [vmem:[%s377_s1 + $0x24] sm:$0xf]  ;;  %v188_v33 = vld [vmem:[%s377_s1 + $0x28] sm:$0xf0] }
   0x9   :  { %133 = vmatpush.bf16.msra.mxu1 %v223_v11  ;;  %v187_v34 = vor.u32 %v237_v31, %v186_v30  ;;  %v191_v35 = vor.u32 %v236_v32, %v188_v33  ;;  %v178_v36 = vld [vmem:[%s377_s1 + $0x10] sm:$0xf]  ;;  %v235_v37 = vld [vmem:[%s377_s1 + $0x14] sm:$0xf0]  ;;  %v234_v38 = vld [vmem:[%s377_s1 + $0x14] sm:$0xf] }
   0xa   :  { %v180_v39 = vld [vmem:[%s377_s1 + $0x18] sm:$0xf0]  ;;  %v179_v40 = vor.u32 %v235_v37, %v178_v36  ;;  %v170_v42 = vld [vmem:[%s377_s1] sm:$0xf]  ;;  %v233_v43 = vld [vmem:[%s377_s1 + $0x4] sm:$0xf0] }
   0xb   :  { %v183_v41 = vor.u32 %v234_v38, %v180_v39  ;;  %v232_v44 = vld [vmem:[%s377_s1 + $0x4] sm:$0xf]  ;;  %v172_v45 = vld [vmem:[%s377_s1 + $0x8] sm:$0xf0]  ;;  %v171_v46 = vor.u32 %v233_v43, %v170_v42  ;;  %v22_v48 = vld [vmem:[%s378_s0] sm:$0xf] }
   0xc   :  { %121 = vmatpush.bf16.msra.mxu0 %v211_v16  ;;  %v175_v47 = vor.u32 %v232_v44, %v172_v45  ;;  %v154_v49 = vld [vmem:[%s379_s2] sm:$0x3] }
   0xd   :  { %134 = vmatpush.bf16.msra.mxu1 %v215_v17  ;;  %v156_v50 = vperm.slane %v154_v49, 0  ;;  %v157_v52 = vperm.slane %v154_v49, 1 }
  0x10   :  { %122 = vmatpush.bf16.msra.mxu0 %v203_v22 }
  0x11   :  { %135 = vmatpush.bf16.msra.mxu1 %v207_v23 }
  0x14   :  { %123 = vmatpush.bf16.msra.mxu0 %v195_v28 }
  0x15   :  { %136 = vmatpush.bf16.msra.mxu1 %v199_v29 }
  0x18   :  { %124 = vmatpush.bf16.msra.mxu0 %v187_v34 }
  0x19   :  { %137 = vmatpush.bf16.msra.mxu1 %v191_v35 }
  0x1c   :  { %125 = vmatpush.bf16.msra.mxu0 %v179_v40 }
  0x1d   :  { %138 = vmatpush.bf16.msra.mxu1 %v183_v41 }
  0x20   :  { %126 = vmatpush.bf16.msra.mxu0 %v171_v46 }
  0x21   :  { %139 = vmatpush.bf16.msra.mxu1 %v175_v47 }
  0x23   :  { %127 = vmatmul.bf16.vlgmr.msra.gmra.mxu0 %v22_v48 }
  0x24   :  { %140 = vmatmul.bf16.vlgmr.msra.gmra.mxu1 %v22_v48 }
  0xa0   :  { %v128_v51 = vpop.f32.mrf.mxu0 }
  0xa1   :  { %v141_v53 = vpop.f32.mrf.mxu1  ;;  %v160_v54 = vadd.f32 %v156_v50, %v128_v51 }
  0xa2   :  { %v161_v55 = vadd.f32 %v157_v52, %v141_v53 }
  0xa3   :  { %162 = vst [vmem:[%s380_s3] sm:$0xff] %v160_v54 }
  0xa4   :  { %163 = vst [vmem:[%s380_s3 + $0x8] sm:$0xff] %v161_v55 }
  0xa8   :  { %v130_v56 = vpop.f32.mrf.mxu0 }
  0xa9   :  { %v143_v57 = vpop.f32.mrf.mxu1 }

// kernel: resnet18_16s_forward.34
= control target key start
LH: loop header
LB: loop body
LE: loop exit
PB: predicated region body
PF: predicated region fallthrough
CT: control target
= control target key end

     0   :  { %s1222_s15 = smov 0   ;;  %s1224_s16 = smov 0   ;;  %s1406_s0 = inlined_call_operand.vmem [shape: bf16[8,2304], index: 0, kind: input, shape index: {}]   ;;  %s1407_s1 = inlined_call_operand.vmem [shape: bf16[2304,256], index: 1, kind: input, shape index: {}]   ;;  %s1408_s2 = inlined_call_operand.vmem [shape: f32[1,256], index: 2, kind: input, shape index: {}]   ;;  %s1409_s3 = inlined_call_operand.vmem [shape: f32[8,256], index: 3, kind: input, shape index: {}]   ;;  %s1410_s4 = inlined_call_operand.vmem [shape: f32[8,256], index: 4, kind: output, shape index: {}]  }
   0x1   :  { %s1226_s17 = smov 0  }
   0x2 LB: > { %s26_s18 = sadd.s32 1, %s1190_s16  ;;  %p896_p0 = scmp.ge.s32.totalorder %s1194_s17, 1  ;;  %s1194_s17 = sphi %s1226_s17, %s14_s17   ;;  %s1190_s16 = sphi %s1224_s16, %s1412_s16   ;;  %s1186_s15 = sphi %s1222_s15, %s1411_s15  }
   0x3   : > { %p27_p1 = scmp.ge.s32.totalorder %s26_s18, 6  ;;  %p236_p2 = scmp.lt.s32.totalorder %s1194_s17, 7 }
   0x5   : > { %s1414_s18 = smov (%p27_p1, %s26_s18), 0  ;;  %p237_p3 = pnand %p896_p0, %p236_p2 }
   0x6   : > { %s293_s19 = smul.u32 (!%p237_p3), 3, %s1186_s15  ;;  %p900_p6 = scmp.ne.s32.totalorder (!%p237_p3), %s1186_s15, 0 }
   0x7   : > { %240 = sbr.rel (%p237_p3) target bundleno = 236 (0xec), region = 36 }
   0x8   : > { %s303_s20 = smul.u32 (!%p237_p3), 48, %s1186_s15  ;;  %p296_p4 = scmp.lt.s32.totalorder (!%p237_p3), %s293_s19, 17 }
   0xa   : > { %p305_p5 = scmp.lt.s32.totalorder (!%p237_p3), %s303_s20, 287 }
   0xc   : > { %s1416_s19 = smov (!%p296_p4, %s293_s19), 17  ;;  %s1418_s20 = smov (!%p305_p5, %s303_s20), 287 }
   0xd   : > { %s897_s21 = sshll.u32 %s1416_s19, 2  ;;  %s1098_s25 = sshll.u32 %s1418_s20, 3 }
   0xe   : > { %s1247_s24 = scalar_lea.vmem %s1406_s0, %s897_s21  ;;  %s1252_s28 = scalar_lea.vmem %s1407_s1, %s1098_s25 }
   0xf   : > { %343 = sbr.rel (%p900_p6) target bundleno = 23 (0x17), region = 40 }
  0x14   : > { %v1196_v0 = vmov 0.0  }
  0x15   : > { %344 = vst [vmem:[%s1410_s4] sm:$0xff] %v1196_v0 }
  0x16   : > { %345 = vst [vmem:[%s1410_s4 + $0x8] sm:$0xff] %v1196_v0 }
  0x17 PF: > { %v959_v1 = vld [vmem:[%s1252_s28 + $0x70] sm:$0xf]  ;;  %v1114_v2 = vld [vmem:[%s1252_s28 + $0x74] sm:$0xf0]  ;;  %v951_v6 = vld [vmem:[%s1252_s28 + $0x60] sm:$0xf] }
  0x18   : > { %v1023_v3 = vld [vmem:[%s1252_s28 + $0xf0] sm:$0xf]  ;;  %v960_v4 = vor.u32 %v1114_v2, %v959_v1  ;;  %v1130_v5 = vld [vmem:[%s1252_s28 + $0xf4] sm:$0xf0]  ;;  %v1112_v7 = vld [vmem:[%s1252_s28 + $0x64] sm:$0xf0] }
  0x19   : > { %v1024_v8 = vor.u32 %v1130_v5, %v1023_v3  ;;  %v1015_v9 = vld [vmem:[%s1252_s28 + $0xe0] sm:$0xf]  ;;  %v1128_v10 = vld [vmem:[%s1252_s28 + $0xe4] sm:$0xf0]  ;;  %v952_v11 = vor.u32 %v1112_v7, %v951_v6  ;;  %v943_v12 = vld [vmem:[%s1252_s28 + $0x50] sm:$0xf] }
  0x1a   : > { %649 = vmatpush.bf16.msra.mxu0 %v960_v4  ;;  %v1016_v13 = vor.u32 %v1128_v10, %v1015_v9  ;;  %v1110_v14 = vld [vmem:[%s1252_s28 + $0x54] sm:$0xf0]  ;;  %v1087_v15 = vld [vmem:[%s1252_s28 + $0x170] sm:$0xf]  ;;  %v1079_v20 = vld [vmem:[%s1252_s28 + $0x160] sm:$0xf] }
  0x1b   : > { %662 = vmatpush.bf16.msra.mxu1 %v1024_v8  ;;  %v1146_v16 = vld [vmem:[%s1252_s28 + $0x174] sm:$0xf0]  ;;  %v1007_v17 = vld [vmem:[%s1252_s28 + $0xd0] sm:$0xf]  ;;  %v1144_v21 = vld [vmem:[%s1252_s28 + $0x164] sm:$0xf0]  ;;  %v944_v23 = vor.u32 %v1110_v14, %v943_v12 }
  0x1c   : > { %v1126_v18 = vld [vmem:[%s1252_s28 + $0xd4] sm:$0xf0]  ;;  %v1088_v19 = vor.u32 %v1146_v16, %v1087_v15  ;;  %v1113_v22 = vld [vmem:[%s1252_s28 + $0x74] sm:$0xf]  ;;  %v935_v24 = vld [vmem:[%s1252_s28 + $0x40] sm:$0xf]  ;;  %v1080_v26 = vor.u32 %v1144_v21, %v1079_v20 }
  0x1d   : > { %v1108_v25 = vld [vmem:[%s1252_s28 + $0x44] sm:$0xf0]  ;;  %v961_v27 = vld [vmem:[%s1252_s28 + $0x78] sm:$0xf0]  ;;  %v1008_v28 = vor.u32 %v1126_v18, %v1007_v17  ;;  %v999_v29 = vld [vmem:[%s1252_s28 + $0xc0] sm:$0xf] }
  0x1e   : > { %650 = vmatpush.bf16.msra.mxu0 %v952_v11  ;;  %675 = vmatpush.bf16.msra.mxu2 %v1088_v19  ;;  %v1124_v30 = vld [vmem:[%s1252_s28 + $0xc4] sm:$0xf0]  ;;  %v964_v31 = vor.u32 %v1113_v22, %v961_v27  ;;  %v1071_v32 = vld [vmem:[%s1252_s28 + $0x150] sm:$0xf]  ;;  %v1142_v33 = vld [vmem:[%s1252_s28 + $0x154] sm:$0xf0]  ;;  %v936_v37 = vor.u32 %v1108_v25, %v935_v24 }
  0x1f   : > { %663 = vmatpush.bf16.msra.mxu1 %v1016_v13  ;;  %v1111_v34 = vld [vmem:[%s1252_s28 + $0x64] sm:$0xf]  ;;  %v953_v35 = vld [vmem:[%s1252_s28 + $0x68] sm:$0xf0]  ;;  %v927_v38 = vld [vmem:[%s1252_s28 + $0x30] sm:$0xf]  ;;  %v1072_v40 = vor.u32 %v1142_v33, %v1071_v32  ;;  %v1000_v42 = vor.u32 %v1124_v30, %v999_v29 }
  0x20   : > { %688 = vmatpush.bf16.msra.mxu3 %v964_v31  ;;  %v956_v36 = vor.u32 %v1111_v34, %v953_v35  ;;  %v1106_v39 = vld [vmem:[%s1252_s28 + $0x34] sm:$0xf0]  ;;  %v1063_v41 = vld [vmem:[%s1252_s28 + $0x140] sm:$0xf]  ;;  %v1140_v43 = vld [vmem:[%s1252_s28 + $0x144] sm:$0xf0] }
  0x21   : > { %v1109_v44 = vld [vmem:[%s1252_s28 + $0x54] sm:$0xf]  ;;  %v945_v45 = vld [vmem:[%s1252_s28 + $0x58] sm:$0xf0]  ;;  %v991_v46 = vld [vmem:[%s1252_s28 + $0xb0] sm:$0xf]  ;;  %v928_v49 = vor.u32 %v1106_v39, %v927_v38  ;;  %v1064_v51 = vor.u32 %v1140_v43, %v1063_v41 }
  0x22   : > { %651 = vmatpush.bf16.msra.mxu0 %v944_v23  ;;  %676 = vmatpush.bf16.msra.mxu2 %v1080_v26  ;;  %v1122_v47 = vld [vmem:[%s1252_s28 + $0xb4] sm:$0xf0]  ;;  %v948_v48 = vor.u32 %v1109_v44, %v945_v45  ;;  %v919_v50 = vld [vmem:[%s1252_s28 + $0x20] sm:$0xf]  ;;  %v1107_v52 = vld [vmem:[%s1252_s28 + $0x44] sm:$0xf] }
  0x23   : > { %664 = vmatpush.bf16.msra.mxu1 %v1008_v28  ;;  %v937_v53 = vld [vmem:[%s1252_s28 + $0x48] sm:$0xf0]  ;;  %v992_v54 = vor.u32 %v1122_v47, %v991_v46  ;;  %v1104_v55 = vld [vmem:[%s1252_s28 + $0x24] sm:$0xf0]  ;;  %v1055_v56 = vld [vmem:[%s1252_s28 + $0x130] sm:$0xf] }
  0x24   : > { %689 = vmatpush.bf16.msra.mxu3 %v956_v36  ;;  %v1138_v57 = vld [vmem:[%s1252_s28 + $0x134] sm:$0xf0]  ;;  %v983_v58 = vld [vmem:[%s1252_s28 + $0xa0] sm:$0xf]  ;;  %v1120_v59 = vld [vmem:[%s1252_s28 + $0xa4] sm:$0xf0]  ;;  %v940_v60 = vor.u32 %v1107_v52, %v937_v53  ;;  %v920_v61 = vor.u32 %v1104_v55, %v919_v50 }
  0x25   : > { %v911_v62 = vld [vmem:[%s1252_s28 + $0x10] sm:$0xf]  ;;  %v1056_v63 = vor.u32 %v1138_v57, %v1055_v56  ;;  %v1105_v0 = vld [vmem:[%s1252_s28 + $0x34] sm:$0xf]  ;;  %v929_v1 = vld [vmem:[%s1252_s28 + $0x38] sm:$0xf0]  ;;  %v984_v2 = vor.u32 %v1120_v59, %v983_v58 }
  0x26   : > { %652 = vmatpush.bf16.msra.mxu0 %v936_v37  ;;  %677 = vmatpush.bf16.msra.mxu2 %v1072_v40  ;;  %v1102_v3 = vld [vmem:[%s1252_s28 + $0x14] sm:$0xf0]  ;;  %v1047_v4 = vld [vmem:[%s1252_s28 + $0x120] sm:$0xf]  ;;  %v1136_v5 = vld [vmem:[%s1252_s28 + $0x124] sm:$0xf0]  ;;  %v932_v10 = vor.u32 %v1105_v0, %v929_v1 }
  0x27   : > { %665 = vmatpush.bf16.msra.mxu1 %v1000_v42  ;;  %v975_v6 = vld [vmem:[%s1252_s28 + $0x90] sm:$0xf]  ;;  %v1118_v7 = vld [vmem:[%s1252_s28 + $0x94] sm:$0xf0]  ;;  %v903_v8 = vld [vmem:[%s1252_s28] sm:$0xf]  ;;  %v912_v11 = vor.u32 %v1102_v3, %v911_v62  ;;  %v1048_v12 = vor.u32 %v1136_v5, %v1047_v4 }
  0x28   : > { %690 = vmatpush.bf16.msra.mxu3 %v948_v48  ;;  %v1100_v9 = vld [vmem:[%s1252_s28 + $0x4] sm:$0xf0]  ;;  %v1103_v13 = vld [vmem:[%s1252_s28 + $0x24] sm:$0xf]  ;;  %v921_v14 = vld [vmem:[%s1252_s28 + $0x28] sm:$0xf0]  ;;  %v976_v16 = vor.u32 %v1118_v7, %v975_v6 }
  0x29   : > { %v348_v15 = vld [vmem:[%s1247_s24] sm:$0xff]  ;;  %v1039_v18 = vld [vmem:[%s1252_s28 + $0x110] sm:$0xf]  ;;  %v1134_v19 = vld [vmem:[%s1252_s28 + $0x114] sm:$0xf0]  ;;  %v924_v25 = vor.u32 %v1103_v13, %v921_v14  ;;  %v904_v27 = vor.u32 %v1100_v9, %v903_v8  ;;  %p1093_p7 = scmp.ne.s32.totalorder %s1186_s15, 5 }
  0x2a   : > { %653 = vmatpush.bf16.msra.mxu0 %v928_v49  ;;  %678 = vmatpush.bf16.msra.mxu2 %v1064_v51  ;;  %v967_v17 = vld [vmem:[%s1252_s28 + $0x80] sm:$0xf]  ;;  %v1116_v20 = vld [vmem:[%s1252_s28 + $0x84] sm:$0xf0]  ;;  %v1129_v21 = vld [vmem:[%s1252_s28 + $0xf4] sm:$0xf]  ;;  %v400_v26 = vunpack.c.l.b16 %v348_v15  ;;  %v1040_v28 = vor.u32 %v1134_v19, %v1039_v18  ;;  %v401_v29 = vunpack.c.h.b16 %v348_v15 }
  0x2b   : > { %666 = vmatpush.bf16.msra.mxu1 %v992_v54  ;;  %v1025_v22 = vld [vmem:[%s1252_s28 + $0xf8] sm:$0xf0]  ;;  %v1145_v23 = vld [vmem:[%s1252_s28 + $0x174] sm:$0xf]  ;;  %v349_v32 = vld [vmem:[%s1247_s24 + $0x8] sm:$0xf]  ;;  %v968_v33 = vor.u32 %v1116_v20, %v967_v17 }
  0x2c   : > { %691 = vmatpush.bf16.msra.mxu3 %v940_v60  ;;  %v1089_v24 = vld [vmem:[%s1252_s28 + $0x178] sm:$0xf0]  ;;  %v1101_v30 = vld [vmem:[%s1252_s28 + $0x14] sm:$0xf]  ;;  %v1028_v34 = vor.u32 %v1129_v21, %v1025_v22  ;;  %v1031_v35 = vld [vmem:[%s1252_s28 + $0x100] sm:$0xf]  ;;  %v403_v42 = vpack.c.b16 %v400_v26, %v400_v26  ;;  %v402_v44 = vunpack.c.l.b16 %v349_v32  ;;  %v1333_v45 = vpack.c.b16 %v401_v29, %v401_v29 }
  0x2d   : > { %v913_v31 = vld [vmem:[%s1252_s28 + $0x18] sm:$0xf0]  ;;  %v1132_v36 = vld [vmem:[%s1252_s28 + $0x104] sm:$0xf0]  ;;  %v1092_v37 = vor.u32 %v1145_v23, %v1089_v24  ;;  %v1127_v38 = vld [vmem:[%s1252_s28 + $0xe4] sm:$0xf] }
  0x2e   : > { %654 = vmatpush.bf16.msra.mxu0 %v920_v61  ;;  %679 = vmatpush.bf16.msra.mxu2 %v1056_v63  ;;  %v1017_v39 = vld [vmem:[%s1252_s28 + $0xe8] sm:$0xf0]  ;;  %v1143_v40 = vld [vmem:[%s1252_s28 + $0x164] sm:$0xf]  ;;  %v916_v43 = vor.u32 %v1101_v30, %v913_v31  ;;  %v1032_v46 = vor.u32 %v1132_v36, %v1031_v35  ;;  %v1125_v51 = vld [vmem:[%s1252_s28 + $0xd4] sm:$0xf]  ;;  %v405_v55 = vpack.c.b16 %v402_v44, %v402_v44 }
  0x2f   : > { %667 = vmatpush.bf16.msra.mxu1 %v984_v2  ;;  %v1081_v41 = vld [vmem:[%s1252_s28 + $0x168] sm:$0xf0]  ;;  %v1099_v47 = vld [vmem:[%s1252_s28 + $0x4] sm:$0xf]  ;;  %v1020_v49 = vor.u32 %v1127_v38, %v1017_v39  ;;  %v1009_v52 = vld [vmem:[%s1252_s28 + $0xd8] sm:$0xf0] }
  0x30   : > { %692 = vmatpush.bf16.msra.mxu3 %v932_v10  ;;  %v905_v48 = vld [vmem:[%s1252_s28 + $0x8] sm:$0xf0]  ;;  %v1084_v50 = vor.u32 %v1143_v40, %v1081_v41  ;;  %v1141_v53 = vld [vmem:[%s1252_s28 + $0x154] sm:$0xf]  ;;  %v1073_v54 = vld [vmem:[%s1252_s28 + $0x158] sm:$0xf0]  ;;  %v1012_v57 = vor.u32 %v1125_v51, %v1009_v52 }
  0x31   : > { %v908_v56 = vor.u32 %v1099_v47, %v905_v48  ;;  %v1076_v58 = vor.u32 %v1141_v53, %v1073_v54  ;;  %v1123_v59 = vld [vmem:[%s1252_s28 + $0xc4] sm:$0xf]  ;;  %v1001_v60 = vld [vmem:[%s1252_s28 + $0xc8] sm:$0xf0]  ;;  %v1121_v1 = vld [vmem:[%s1252_s28 + $0xb4] sm:$0xf] }
  0x32   : > { %655 = vmatpush.bf16.msra.mxu0 %v912_v11  ;;  %680 = vmatpush.bf16.msra.mxu2 %v1048_v12  ;;  %v1139_v61 = vld [vmem:[%s1252_s28 + $0x144] sm:$0xf]  ;;  %v1065_v62 = vld [vmem:[%s1252_s28 + $0x148] sm:$0xf0]  ;;  %v1004_v63 = vor.u32 %v1123_v59, %v1001_v60  ;;  %v993_v2 = vld [vmem:[%s1252_s28 + $0xb8] sm:$0xf0] }
  0x33   : > { %668 = vmatpush.bf16.msra.mxu1 %v976_v16  ;;  %v1068_v0 = vor.u32 %v1139_v61, %v1065_v62  ;;  %v1137_v3 = vld [vmem:[%s1252_s28 + $0x134] sm:$0xf]  ;;  %v1057_v4 = vld [vmem:[%s1252_s28 + $0x138] sm:$0xf0]  ;;  %v996_v5 = vor.u32 %v1121_v1, %v993_v2  ;;  %v1119_v7 = vld [vmem:[%s1252_s28 + $0xa4] sm:$0xf] }
  0x34   : > { %693 = vmatpush.bf16.msra.mxu3 %v924_v25  ;;  %v1060_v6 = vor.u32 %v1137_v3, %v1057_v4  ;;  %v985_v8 = vld [vmem:[%s1252_s28 + $0xa8] sm:$0xf0]  ;;  %v1135_v9 = vld [vmem:[%s1252_s28 + $0x124] sm:$0xf]  ;;  %v1117_v13 = vld [vmem:[%s1252_s28 + $0x94] sm:$0xf] }
  0x35   : > { %v1049_v10 = vld [vmem:[%s1252_s28 + $0x128] sm:$0xf0]  ;;  %v988_v11 = vor.u32 %v1119_v7, %v985_v8  ;;  %v977_v14 = vld [vmem:[%s1252_s28 + $0x98] sm:$0xf0]  ;;  %v1133_v15 = vld [vmem:[%s1252_s28 + $0x114] sm:$0xf] }
  0x36   : > { %656 = vmatpush.bf16.msra.mxu0 %v904_v27  ;;  %681 = vmatpush.bf16.msra.mxu2 %v1040_v28  ;;  %v1052_v12 = vor.u32 %v1135_v9, %v1049_v10  ;;  %v1041_v16 = vld [vmem:[%s1252_s28 + $0x118] sm:$0xf0]  ;;  %v980_v17 = vor.u32 %v1117_v13, %v977_v14  ;;  %v1115_v19 = vld [vmem:[%s1252_s28 + $0x84] sm:$0xf]  ;;  %v969_v20 = vld [vmem:[%s1252_s28 + $0x88] sm:$0xf0] }
  0x37   : > { %669 = vmatpush.bf16.msra.mxu1 %v968_v33  ;;  %v1044_v18 = vor.u32 %v1133_v15, %v1041_v16  ;;  %v1131_v21 = vld [vmem:[%s1252_s28 + $0x104] sm:$0xf]  ;;  %v1033_v22 = vld [vmem:[%s1252_s28 + $0x108] sm:$0xf0]  ;;  %v972_v23 = vor.u32 %v1115_v19, %v969_v20 }
  0x38   : > { %694 = vmatpush.bf16.msra.mxu3 %v916_v43  ;;  %v1036_v24 = vor.u32 %v1131_v21, %v1033_v22  ;;  %v346_v30 = vld [vmem:[%s1410_s4] sm:$0xff]  ;;  %v347_v40 = vld [vmem:[%s1410_s4 + $0x8] sm:$0xff] }
  0x39   : > { %657 = vmatmul.bf16.vlgmr.msra.gmra.mxu0 %v403_v42 }
  0x3a   : > { %701 = vmatpush.bf16.msrb.mxu0 %v1028_v34  ;;  %670 = vmatmul.bf16.vlgmr.msra.gmra.mxu1 %v1333_v45 }
  0x3b   : > { %714 = vmatpush.bf16.msrb.mxu1 %v1092_v37  ;;  %682 = vmatpush.bf16.msra.mxu2 %v1032_v46 }
  0x3c   : > { %695 = vmatpush.bf16.msra.mxu3 %v908_v56 }
  0x3e   : > { %702 = vmatpush.bf16.msrb.mxu0 %v1020_v49  ;;  %683 = vmatmul.bf16.vlgmr.msra.gmra.mxu2 %v405_v55 }
  0x3f   : > { %715 = vmatpush.bf16.msrb.mxu1 %v1084_v50  ;;  %696 = vmatmul.bf16.vlgmr.msra.gmra.mxu3 %v403_v42 }
  0x42   : > { %703 = vmatpush.bf16.msrb.mxu0 %v1012_v57 }
  0x43   : > { %716 = vmatpush.bf16.msrb.mxu1 %v1076_v58 }
  0x46   : > { %704 = vmatpush.bf16.msrb.mxu0 %v1004_v63 }
  0x47   : > { %717 = vmatpush.bf16.msrb.mxu1 %v1068_v0 }
  0x4a   : > { %705 = vmatpush.bf16.msrb.mxu0 %v996_v5 }
  0x4b   : > { %718 = vmatpush.bf16.msrb.mxu1 %v1060_v6 }
  0x4e   : > { %706 = vmatpush.bf16.msrb.mxu0 %v988_v11 }
  0x4f   : > { %719 = vmatpush.bf16.msrb.mxu1 %v1052_v12 }
  0x52   : > { %707 = vmatpush.bf16.msrb.mxu0 %v980_v17 }
  0x53   : > { %720 = vmatpush.bf16.msrb.mxu1 %v1044_v18 }
  0x56   : > { %708 = vmatpush.bf16.msrb.mxu0 %v972_v23 }
  0x57   : > { %721 = vmatpush.bf16.msrb.mxu1 %v1036_v24 }
  0x59   : > { %709 = vmatmul.bf16.vlgmr.msrb.gmra.mxu0 %v1333_v45 }
  0x5a   : > { %722 = vmatmul.bf16.vlgmr.msrb.gmra.mxu1 %v405_v55 }
  0xb6   : > { %v658_v25 = vpop.f32.mrf.mxu0 }
  0xb7   : > { %v671_v26 = vpop.f32.mrf.mxu1 }
  0xb8   : > { %v672_v27 = vadd.f32 %v671_v26, %v658_v25 }
  0xbe   : > { %v660_v28 = vpop.f32.mrf.mxu0 }
  0xbf   : > { %v673_v29 = vpop.f32.mrf.mxu1 }
  0xc1   : > { %v684_v31 = vpop.f32.mrf.mxu2 }
  0xc2   : > { %v685_v32 = vadd.f32 %v684_v31, %v672_v27  ;;  %v697_v34 = vpop.f32.mrf.mxu3 }
  0xc4   : > { %v727_v33 = vadd.f32 %v685_v32, %v346_v30 }
  0xc6   : > { %729 = vst [vmem:[%s1410_s4] sm:$0xff] %v727_v33 }
  0xc9   : > { %v686_v35 = vpop.f32.mrf.mxu2 }
  0xca   : > { %v699_v36 = vpop.f32.mrf.mxu3 }
  0xd6   : > { %v710_v37 = vpop.f32.mrf.mxu0 }
  0xd7   : > { %v711_v38 = vadd.f32 %v710_v37, %v697_v34  ;;  %v723_v39 = vpop.f32.mrf.mxu1 }
  0xd9   : > { %v724_v41 = vadd.f32 %v723_v39, %v711_v38 }
  0xdb   : > { %v728_v42 = vadd.f32 %v724_v41, %v347_v40  ;;  %734 = sbr.rel (%p1093_p7) target bundleno = 236 (0xec), region = 44 }
  0xdd   : > { %730 = vst [vmem:[%s1410_s4 + $0x8] sm:$0xff] %v728_v42 }
  0xde   : > { %v712_v43 = vpop.f32.mrf.mxu0 }
  0xdf   : > { %v725_v44 = vpop.f32.mrf.mxu1 }
  0xe0   : > { %v735_v45 = vld [vmem:[%s1410_s4] sm:$0xff]  ;;  %v746_v51 = vld [vmem:[%s1409_s3 + $0x8] sm:$0xff] }
  0xe1   : > { %v737_v46 = vld [vmem:[%s1408_s2] sm:$0x3] }
  0xe2   : > { %v739_v47 = vperm.slane %v737_v46, 0  ;;  %v740_v49 = vperm.slane %v737_v46, 1  ;;  %v745_v50 = vld [vmem:[%s1409_s3] sm:$0xff] }
  0xe4   : > { %v736_v48 = vld [vmem:[%s1410_s4 + $0x8] sm:$0xff]  ;;  %v743_v52 = vadd.f32 %v739_v47, %v735_v45 }
  0xe5   : > { %v744_v53 = vadd.f32 %v740_v49, %v736_v48 }
  0xe6   : > { %v747_v54 = vadd.f32 %v745_v50, %v743_v52 }
  0xe7   : > { %v748_v55 = vadd.f32 %v746_v51, %v744_v53 }
  0xe8   : > { %v749_v56 = vmax.f32 %v747_v54, 0.0 }
  0xe9   : > { %v750_v57 = vmax.f32 %v748_v55, 0.0 }
  0xea   : > { %751 = vst [vmem:[%s1410_s4] sm:$0xff] %v749_v56 }
  0xeb   : > { %752 = vst [vmem:[%s1410_s4 + $0x8] sm:$0xff] %v750_v57 }
  0xec PF: > { %s14_s17 = sadd.s32 1, %s1194_s17   ;;  %s1411_s15 = smov %s1190_s16 }
  0xed   : > { %p11_p8 = scmp.ge.s32.totalorder %s14_s17, 8   ;;  %s1412_s16 = smov %s1414_s18 }
  0xef   :  { %13 = sbr.rel (!%p11_p8) target bundleno = 2 (0x2), region = 83 }

// kernel: resnet18_16s_forward.35
= control target key start
LH: loop header
LB: loop body
LE: loop exit
PB: predicated region body
PF: predicated region fallthrough
CT: control target
= control target key end

     0   :  { %s1128_s12 = smov 0   ;;  %s1130_s13 = smov 0   ;;  %s1306_s0 = inlined_call_operand.vmem [shape: bf16[8,2304], index: 0, kind: input, shape index: {}]   ;;  %s1307_s1 = inlined_call_operand.vmem [shape: bf16[2304,256], index: 1, kind: input, shape index: {}]   ;;  %s1308_s2 = inlined_call_operand.vmem [shape: f32[1,256], index: 2, kind: input, shape index: {}]   ;;  %s1309_s3 = inlined_call_operand.vmem [shape: f32[8,256], index: 3, kind: output, shape index: {}]  }
   0x1   :  { %s1132_s14 = smov 0  }
   0x2 LB: > { %s25_s15 = sadd.s32 1, %s1101_s13  ;;  %p807_p0 = scmp.ge.s32.totalorder %s1105_s14, 1  ;;  %s1105_s14 = sphi %s1132_s14, %s13_s14   ;;  %s1101_s13 = sphi %s1130_s13, %s1311_s13   ;;  %s1097_s12 = sphi %s1128_s12, %s1310_s12  }
   0x3   : > { %p26_p1 = scmp.ge.s32.totalorder %s25_s15, 6  ;;  %p194_p2 = scmp.lt.s32.totalorder %s1105_s14, 7 }
   0x5   : > { %s1313_s15 = smov (%p26_p1, %s25_s15), 0  ;;  %p195_p3 = pnand %p807_p0, %p194_p2 }
   0x6   : > { %s240_s16 = smul.u32 (!%p195_p3), 3, %s1097_s12  ;;  %p811_p6 = scmp.ne.s32.totalorder (!%p195_p3), %s1097_s12, 0 }
   0x7   : > { %198 = sbr.rel (%p195_p3) target bundleno = 234 (0xea), region = 32 }
   0x8   : > { %s250_s17 = smul.u32 (!%p195_p3), 48, %s1097_s12  ;;  %p243_p4 = scmp.lt.s32.totalorder (!%p195_p3), %s240_s16, 17 }
   0xa   : > { %p252_p5 = scmp.lt.s32.totalorder (!%p195_p3), %s250_s17, 287 }
   0xc   : > { %s1315_s16 = smov (!%p243_p4, %s240_s16), 17  ;;  %s1317_s17 = smov (!%p252_p5, %s250_s17), 287 }
   0xd   : > { %s808_s18 = sshll.u32 %s1315_s16, 2  ;;  %s1009_s22 = sshll.u32 %s1317_s17, 3 }
   0xe   : > { %s1153_s21 = scalar_lea.vmem %s1306_s0, %s808_s18  ;;  %s1158_s25 = scalar_lea.vmem %s1307_s1, %s1009_s22 }
   0xf   : > { %280 = sbr.rel (%p811_p6) target bundleno = 23 (0x17), region = 36 }
  0x14   : > { %v1107_v0 = vmov 0.0  }
  0x15   : > { %281 = vst [vmem:[%s1309_s3] sm:$0xff] %v1107_v0 }
  0x16   : > { %282 = vst [vmem:[%s1309_s3 + $0x8] sm:$0xff] %v1107_v0 }
  0x17 PF: > { %v870_v1 = vld [vmem:[%s1158_s25 + $0x70] sm:$0xf]  ;;  %v1025_v2 = vld [vmem:[%s1158_s25 + $0x74] sm:$0xf0]  ;;  %v862_v6 = vld [vmem:[%s1158_s25 + $0x60] sm:$0xf] }
  0x18   : > { %v934_v3 = vld [vmem:[%s1158_s25 + $0xf0] sm:$0xf]  ;;  %v871_v4 = vor.u32 %v1025_v2, %v870_v1  ;;  %v1041_v5 = vld [vmem:[%s1158_s25 + $0xf4] sm:$0xf0]  ;;  %v1023_v7 = vld [vmem:[%s1158_s25 + $0x64] sm:$0xf0] }
  0x19   : > { %v935_v8 = vor.u32 %v1041_v5, %v934_v3  ;;  %v926_v9 = vld [vmem:[%s1158_s25 + $0xe0] sm:$0xf]  ;;  %v1039_v10 = vld [vmem:[%s1158_s25 + $0xe4] sm:$0xf0]  ;;  %v863_v11 = vor.u32 %v1023_v7, %v862_v6  ;;  %v854_v12 = vld [vmem:[%s1158_s25 + $0x50] sm:$0xf] }
  0x1a   : > { %586 = vmatpush.bf16.msra.mxu0 %v871_v4  ;;  %v927_v13 = vor.u32 %v1039_v10, %v926_v9  ;;  %v1021_v14 = vld [vmem:[%s1158_s25 + $0x54] sm:$0xf0]  ;;  %v998_v15 = vld [vmem:[%s1158_s25 + $0x170] sm:$0xf]  ;;  %v990_v20 = vld [vmem:[%s1158_s25 + $0x160] sm:$0xf] }
  0x1b   : > { %599 = vmatpush.bf16.msra.mxu1 %v935_v8  ;;  %v1057_v16 = vld [vmem:[%s1158_s25 + $0x174] sm:$0xf0]  ;;  %v918_v17 = vld [vmem:[%s1158_s25 + $0xd0] sm:$0xf]  ;;  %v1055_v21 = vld [vmem:[%s1158_s25 + $0x164] sm:$0xf0]  ;;  %v855_v23 = vor.u32 %v1021_v14, %v854_v12 }
  0x1c   : > { %v1037_v18 = vld [vmem:[%s1158_s25 + $0xd4] sm:$0xf0]  ;;  %v999_v19 = vor.u32 %v1057_v16, %v998_v15  ;;  %v1024_v22 = vld [vmem:[%s1158_s25 + $0x74] sm:$0xf]  ;;  %v846_v24 = vld [vmem:[%s1158_s25 + $0x40] sm:$0xf]  ;;  %v991_v26 = vor.u32 %v1055_v21, %v990_v20 }
  0x1d   : > { %v1019_v25 = vld [vmem:[%s1158_s25 + $0x44] sm:$0xf0]  ;;  %v872_v27 = vld [vmem:[%s1158_s25 + $0x78] sm:$0xf0]  ;;  %v919_v28 = vor.u32 %v1037_v18, %v918_v17  ;;  %v910_v29 = vld [vmem:[%s1158_s25 + $0xc0] sm:$0xf] }
  0x1e   : > { %587 = vmatpush.bf16.msra.mxu0 %v863_v11  ;;  %612 = vmatpush.bf16.msra.mxu2 %v999_v19  ;;  %v1035_v30 = vld [vmem:[%s1158_s25 + $0xc4] sm:$0xf0]  ;;  %v875_v31 = vor.u32 %v1024_v22, %v872_v27  ;;  %v982_v32 = vld [vmem:[%s1158_s25 + $0x150] sm:$0xf]  ;;  %v1053_v33 = vld [vmem:[%s1158_s25 + $0x154] sm:$0xf0]  ;;  %v847_v37 = vor.u32 %v1019_v25, %v846_v24 }
  0x1f   : > { %600 = vmatpush.bf16.msra.mxu1 %v927_v13  ;;  %v1022_v34 = vld [vmem:[%s1158_s25 + $0x64] sm:$0xf]  ;;  %v864_v35 = vld [vmem:[%s1158_s25 + $0x68] sm:$0xf0]  ;;  %v838_v38 = vld [vmem:[%s1158_s25 + $0x30] sm:$0xf]  ;;  %v983_v40 = vor.u32 %v1053_v33, %v982_v32  ;;  %v911_v42 = vor.u32 %v1035_v30, %v910_v29 }
  0x20   : > { %625 = vmatpush.bf16.msra.mxu3 %v875_v31  ;;  %v867_v36 = vor.u32 %v1022_v34, %v864_v35  ;;  %v1017_v39 = vld [vmem:[%s1158_s25 + $0x34] sm:$0xf0]  ;;  %v974_v41 = vld [vmem:[%s1158_s25 + $0x140] sm:$0xf]  ;;  %v1051_v43 = vld [vmem:[%s1158_s25 + $0x144] sm:$0xf0] }
  0x21   : > { %v1020_v44 = vld [vmem:[%s1158_s25 + $0x54] sm:$0xf]  ;;  %v856_v45 = vld [vmem:[%s1158_s25 + $0x58] sm:$0xf0]  ;;  %v902_v46 = vld [vmem:[%s1158_s25 + $0xb0] sm:$0xf]  ;;  %v839_v49 = vor.u32 %v1017_v39, %v838_v38  ;;  %v975_v51 = vor.u32 %v1051_v43, %v974_v41 }
  0x22   : > { %588 = vmatpush.bf16.msra.mxu0 %v855_v23  ;;  %613 = vmatpush.bf16.msra.mxu2 %v991_v26  ;;  %v1033_v47 = vld [vmem:[%s1158_s25 + $0xb4] sm:$0xf0]  ;;  %v859_v48 = vor.u32 %v1020_v44, %v856_v45  ;;  %v830_v50 = vld [vmem:[%s1158_s25 + $0x20] sm:$0xf]  ;;  %v1018_v52 = vld [vmem:[%s1158_s25 + $0x44] sm:$0xf] }
  0x23   : > { %601 = vmatpush.bf16.msra.mxu1 %v919_v28  ;;  %v848_v53 = vld [vmem:[%s1158_s25 + $0x48] sm:$0xf0]  ;;  %v903_v54 = vor.u32 %v1033_v47, %v902_v46  ;;  %v1015_v55 = vld [vmem:[%s1158_s25 + $0x24] sm:$0xf0]  ;;  %v966_v56 = vld [vmem:[%s1158_s25 + $0x130] sm:$0xf] }
  0x24   : > { %626 = vmatpush.bf16.msra.mxu3 %v867_v36  ;;  %v1049_v57 = vld [vmem:[%s1158_s25 + $0x134] sm:$0xf0]  ;;  %v894_v58 = vld [vmem:[%s1158_s25 + $0xa0] sm:$0xf]  ;;  %v1031_v59 = vld [vmem:[%s1158_s25 + $0xa4] sm:$0xf0]  ;;  %v851_v60 = vor.u32 %v1018_v52, %v848_v53  ;;  %v831_v61 = vor.u32 %v1015_v55, %v830_v50 }
  0x25   : > { %v822_v62 = vld [vmem:[%s1158_s25 + $0x10] sm:$0xf]  ;;  %v967_v63 = vor.u32 %v1049_v57, %v966_v56  ;;  %v1016_v0 = vld [vmem:[%s1158_s25 + $0x34] sm:$0xf]  ;;  %v840_v1 = vld [vmem:[%s1158_s25 + $0x38] sm:$0xf0]  ;;  %v895_v2 = vor.u32 %v1031_v59, %v894_v58 }
  0x26   : > { %589 = vmatpush.bf16.msra.mxu0 %v847_v37  ;;  %614 = vmatpush.bf16.msra.mxu2 %v983_v40  ;;  %v1013_v3 = vld [vmem:[%s1158_s25 + $0x14] sm:$0xf0]  ;;  %v958_v4 = vld [vmem:[%s1158_s25 + $0x120] sm:$0xf]  ;;  %v1047_v5 = vld [vmem:[%s1158_s25 + $0x124] sm:$0xf0]  ;;  %v843_v10 = vor.u32 %v1016_v0, %v840_v1 }
  0x27   : > { %602 = vmatpush.bf16.msra.mxu1 %v911_v42  ;;  %v886_v6 = vld [vmem:[%s1158_s25 + $0x90] sm:$0xf]  ;;  %v1029_v7 = vld [vmem:[%s1158_s25 + $0x94] sm:$0xf0]  ;;  %v814_v8 = vld [vmem:[%s1158_s25] sm:$0xf]  ;;  %v823_v11 = vor.u32 %v1013_v3, %v822_v62  ;;  %v959_v12 = vor.u32 %v1047_v5, %v958_v4 }
  0x28   : > { %627 = vmatpush.bf16.msra.mxu3 %v859_v48  ;;  %v1011_v9 = vld [vmem:[%s1158_s25 + $0x4] sm:$0xf0]  ;;  %v1014_v13 = vld [vmem:[%s1158_s25 + $0x24] sm:$0xf]  ;;  %v832_v14 = vld [vmem:[%s1158_s25 + $0x28] sm:$0xf0]  ;;  %v887_v16 = vor.u32 %v1029_v7, %v886_v6 }
  0x29   : > { %v285_v15 = vld [vmem:[%s1153_s21] sm:$0xff]  ;;  %v950_v18 = vld [vmem:[%s1158_s25 + $0x110] sm:$0xf]  ;;  %v1045_v19 = vld [vmem:[%s1158_s25 + $0x114] sm:$0xf0]  ;;  %v835_v25 = vor.u32 %v1014_v13, %v832_v14  ;;  %v815_v27 = vor.u32 %v1011_v9, %v814_v8  ;;  %p1004_p7 = scmp.ne.s32.totalorder %s1097_s12, 5 }
  0x2a   : > { %590 = vmatpush.bf16.msra.mxu0 %v839_v49  ;;  %615 = vmatpush.bf16.msra.mxu2 %v975_v51  ;;  %v878_v17 = vld [vmem:[%s1158_s25 + $0x80] sm:$0xf]  ;;  %v1027_v20 = vld [vmem:[%s1158_s25 + $0x84] sm:$0xf0]  ;;  %v1040_v21 = vld [vmem:[%s1158_s25 + $0xf4] sm:$0xf]  ;;  %v337_v26 = vunpack.c.l.b16 %v285_v15  ;;  %v951_v28 = vor.u32 %v1045_v19, %v950_v18  ;;  %v338_v29 = vunpack.c.h.b16 %v285_v15 }
  0x2b   : > { %603 = vmatpush.bf16.msra.mxu1 %v903_v54  ;;  %v936_v22 = vld [vmem:[%s1158_s25 + $0xf8] sm:$0xf0]  ;;  %v1056_v23 = vld [vmem:[%s1158_s25 + $0x174] sm:$0xf]  ;;  %v286_v32 = vld [vmem:[%s1153_s21 + $0x8] sm:$0xf]  ;;  %v879_v33 = vor.u32 %v1027_v20, %v878_v17 }
  0x2c   : > { %628 = vmatpush.bf16.msra.mxu3 %v851_v60  ;;  %v1000_v24 = vld [vmem:[%s1158_s25 + $0x178] sm:$0xf0]  ;;  %v1012_v30 = vld [vmem:[%s1158_s25 + $0x14] sm:$0xf]  ;;  %v939_v34 = vor.u32 %v1040_v21, %v936_v22  ;;  %v942_v35 = vld [vmem:[%s1158_s25 + $0x100] sm:$0xf]  ;;  %v340_v42 = vpack.c.b16 %v337_v26, %v337_v26  ;;  %v339_v44 = vunpack.c.l.b16 %v286_v32  ;;  %v1239_v45 = vpack.c.b16 %v338_v29, %v338_v29 }
  0x2d   : > { %v824_v31 = vld [vmem:[%s1158_s25 + $0x18] sm:$0xf0]  ;;  %v1043_v36 = vld [vmem:[%s1158_s25 + $0x104] sm:$0xf0]  ;;  %v1003_v37 = vor.u32 %v1056_v23, %v1000_v24  ;;  %v1038_v38 = vld [vmem:[%s1158_s25 + $0xe4] sm:$0xf] }
  0x2e   : > { %591 = vmatpush.bf16.msra.mxu0 %v831_v61  ;;  %616 = vmatpush.bf16.msra.mxu2 %v967_v63  ;;  %v928_v39 = vld [vmem:[%s1158_s25 + $0xe8] sm:$0xf0]  ;;  %v1054_v40 = vld [vmem:[%s1158_s25 + $0x164] sm:$0xf]  ;;  %v827_v43 = vor.u32 %v1012_v30, %v824_v31  ;;  %v943_v46 = vor.u32 %v1043_v36, %v942_v35  ;;  %v1036_v51 = vld [vmem:[%s1158_s25 + $0xd4] sm:$0xf]  ;;  %v342_v55 = vpack.c.b16 %v339_v44, %v339_v44 }
  0x2f   : > { %604 = vmatpush.bf16.msra.mxu1 %v895_v2  ;;  %v992_v41 = vld [vmem:[%s1158_s25 + $0x168] sm:$0xf0]  ;;  %v1010_v47 = vld [vmem:[%s1158_s25 + $0x4] sm:$0xf]  ;;  %v931_v49 = vor.u32 %v1038_v38, %v928_v39  ;;  %v920_v52 = vld [vmem:[%s1158_s25 + $0xd8] sm:$0xf0] }
  0x30   : > { %629 = vmatpush.bf16.msra.mxu3 %v843_v10  ;;  %v816_v48 = vld [vmem:[%s1158_s25 + $0x8] sm:$0xf0]  ;;  %v995_v50 = vor.u32 %v1054_v40, %v992_v41  ;;  %v1052_v53 = vld [vmem:[%s1158_s25 + $0x154] sm:$0xf]  ;;  %v984_v54 = vld [vmem:[%s1158_s25 + $0x158] sm:$0xf0]  ;;  %v923_v57 = vor.u32 %v1036_v51, %v920_v52 }
  0x31   : > { %v819_v56 = vor.u32 %v1010_v47, %v816_v48  ;;  %v987_v58 = vor.u32 %v1052_v53, %v984_v54  ;;  %v1034_v59 = vld [vmem:[%s1158_s25 + $0xc4] sm:$0xf]  ;;  %v912_v60 = vld [vmem:[%s1158_s25 + $0xc8] sm:$0xf0]  ;;  %v1032_v1 = vld [vmem:[%s1158_s25 + $0xb4] sm:$0xf] }
  0x32   : > { %592 = vmatpush.bf16.msra.mxu0 %v823_v11  ;;  %617 = vmatpush.bf16.msra.mxu2 %v959_v12  ;;  %v1050_v61 = vld [vmem:[%s1158_s25 + $0x144] sm:$0xf]  ;;  %v976_v62 = vld [vmem:[%s1158_s25 + $0x148] sm:$0xf0]  ;;  %v915_v63 = vor.u32 %v1034_v59, %v912_v60  ;;  %v904_v2 = vld [vmem:[%s1158_s25 + $0xb8] sm:$0xf0] }
  0x33   : > { %605 = vmatpush.bf16.msra.mxu1 %v887_v16  ;;  %v979_v0 = vor.u32 %v1050_v61, %v976_v62  ;;  %v1048_v3 = vld [vmem:[%s1158_s25 + $0x134] sm:$0xf]  ;;  %v968_v4 = vld [vmem:[%s1158_s25 + $0x138] sm:$0xf0]  ;;  %v907_v5 = vor.u32 %v1032_v1, %v904_v2  ;;  %v1030_v7 = vld [vmem:[%s1158_s25 + $0xa4] sm:$0xf] }
  0x34   : > { %630 = vmatpush.bf16.msra.mxu3 %v835_v25  ;;  %v971_v6 = vor.u32 %v1048_v3, %v968_v4  ;;  %v896_v8 = vld [vmem:[%s1158_s25 + $0xa8] sm:$0xf0]  ;;  %v1046_v9 = vld [vmem:[%s1158_s25 + $0x124] sm:$0xf]  ;;  %v1028_v13 = vld [vmem:[%s1158_s25 + $0x94] sm:$0xf] }
  0x35   : > { %v960_v10 = vld [vmem:[%s1158_s25 + $0x128] sm:$0xf0]  ;;  %v899_v11 = vor.u32 %v1030_v7, %v896_v8  ;;  %v888_v14 = vld [vmem:[%s1158_s25 + $0x98] sm:$0xf0]  ;;  %v1044_v15 = vld [vmem:[%s1158_s25 + $0x114] sm:$0xf] }
  0x36   : > { %593 = vmatpush.bf16.msra.mxu0 %v815_v27  ;;  %618 = vmatpush.bf16.msra.mxu2 %v951_v28  ;;  %v963_v12 = vor.u32 %v1046_v9, %v960_v10  ;;  %v952_v16 = vld [vmem:[%s1158_s25 + $0x118] sm:$0xf0]  ;;  %v891_v17 = vor.u32 %v1028_v13, %v888_v14  ;;  %v1026_v19 = vld [vmem:[%s1158_s25 + $0x84] sm:$0xf]  ;;  %v880_v20 = vld [vmem:[%s1158_s25 + $0x88] sm:$0xf0] }
  0x37   : > { %606 = vmatpush.bf16.msra.mxu1 %v879_v33  ;;  %v955_v18 = vor.u32 %v1044_v15, %v952_v16  ;;  %v1042_v21 = vld [vmem:[%s1158_s25 + $0x104] sm:$0xf]  ;;  %v944_v22 = vld [vmem:[%s1158_s25 + $0x108] sm:$0xf0]  ;;  %v883_v23 = vor.u32 %v1026_v19, %v880_v20 }
  0x38   : > { %631 = vmatpush.bf16.msra.mxu3 %v827_v43  ;;  %v947_v24 = vor.u32 %v1042_v21, %v944_v22  ;;  %v283_v30 = vld [vmem:[%s1309_s3] sm:$0xff]  ;;  %v284_v40 = vld [vmem:[%s1309_s3 + $0x8] sm:$0xff] }
  0x39   : > { %594 = vmatmul.bf16.vlgmr.msra.gmra.mxu0 %v340_v42 }
  0x3a   : > { %638 = vmatpush.bf16.msrb.mxu0 %v939_v34  ;;  %607 = vmatmul.bf16.vlgmr.msra.gmra.mxu1 %v1239_v45 }
  0x3b   : > { %651 = vmatpush.bf16.msrb.mxu1 %v1003_v37  ;;  %619 = vmatpush.bf16.msra.mxu2 %v943_v46 }
  0x3c   : > { %632 = vmatpush.bf16.msra.mxu3 %v819_v56 }
  0x3e   : > { %639 = vmatpush.bf16.msrb.mxu0 %v931_v49  ;;  %620 = vmatmul.bf16.vlgmr.msra.gmra.mxu2 %v342_v55 }
  0x3f   : > { %652 = vmatpush.bf16.msrb.mxu1 %v995_v50  ;;  %633 = vmatmul.bf16.vlgmr.msra.gmra.mxu3 %v340_v42 }
  0x42   : > { %640 = vmatpush.bf16.msrb.mxu0 %v923_v57 }
  0x43   : > { %653 = vmatpush.bf16.msrb.mxu1 %v987_v58 }
  0x46   : > { %641 = vmatpush.bf16.msrb.mxu0 %v915_v63 }
  0x47   : > { %654 = vmatpush.bf16.msrb.mxu1 %v979_v0 }
  0x4a   : > { %642 = vmatpush.bf16.msrb.mxu0 %v907_v5 }
  0x4b   : > { %655 = vmatpush.bf16.msrb.mxu1 %v971_v6 }
  0x4e   : > { %643 = vmatpush.bf16.msrb.mxu0 %v899_v11 }
  0x4f   : > { %656 = vmatpush.bf16.msrb.mxu1 %v963_v12 }
  0x52   : > { %644 = vmatpush.bf16.msrb.mxu0 %v891_v17 }
  0x53   : > { %657 = vmatpush.bf16.msrb.mxu1 %v955_v18 }
  0x56   : > { %645 = vmatpush.bf16.msrb.mxu0 %v883_v23 }
  0x57   : > { %658 = vmatpush.bf16.msrb.mxu1 %v947_v24 }
  0x59   : > { %646 = vmatmul.bf16.vlgmr.msrb.gmra.mxu0 %v1239_v45 }
  0x5a   : > { %659 = vmatmul.bf16.vlgmr.msrb.gmra.mxu1 %v342_v55 }
  0xb6   : > { %v595_v25 = vpop.f32.mrf.mxu0 }
  0xb7   : > { %v608_v26 = vpop.f32.mrf.mxu1 }
  0xb8   : > { %v609_v27 = vadd.f32 %v608_v26, %v595_v25 }
  0xbe   : > { %v597_v28 = vpop.f32.mrf.mxu0 }
  0xbf   : > { %v610_v29 = vpop.f32.mrf.mxu1 }
  0xc1   : > { %v621_v31 = vpop.f32.mrf.mxu2 }
  0xc2   : > { %v622_v32 = vadd.f32 %v621_v31, %v609_v27  ;;  %v634_v34 = vpop.f32.mrf.mxu3 }
  0xc4   : > { %v664_v33 = vadd.f32 %v622_v32, %v283_v30 }
  0xc6   : > { %666 = vst [vmem:[%s1309_s3] sm:$0xff] %v664_v33 }
  0xc9   : > { %v623_v35 = vpop.f32.mrf.mxu2 }
  0xca   : > { %v636_v36 = vpop.f32.mrf.mxu3 }
  0xd6   : > { %v647_v37 = vpop.f32.mrf.mxu0 }
  0xd7   : > { %v648_v38 = vadd.f32 %v647_v37, %v634_v34  ;;  %v660_v39 = vpop.f32.mrf.mxu1 }
  0xd9   : > { %v661_v41 = vadd.f32 %v660_v39, %v648_v38 }
  0xdb   : > { %v665_v42 = vadd.f32 %v661_v41, %v284_v40  ;;  %671 = sbr.rel (%p1004_p7) target bundleno = 234 (0xea), region = 40 }
  0xdd   : > { %667 = vst [vmem:[%s1309_s3 + $0x8] sm:$0xff] %v665_v42 }
  0xde   : > { %v649_v43 = vpop.f32.mrf.mxu0 }
  0xdf   : > { %v662_v44 = vpop.f32.mrf.mxu1 }
  0xe0   : > { %v672_v45 = vld [vmem:[%s1309_s3] sm:$0xff] }
  0xe1   : > { %v674_v46 = vld [vmem:[%s1308_s2] sm:$0x3] }
  0xe2   : > { %v676_v48 = vperm.slane %v674_v46, 0  ;;  %v677_v49 = vperm.slane %v674_v46, 1 }
  0xe4   : > { %v673_v47 = vld [vmem:[%s1309_s3 + $0x8] sm:$0xff]  ;;  %v680_v50 = vadd.f32 %v676_v48, %v672_v45 }
  0xe5   : > { %v681_v51 = vadd.f32 %v677_v49, %v673_v47 }
  0xe6   : > { %v682_v52 = vmax.f32 %v680_v50, 0.0 }
  0xe7   : > { %v683_v53 = vmax.f32 %v681_v51, 0.0 }
  0xe8   : > { %684 = vst [vmem:[%s1309_s3] sm:$0xff] %v682_v52 }
  0xe9   : > { %685 = vst [vmem:[%s1309_s3 + $0x8] sm:$0xff] %v683_v53 }
  0xea PF: > { %s13_s14 = sadd.s32 1, %s1105_s14   ;;  %s1310_s12 = smov %s1101_s13 }
  0xeb   : > { %p10_p8 = scmp.ge.s32.totalorder %s13_s14, 8   ;;  %s1311_s13 = smov %s1313_s15 }
  0xed   :  { %12 = sbr.rel (!%p10_p8) target bundleno = 2 (0x2), region = 76 }

// kernel: resnet18_16s_forward.38
= control target key start
LH: loop header
LB: loop body
LE: loop exit
PB: predicated region body
PF: predicated region fallthrough
CT: control target
= control target key end

     0   :  { %s1412_s12 = smov 0   ;;  %s1414_s13 = smov 0   ;;  %s1736_s0 = inlined_call_operand.vmem [shape: bf16[8,2304], index: 0, kind: input, shape index: {}]   ;;  %s1737_s1 = inlined_call_operand.vmem [shape: bf16[2304,512], index: 1, kind: input, shape index: {}]   ;;  %s1738_s2 = inlined_call_operand.vmem [shape: f32[1,512], index: 2, kind: input, shape index: {}]   ;;  %s1739_s3 = inlined_call_operand.vmem [shape: f32[8,512], index: 3, kind: output, shape index: {}]  }
   0x1   :  { %s1416_s14 = smov 0   ;;  %s1418_s15 = smov 0  }
   0x2   :  { %s1420_s16 = smov 0   ;;  %s1422_s17 = smov 0  }
   0x3   :  { %s1424_s18 = smov 0  }
   0x4 LB: > { %s25_s19 = sadd.s32 1, %s1381_s16  ;;  %s28_s20 = sadd.s32 1, %s1385_s17  ;;  %s1389_s18 = sphi %s1424_s18, %s13_s18   ;;  %s1385_s17 = sphi %s1422_s17, %s1745_s17   ;;  %s1381_s16 = sphi %s1420_s16, %s1744_s16   ;;  %s1377_s15 = sphi %s1418_s15, %s1743_s15   ;;  %s1373_s14 = sphi %s1416_s14, %s1742_s14   ;;  %s1369_s13 = sphi %s1414_s13, %s1741_s13   ;;  %s1365_s12 = sphi %s1412_s12, %s1740_s12  }
   0x5   : > { %p26_p0 = scmp.ge.s32.totalorder %s25_s19, 6  ;;  %p76_p1 = scmp.ne.s32.totalorder %s1369_s13, %s1365_s12 }
   0x6   : > { %p77_p2 = scmp.eq.s32.totalorder %s1389_s18, 0  ;;  %s69_s24 = sadd.s32 1, %s1369_s13 }
   0x7   : > { %s1747_s19 = smov (%p26_p0, %s25_s19), 0  ;;  %s1749_s20 = smov (!%p26_p0, %s28_s20), %s1385_s17 }
   0x8   : > { %p78_p3 = por %p77_p2, %p76_p1  ;;  %p30_p4 = scmp.ge.s32.totalorder %s1749_s20, 2 }
   0x9   : > { %s64_s21 = ssub.s32 %s1381_s16, %s1747_s19  ;;  %p1022_p6 = scmp.ge.s32.totalorder %s1389_s18, 12 }
   0xa   : > { %s1751_s20 = smov (%p30_p4, %s1749_s20), 0 }
   0xb   : > { %s65_s22 = ssub.s32 %s1385_s17, %s1751_s20  ;;  %156 = sbr.rel (%p1022_p6) target bundleno = 72 (0x48), region = 16 }
   0xc   : > { %s66_s23 = sor.u32 %s65_s22, %s64_s21 }
   0xd   : > { %p67_p5 = scmp.eq.s32.totalorder %s66_s23, 0 }
   0xf   : > { %s1463_s25 = scalar_select %p67_p5, %s1369_s13, %s69_s24  }
  0x10   : > { %172 = sbr.rel (!%p78_p3) target bundleno = 72 (0x48), region = 24  ;;  %s174_s26 = sand.u32 (%p78_p3), 1, %s1369_s13  }
  0x11   : > { %s1276_s27 = smul.u32 (%p78_p3), 384, %s174_s26  ;;  %s1023_s28 = sshll.u32 (%p78_p3), %s1385_s17, 1 }
  0x12   : > { %s1227_s29 = smul.u32 (%p78_p3), 192, %s1381_s16 }
  0x13   : > { %s1477_s8 = scalar_lea.vmem (%p78_p3), [#allocation2], %s1276_s27 }
  0x14   : > { %s180_s30 = sadd.s32 (%p78_p3), %s1227_s29, %s1023_s28 }
  0x15   : > { %s1025_s4 = sshll.u32 %s180_s30, 2 }
  0x16   : > { %s1472_s7 = scalar_lea.vmem %s1737_s1, %s1025_s4 }
  0x17   : > { %v305_v0 = vld [vmem:[%s1472_s7] sm:$0xff]  ;;  %v307_v1 = vld [vmem:[%s1472_s7 + $0x10] sm:$0xff] }
  0x18   : > { %v309_v2 = vld [vmem:[%s1472_s7 + $0x20] sm:$0xff]  ;;  %306 = vst [vmem:[%s1477_s8] sm:$0xff] %v305_v0  ;;  %v311_v3 = vld [vmem:[%s1472_s7 + $0x30] sm:$0xff] }
  0x19   : > { %308 = vst [vmem:[%s1477_s8 + $0x8] sm:$0xff] %v307_v1  ;;  %v313_v4 = vld [vmem:[%s1472_s7 + $0x40] sm:$0xff]  ;;  %v315_v5 = vld [vmem:[%s1472_s7 + $0x50] sm:$0xff] }
  0x1a   : > { %310 = vst [vmem:[%s1477_s8 + $0x10] sm:$0xff] %v309_v2  ;;  %v317_v6 = vld [vmem:[%s1472_s7 + $0x60] sm:$0xff]  ;;  %v319_v7 = vld [vmem:[%s1472_s7 + $0x70] sm:$0xff] }
  0x1b   : > { %312 = vst [vmem:[%s1477_s8 + $0x18] sm:$0xff] %v311_v3  ;;  %v321_v8 = vld [vmem:[%s1472_s7 + $0x80] sm:$0xff]  ;;  %v323_v9 = vld [vmem:[%s1472_s7 + $0x90] sm:$0xff] }
  0x1c   : > { %314 = vst [vmem:[%s1477_s8 + $0x20] sm:$0xff] %v313_v4  ;;  %v325_v10 = vld [vmem:[%s1472_s7 + $0xa0] sm:$0xff]  ;;  %v327_v11 = vld [vmem:[%s1472_s7 + $0xb0] sm:$0xff] }
  0x1d   : > { %316 = vst [vmem:[%s1477_s8 + $0x28] sm:$0xff] %v315_v5  ;;  %v329_v12 = vld [vmem:[%s1472_s7 + $0xc0] sm:$0xff]  ;;  %v331_v13 = vld [vmem:[%s1472_s7 + $0xd0] sm:$0xff] }
  0x1e   : > { %318 = vst [vmem:[%s1477_s8 + $0x30] sm:$0xff] %v317_v6  ;;  %v333_v14 = vld [vmem:[%s1472_s7 + $0xe0] sm:$0xff]  ;;  %v335_v15 = vld [vmem:[%s1472_s7 + $0xf0] sm:$0xff] }
  0x1f   : > { %320 = vst [vmem:[%s1477_s8 + $0x38] sm:$0xff] %v319_v7  ;;  %v337_v16 = vld [vmem:[%s1472_s7 + $0x100] sm:$0xff]  ;;  %v339_v17 = vld [vmem:[%s1472_s7 + $0x110] sm:$0xff] }
  0x20   : > { %322 = vst [vmem:[%s1477_s8 + $0x40] sm:$0xff] %v321_v8  ;;  %v341_v18 = vld [vmem:[%s1472_s7 + $0x120] sm:$0xff]  ;;  %v343_v19 = vld [vmem:[%s1472_s7 + $0x130] sm:$0xff] }
  0x21   : > { %324 = vst [vmem:[%s1477_s8 + $0x48] sm:$0xff] %v323_v9  ;;  %v345_v20 = vld [vmem:[%s1472_s7 + $0x140] sm:$0xff]  ;;  %v347_v21 = vld [vmem:[%s1472_s7 + $0x150] sm:$0xff] }
  0x22   : > { %326 = vst [vmem:[%s1477_s8 + $0x50] sm:$0xff] %v325_v10  ;;  %v349_v22 = vld [vmem:[%s1472_s7 + $0x160] sm:$0xff]  ;;  %v351_v23 = vld [vmem:[%s1472_s7 + $0x170] sm:$0xff] }
  0x23   : > { %328 = vst [vmem:[%s1477_s8 + $0x58] sm:$0xff] %v327_v11  ;;  %v353_v24 = vld [vmem:[%s1472_s7 + $0x180] sm:$0xff]  ;;  %v355_v25 = vld [vmem:[%s1472_s7 + $0x190] sm:$0xff] }
  0x24   : > { %330 = vst [vmem:[%s1477_s8 + $0x60] sm:$0xff] %v329_v12  ;;  %v357_v26 = vld [vmem:[%s1472_s7 + $0x1a0] sm:$0xff]  ;;  %v359_v27 = vld [vmem:[%s1472_s7 + $0x1b0] sm:$0xff] }
  0x25   : > { %332 = vst [vmem:[%s1477_s8 + $0x68] sm:$0xff] %v331_v13  ;;  %v361_v28 = vld [vmem:[%s1472_s7 + $0x1c0] sm:$0xff]  ;;  %v363_v29 = vld [vmem:[%s1472_s7 + $0x1d0] sm:$0xff] }
  0x26   : > { %334 = vst [vmem:[%s1477_s8 + $0x70] sm:$0xff] %v333_v14  ;;  %v365_v30 = vld [vmem:[%s1472_s7 + $0x1e0] sm:$0xff]  ;;  %v367_v31 = vld [vmem:[%s1472_s7 + $0x1f0] sm:$0xff] }
  0x27   : > { %336 = vst [vmem:[%s1477_s8 + $0x78] sm:$0xff] %v335_v15  ;;  %v369_v32 = vld [vmem:[%s1472_s7 + $0x200] sm:$0xff]  ;;  %v371_v33 = vld [vmem:[%s1472_s7 + $0x210] sm:$0xff] }
  0x28   : > { %338 = vst [vmem:[%s1477_s8 + $0x80] sm:$0xff] %v337_v16  ;;  %v373_v34 = vld [vmem:[%s1472_s7 + $0x220] sm:$0xff]  ;;  %v375_v35 = vld [vmem:[%s1472_s7 + $0x230] sm:$0xff] }
  0x29   : > { %340 = vst [vmem:[%s1477_s8 + $0x88] sm:$0xff] %v339_v17  ;;  %v377_v36 = vld [vmem:[%s1472_s7 + $0x240] sm:$0xff]  ;;  %v379_v37 = vld [vmem:[%s1472_s7 + $0x250] sm:$0xff] }
  0x2a   : > { %342 = vst [vmem:[%s1477_s8 + $0x90] sm:$0xff] %v341_v18  ;;  %v381_v38 = vld [vmem:[%s1472_s7 + $0x260] sm:$0xff]  ;;  %v383_v39 = vld [vmem:[%s1472_s7 + $0x270] sm:$0xff] }
  0x2b   : > { %344 = vst [vmem:[%s1477_s8 + $0x98] sm:$0xff] %v343_v19  ;;  %v385_v40 = vld [vmem:[%s1472_s7 + $0x280] sm:$0xff]  ;;  %v387_v41 = vld [vmem:[%s1472_s7 + $0x290] sm:$0xff] }
  0x2c   : > { %346 = vst [vmem:[%s1477_s8 + $0xa0] sm:$0xff] %v345_v20  ;;  %v389_v42 = vld [vmem:[%s1472_s7 + $0x2a0] sm:$0xff]  ;;  %v391_v43 = vld [vmem:[%s1472_s7 + $0x2b0] sm:$0xff] }
  0x2d   : > { %348 = vst [vmem:[%s1477_s8 + $0xa8] sm:$0xff] %v347_v21  ;;  %v393_v44 = vld [vmem:[%s1472_s7 + $0x2c0] sm:$0xff]  ;;  %v395_v45 = vld [vmem:[%s1472_s7 + $0x2d0] sm:$0xff] }
  0x2e   : > { %350 = vst [vmem:[%s1477_s8 + $0xb0] sm:$0xff] %v349_v22  ;;  %v397_v46 = vld [vmem:[%s1472_s7 + $0x2e0] sm:$0xff]  ;;  %v399_v47 = vld [vmem:[%s1472_s7 + $0x2f0] sm:$0xff] }
  0x2f   : > { %352 = vst [vmem:[%s1477_s8 + $0xb8] sm:$0xff] %v351_v23 }
  0x30   : > { %354 = vst [vmem:[%s1477_s8 + $0xc0] sm:$0xff] %v353_v24 }
  0x31   : > { %356 = vst [vmem:[%s1477_s8 + $0xc8] sm:$0xff] %v355_v25 }
  0x32   : > { %358 = vst [vmem:[%s1477_s8 + $0xd0] sm:$0xff] %v357_v26 }
  0x33   : > { %360 = vst [vmem:[%s1477_s8 + $0xd8] sm:$0xff] %v359_v27 }
  0x34   : > { %362 = vst [vmem:[%s1477_s8 + $0xe0] sm:$0xff] %v361_v28 }
  0x35   : > { %364 = vst [vmem:[%s1477_s8 + $0xe8] sm:$0xff] %v363_v29 }
  0x36   : > { %366 = vst [vmem:[%s1477_s8 + $0xf0] sm:$0xff] %v365_v30 }
  0x37   : > { %368 = vst [vmem:[%s1477_s8 + $0xf8] sm:$0xff] %v367_v31 }
  0x38   : > { %370 = vst [vmem:[%s1477_s8 + $0x100] sm:$0xff] %v369_v32 }
  0x39   : > { %372 = vst [vmem:[%s1477_s8 + $0x108] sm:$0xff] %v371_v33 }
  0x3a   : > { %374 = vst [vmem:[%s1477_s8 + $0x110] sm:$0xff] %v373_v34 }
  0x3b   : > { %376 = vst [vmem:[%s1477_s8 + $0x118] sm:$0xff] %v375_v35 }
  0x3c   : > { %378 = vst [vmem:[%s1477_s8 + $0x120] sm:$0xff] %v377_v36 }
  0x3d   : > { %380 = vst [vmem:[%s1477_s8 + $0x128] sm:$0xff] %v379_v37 }
  0x3e   : > { %382 = vst [vmem:[%s1477_s8 + $0x130] sm:$0xff] %v381_v38 }
  0x3f   : > { %384 = vst [vmem:[%s1477_s8 + $0x138] sm:$0xff] %v383_v39 }
  0x40   : > { %386 = vst [vmem:[%s1477_s8 + $0x140] sm:$0xff] %v385_v40 }
  0x41   : > { %388 = vst [vmem:[%s1477_s8 + $0x148] sm:$0xff] %v387_v41 }
  0x42   : > { %390 = vst [vmem:[%s1477_s8 + $0x150] sm:$0xff] %v389_v42 }
  0x43   : > { %392 = vst [vmem:[%s1477_s8 + $0x158] sm:$0xff] %v391_v43 }
  0x44   : > { %394 = vst [vmem:[%s1477_s8 + $0x160] sm:$0xff] %v393_v44 }
  0x45   : > { %396 = vst [vmem:[%s1477_s8 + $0x168] sm:$0xff] %v395_v45 }
  0x46   : > { %398 = vst [vmem:[%s1477_s8 + $0x170] sm:$0xff] %v397_v46 }
  0x47   : > { %400 = vst [vmem:[%s1477_s8 + $0x178] sm:$0xff] %v399_v47 }
  0x48 PF: > { %p1026_p7 = scmp.ge.s32.totalorder %s1389_s18, 1  ;;  %p413_p8 = scmp.lt.s32.totalorder %s1389_s18, 13 }
  0x4a   : > { %p414_p9 = pnand %p1026_p7, %p413_p8 }
  0x4b   : > { %s420_s9 = sand.u32 (!%p414_p9), 1, %s1365_s12   ;;  %s460_s10 = smul.u32 (!%p414_p9), 3, %s1373_s14 }
  0x4c   : > { %417 = sbr.rel (%p414_p9) target bundleno = 303 (0x12f), region = 66  ;;  %s1028_s21 = sshll.u32 (!%p414_p9), %s1377_s15, 1 }
  0x4d   : > { %s1277_s11 = smul.u32 (!%p414_p9), 384, %s420_s9  ;;  %p463_p10 = scmp.lt.s32.totalorder (!%p414_p9), %s460_s10, 17 }
  0x4e   : > { %p473_p11 = scmp.lt.s32.totalorder (!%p414_p9), %s1028_s21, 3  ;;  %p1031_p12 = scmp.ne.s32.totalorder (!%p414_p9), %s1373_s14, 0 }
  0x4f   : > { %s1594_s5 = scalar_lea.vmem (!%p414_p9), [#allocation2], %s1277_s11 }
  0x51   : > { %s1753_s10 = smov (!%p463_p10, %s460_s10), 17  ;;  %s1755_s21 = smov (!%p473_p11, %s1028_s21), 3 }
  0x52   : > { %s1027_s22 = sshll.u32 %s1753_s10, 2  ;;  %s475_s12 = scalar_lea.vmem %s1738_s2, %s1755_s21 }
  0x53   : > { %s1582_s26 = scalar_lea.vmem %s1736_s0, %s1027_s22  ;;  %s1030_s29 = sshll.u32 %s1755_s21, 3 }
  0x54   : > { %s1592_s4 = scalar_lea.vmem %s1739_s3, %s1030_s29  ;;  %490 = sbr.rel (%p1031_p12) target bundleno = 92 (0x5c), region = 74 }
  0x59   : > { %v1391_v48 = vmov 0.0  }
  0x5a   : > { %491 = vst [vmem:[%s1592_s4] sm:$0xff] %v1391_v48 }
  0x5b   : > { %492 = vst [vmem:[%s1592_s4 + $0x8] sm:$0xff] %v1391_v48 }
  0x5c PF: > { %v1090_v49 = vld [vmem:[%s1594_s5 + $0x70] sm:$0xf]  ;;  %v1243_v50 = vld [vmem:[%s1594_s5 + $0x74] sm:$0xf0]  ;;  %v1082_v54 = vld [vmem:[%s1594_s5 + $0x60] sm:$0xf] }
  0x5d   : > { %v1154_v51 = vld [vmem:[%s1594_s5 + $0xf0] sm:$0xf]  ;;  %v1091_v52 = vor.u32 %v1243_v50, %v1090_v49  ;;  %v1259_v53 = vld [vmem:[%s1594_s5 + $0xf4] sm:$0xf0]  ;;  %v1241_v55 = vld [vmem:[%s1594_s5 + $0x64] sm:$0xf0] }
  0x5e   : > { %v1155_v56 = vor.u32 %v1259_v53, %v1154_v51  ;;  %v1146_v57 = vld [vmem:[%s1594_s5 + $0xe0] sm:$0xf]  ;;  %v1257_v58 = vld [vmem:[%s1594_s5 + $0xe4] sm:$0xf0]  ;;  %v1083_v59 = vor.u32 %v1241_v55, %v1082_v54  ;;  %v1074_v60 = vld [vmem:[%s1594_s5 + $0x50] sm:$0xf] }
  0x5f   : > { %796 = vmatpush.bf16.msra.mxu0 %v1091_v52  ;;  %v1147_v61 = vor.u32 %v1257_v58, %v1146_v57  ;;  %v1239_v62 = vld [vmem:[%s1594_s5 + $0x54] sm:$0xf0]  ;;  %v1218_v63 = vld [vmem:[%s1594_s5 + $0x170] sm:$0xf]  ;;  %v1210_v4 = vld [vmem:[%s1594_s5 + $0x160] sm:$0xf] }
  0x60   : > { %809 = vmatpush.bf16.msra.mxu1 %v1155_v56  ;;  %v1275_v0 = vld [vmem:[%s1594_s5 + $0x174] sm:$0xf0]  ;;  %v1138_v1 = vld [vmem:[%s1594_s5 + $0xd0] sm:$0xf]  ;;  %v1273_v5 = vld [vmem:[%s1594_s5 + $0x164] sm:$0xf0]  ;;  %v1075_v7 = vor.u32 %v1239_v62, %v1074_v60 }
  0x61   : > { %v1255_v2 = vld [vmem:[%s1594_s5 + $0xd4] sm:$0xf0]  ;;  %v1219_v3 = vor.u32 %v1275_v0, %v1218_v63  ;;  %v1242_v6 = vld [vmem:[%s1594_s5 + $0x74] sm:$0xf]  ;;  %v1066_v8 = vld [vmem:[%s1594_s5 + $0x40] sm:$0xf]  ;;  %v1211_v10 = vor.u32 %v1273_v5, %v1210_v4 }
  0x62   : > { %v1237_v9 = vld [vmem:[%s1594_s5 + $0x44] sm:$0xf0]  ;;  %v1092_v11 = vld [vmem:[%s1594_s5 + $0x78] sm:$0xf0]  ;;  %v1139_v12 = vor.u32 %v1255_v2, %v1138_v1  ;;  %v1130_v13 = vld [vmem:[%s1594_s5 + $0xc0] sm:$0xf] }
  0x63   : > { %797 = vmatpush.bf16.msra.mxu0 %v1083_v59  ;;  %822 = vmatpush.bf16.msra.mxu2 %v1219_v3  ;;  %v1253_v14 = vld [vmem:[%s1594_s5 + $0xc4] sm:$0xf0]  ;;  %v1095_v15 = vor.u32 %v1242_v6, %v1092_v11  ;;  %v1202_v16 = vld [vmem:[%s1594_s5 + $0x150] sm:$0xf]  ;;  %v1271_v17 = vld [vmem:[%s1594_s5 + $0x154] sm:$0xf0]  ;;  %v1067_v21 = vor.u32 %v1237_v9, %v1066_v8 }
  0x64   : > { %810 = vmatpush.bf16.msra.mxu1 %v1147_v61  ;;  %v1240_v18 = vld [vmem:[%s1594_s5 + $0x64] sm:$0xf]  ;;  %v1084_v19 = vld [vmem:[%s1594_s5 + $0x68] sm:$0xf0]  ;;  %v1058_v22 = vld [vmem:[%s1594_s5 + $0x30] sm:$0xf]  ;;  %v1203_v24 = vor.u32 %v1271_v17, %v1202_v16  ;;  %v1131_v26 = vor.u32 %v1253_v14, %v1130_v13 }
  0x65   : > { %835 = vmatpush.bf16.msra.mxu3 %v1095_v15  ;;  %v1087_v20 = vor.u32 %v1240_v18, %v1084_v19  ;;  %v1235_v23 = vld [vmem:[%s1594_s5 + $0x34] sm:$0xf0]  ;;  %v1194_v25 = vld [vmem:[%s1594_s5 + $0x140] sm:$0xf]  ;;  %v1269_v27 = vld [vmem:[%s1594_s5 + $0x144] sm:$0xf0] }
  0x66   : > { %v1238_v28 = vld [vmem:[%s1594_s5 + $0x54] sm:$0xf]  ;;  %v1076_v29 = vld [vmem:[%s1594_s5 + $0x58] sm:$0xf0]  ;;  %v1122_v30 = vld [vmem:[%s1594_s5 + $0xb0] sm:$0xf]  ;;  %v1059_v33 = vor.u32 %v1235_v23, %v1058_v22  ;;  %v1195_v35 = vor.u32 %v1269_v27, %v1194_v25 }
  0x67   : > { %798 = vmatpush.bf16.msra.mxu0 %v1075_v7  ;;  %823 = vmatpush.bf16.msra.mxu2 %v1211_v10  ;;  %v1251_v31 = vld [vmem:[%s1594_s5 + $0xb4] sm:$0xf0]  ;;  %v1079_v32 = vor.u32 %v1238_v28, %v1076_v29  ;;  %v1050_v34 = vld [vmem:[%s1594_s5 + $0x20] sm:$0xf]  ;;  %v1236_v36 = vld [vmem:[%s1594_s5 + $0x44] sm:$0xf] }
  0x68   : > { %811 = vmatpush.bf16.msra.mxu1 %v1139_v12  ;;  %v1068_v37 = vld [vmem:[%s1594_s5 + $0x48] sm:$0xf0]  ;;  %v1123_v38 = vor.u32 %v1251_v31, %v1122_v30  ;;  %v1233_v39 = vld [vmem:[%s1594_s5 + $0x24] sm:$0xf0]  ;;  %v1186_v40 = vld [vmem:[%s1594_s5 + $0x130] sm:$0xf] }
  0x69   : > { %836 = vmatpush.bf16.msra.mxu3 %v1087_v20  ;;  %v1267_v41 = vld [vmem:[%s1594_s5 + $0x134] sm:$0xf0]  ;;  %v1114_v42 = vld [vmem:[%s1594_s5 + $0xa0] sm:$0xf]  ;;  %v1249_v43 = vld [vmem:[%s1594_s5 + $0xa4] sm:$0xf0]  ;;  %v1071_v44 = vor.u32 %v1236_v36, %v1068_v37  ;;  %v1051_v45 = vor.u32 %v1233_v39, %v1050_v34 }
  0x6a   : > { %v1042_v46 = vld [vmem:[%s1594_s5 + $0x10] sm:$0xf]  ;;  %v1187_v47 = vor.u32 %v1267_v41, %v1186_v40  ;;  %v1234_v48 = vld [vmem:[%s1594_s5 + $0x34] sm:$0xf]  ;;  %v1060_v49 = vld [vmem:[%s1594_s5 + $0x38] sm:$0xf0]  ;;  %v1115_v50 = vor.u32 %v1249_v43, %v1114_v42 }
  0x6b   : > { %799 = vmatpush.bf16.msra.mxu0 %v1067_v21  ;;  %824 = vmatpush.bf16.msra.mxu2 %v1203_v24  ;;  %v1231_v51 = vld [vmem:[%s1594_s5 + $0x14] sm:$0xf0]  ;;  %v1178_v52 = vld [vmem:[%s1594_s5 + $0x120] sm:$0xf]  ;;  %v1265_v53 = vld [vmem:[%s1594_s5 + $0x124] sm:$0xf0]  ;;  %v1063_v58 = vor.u32 %v1234_v48, %v1060_v49 }
  0x6c   : > { %812 = vmatpush.bf16.msra.mxu1 %v1131_v26  ;;  %v1106_v54 = vld [vmem:[%s1594_s5 + $0x90] sm:$0xf]  ;;  %v1247_v55 = vld [vmem:[%s1594_s5 + $0x94] sm:$0xf0]  ;;  %v1034_v56 = vld [vmem:[%s1594_s5] sm:$0xf]  ;;  %v1043_v59 = vor.u32 %v1231_v51, %v1042_v46  ;;  %v1179_v60 = vor.u32 %v1265_v53, %v1178_v52 }
  0x6d   : > { %837 = vmatpush.bf16.msra.mxu3 %v1079_v32  ;;  %v1229_v57 = vld [vmem:[%s1594_s5 + $0x4] sm:$0xf0]  ;;  %v1232_v61 = vld [vmem:[%s1594_s5 + $0x24] sm:$0xf]  ;;  %v1052_v62 = vld [vmem:[%s1594_s5 + $0x28] sm:$0xf0]  ;;  %v1107_v0 = vor.u32 %v1247_v55, %v1106_v54 }
  0x6e   : > { %v495_v63 = vld [vmem:[%s1582_s26] sm:$0xff]  ;;  %v1170_v2 = vld [vmem:[%s1594_s5 + $0x110] sm:$0xf]  ;;  %v1263_v3 = vld [vmem:[%s1594_s5 + $0x114] sm:$0xf0]  ;;  %v1055_v9 = vor.u32 %v1232_v61, %v1052_v62  ;;  %v1035_v11 = vor.u32 %v1229_v57, %v1034_v56  ;;  %p1224_p13 = scmp.ne.s32.totalorder %s1373_s14, 5 }
  0x6f   : > { %800 = vmatpush.bf16.msra.mxu0 %v1059_v33  ;;  %825 = vmatpush.bf16.msra.mxu2 %v1195_v35  ;;  %v1098_v1 = vld [vmem:[%s1594_s5 + $0x80] sm:$0xf]  ;;  %v1245_v4 = vld [vmem:[%s1594_s5 + $0x84] sm:$0xf0]  ;;  %v1258_v5 = vld [vmem:[%s1594_s5 + $0xf4] sm:$0xf]  ;;  %v547_v10 = vunpack.c.l.b16 %v495_v63  ;;  %v1171_v12 = vor.u32 %v1263_v3, %v1170_v2  ;;  %v548_v13 = vunpack.c.h.b16 %v495_v63 }
  0x70   : > { %813 = vmatpush.bf16.msra.mxu1 %v1123_v38  ;;  %v1156_v6 = vld [vmem:[%s1594_s5 + $0xf8] sm:$0xf0]  ;;  %v1274_v7 = vld [vmem:[%s1594_s5 + $0x174] sm:$0xf]  ;;  %v496_v16 = vld [vmem:[%s1582_s26 + $0x8] sm:$0xf]  ;;  %v1099_v17 = vor.u32 %v1245_v4, %v1098_v1 }
  0x71   : > { %838 = vmatpush.bf16.msra.mxu3 %v1071_v44  ;;  %v1220_v8 = vld [vmem:[%s1594_s5 + $0x178] sm:$0xf0]  ;;  %v1230_v14 = vld [vmem:[%s1594_s5 + $0x14] sm:$0xf]  ;;  %v1159_v18 = vor.u32 %v1258_v5, %v1156_v6  ;;  %v1162_v19 = vld [vmem:[%s1594_s5 + $0x100] sm:$0xf]  ;;  %v550_v26 = vpack.c.b16 %v547_v10, %v547_v10  ;;  %v549_v28 = vunpack.c.l.b16 %v496_v16  ;;  %v1671_v29 = vpack.c.b16 %v548_v13, %v548_v13 }
  0x72   : > { %v1044_v15 = vld [vmem:[%s1594_s5 + $0x18] sm:$0xf0]  ;;  %v1261_v20 = vld [vmem:[%s1594_s5 + $0x104] sm:$0xf0]  ;;  %v1223_v21 = vor.u32 %v1274_v7, %v1220_v8  ;;  %v1256_v22 = vld [vmem:[%s1594_s5 + $0xe4] sm:$0xf] }
  0x73   : > { %801 = vmatpush.bf16.msra.mxu0 %v1051_v45  ;;  %826 = vmatpush.bf16.msra.mxu2 %v1187_v47  ;;  %v1148_v23 = vld [vmem:[%s1594_s5 + $0xe8] sm:$0xf0]  ;;  %v1272_v24 = vld [vmem:[%s1594_s5 + $0x164] sm:$0xf]  ;;  %v1047_v27 = vor.u32 %v1230_v14, %v1044_v15  ;;  %v1163_v30 = vor.u32 %v1261_v20, %v1162_v19  ;;  %v1254_v35 = vld [vmem:[%s1594_s5 + $0xd4] sm:$0xf]  ;;  %v552_v39 = vpack.c.b16 %v549_v28, %v549_v28 }
  0x74   : > { %814 = vmatpush.bf16.msra.mxu1 %v1115_v50  ;;  %v1212_v25 = vld [vmem:[%s1594_s5 + $0x168] sm:$0xf0]  ;;  %v1228_v31 = vld [vmem:[%s1594_s5 + $0x4] sm:$0xf]  ;;  %v1151_v33 = vor.u32 %v1256_v22, %v1148_v23  ;;  %v1140_v36 = vld [vmem:[%s1594_s5 + $0xd8] sm:$0xf0] }
  0x75   : > { %839 = vmatpush.bf16.msra.mxu3 %v1063_v58  ;;  %v1036_v32 = vld [vmem:[%s1594_s5 + $0x8] sm:$0xf0]  ;;  %v1215_v34 = vor.u32 %v1272_v24, %v1212_v25  ;;  %v1270_v37 = vld [vmem:[%s1594_s5 + $0x154] sm:$0xf]  ;;  %v1204_v38 = vld [vmem:[%s1594_s5 + $0x158] sm:$0xf0]  ;;  %v1143_v41 = vor.u32 %v1254_v35, %v1140_v36 }
  0x76   : > { %v1039_v40 = vor.u32 %v1228_v31, %v1036_v32  ;;  %v1207_v42 = vor.u32 %v1270_v37, %v1204_v38  ;;  %v1252_v43 = vld [vmem:[%s1594_s5 + $0xc4] sm:$0xf]  ;;  %v1132_v44 = vld [vmem:[%s1594_s5 + $0xc8] sm:$0xf0]  ;;  %v1250_v49 = vld [vmem:[%s1594_s5 + $0xb4] sm:$0xf] }
  0x77   : > { %802 = vmatpush.bf16.msra.mxu0 %v1043_v59  ;;  %827 = vmatpush.bf16.msra.mxu2 %v1179_v60  ;;  %v1268_v45 = vld [vmem:[%s1594_s5 + $0x144] sm:$0xf]  ;;  %v1196_v46 = vld [vmem:[%s1594_s5 + $0x148] sm:$0xf0]  ;;  %v1135_v47 = vor.u32 %v1252_v43, %v1132_v44  ;;  %v1124_v50 = vld [vmem:[%s1594_s5 + $0xb8] sm:$0xf0] }
  0x78   : > { %815 = vmatpush.bf16.msra.mxu1 %v1107_v0  ;;  %v1199_v48 = vor.u32 %v1268_v45, %v1196_v46  ;;  %v1266_v51 = vld [vmem:[%s1594_s5 + $0x134] sm:$0xf]  ;;  %v1188_v52 = vld [vmem:[%s1594_s5 + $0x138] sm:$0xf0]  ;;  %v1127_v53 = vor.u32 %v1250_v49, %v1124_v50  ;;  %v1248_v55 = vld [vmem:[%s1594_s5 + $0xa4] sm:$0xf] }
  0x79   : > { %840 = vmatpush.bf16.msra.mxu3 %v1055_v9  ;;  %v1191_v54 = vor.u32 %v1266_v51, %v1188_v52  ;;  %v1116_v56 = vld [vmem:[%s1594_s5 + $0xa8] sm:$0xf0]  ;;  %v1264_v57 = vld [vmem:[%s1594_s5 + $0x124] sm:$0xf]  ;;  %v1246_v61 = vld [vmem:[%s1594_s5 + $0x94] sm:$0xf] }
  0x7a   : > { %v1180_v58 = vld [vmem:[%s1594_s5 + $0x128] sm:$0xf0]  ;;  %v1119_v59 = vor.u32 %v1248_v55, %v1116_v56  ;;  %v1108_v62 = vld [vmem:[%s1594_s5 + $0x98] sm:$0xf0]  ;;  %v1262_v63 = vld [vmem:[%s1594_s5 + $0x114] sm:$0xf] }
  0x7b   : > { %803 = vmatpush.bf16.msra.mxu0 %v1035_v11  ;;  %828 = vmatpush.bf16.msra.mxu2 %v1171_v12  ;;  %v1183_v60 = vor.u32 %v1264_v57, %v1180_v58  ;;  %v1172_v0 = vld [vmem:[%s1594_s5 + $0x118] sm:$0xf0]  ;;  %v1111_v1 = vor.u32 %v1246_v61, %v1108_v62  ;;  %v1244_v3 = vld [vmem:[%s1594_s5 + $0x84] sm:$0xf]  ;;  %v1100_v4 = vld [vmem:[%s1594_s5 + $0x88] sm:$0xf0] }
  0x7c   : > { %816 = vmatpush.bf16.msra.mxu1 %v1099_v17  ;;  %v1175_v2 = vor.u32 %v1262_v63, %v1172_v0  ;;  %v1260_v5 = vld [vmem:[%s1594_s5 + $0x104] sm:$0xf]  ;;  %v1164_v6 = vld [vmem:[%s1594_s5 + $0x108] sm:$0xf0]  ;;  %v1103_v7 = vor.u32 %v1244_v3, %v1100_v4 }
  0x7d   : > { %841 = vmatpush.bf16.msra.mxu3 %v1047_v27  ;;  %v1167_v8 = vor.u32 %v1260_v5, %v1164_v6  ;;  %v493_v14 = vld [vmem:[%s1592_s4] sm:$0xff]  ;;  %v494_v17 = vld [vmem:[%s1592_s4 + $0x8] sm:$0xff] }
  0x7e   : > { %804 = vmatmul.bf16.vlgmr.msra.gmra.mxu0 %v550_v26 }
  0x7f   : > { %848 = vmatpush.bf16.msrb.mxu0 %v1159_v18  ;;  %817 = vmatmul.bf16.vlgmr.msra.gmra.mxu1 %v1671_v29 }
  0x80   : > { %861 = vmatpush.bf16.msrb.mxu1 %v1223_v21  ;;  %829 = vmatpush.bf16.msra.mxu2 %v1163_v30 }
  0x81   : > { %842 = vmatpush.bf16.msra.mxu3 %v1039_v40 }
  0x83   : > { %849 = vmatpush.bf16.msrb.mxu0 %v1151_v33  ;;  %830 = vmatmul.bf16.vlgmr.msra.gmra.mxu2 %v552_v39 }
  0x84   : > { %862 = vmatpush.bf16.msrb.mxu1 %v1215_v34  ;;  %843 = vmatmul.bf16.vlgmr.msra.gmra.mxu3 %v550_v26 }
  0x87   : > { %850 = vmatpush.bf16.msrb.mxu0 %v1143_v41 }
  0x88   : > { %863 = vmatpush.bf16.msrb.mxu1 %v1207_v42 }
  0x8b   : > { %851 = vmatpush.bf16.msrb.mxu0 %v1135_v47 }
  0x8c   : > { %864 = vmatpush.bf16.msrb.mxu1 %v1199_v48 }
  0x8f   : > { %852 = vmatpush.bf16.msrb.mxu0 %v1127_v53 }
  0x90   : > { %865 = vmatpush.bf16.msrb.mxu1 %v1191_v54 }
  0x93   : > { %853 = vmatpush.bf16.msrb.mxu0 %v1119_v59 }
  0x94   : > { %866 = vmatpush.bf16.msrb.mxu1 %v1183_v60 }
  0x97   : > { %854 = vmatpush.bf16.msrb.mxu0 %v1111_v1 }
  0x98   : > { %867 = vmatpush.bf16.msrb.mxu1 %v1175_v2 }
  0x9b   : > { %855 = vmatpush.bf16.msrb.mxu0 %v1103_v7 }
  0x9c   : > { %868 = vmatpush.bf16.msrb.mxu1 %v1167_v8 }
  0x9e   : > { %856 = vmatmul.bf16.vlgmr.msrb.gmra.mxu0 %v1671_v29 }
  0x9f   : > { %869 = vmatmul.bf16.vlgmr.msrb.gmra.mxu1 %v552_v39 }
  0xfb   : > { %v805_v9 = vpop.f32.mrf.mxu0 }
  0xfc   : > { %v818_v10 = vpop.f32.mrf.mxu1 }
  0xfd   : > { %v819_v11 = vadd.f32 %v818_v10, %v805_v9 }
 0x103   : > { %v807_v12 = vpop.f32.mrf.mxu0 }
 0x104   : > { %v820_v13 = vpop.f32.mrf.mxu1 }
 0x106   : > { %v831_v15 = vpop.f32.mrf.mxu2 }
 0x107   : > { %v832_v16 = vadd.f32 %v831_v15, %v819_v11  ;;  %v844_v19 = vpop.f32.mrf.mxu3 }
 0x109   : > { %v874_v18 = vadd.f32 %v832_v16, %v493_v14 }
 0x10b   : > { %876 = vst [vmem:[%s1592_s4] sm:$0xff] %v874_v18 }
 0x10e   : > { %v833_v20 = vpop.f32.mrf.mxu2 }
 0x10f   : > { %v846_v21 = vpop.f32.mrf.mxu3 }
 0x11b   : > { %v857_v22 = vpop.f32.mrf.mxu0 }
 0x11c   : > { %v858_v23 = vadd.f32 %v857_v22, %v844_v19  ;;  %v870_v24 = vpop.f32.mrf.mxu1 }
 0x11e   : > { %v871_v25 = vadd.f32 %v870_v24, %v858_v23 }
 0x120   : > { %v875_v26 = vadd.f32 %v871_v25, %v494_v17  ;;  %881 = sbr.rel (%p1224_p13) target bundleno = 303 (0x12f), region = 78 }
 0x122   : > { %877 = vst [vmem:[%s1592_s4 + $0x8] sm:$0xff] %v875_v26 }
 0x123   : > { %v859_v27 = vpop.f32.mrf.mxu0 }
 0x124   : > { %v872_v28 = vpop.f32.mrf.mxu1 }
 0x125   : > { %v882_v29 = vld [vmem:[%s1592_s4] sm:$0xff] }
 0x126   : > { %v884_v31 = vld [vmem:[%s475_s12] sm:$0x3] }
 0x127   : > { %v886_v32 = vperm.slane %v884_v31, 0  ;;  %v887_v33 = vperm.slane %v884_v31, 1 }
 0x129   : > { %v883_v30 = vld [vmem:[%s1592_s4 + $0x8] sm:$0xff]  ;;  %v890_v34 = vadd.f32 %v886_v32, %v882_v29 }
 0x12a   : > { %v891_v35 = vadd.f32 %v887_v33, %v883_v30 }
 0x12b   : > { %v892_v36 = vmax.f32 %v890_v34, 0.0 }
 0x12c   : > { %v893_v37 = vmax.f32 %v891_v35, 0.0 }
 0x12d   : > { %894 = vst [vmem:[%s1592_s4] sm:$0xff] %v892_v36 }
 0x12e   : > { %895 = vst [vmem:[%s1592_s4 + $0x8] sm:$0xff] %v893_v37 }
 0x12f PF: > { %s13_s18 = sadd.s32 1, %s1389_s18   ;;  %s1740_s12 = smov %s1369_s13 }
 0x130   : > { %p10_p0 = scmp.ge.s32.totalorder %s13_s18, 14   ;;  %s1741_s13 = smov %s1463_s25 }
 0x131   : > { %s1742_s14 = smov %s1381_s16  ;;  %s1743_s15 = smov %s1385_s17 }
 0x132   : > { %s1744_s16 = smov %s1747_s19  ;;  %s1745_s17 = smov %s1751_s20 }
 0x133   :  { %12 = sbr.rel (!%p10_p0) target bundleno = 4 (0x4), region = 119 }

// kernel: resnet18_16s_forward.37
= control target key start
LH: loop header
LB: loop body
LE: loop exit
PB: predicated region body
PF: predicated region fallthrough
CT: control target
= control target key end

     0   :  { %s1103_s12 = smov 0   ;;  %s1105_s13 = smov 0   ;;  %s1308_s0 = inlined_call_operand.vmem [shape: bf16[8,256], index: 0, kind: input, shape index: {}]   ;;  %s1309_s1 = inlined_call_operand.vmem [shape: bf16[256,512], index: 1, kind: input, shape index: {}]   ;;  %s1310_s2 = inlined_call_operand.vmem [shape: f32[1,512], index: 2, kind: input, shape index: {}]   ;;  %s1311_s3 = inlined_call_operand.vmem [shape: f32[8,512], index: 3, kind: output, shape index: {}]  }
   0x1   :  { %s1107_s14 = smov 0   ;;  %s1109_s15 = smov 0  }
   0x2   :  { %s1111_s16 = smov 0  }
   0x3 LB: > { %s28_s17 = sadd.s32 1, %s1076_s15  ;;  %p76_p1 = scmp.ne.s32.totalorder %s1068_s13, %s1064_s12  ;;  %s1080_s16 = sphi %s1111_s16, %s13_s16   ;;  %s1076_s15 = sphi %s1109_s15, %s1315_s15   ;;  %s1072_s14 = sphi %s1107_s14, %s1314_s14   ;;  %s1068_s13 = sphi %s1105_s13, %s1313_s13   ;;  %s1064_s12 = sphi %s1103_s12, %s1312_s12  }
   0x4   : > { %p30_p0 = scmp.ge.s32.totalorder %s28_s17, 2  ;;  %p77_p2 = scmp.eq.s32.totalorder %s1080_s16, 0 }
   0x5   : > { %s69_s19 = sadd.s32 1, %s1068_s13  ;;  %p829_p5 = scmp.ge.s32.totalorder %s1080_s16, 2 }
   0x6   : > { %s1317_s17 = smov (%p30_p0, %s28_s17), 0  ;;  %p78_p3 = por %p77_p2, %p76_p1 }
   0x7   : > { %s65_s18 = ssub.s32 %s1076_s15, %s1317_s17  ;;  %169 = sbr.rel (%p829_p5) target bundleno = 48 (0x30), region = 20 }
   0x8   : > { %p67_p4 = scmp.eq.s32.totalorder %s65_s18, 0 }
   0xa   : > { %s1138_s20 = scalar_select %p67_p4, %s1068_s13, %s69_s19  }
   0xc   : > { %172 = sbr.rel (!%p78_p3) target bundleno = 48 (0x30), region = 24  ;;  %s174_s21 = sand.u32 (%p78_p3), 1, %s1068_s13  }
   0xd   : > { %s968_s22 = sshll.u32 (%p78_p3), %s1076_s15, 3  ;;  %s830_s23 = sshll.u32 (%p78_p3), %s174_s21, 8 }
   0xe   : > { %s1146_s26 = scalar_lea.vmem (%p78_p3), %s1309_s1, %s968_s22  ;;  %s1151_s27 = scalar_lea.vmem (%p78_p3), [#allocation2], %s830_s23 }
   0xf   : > { %v273_v0 = vld [vmem:[%s1146_s26] sm:$0xff] (%p78_p3)  ;;  %v275_v1 = vld [vmem:[%s1146_s26 + $0x10] sm:$0xff] (%p78_p3) }
  0x10   : > { %v277_v2 = vld [vmem:[%s1146_s26 + $0x20] sm:$0xff] (%p78_p3)  ;;  %274 = vst [vmem:[%s1151_s27] sm:$0xff] (%p78_p3), %v273_v0  ;;  %v279_v3 = vld [vmem:[%s1146_s26 + $0x30] sm:$0xff] (%p78_p3) }
  0x11   : > { %276 = vst [vmem:[%s1151_s27 + $0x8] sm:$0xff] %v275_v1  ;;  %v281_v4 = vld [vmem:[%s1146_s26 + $0x40] sm:$0xff]  ;;  %v283_v5 = vld [vmem:[%s1146_s26 + $0x50] sm:$0xff] }
  0x12   : > { %278 = vst [vmem:[%s1151_s27 + $0x10] sm:$0xff] %v277_v2  ;;  %v285_v6 = vld [vmem:[%s1146_s26 + $0x60] sm:$0xff]  ;;  %v287_v7 = vld [vmem:[%s1146_s26 + $0x70] sm:$0xff] }
  0x13   : > { %280 = vst [vmem:[%s1151_s27 + $0x18] sm:$0xff] %v279_v3  ;;  %v289_v8 = vld [vmem:[%s1146_s26 + $0x80] sm:$0xff]  ;;  %v291_v9 = vld [vmem:[%s1146_s26 + $0x90] sm:$0xff] }
  0x14   : > { %282 = vst [vmem:[%s1151_s27 + $0x20] sm:$0xff] %v281_v4  ;;  %v293_v10 = vld [vmem:[%s1146_s26 + $0xa0] sm:$0xff]  ;;  %v295_v11 = vld [vmem:[%s1146_s26 + $0xb0] sm:$0xff] }
  0x15   : > { %284 = vst [vmem:[%s1151_s27 + $0x28] sm:$0xff] %v283_v5  ;;  %v297_v12 = vld [vmem:[%s1146_s26 + $0xc0] sm:$0xff]  ;;  %v299_v13 = vld [vmem:[%s1146_s26 + $0xd0] sm:$0xff] }
  0x16   : > { %286 = vst [vmem:[%s1151_s27 + $0x30] sm:$0xff] %v285_v6  ;;  %v301_v14 = vld [vmem:[%s1146_s26 + $0xe0] sm:$0xff]  ;;  %v303_v15 = vld [vmem:[%s1146_s26 + $0xf0] sm:$0xff] }
  0x17   : > { %288 = vst [vmem:[%s1151_s27 + $0x38] sm:$0xff] %v287_v7  ;;  %v305_v16 = vld [vmem:[%s1146_s26 + $0x100] sm:$0xff]  ;;  %v307_v17 = vld [vmem:[%s1146_s26 + $0x110] sm:$0xff] }
  0x18   : > { %290 = vst [vmem:[%s1151_s27 + $0x40] sm:$0xff] %v289_v8  ;;  %v309_v18 = vld [vmem:[%s1146_s26 + $0x120] sm:$0xff]  ;;  %v311_v19 = vld [vmem:[%s1146_s26 + $0x130] sm:$0xff] }
  0x19   : > { %292 = vst [vmem:[%s1151_s27 + $0x48] sm:$0xff] %v291_v9  ;;  %v313_v20 = vld [vmem:[%s1146_s26 + $0x140] sm:$0xff]  ;;  %v315_v21 = vld [vmem:[%s1146_s26 + $0x150] sm:$0xff] }
  0x1a   : > { %294 = vst [vmem:[%s1151_s27 + $0x50] sm:$0xff] %v293_v10  ;;  %v317_v22 = vld [vmem:[%s1146_s26 + $0x160] sm:$0xff]  ;;  %v319_v23 = vld [vmem:[%s1146_s26 + $0x170] sm:$0xff] }
  0x1b   : > { %296 = vst [vmem:[%s1151_s27 + $0x58] sm:$0xff] %v295_v11  ;;  %v321_v24 = vld [vmem:[%s1146_s26 + $0x180] sm:$0xff]  ;;  %v323_v25 = vld [vmem:[%s1146_s26 + $0x190] sm:$0xff] }
  0x1c   : > { %298 = vst [vmem:[%s1151_s27 + $0x60] sm:$0xff] %v297_v12  ;;  %v325_v26 = vld [vmem:[%s1146_s26 + $0x1a0] sm:$0xff]  ;;  %v327_v27 = vld [vmem:[%s1146_s26 + $0x1b0] sm:$0xff] }
  0x1d   : > { %300 = vst [vmem:[%s1151_s27 + $0x68] sm:$0xff] %v299_v13  ;;  %v329_v28 = vld [vmem:[%s1146_s26 + $0x1c0] sm:$0xff]  ;;  %v331_v29 = vld [vmem:[%s1146_s26 + $0x1d0] sm:$0xff] }
  0x1e   : > { %302 = vst [vmem:[%s1151_s27 + $0x70] sm:$0xff] %v301_v14  ;;  %v333_v30 = vld [vmem:[%s1146_s26 + $0x1e0] sm:$0xff]  ;;  %v335_v31 = vld [vmem:[%s1146_s26 + $0x1f0] sm:$0xff] }
  0x1f   : > { %304 = vst [vmem:[%s1151_s27 + $0x78] sm:$0xff] %v303_v15 }
  0x20   : > { %306 = vst [vmem:[%s1151_s27 + $0x80] sm:$0xff] %v305_v16 }
  0x21   : > { %308 = vst [vmem:[%s1151_s27 + $0x88] sm:$0xff] %v307_v17 }
  0x22   : > { %310 = vst [vmem:[%s1151_s27 + $0x90] sm:$0xff] %v309_v18 }
  0x23   : > { %312 = vst [vmem:[%s1151_s27 + $0x98] sm:$0xff] %v311_v19 }
  0x24   : > { %314 = vst [vmem:[%s1151_s27 + $0xa0] sm:$0xff] %v313_v20 }
  0x25   : > { %316 = vst [vmem:[%s1151_s27 + $0xa8] sm:$0xff] %v315_v21 }
  0x26   : > { %318 = vst [vmem:[%s1151_s27 + $0xb0] sm:$0xff] %v317_v22 }
  0x27   : > { %320 = vst [vmem:[%s1151_s27 + $0xb8] sm:$0xff] %v319_v23 }
  0x28   : > { %322 = vst [vmem:[%s1151_s27 + $0xc0] sm:$0xff] %v321_v24 }
  0x29   : > { %324 = vst [vmem:[%s1151_s27 + $0xc8] sm:$0xff] %v323_v25 }
  0x2a   : > { %326 = vst [vmem:[%s1151_s27 + $0xd0] sm:$0xff] %v325_v26 }
  0x2b   : > { %328 = vst [vmem:[%s1151_s27 + $0xd8] sm:$0xff] %v327_v27 }
  0x2c   : > { %330 = vst [vmem:[%s1151_s27 + $0xe0] sm:$0xff] %v329_v28 }
  0x2d   : > { %332 = vst [vmem:[%s1151_s27 + $0xe8] sm:$0xff] %v331_v29 }
  0x2e   : > { %334 = vst [vmem:[%s1151_s27 + $0xf0] sm:$0xff] %v333_v30 }
  0x2f   : > { %336 = vst [vmem:[%s1151_s27 + $0xf8] sm:$0xff] %v335_v31 }
  0x30 PF: > { %p833_p6 = scmp.ge.s32.totalorder %s1080_s16, 1  ;;  %p349_p7 = scmp.lt.s32.totalorder %s1080_s16, 3 }
  0x32   : > { %p350_p8 = pnand %p833_p6, %p349_p7 }
  0x33   : > { %s356_s28 = sand.u32 (!%p350_p8), 1, %s1064_s12   ;;  %s835_s6 = sshll.u32 (!%p350_p8), %s1072_s14, 1 }
  0x34   : > { %353 = sbr.rel (%p350_p8) target bundleno = 233 (0xe9), region = 66  ;;  %s834_s29 = sshll.u32 (!%p350_p8), %s356_s28, 8 }
  0x35   : > { %s1217_s30 = scalar_lea.vmem (!%p350_p8), [#allocation2], %s834_s29  ;;  %p409_p9 = scmp.lt.s32.totalorder (!%p350_p8), %s835_s6, 3 }
  0x39   : > { %v896_v32 = vld [vmem:[%s1217_s30 + $0x70] sm:$0xf]  ;;  %v984_v33 = vld [vmem:[%s1217_s30 + $0x74] sm:$0xf0]  ;;  %v983_v37 = vld [vmem:[%s1217_s30 + $0x74] sm:$0xf] }
  0x3a   : > { %v960_v34 = vld [vmem:[%s1217_s30 + $0xf0] sm:$0xf]  ;;  %v897_v35 = vor.u32 %v984_v33, %v896_v32  ;;  %v1000_v36 = vld [vmem:[%s1217_s30 + $0xf4] sm:$0xf0]  ;;  %v898_v38 = vld [vmem:[%s1217_s30 + $0x78] sm:$0xf0] }
  0x3b   : > { %v961_v39 = vor.u32 %v1000_v36, %v960_v34  ;;  %v901_v40 = vor.u32 %v983_v37, %v898_v38  ;;  %v999_v41 = vld [vmem:[%s1217_s30 + $0xf4] sm:$0xf]  ;;  %v962_v42 = vld [vmem:[%s1217_s30 + $0xf8] sm:$0xf0]  ;;  %v888_v43 = vld [vmem:[%s1217_s30 + $0x60] sm:$0xf] }
  0x3c   : > { %631 = vmatpush.bf16.msra.mxu0 %v897_v35  ;;  %v965_v44 = vor.u32 %v999_v41, %v962_v42  ;;  %v982_v45 = vld [vmem:[%s1217_s30 + $0x64] sm:$0xf0]  ;;  %v952_v46 = vld [vmem:[%s1217_s30 + $0xe0] sm:$0xf]  ;;  %v981_v50 = vld [vmem:[%s1217_s30 + $0x64] sm:$0xf] }
  0x3d   : > { %v998_v47 = vld [vmem:[%s1217_s30 + $0xe4] sm:$0xf0]  ;;  %644 = vmatpush.bf16.msra.mxu1 %v961_v39  ;;  %657 = vmatpush.bf16.msra.mxu2 %v901_v40  ;;  %v889_v48 = vor.u32 %v982_v45, %v888_v43  ;;  %v890_v51 = vld [vmem:[%s1217_s30 + $0x68] sm:$0xf0]  ;;  %v997_v52 = vld [vmem:[%s1217_s30 + $0xe4] sm:$0xf] }
  0x3e   : > { %v953_v49 = vor.u32 %v998_v47, %v952_v46  ;;  %670 = vmatpush.bf16.msra.mxu3 %v965_v44  ;;  %v893_v53 = vor.u32 %v981_v50, %v890_v51  ;;  %v954_v54 = vld [vmem:[%s1217_s30 + $0xe8] sm:$0xf0]  ;;  %v880_v55 = vld [vmem:[%s1217_s30 + $0x50] sm:$0xf]  ;;  %v980_v56 = vld [vmem:[%s1217_s30 + $0x54] sm:$0xf0] }
  0x3f   : > { %v957_v57 = vor.u32 %v997_v52, %v954_v54  ;;  %v944_v58 = vld [vmem:[%s1217_s30 + $0xd0] sm:$0xf]  ;;  %v996_v59 = vld [vmem:[%s1217_s30 + $0xd4] sm:$0xf0]  ;;  %v979_v60 = vld [vmem:[%s1217_s30 + $0x54] sm:$0xf]  ;;  %v881_v61 = vor.u32 %v980_v56, %v880_v55 }
  0x40   : > { %632 = vmatpush.bf16.msra.mxu0 %v889_v48  ;;  %v882_v62 = vld [vmem:[%s1217_s30 + $0x58] sm:$0xf0]  ;;  %v995_v63 = vld [vmem:[%s1217_s30 + $0xd4] sm:$0xf]  ;;  %v945_v1 = vor.u32 %v996_v59, %v944_v58  ;;  %v872_v3 = vld [vmem:[%s1217_s30 + $0x40] sm:$0xf] }
  0x41   : > { %v946_v0 = vld [vmem:[%s1217_s30 + $0xd8] sm:$0xf0]  ;;  %645 = vmatpush.bf16.msra.mxu1 %v953_v49  ;;  %658 = vmatpush.bf16.msra.mxu2 %v893_v53  ;;  %v885_v2 = vor.u32 %v979_v60, %v882_v62  ;;  %v978_v4 = vld [vmem:[%s1217_s30 + $0x44] sm:$0xf0]  ;;  %v936_v5 = vld [vmem:[%s1217_s30 + $0xc0] sm:$0xf] }
  0x42   : > { %671 = vmatpush.bf16.msra.mxu3 %v957_v57  ;;  %v949_v6 = vor.u32 %v995_v63, %v946_v0  ;;  %v994_v7 = vld [vmem:[%s1217_s30 + $0xc4] sm:$0xf0]  ;;  %v977_v8 = vld [vmem:[%s1217_s30 + $0x44] sm:$0xf]  ;;  %v874_v9 = vld [vmem:[%s1217_s30 + $0x48] sm:$0xf0]  ;;  %v873_v12 = vor.u32 %v978_v4, %v872_v3 }
  0x43   : > { %v993_v10 = vld [vmem:[%s1217_s30 + $0xc4] sm:$0xf]  ;;  %v938_v11 = vld [vmem:[%s1217_s30 + $0xc8] sm:$0xf0]  ;;  %v937_v13 = vor.u32 %v994_v7, %v936_v5  ;;  %v877_v14 = vor.u32 %v977_v8, %v874_v9  ;;  %v864_v15 = vld [vmem:[%s1217_s30 + $0x30] sm:$0xf] }
  0x44   : > { %633 = vmatpush.bf16.msra.mxu0 %v881_v61  ;;  %v976_v16 = vld [vmem:[%s1217_s30 + $0x34] sm:$0xf0]  ;;  %v928_v17 = vld [vmem:[%s1217_s30 + $0xb0] sm:$0xf]  ;;  %v941_v18 = vor.u32 %v993_v10, %v938_v11  ;;  %v975_v20 = vld [vmem:[%s1217_s30 + $0x34] sm:$0xf] }
  0x45   : > { %646 = vmatpush.bf16.msra.mxu1 %v945_v1  ;;  %659 = vmatpush.bf16.msra.mxu2 %v885_v2  ;;  %v992_v19 = vld [vmem:[%s1217_s30 + $0xb4] sm:$0xf0]  ;;  %v866_v21 = vld [vmem:[%s1217_s30 + $0x38] sm:$0xf0]  ;;  %v991_v22 = vld [vmem:[%s1217_s30 + $0xb4] sm:$0xf]  ;;  %v865_v24 = vor.u32 %v976_v16, %v864_v15 }
  0x46   : > { %672 = vmatpush.bf16.msra.mxu3 %v949_v6  ;;  %v930_v23 = vld [vmem:[%s1217_s30 + $0xb8] sm:$0xf0]  ;;  %v929_v25 = vor.u32 %v992_v19, %v928_v17  ;;  %v869_v26 = vor.u32 %v975_v20, %v866_v21  ;;  %v856_v27 = vld [vmem:[%s1217_s30 + $0x20] sm:$0xf]  ;;  %v974_v28 = vld [vmem:[%s1217_s30 + $0x24] sm:$0xf0] }
  0x47   : > { %v920_v29 = vld [vmem:[%s1217_s30 + $0xa0] sm:$0xf]  ;;  %v933_v30 = vor.u32 %v991_v22, %v930_v23  ;;  %v990_v31 = vld [vmem:[%s1217_s30 + $0xa4] sm:$0xf0]  ;;  %v973_v32 = vld [vmem:[%s1217_s30 + $0x24] sm:$0xf]  ;;  %v857_v36 = vor.u32 %v974_v28, %v856_v27 }
  0x48   : > { %634 = vmatpush.bf16.msra.mxu0 %v873_v12  ;;  %v858_v33 = vld [vmem:[%s1217_s30 + $0x28] sm:$0xf0]  ;;  %v989_v34 = vld [vmem:[%s1217_s30 + $0xa4] sm:$0xf]  ;;  %v921_v37 = vor.u32 %v990_v31, %v920_v29  ;;  %v848_v39 = vld [vmem:[%s1217_s30 + $0x10] sm:$0xf] }
  0x49   : > { %647 = vmatpush.bf16.msra.mxu1 %v937_v13  ;;  %660 = vmatpush.bf16.msra.mxu2 %v877_v14  ;;  %v922_v35 = vld [vmem:[%s1217_s30 + $0xa8] sm:$0xf0]  ;;  %v861_v38 = vor.u32 %v973_v32, %v858_v33  ;;  %v972_v40 = vld [vmem:[%s1217_s30 + $0x14] sm:$0xf0]  ;;  %v912_v41 = vld [vmem:[%s1217_s30 + $0x90] sm:$0xf] }
  0x4a   : > { %673 = vmatpush.bf16.msra.mxu3 %v941_v18  ;;  %v925_v42 = vor.u32 %v989_v34, %v922_v35  ;;  %v988_v43 = vld [vmem:[%s1217_s30 + $0x94] sm:$0xf0]  ;;  %v971_v44 = vld [vmem:[%s1217_s30 + $0x14] sm:$0xf]  ;;  %v850_v45 = vld [vmem:[%s1217_s30 + $0x18] sm:$0xf0]  ;;  %v849_v48 = vor.u32 %v972_v40, %v848_v39 }
  0x4b   : > { %v987_v46 = vld [vmem:[%s1217_s30 + $0x94] sm:$0xf]  ;;  %v914_v47 = vld [vmem:[%s1217_s30 + $0x98] sm:$0xf0]  ;;  %v431_v49 = vld [vmem:[%s1308_s0] sm:$0xff]  ;;  %v913_v50 = vor.u32 %v988_v43, %v912_v41  ;;  %v853_v51 = vor.u32 %v971_v44, %v850_v45  ;;  %s1319_s6 = smov (!%p409_p9, %s835_s6), 3 }
  0x4c   : > { %635 = vmatpush.bf16.msra.mxu0 %v865_v24  ;;  %v840_v52 = vld [vmem:[%s1217_s30] sm:$0xf]  ;;  %v970_v53 = vld [vmem:[%s1217_s30 + $0x4] sm:$0xf0]  ;;  %v917_v55 = vor.u32 %v987_v46, %v914_v47  ;;  %v969_v57 = vld [vmem:[%s1217_s30 + $0x4] sm:$0xf]  ;;  %v465_v61 = vunpack.c.l.b16 %v431_v49  ;;  %v466_v63 = vunpack.c.h.b16 %v431_v49  ;;  %s411_s14 = scalar_lea.vmem %s1310_s2, %s1319_s6 }
  0x4d   : > { %648 = vmatpush.bf16.msra.mxu1 %v929_v25  ;;  %661 = vmatpush.bf16.msra.mxu2 %v869_v26  ;;  %v904_v54 = vld [vmem:[%s1217_s30 + $0x80] sm:$0xf]  ;;  %v986_v56 = vld [vmem:[%s1217_s30 + $0x84] sm:$0xf0]  ;;  %v842_v58 = vld [vmem:[%s1217_s30 + $0x8] sm:$0xf0]  ;;  %v841_v62 = vor.u32 %v970_v53, %v840_v52 }
  0x4e   : > { %674 = vmatpush.bf16.msra.mxu3 %v933_v30  ;;  %v985_v59 = vld [vmem:[%s1217_s30 + $0x84] sm:$0xf]  ;;  %v906_v60 = vld [vmem:[%s1217_s30 + $0x88] sm:$0xf0]  ;;  %v905_v0 = vor.u32 %v986_v56, %v904_v54  ;;  %v845_v1 = vor.u32 %v969_v57, %v842_v58  ;;  %v467_v3 = vpack.c.b16 %v465_v61, %v465_v61  ;;  %v468_v4 = vpack.c.b16 %v466_v63, %v466_v63  ;;  %s837_s7 = sshll.u32 %s1319_s6, 3 }
  0x4f   : > { %v909_v2 = vor.u32 %v985_v59, %v906_v60  ;;  %s421_s10 = scalar_lea.vmem %s1311_s3, %s837_s7  ;;  %v1082_v5 = vmov 0.0   ;;  %v692_v16 = vld [vmem:[%s411_s14] sm:$0x3] }
  0x50   : > { %636 = vmatpush.bf16.msra.mxu0 %v857_v36  ;;  %427 = vst [vmem:[%s421_s10] sm:$0xff] %v1082_v5  ;;  %v694_v19 = vperm.slane %v692_v16, 0  ;;  %v695_v20 = vperm.slane %v692_v16, 1 }
  0x51   : > { %649 = vmatpush.bf16.msra.mxu1 %v921_v37  ;;  %662 = vmatpush.bf16.msra.mxu2 %v861_v38  ;;  %428 = vst [vmem:[%s421_s10 + $0x8] sm:$0xff] %v1082_v5 }
  0x52   : > { %675 = vmatpush.bf16.msra.mxu3 %v925_v42 }
  0x54   : > { %637 = vmatpush.bf16.msra.mxu0 %v849_v48 }
  0x55   : > { %650 = vmatpush.bf16.msra.mxu1 %v913_v50  ;;  %663 = vmatpush.bf16.msra.mxu2 %v853_v51 }
  0x56   : > { %676 = vmatpush.bf16.msra.mxu3 %v917_v55 }
  0x57   : > { %v429_v7 = vld [vmem:[%s421_s10] sm:$0xff] }
  0x58   : > { %638 = vmatpush.bf16.msra.mxu0 %v841_v62 }
  0x59   : > { %651 = vmatpush.bf16.msra.mxu1 %v905_v0  ;;  %664 = vmatpush.bf16.msra.mxu2 %v845_v1 }
  0x5a   : > { %677 = vmatpush.bf16.msra.mxu3 %v909_v2 }
  0x5b   : > { %639 = vmatmul.bf16.vlgmr.msra.gmra.mxu0 %v467_v3 }
  0x5c   : > { %652 = vmatmul.bf16.vlgmr.msra.gmra.mxu1 %v468_v4  ;;  %665 = vmatmul.bf16.vlgmr.msra.gmra.mxu2 %v467_v3 }
  0x5d   : > { %678 = vmatmul.bf16.vlgmr.msra.gmra.mxu3 %v468_v4 }
  0xd8   : > { %v640_v6 = vpop.f32.mrf.mxu0 }
  0xd9   : > { %v653_v8 = vpop.f32.mrf.mxu1 }
  0xda   : > { %v654_v9 = vadd.f32 %v653_v8, %v640_v6 }
  0xdc   : > { %v683_v10 = vadd.f32 %v654_v9, %v429_v7 }
  0xde   : > { %685 = vst [vmem:[%s421_s10] sm:$0xff] %v683_v10 }
  0xdf   : > { %v666_v11 = vpop.f32.mrf.mxu2 }
  0xe0   : > { %v679_v12 = vpop.f32.mrf.mxu3  ;;  %v642_v13 = vpop.f32.mrf.mxu0 }
  0xe1   : > { %v680_v14 = vadd.f32 %v679_v12, %v666_v11  ;;  %v655_v15 = vpop.f32.mrf.mxu1 }
  0xe3   : > { %686 = vst [vmem:[%s421_s10 + $0x8] sm:$0xff] %v680_v14  ;;  %v699_v23 = vadd.f32 %v695_v20, %v680_v14 }
  0xe5   : > { %v690_v21 = vld [vmem:[%s421_s10] sm:$0xff]  ;;  %701 = vst [vmem:[%s421_s10 + $0x8] sm:$0xff] %v699_v23 }
  0xe6   : > { %v698_v22 = vadd.f32 %v694_v19, %v690_v21 }
  0xe7   : > { %v668_v17 = vpop.f32.mrf.mxu2 }
  0xe8   : > { %v681_v18 = vpop.f32.mrf.mxu3  ;;  %700 = vst [vmem:[%s421_s10] sm:$0xff] %v698_v22 }
  0xe9 PF: > { %s13_s16 = sadd.s32 1, %s1080_s16   ;;  %s1312_s12 = smov %s1068_s13 }
  0xea   : > { %p10_p10 = scmp.ge.s32.totalorder %s13_s16, 4   ;;  %s1313_s13 = smov %s1138_s20 }
  0xeb   : > { %s1314_s14 = smov %s1076_s15  ;;  %s1315_s15 = smov %s1317_s17 }
  0xec   :  { %12 = sbr.rel (!%p10_p10) target bundleno = 3 (0x3), region = 119 }

// kernel: resnet18_16s_forward.39
= control target key start
LH: loop header
LB: loop body
LE: loop exit
PB: predicated region body
PF: predicated region fallthrough
CT: control target
= control target key end

     0   :  { %s1775_s15 = smov 0   ;;  %s1777_s16 = smov 0   ;;  %s2182_s0 = inlined_call_operand.vmem [shape: bf16[8,4608], index: 0, kind: input, shape index: {}]   ;;  %s2183_s1 = inlined_call_operand.vmem [shape: bf16[4608,512], index: 1, kind: input, shape index: {}]   ;;  %s2184_s2 = inlined_call_operand.vmem [shape: f32[1,512], index: 2, kind: input, shape index: {}]   ;;  %s2185_s3 = inlined_call_operand.vmem [shape: f32[8,512], index: 3, kind: input, shape index: {}]   ;;  %s2186_s4 = inlined_call_operand.vmem [shape: f32[8,512], index: 4, kind: output, shape index: {}]  }
   0x1   :  { %s1779_s17 = smov 0   ;;  %s1781_s18 = smov 0  }
   0x2   :  { %s1783_s19 = smov 0   ;;  %s1785_s20 = smov 0  }
   0x3   :  { %s1787_s21 = smov 0  }
   0x4 LB: > { %s26_s22 = sadd.s32 1, %s1739_s19  ;;  %s29_s23 = sadd.s32 1, %s1743_s20  ;;  %s1747_s21 = sphi %s1787_s21, %s14_s21   ;;  %s1743_s20 = sphi %s1785_s20, %s2192_s20   ;;  %s1739_s19 = sphi %s1783_s19, %s2191_s19   ;;  %s1735_s18 = sphi %s1781_s18, %s2190_s18   ;;  %s1731_s17 = sphi %s1779_s17, %s2189_s17   ;;  %s1727_s16 = sphi %s1777_s16, %s2188_s16   ;;  %s1723_s15 = sphi %s1775_s15, %s2187_s15  }
   0x5   : > { %p27_p0 = scmp.ge.s32.totalorder %s26_s22, 9  ;;  %p77_p1 = scmp.ne.s32.totalorder %s1727_s16, %s1723_s15 }
   0x6   : > { %p78_p2 = scmp.eq.s32.totalorder %s1747_s21, 0  ;;  %s70_s27 = sadd.s32 1, %s1727_s16 }
   0x7   : > { %s2194_s22 = smov (%p27_p0, %s26_s22), 0  ;;  %s2196_s23 = smov (!%p27_p0, %s29_s23), %s1743_s20 }
   0x8   : > { %p79_p3 = por %p78_p2, %p77_p1  ;;  %p31_p4 = scmp.ge.s32.totalorder %s2196_s23, 2 }
   0x9   : > { %s65_s24 = ssub.s32 %s1739_s19, %s2194_s22  ;;  %p1296_p6 = scmp.ge.s32.totalorder %s1747_s21, 18 }
   0xa   : > { %s2198_s23 = smov (%p31_p4, %s2196_s23), 0 }
   0xb   : > { %s66_s25 = ssub.s32 %s1743_s20, %s2198_s23  ;;  %185 = sbr.rel (%p1296_p6) target bundleno = 87 (0x57), region = 16 }
   0xc   : > { %s67_s26 = sor.u32 %s66_s25, %s65_s24 }
   0xd   : > { %p68_p5 = scmp.eq.s32.totalorder %s67_s26, 0 }
   0xf   : > { %s1826_s28 = scalar_select %p68_p5, %s1727_s16, %s70_s27  }
  0x10   : > { %201 = sbr.rel (!%p79_p3) target bundleno = 87 (0x57), region = 24  ;;  %s203_s29 = sand.u32 (%p79_p3), 1, %s1727_s16  }
  0x11   : > { %s1299_s30 = sshll.u32 (%p79_p3), %s1743_s20, 1  ;;  %s1297_s5 = sshll.u32 (%p79_p3), %s203_s29, 9 }
  0x12   : > { %s1571_s6 = sshll.u32 (%p79_p3), %s1739_s19, 8  ;;  %s1840_s12 = scalar_lea.vmem (%p79_p3), [#allocation2], %s1297_s5 }
  0x13   : > { %s209_s7 = sadd.s32 (%p79_p3), %s1571_s6, %s1299_s30 }
  0x14   : > { %s1301_s8 = sshll.u32 (%p79_p3), %s209_s7, 2 }
  0x15   : > { %s1835_s11 = scalar_lea.vmem %s2183_s1, %s1301_s8 }
  0x16   : > { %v366_v0 = vld [vmem:[%s1835_s11] sm:$0xff]  ;;  %v368_v1 = vld [vmem:[%s1835_s11 + $0x10] sm:$0xff] }
  0x17   : > { %v370_v2 = vld [vmem:[%s1835_s11 + $0x20] sm:$0xff]  ;;  %367 = vst [vmem:[%s1840_s12] sm:$0xff] %v366_v0  ;;  %v372_v3 = vld [vmem:[%s1835_s11 + $0x30] sm:$0xff] }
  0x18   : > { %369 = vst [vmem:[%s1840_s12 + $0x8] sm:$0xff] %v368_v1  ;;  %v374_v4 = vld [vmem:[%s1835_s11 + $0x40] sm:$0xff]  ;;  %v376_v5 = vld [vmem:[%s1835_s11 + $0x50] sm:$0xff] }
  0x19   : > { %371 = vst [vmem:[%s1840_s12 + $0x10] sm:$0xff] %v370_v2  ;;  %v378_v6 = vld [vmem:[%s1835_s11 + $0x60] sm:$0xff]  ;;  %v380_v7 = vld [vmem:[%s1835_s11 + $0x70] sm:$0xff] }
  0x1a   : > { %373 = vst [vmem:[%s1840_s12 + $0x18] sm:$0xff] %v372_v3  ;;  %v382_v8 = vld [vmem:[%s1835_s11 + $0x80] sm:$0xff]  ;;  %v384_v9 = vld [vmem:[%s1835_s11 + $0x90] sm:$0xff] }
  0x1b   : > { %375 = vst [vmem:[%s1840_s12 + $0x20] sm:$0xff] %v374_v4  ;;  %v386_v10 = vld [vmem:[%s1835_s11 + $0xa0] sm:$0xff]  ;;  %v388_v11 = vld [vmem:[%s1835_s11 + $0xb0] sm:$0xff] }
  0x1c   : > { %377 = vst [vmem:[%s1840_s12 + $0x28] sm:$0xff] %v376_v5  ;;  %v390_v12 = vld [vmem:[%s1835_s11 + $0xc0] sm:$0xff]  ;;  %v392_v13 = vld [vmem:[%s1835_s11 + $0xd0] sm:$0xff] }
  0x1d   : > { %379 = vst [vmem:[%s1840_s12 + $0x30] sm:$0xff] %v378_v6  ;;  %v394_v14 = vld [vmem:[%s1835_s11 + $0xe0] sm:$0xff]  ;;  %v396_v15 = vld [vmem:[%s1835_s11 + $0xf0] sm:$0xff] }
  0x1e   : > { %381 = vst [vmem:[%s1840_s12 + $0x38] sm:$0xff] %v380_v7  ;;  %v398_v16 = vld [vmem:[%s1835_s11 + $0x100] sm:$0xff]  ;;  %v400_v17 = vld [vmem:[%s1835_s11 + $0x110] sm:$0xff] }
  0x1f   : > { %383 = vst [vmem:[%s1840_s12 + $0x40] sm:$0xff] %v382_v8  ;;  %v402_v18 = vld [vmem:[%s1835_s11 + $0x120] sm:$0xff]  ;;  %v404_v19 = vld [vmem:[%s1835_s11 + $0x130] sm:$0xff] }
  0x20   : > { %385 = vst [vmem:[%s1840_s12 + $0x48] sm:$0xff] %v384_v9  ;;  %v406_v20 = vld [vmem:[%s1835_s11 + $0x140] sm:$0xff]  ;;  %v408_v21 = vld [vmem:[%s1835_s11 + $0x150] sm:$0xff] }
  0x21   : > { %387 = vst [vmem:[%s1840_s12 + $0x50] sm:$0xff] %v386_v10  ;;  %v410_v22 = vld [vmem:[%s1835_s11 + $0x160] sm:$0xff]  ;;  %v412_v23 = vld [vmem:[%s1835_s11 + $0x170] sm:$0xff] }
  0x22   : > { %389 = vst [vmem:[%s1840_s12 + $0x58] sm:$0xff] %v388_v11  ;;  %v414_v24 = vld [vmem:[%s1835_s11 + $0x180] sm:$0xff]  ;;  %v416_v25 = vld [vmem:[%s1835_s11 + $0x190] sm:$0xff] }
  0x23   : > { %391 = vst [vmem:[%s1840_s12 + $0x60] sm:$0xff] %v390_v12  ;;  %v418_v26 = vld [vmem:[%s1835_s11 + $0x1a0] sm:$0xff]  ;;  %v420_v27 = vld [vmem:[%s1835_s11 + $0x1b0] sm:$0xff] }
  0x24   : > { %393 = vst [vmem:[%s1840_s12 + $0x68] sm:$0xff] %v392_v13  ;;  %v422_v28 = vld [vmem:[%s1835_s11 + $0x1c0] sm:$0xff]  ;;  %v424_v29 = vld [vmem:[%s1835_s11 + $0x1d0] sm:$0xff] }
  0x25   : > { %395 = vst [vmem:[%s1840_s12 + $0x70] sm:$0xff] %v394_v14  ;;  %v426_v30 = vld [vmem:[%s1835_s11 + $0x1e0] sm:$0xff]  ;;  %v428_v31 = vld [vmem:[%s1835_s11 + $0x1f0] sm:$0xff] }
  0x26   : > { %397 = vst [vmem:[%s1840_s12 + $0x78] sm:$0xff] %v396_v15  ;;  %v430_v32 = vld [vmem:[%s1835_s11 + $0x200] sm:$0xff]  ;;  %v432_v33 = vld [vmem:[%s1835_s11 + $0x210] sm:$0xff] }
  0x27   : > { %399 = vst [vmem:[%s1840_s12 + $0x80] sm:$0xff] %v398_v16  ;;  %v434_v34 = vld [vmem:[%s1835_s11 + $0x220] sm:$0xff]  ;;  %v436_v35 = vld [vmem:[%s1835_s11 + $0x230] sm:$0xff] }
  0x28   : > { %401 = vst [vmem:[%s1840_s12 + $0x88] sm:$0xff] %v400_v17  ;;  %v438_v36 = vld [vmem:[%s1835_s11 + $0x240] sm:$0xff]  ;;  %v440_v37 = vld [vmem:[%s1835_s11 + $0x250] sm:$0xff] }
  0x29   : > { %403 = vst [vmem:[%s1840_s12 + $0x90] sm:$0xff] %v402_v18  ;;  %v442_v38 = vld [vmem:[%s1835_s11 + $0x260] sm:$0xff]  ;;  %v444_v39 = vld [vmem:[%s1835_s11 + $0x270] sm:$0xff] }
  0x2a   : > { %405 = vst [vmem:[%s1840_s12 + $0x98] sm:$0xff] %v404_v19  ;;  %v446_v40 = vld [vmem:[%s1835_s11 + $0x280] sm:$0xff]  ;;  %v448_v41 = vld [vmem:[%s1835_s11 + $0x290] sm:$0xff] }
  0x2b   : > { %407 = vst [vmem:[%s1840_s12 + $0xa0] sm:$0xff] %v406_v20  ;;  %v450_v42 = vld [vmem:[%s1835_s11 + $0x2a0] sm:$0xff]  ;;  %v452_v43 = vld [vmem:[%s1835_s11 + $0x2b0] sm:$0xff] }
  0x2c   : > { %409 = vst [vmem:[%s1840_s12 + $0xa8] sm:$0xff] %v408_v21  ;;  %v454_v44 = vld [vmem:[%s1835_s11 + $0x2c0] sm:$0xff]  ;;  %v456_v45 = vld [vmem:[%s1835_s11 + $0x2d0] sm:$0xff] }
  0x2d   : > { %411 = vst [vmem:[%s1840_s12 + $0xb0] sm:$0xff] %v410_v22  ;;  %v458_v46 = vld [vmem:[%s1835_s11 + $0x2e0] sm:$0xff]  ;;  %v460_v47 = vld [vmem:[%s1835_s11 + $0x2f0] sm:$0xff] }
  0x2e   : > { %413 = vst [vmem:[%s1840_s12 + $0xb8] sm:$0xff] %v412_v23  ;;  %v462_v48 = vld [vmem:[%s1835_s11 + $0x300] sm:$0xff]  ;;  %v464_v49 = vld [vmem:[%s1835_s11 + $0x310] sm:$0xff] }
  0x2f   : > { %415 = vst [vmem:[%s1840_s12 + $0xc0] sm:$0xff] %v414_v24  ;;  %v466_v50 = vld [vmem:[%s1835_s11 + $0x320] sm:$0xff]  ;;  %v468_v51 = vld [vmem:[%s1835_s11 + $0x330] sm:$0xff] }
  0x30   : > { %417 = vst [vmem:[%s1840_s12 + $0xc8] sm:$0xff] %v416_v25  ;;  %v470_v52 = vld [vmem:[%s1835_s11 + $0x340] sm:$0xff]  ;;  %v472_v53 = vld [vmem:[%s1835_s11 + $0x350] sm:$0xff] }
  0x31   : > { %419 = vst [vmem:[%s1840_s12 + $0xd0] sm:$0xff] %v418_v26  ;;  %v474_v54 = vld [vmem:[%s1835_s11 + $0x360] sm:$0xff]  ;;  %v476_v55 = vld [vmem:[%s1835_s11 + $0x370] sm:$0xff] }
  0x32   : > { %421 = vst [vmem:[%s1840_s12 + $0xd8] sm:$0xff] %v420_v27  ;;  %v478_v56 = vld [vmem:[%s1835_s11 + $0x380] sm:$0xff]  ;;  %v480_v57 = vld [vmem:[%s1835_s11 + $0x390] sm:$0xff] }
  0x33   : > { %423 = vst [vmem:[%s1840_s12 + $0xe0] sm:$0xff] %v422_v28  ;;  %v482_v58 = vld [vmem:[%s1835_s11 + $0x3a0] sm:$0xff]  ;;  %v484_v59 = vld [vmem:[%s1835_s11 + $0x3b0] sm:$0xff] }
  0x34   : > { %425 = vst [vmem:[%s1840_s12 + $0xe8] sm:$0xff] %v424_v29  ;;  %v486_v60 = vld [vmem:[%s1835_s11 + $0x3c0] sm:$0xff]  ;;  %v488_v61 = vld [vmem:[%s1835_s11 + $0x3d0] sm:$0xff] }
  0x35   : > { %427 = vst [vmem:[%s1840_s12 + $0xf0] sm:$0xff] %v426_v30  ;;  %v490_v62 = vld [vmem:[%s1835_s11 + $0x3e0] sm:$0xff]  ;;  %v492_v63 = vld [vmem:[%s1835_s11 + $0x3f0] sm:$0xff] }
  0x36   : > { %429 = vst [vmem:[%s1840_s12 + $0xf8] sm:$0xff] %v428_v31 }
  0x37   : > { %431 = vst [vmem:[%s1840_s12 + $0x100] sm:$0xff] %v430_v32 }
  0x38   : > { %433 = vst [vmem:[%s1840_s12 + $0x108] sm:$0xff] %v432_v33 }
  0x39   : > { %435 = vst [vmem:[%s1840_s12 + $0x110] sm:$0xff] %v434_v34 }
  0x3a   : > { %437 = vst [vmem:[%s1840_s12 + $0x118] sm:$0xff] %v436_v35 }
  0x3b   : > { %439 = vst [vmem:[%s1840_s12 + $0x120] sm:$0xff] %v438_v36 }
  0x3c   : > { %441 = vst [vmem:[%s1840_s12 + $0x128] sm:$0xff] %v440_v37 }
  0x3d   : > { %443 = vst [vmem:[%s1840_s12 + $0x130] sm:$0xff] %v442_v38 }
  0x3e   : > { %445 = vst [vmem:[%s1840_s12 + $0x138] sm:$0xff] %v444_v39 }
  0x3f   : > { %447 = vst [vmem:[%s1840_s12 + $0x140] sm:$0xff] %v446_v40 }
  0x40   : > { %449 = vst [vmem:[%s1840_s12 + $0x148] sm:$0xff] %v448_v41 }
  0x41   : > { %451 = vst [vmem:[%s1840_s12 + $0x150] sm:$0xff] %v450_v42 }
  0x42   : > { %453 = vst [vmem:[%s1840_s12 + $0x158] sm:$0xff] %v452_v43 }
  0x43   : > { %455 = vst [vmem:[%s1840_s12 + $0x160] sm:$0xff] %v454_v44 }
  0x44   : > { %457 = vst [vmem:[%s1840_s12 + $0x168] sm:$0xff] %v456_v45 }
  0x45   : > { %459 = vst [vmem:[%s1840_s12 + $0x170] sm:$0xff] %v458_v46 }
  0x46   : > { %461 = vst [vmem:[%s1840_s12 + $0x178] sm:$0xff] %v460_v47 }
  0x47   : > { %463 = vst [vmem:[%s1840_s12 + $0x180] sm:$0xff] %v462_v48 }
  0x48   : > { %465 = vst [vmem:[%s1840_s12 + $0x188] sm:$0xff] %v464_v49 }
  0x49   : > { %467 = vst [vmem:[%s1840_s12 + $0x190] sm:$0xff] %v466_v50 }
  0x4a   : > { %469 = vst [vmem:[%s1840_s12 + $0x198] sm:$0xff] %v468_v51 }
  0x4b   : > { %471 = vst [vmem:[%s1840_s12 + $0x1a0] sm:$0xff] %v470_v52 }
  0x4c   : > { %473 = vst [vmem:[%s1840_s12 + $0x1a8] sm:$0xff] %v472_v53 }
  0x4d   : > { %475 = vst [vmem:[%s1840_s12 + $0x1b0] sm:$0xff] %v474_v54 }
  0x4e   : > { %477 = vst [vmem:[%s1840_s12 + $0x1b8] sm:$0xff] %v476_v55 }
  0x4f   : > { %479 = vst [vmem:[%s1840_s12 + $0x1c0] sm:$0xff] %v478_v56 }
  0x50   : > { %481 = vst [vmem:[%s1840_s12 + $0x1c8] sm:$0xff] %v480_v57 }
  0x51   : > { %483 = vst [vmem:[%s1840_s12 + $0x1d0] sm:$0xff] %v482_v58 }
  0x52   : > { %485 = vst [vmem:[%s1840_s12 + $0x1d8] sm:$0xff] %v484_v59 }
  0x53   : > { %487 = vst [vmem:[%s1840_s12 + $0x1e0] sm:$0xff] %v486_v60 }
  0x54   : > { %489 = vst [vmem:[%s1840_s12 + $0x1e8] sm:$0xff] %v488_v61 }
  0x55   : > { %491 = vst [vmem:[%s1840_s12 + $0x1f0] sm:$0xff] %v490_v62 }
  0x56   : > { %493 = vst [vmem:[%s1840_s12 + $0x1f8] sm:$0xff] %v492_v63 }
  0x57 PF: > { %p1302_p7 = scmp.ge.s32.totalorder %s1747_s21, 1  ;;  %p519_p8 = scmp.lt.s32.totalorder %s1747_s21, 19 }
  0x59   : > { %p520_p9 = pnand %p1302_p7, %p519_p8 }
  0x5a   : > { %s526_s13 = sand.u32 (!%p520_p9), 1, %s1723_s15   ;;  %s1304_s14 = sshll.u32 (!%p520_p9), %s1731_s17, 2 }
  0x5b   : > { %523 = sbr.rel (%p520_p9) target bundleno = 329 (0x149), region = 70  ;;  %s1303_s24 = sshll.u32 (!%p520_p9), %s526_s13, 9 }
  0x5c   : > { %p580_p10 = scmp.lt.s32.totalorder (!%p520_p9), %s1304_s14, 35  ;;  %s1306_s25 = sshll.u32 (!%p520_p9), %s1735_s18, 1 }
  0x5d   : > { %p590_p11 = scmp.lt.s32.totalorder (!%p520_p9), %s1306_s25, 3  ;;  %s1994_s13 = scalar_lea.vmem (!%p520_p9), [#allocation2], %s1303_s24 }
  0x5e   : > { %p1311_p12 = scmp.ne.s32.totalorder (!%p520_p9), %s1731_s17, 0 }
  0x60   : > { %s2200_s14 = smov (!%p580_p10, %s1304_s14), 35  ;;  %s2202_s25 = smov (!%p590_p11, %s1306_s25), 3 }
  0x61   : > { %s1305_s26 = sshll.u32 %s2200_s14, 2  ;;  %s592_s15 = scalar_lea.vmem %s2184_s2, %s2202_s25 }
  0x62   : > { %s1975_s30 = scalar_lea.vmem %s2182_s0, %s1305_s26  ;;  %s1308_s7 = sshll.u32 %s2202_s25, 3 }
  0x63   : > { %s1987_s18 = scalar_lea.vmem %s2185_s3, %s1308_s7  ;;  %s1992_s12 = scalar_lea.vmem %s2186_s4, %s1308_s7 }
  0x64   : > { %617 = sbr.rel (%p1311_p12) target bundleno = 108 (0x6c), region = 78 }
  0x69   : > { %v1749_v0 = vmov 0.0  }
  0x6a   : > { %618 = vst [vmem:[%s1992_s12] sm:$0xff] %v1749_v0 }
  0x6b   : > { %619 = vst [vmem:[%s1992_s12 + $0x8] sm:$0xff] %v1749_v0 }
  0x6c PF: > { %v1370_v1 = vld [vmem:[%s1994_s13 + $0x70] sm:$0xf]  ;;  %v1587_v2 = vld [vmem:[%s1994_s13 + $0x74] sm:$0xf0]  ;;  %v1362_v12 = vld [vmem:[%s1994_s13 + $0x60] sm:$0xf] }
  0x6d   : > { %v1434_v3 = vld [vmem:[%s1994_s13 + $0xf0] sm:$0xf]  ;;  %v1371_v4 = vor.u32 %v1587_v2, %v1370_v1  ;;  %v1603_v5 = vld [vmem:[%s1994_s13 + $0xf4] sm:$0xf0]  ;;  %v1585_v14 = vld [vmem:[%s1994_s13 + $0x64] sm:$0xf0] }
  0x6e   : > { %v1498_v6 = vld [vmem:[%s1994_s13 + $0x170] sm:$0xf]  ;;  %v1619_v7 = vld [vmem:[%s1994_s13 + $0x174] sm:$0xf0]  ;;  %v1435_v8 = vor.u32 %v1603_v5, %v1434_v3  ;;  %v1426_v15 = vld [vmem:[%s1994_s13 + $0xe0] sm:$0xf]  ;;  %v1363_v17 = vor.u32 %v1585_v14, %v1362_v12 }
  0x6f   : > { %v1499_v9 = vor.u32 %v1619_v7, %v1498_v6  ;;  %v1562_v10 = vld [vmem:[%s1994_s13 + $0x1f0] sm:$0xf]  ;;  %v1635_v11 = vld [vmem:[%s1994_s13 + $0x1f4] sm:$0xf0]  ;;  %1022 = vmatpush.bf16.msra.mxu0 %v1371_v4  ;;  %v1601_v16 = vld [vmem:[%s1994_s13 + $0xe4] sm:$0xf0] }
  0x70   : > { %v1563_v13 = vor.u32 %v1635_v11, %v1562_v10  ;;  %1035 = vmatpush.bf16.msra.mxu1 %v1435_v8  ;;  %v1427_v18 = vor.u32 %v1601_v16, %v1426_v15  ;;  %v1490_v19 = vld [vmem:[%s1994_s13 + $0x160] sm:$0xf]  ;;  %v1617_v20 = vld [vmem:[%s1994_s13 + $0x164] sm:$0xf0]  ;;  %v1354_v24 = vld [vmem:[%s1994_s13 + $0x50] sm:$0xf] }
  0x71   : > { %1048 = vmatpush.bf16.msra.mxu2 %v1499_v9  ;;  %v1554_v21 = vld [vmem:[%s1994_s13 + $0x1e0] sm:$0xf]  ;;  %v1491_v22 = vor.u32 %v1617_v20, %v1490_v19  ;;  %v1633_v23 = vld [vmem:[%s1994_s13 + $0x1e4] sm:$0xf0]  ;;  %v1583_v25 = vld [vmem:[%s1994_s13 + $0x54] sm:$0xf0] }
  0x72   : > { %1061 = vmatpush.bf16.msra.mxu3 %v1563_v13  ;;  %v1555_v26 = vor.u32 %v1633_v23, %v1554_v21  ;;  %v1418_v27 = vld [vmem:[%s1994_s13 + $0xd0] sm:$0xf]  ;;  %v1599_v28 = vld [vmem:[%s1994_s13 + $0xd4] sm:$0xf0]  ;;  %v1355_v30 = vor.u32 %v1583_v25, %v1354_v24  ;;  %v1346_v36 = vld [vmem:[%s1994_s13 + $0x40] sm:$0xf] }
  0x73   : > { %v1482_v29 = vld [vmem:[%s1994_s13 + $0x150] sm:$0xf]  ;;  %1023 = vmatpush.bf16.msra.mxu0 %v1363_v17  ;;  %v1615_v31 = vld [vmem:[%s1994_s13 + $0x154] sm:$0xf0]  ;;  %v1419_v34 = vor.u32 %v1599_v28, %v1418_v27  ;;  %v1581_v37 = vld [vmem:[%s1994_s13 + $0x44] sm:$0xf0] }
  0x74   : > { %v1546_v32 = vld [vmem:[%s1994_s13 + $0x1d0] sm:$0xf]  ;;  %v1631_v33 = vld [vmem:[%s1994_s13 + $0x1d4] sm:$0xf0]  ;;  %1036 = vmatpush.bf16.msra.mxu1 %v1427_v18  ;;  %v1483_v35 = vor.u32 %v1615_v31, %v1482_v29  ;;  %v1410_v38 = vld [vmem:[%s1994_s13 + $0xc0] sm:$0xf]  ;;  %v1347_v45 = vor.u32 %v1581_v37, %v1346_v36 }
  0x75   : > { %1049 = vmatpush.bf16.msra.mxu2 %v1491_v22  ;;  %v1547_v39 = vor.u32 %v1631_v33, %v1546_v32  ;;  %v1597_v40 = vld [vmem:[%s1994_s13 + $0xc4] sm:$0xf0]  ;;  %v1474_v41 = vld [vmem:[%s1994_s13 + $0x140] sm:$0xf]  ;;  %v1338_v48 = vld [vmem:[%s1994_s13 + $0x30] sm:$0xf] }
  0x76   : > { %1062 = vmatpush.bf16.msra.mxu3 %v1555_v26  ;;  %v1613_v42 = vld [vmem:[%s1994_s13 + $0x144] sm:$0xf0]  ;;  %v1538_v43 = vld [vmem:[%s1994_s13 + $0x1c0] sm:$0xf]  ;;  %v1411_v46 = vor.u32 %v1597_v40, %v1410_v38  ;;  %v1579_v49 = vld [vmem:[%s1994_s13 + $0x34] sm:$0xf0] }
  0x77   : > { %v1629_v44 = vld [vmem:[%s1994_s13 + $0x1c4] sm:$0xf0]  ;;  %1024 = vmatpush.bf16.msra.mxu0 %v1355_v30  ;;  %v1475_v47 = vor.u32 %v1613_v42, %v1474_v41  ;;  %v1402_v50 = vld [vmem:[%s1994_s13 + $0xb0] sm:$0xf]  ;;  %v1595_v52 = vld [vmem:[%s1994_s13 + $0xb4] sm:$0xf0]  ;;  %v1339_v57 = vor.u32 %v1579_v49, %v1338_v48 }
  0x78   : > { %1037 = vmatpush.bf16.msra.mxu1 %v1419_v34  ;;  %v1539_v51 = vor.u32 %v1629_v44, %v1538_v43  ;;  %v1466_v53 = vld [vmem:[%s1994_s13 + $0x130] sm:$0xf]  ;;  %v1611_v54 = vld [vmem:[%s1994_s13 + $0x134] sm:$0xf0]  ;;  %v1403_v58 = vor.u32 %v1595_v52, %v1402_v50  ;;  %v1330_v60 = vld [vmem:[%s1994_s13 + $0x20] sm:$0xf] }
  0x79   : > { %1050 = vmatpush.bf16.msra.mxu2 %v1483_v35  ;;  %v1530_v55 = vld [vmem:[%s1994_s13 + $0x1b0] sm:$0xf]  ;;  %v1627_v56 = vld [vmem:[%s1994_s13 + $0x1b4] sm:$0xf0]  ;;  %v1467_v59 = vor.u32 %v1611_v54, %v1466_v53  ;;  %v1577_v61 = vld [vmem:[%s1994_s13 + $0x24] sm:$0xf0] }
  0x7a   : > { %1063 = vmatpush.bf16.msra.mxu3 %v1547_v39  ;;  %v1394_v62 = vld [vmem:[%s1994_s13 + $0xa0] sm:$0xf]  ;;  %v1531_v63 = vor.u32 %v1627_v56, %v1530_v55  ;;  %v1593_v0 = vld [vmem:[%s1994_s13 + $0xa4] sm:$0xf0]  ;;  %v1331_v5 = vor.u32 %v1577_v61, %v1330_v60  ;;  %v1322_v8 = vld [vmem:[%s1994_s13 + $0x10] sm:$0xf] }
  0x7b   : > { %1025 = vmatpush.bf16.msra.mxu0 %v1347_v45  ;;  %v1458_v1 = vld [vmem:[%s1994_s13 + $0x120] sm:$0xf]  ;;  %v1609_v2 = vld [vmem:[%s1994_s13 + $0x124] sm:$0xf0]  ;;  %v1395_v6 = vor.u32 %v1593_v0, %v1394_v62  ;;  %v1575_v9 = vld [vmem:[%s1994_s13 + $0x14] sm:$0xf0] }
  0x7c   : > { %1038 = vmatpush.bf16.msra.mxu1 %v1411_v46  ;;  %v1522_v3 = vld [vmem:[%s1994_s13 + $0x1a0] sm:$0xf]  ;;  %v1625_v4 = vld [vmem:[%s1994_s13 + $0x1a4] sm:$0xf0]  ;;  %v1459_v7 = vor.u32 %v1609_v2, %v1458_v1  ;;  %v1386_v10 = vld [vmem:[%s1994_s13 + $0x90] sm:$0xf]  ;;  %v1323_v17 = vor.u32 %v1575_v9, %v1322_v8 }
  0x7d   : > { %1051 = vmatpush.bf16.msra.mxu2 %v1475_v47  ;;  %v1523_v11 = vor.u32 %v1625_v4, %v1522_v3  ;;  %v1591_v12 = vld [vmem:[%s1994_s13 + $0x94] sm:$0xf0]  ;;  %v1450_v13 = vld [vmem:[%s1994_s13 + $0x110] sm:$0xf]  ;;  %v1314_v18 = vld [vmem:[%s1994_s13] sm:$0xf] }
  0x7e   : > { %1064 = vmatpush.bf16.msra.mxu3 %v1539_v51  ;;  %v1607_v14 = vld [vmem:[%s1994_s13 + $0x114] sm:$0xf0]  ;;  %v1514_v15 = vld [vmem:[%s1994_s13 + $0x190] sm:$0xf]  ;;  %v1573_v19 = vld [vmem:[%s1994_s13 + $0x4] sm:$0xf0]  ;;  %v1387_v21 = vor.u32 %v1591_v12, %v1386_v10 }
  0x7f   : > { %1026 = vmatpush.bf16.msra.mxu0 %v1339_v57  ;;  %v1623_v16 = vld [vmem:[%s1994_s13 + $0x194] sm:$0xf0]  ;;  %v1378_v20 = vld [vmem:[%s1994_s13 + $0x80] sm:$0xf]  ;;  %v1451_v22 = vor.u32 %v1607_v14, %v1450_v13  ;;  %v1589_v23 = vld [vmem:[%s1994_s13 + $0x84] sm:$0xf0]  ;;  %v1315_v33 = vor.u32 %v1573_v19, %v1314_v18 }
  0x80   : > { %1039 = vmatpush.bf16.msra.mxu1 %v1403_v58  ;;  %v1442_v24 = vld [vmem:[%s1994_s13 + $0x100] sm:$0xf]  ;;  %v1605_v25 = vld [vmem:[%s1994_s13 + $0x104] sm:$0xf0]  ;;  %v1515_v26 = vor.u32 %v1623_v16, %v1514_v15  ;;  %v1586_v29 = vld [vmem:[%s1994_s13 + $0x74] sm:$0xf]  ;;  %v1379_v38 = vor.u32 %v1589_v23, %v1378_v20 }
  0x81   : > { %1052 = vmatpush.bf16.msra.mxu2 %v1467_v59  ;;  %v1506_v27 = vld [vmem:[%s1994_s13 + $0x180] sm:$0xf]  ;;  %v1621_v28 = vld [vmem:[%s1994_s13 + $0x184] sm:$0xf0]  ;;  %v1372_v30 = vld [vmem:[%s1994_s13 + $0x78] sm:$0xf0]  ;;  %v1443_v39 = vor.u32 %v1605_v25, %v1442_v24 }
  0x82   : > { %1065 = vmatpush.bf16.msra.mxu3 %v1531_v63  ;;  %v1602_v31 = vld [vmem:[%s1994_s13 + $0xf4] sm:$0xf]  ;;  %v623_v32 = vld [vmem:[%s1975_s30 + $0x8] sm:$0xff]  ;;  %v1436_v34 = vld [vmem:[%s1994_s13 + $0xf8] sm:$0xf0]  ;;  %v1507_v43 = vor.u32 %v1621_v28, %v1506_v27  ;;  %v1375_v44 = vor.u32 %v1586_v29, %v1372_v30  ;;  %p1568_p13 = scmp.ne.s32.totalorder %s1731_s17, 8 }
  0x83   : > { %1027 = vmatpush.bf16.msra.mxu0 %v1331_v5  ;;  %v1618_v35 = vld [vmem:[%s1994_s13 + $0x174] sm:$0xf]  ;;  %v1500_v36 = vld [vmem:[%s1994_s13 + $0x178] sm:$0xf0]  ;;  %v692_v37 = vunpack.c.l.b16 %v623_v32  ;;  %v693_v42 = vunpack.c.h.b16 %v623_v32  ;;  %v622_v45 = vld [vmem:[%s1975_s30] sm:$0xff]  ;;  %v1439_v46 = vor.u32 %v1602_v31, %v1436_v34 }
  0x84   : > { %1040 = vmatpush.bf16.msra.mxu1 %v1395_v6  ;;  %v1634_v40 = vld [vmem:[%s1994_s13 + $0x1f4] sm:$0xf]  ;;  %v1564_v41 = vld [vmem:[%s1994_s13 + $0x1f8] sm:$0xf0]  ;;  %v1503_v47 = vor.u32 %v1618_v35, %v1500_v36  ;;  %v1584_v48 = vld [vmem:[%s1994_s13 + $0x64] sm:$0xf]  ;;  %v690_v51 = vunpack.c.l.b16 %v622_v45  ;;  %v691_v52 = vunpack.c.h.b16 %v622_v45 }
  0x85   : > { %1053 = vmatpush.bf16.msra.mxu2 %v1459_v7  ;;  %v1364_v49 = vld [vmem:[%s1994_s13 + $0x68] sm:$0xf0]  ;;  %v1600_v50 = vld [vmem:[%s1994_s13 + $0xe4] sm:$0xf]  ;;  %v1567_v53 = vor.u32 %v1634_v40, %v1564_v41  ;;  %v2079_v57 = vpack.c.b16 %v692_v37, %v692_v37  ;;  %v2083_v60 = vpack.c.b16 %v693_v42, %v693_v42  ;;  %v1582_v2 = vld [vmem:[%s1994_s13 + $0x54] sm:$0xf] }
  0x86   : > { %1066 = vmatpush.bf16.msra.mxu3 %v1523_v11  ;;  %v1428_v54 = vld [vmem:[%s1994_s13 + $0xe8] sm:$0xf0]  ;;  %v1616_v55 = vld [vmem:[%s1994_s13 + $0x164] sm:$0xf]  ;;  %v2085_v61 = vpack.c.b16 %v690_v51, %v690_v51  ;;  %v1367_v62 = vor.u32 %v1584_v48, %v1364_v49  ;;  %v2087_v63 = vpack.c.b16 %v691_v52, %v691_v52  ;;  %v1356_v3 = vld [vmem:[%s1994_s13 + $0x58] sm:$0xf0] }
  0x87   : > { %1028 = vmatpush.bf16.msra.mxu0 %v1323_v17  ;;  %v1492_v56 = vld [vmem:[%s1994_s13 + $0x168] sm:$0xf0]  ;;  %v1632_v58 = vld [vmem:[%s1994_s13 + $0x1e4] sm:$0xf]  ;;  %v1431_v0 = vor.u32 %v1600_v50, %v1428_v54  ;;  %v1598_v4 = vld [vmem:[%s1994_s13 + $0xd4] sm:$0xf]  ;;  %v1359_v11 = vor.u32 %v1582_v2, %v1356_v3 }
  0x88   : > { %1041 = vmatpush.bf16.msra.mxu1 %v1387_v21  ;;  %v1556_v59 = vld [vmem:[%s1994_s13 + $0x1e8] sm:$0xf0]  ;;  %v1495_v1 = vor.u32 %v1616_v55, %v1492_v56  ;;  %v1420_v6 = vld [vmem:[%s1994_s13 + $0xd8] sm:$0xf0]  ;;  %v1614_v7 = vld [vmem:[%s1994_s13 + $0x154] sm:$0xf] }
  0x89   : > { %1054 = vmatpush.bf16.msra.mxu2 %v1451_v22  ;;  %v1559_v5 = vor.u32 %v1632_v58, %v1556_v59  ;;  %v1484_v8 = vld [vmem:[%s1994_s13 + $0x158] sm:$0xf0]  ;;  %v1630_v9 = vld [vmem:[%s1994_s13 + $0x1d4] sm:$0xf]  ;;  %v1423_v12 = vor.u32 %v1598_v4, %v1420_v6  ;;  %v1580_v14 = vld [vmem:[%s1994_s13 + $0x44] sm:$0xf] }
  0x8a   : > { %1067 = vmatpush.bf16.msra.mxu3 %v1515_v26  ;;  %v1548_v10 = vld [vmem:[%s1994_s13 + $0x1d8] sm:$0xf0]  ;;  %v1487_v13 = vor.u32 %v1614_v7, %v1484_v8  ;;  %v1348_v15 = vld [vmem:[%s1994_s13 + $0x48] sm:$0xf0]  ;;  %v1596_v16 = vld [vmem:[%s1994_s13 + $0xc4] sm:$0xf] }
  0x8b   : > { %1029 = vmatpush.bf16.msra.mxu0 %v1315_v33  ;;  %v1551_v17 = vor.u32 %v1630_v9, %v1548_v10  ;;  %v1412_v18 = vld [vmem:[%s1994_s13 + $0xc8] sm:$0xf0]  ;;  %v1612_v19 = vld [vmem:[%s1994_s13 + $0x144] sm:$0xf]  ;;  %v1351_v23 = vor.u32 %v1580_v14, %v1348_v15  ;;  %v1578_v26 = vld [vmem:[%s1994_s13 + $0x34] sm:$0xf] }
  0x8c   : > { %1042 = vmatpush.bf16.msra.mxu1 %v1379_v38  ;;  %v1476_v20 = vld [vmem:[%s1994_s13 + $0x148] sm:$0xf0]  ;;  %v1628_v21 = vld [vmem:[%s1994_s13 + $0x1c4] sm:$0xf]  ;;  %v1415_v24 = vor.u32 %v1596_v16, %v1412_v18  ;;  %v1340_v27 = vld [vmem:[%s1994_s13 + $0x38] sm:$0xf0] }
  0x8d   : > { %1055 = vmatpush.bf16.msra.mxu2 %v1443_v39  ;;  %v1540_v22 = vld [vmem:[%s1994_s13 + $0x1c8] sm:$0xf0]  ;;  %v1479_v25 = vor.u32 %v1612_v19, %v1476_v20  ;;  %v1594_v28 = vld [vmem:[%s1994_s13 + $0xb4] sm:$0xf]  ;;  %v1404_v30 = vld [vmem:[%s1994_s13 + $0xb8] sm:$0xf0]  ;;  %v1343_v35 = vor.u32 %v1578_v26, %v1340_v27 }
  0x8e   : > { %1068 = vmatpush.bf16.msra.mxu3 %v1507_v43  ;;  %1030 = vmatmul.bf16.vlgmr.msra.gmra.mxu0 %v2085_v61  ;;  %v1543_v29 = vor.u32 %v1628_v21, %v1540_v22  ;;  %v1610_v31 = vld [vmem:[%s1994_s13 + $0x134] sm:$0xf]  ;;  %v1468_v32 = vld [vmem:[%s1994_s13 + $0x138] sm:$0xf0]  ;;  %v1407_v36 = vor.u32 %v1594_v28, %v1404_v30  ;;  %v1576_v38 = vld [vmem:[%s1994_s13 + $0x24] sm:$0xf] }
  0x8f   : > { %1074 = vmatpush.bf16.msrb.mxu0 %v1375_v44  ;;  %1043 = vmatmul.bf16.vlgmr.msra.gmra.mxu1 %v2087_v63  ;;  %v1626_v33 = vld [vmem:[%s1994_s13 + $0x1b4] sm:$0xf]  ;;  %v1532_v34 = vld [vmem:[%s1994_s13 + $0x1b8] sm:$0xf0]  ;;  %v1471_v37 = vor.u32 %v1610_v31, %v1468_v32  ;;  %v1332_v39 = vld [vmem:[%s1994_s13 + $0x28] sm:$0xf0] }
  0x90   : > { %1087 = vmatpush.bf16.msrb.mxu1 %v1439_v46  ;;  %1056 = vmatmul.bf16.vlgmr.msra.gmra.mxu2 %v2079_v57  ;;  %v1592_v40 = vld [vmem:[%s1994_s13 + $0xa4] sm:$0xf]  ;;  %v1535_v41 = vor.u32 %v1626_v33, %v1532_v34  ;;  %v1396_v42 = vld [vmem:[%s1994_s13 + $0xa8] sm:$0xf0]  ;;  %v1574_v50 = vld [vmem:[%s1994_s13 + $0x14] sm:$0xf] }
  0x91   : > { %1100 = vmatpush.bf16.msrb.mxu2 %v1503_v47  ;;  %1069 = vmatmul.bf16.vlgmr.msra.gmra.mxu3 %v2083_v60  ;;  %v1608_v43 = vld [vmem:[%s1994_s13 + $0x124] sm:$0xf]  ;;  %v1460_v44 = vld [vmem:[%s1994_s13 + $0x128] sm:$0xf0]  ;;  %v1335_v47 = vor.u32 %v1576_v38, %v1332_v39  ;;  %v1399_v48 = vor.u32 %v1592_v40, %v1396_v42  ;;  %v1324_v51 = vld [vmem:[%s1994_s13 + $0x18] sm:$0xf0] }
  0x92   : > { %1113 = vmatpush.bf16.msrb.mxu3 %v1567_v53  ;;  %v1624_v45 = vld [vmem:[%s1994_s13 + $0x1a4] sm:$0xf]  ;;  %v1524_v46 = vld [vmem:[%s1994_s13 + $0x1a8] sm:$0xf0]  ;;  %v1463_v49 = vor.u32 %v1608_v43, %v1460_v44  ;;  %v1590_v52 = vld [vmem:[%s1994_s13 + $0x94] sm:$0xf] }
  0x93   : > { %1075 = vmatpush.bf16.msrb.mxu0 %v1367_v62  ;;  %v1527_v53 = vor.u32 %v1624_v45, %v1524_v46  ;;  %v1388_v54 = vld [vmem:[%s1994_s13 + $0x98] sm:$0xf0]  ;;  %v1606_v55 = vld [vmem:[%s1994_s13 + $0x114] sm:$0xf]  ;;  %v1327_v62 = vor.u32 %v1574_v50, %v1324_v51  ;;  %v1572_v2 = vld [vmem:[%s1994_s13 + $0x4] sm:$0xf] }
  0x94   : > { %1088 = vmatpush.bf16.msrb.mxu1 %v1431_v0  ;;  %v1452_v56 = vld [vmem:[%s1994_s13 + $0x118] sm:$0xf0]  ;;  %v1622_v58 = vld [vmem:[%s1994_s13 + $0x194] sm:$0xf]  ;;  %v1391_v0 = vor.u32 %v1590_v52, %v1388_v54  ;;  %v1316_v3 = vld [vmem:[%s1994_s13 + $0x8] sm:$0xf0] }
  0x95   : > { %1101 = vmatpush.bf16.msrb.mxu2 %v1495_v1  ;;  %v1516_v59 = vld [vmem:[%s1994_s13 + $0x198] sm:$0xf0]  ;;  %v1455_v1 = vor.u32 %v1606_v55, %v1452_v56  ;;  %v1588_v4 = vld [vmem:[%s1994_s13 + $0x84] sm:$0xf]  ;;  %v1380_v6 = vld [vmem:[%s1994_s13 + $0x88] sm:$0xf0] }
  0x96   : > { %1114 = vmatpush.bf16.msrb.mxu3 %v1559_v5  ;;  %v1519_v5 = vor.u32 %v1622_v58, %v1516_v59  ;;  %v1604_v7 = vld [vmem:[%s1994_s13 + $0x104] sm:$0xf]  ;;  %v1444_v8 = vld [vmem:[%s1994_s13 + $0x108] sm:$0xf0] }
  0x97   : > { %1076 = vmatpush.bf16.msrb.mxu0 %v1359_v11  ;;  %v1620_v9 = vld [vmem:[%s1994_s13 + $0x184] sm:$0xf]  ;;  %v1508_v10 = vld [vmem:[%s1994_s13 + $0x188] sm:$0xf0]  ;;  %v1319_v11 = vor.u32 %v1572_v2, %v1316_v3 }
  0x98   : > { %1089 = vmatpush.bf16.msrb.mxu1 %v1423_v12  ;;  %v1383_v12 = vor.u32 %v1588_v4, %v1380_v6  ;;  %v1511_v14 = vor.u32 %v1620_v9, %v1508_v10  ;;  %v620_v21 = vld [vmem:[%s1992_s12] sm:$0xff] }
  0x99   : > { %1102 = vmatpush.bf16.msrb.mxu2 %v1487_v13  ;;  %v1447_v13 = vor.u32 %v1604_v7, %v1444_v8 }
  0x9a   : > { %1115 = vmatpush.bf16.msrb.mxu3 %v1551_v17 }
  0x9b   : > { %1077 = vmatpush.bf16.msrb.mxu0 %v1351_v23 }
  0x9c   : > { %1090 = vmatpush.bf16.msrb.mxu1 %v1415_v24 }
  0x9d   : > { %1103 = vmatpush.bf16.msrb.mxu2 %v1479_v25  ;;  %v621_v25 = vld [vmem:[%s1992_s12 + $0x8] sm:$0xff] }
  0x9e   : > { %1116 = vmatpush.bf16.msrb.mxu3 %v1543_v29 }
  0x9f   : > { %1078 = vmatpush.bf16.msrb.mxu0 %v1343_v35 }
  0xa0   : > { %1091 = vmatpush.bf16.msrb.mxu1 %v1407_v36 }
  0xa1   : > { %1104 = vmatpush.bf16.msrb.mxu2 %v1471_v37 }
  0xa2   : > { %1117 = vmatpush.bf16.msrb.mxu3 %v1535_v41 }
  0xa3   : > { %1079 = vmatpush.bf16.msrb.mxu0 %v1335_v47 }
  0xa4   : > { %1092 = vmatpush.bf16.msrb.mxu1 %v1399_v48 }
  0xa5   : > { %1105 = vmatpush.bf16.msrb.mxu2 %v1463_v49 }
  0xa6   : > { %1118 = vmatpush.bf16.msrb.mxu3 %v1527_v53 }
  0xa7   : > { %1080 = vmatpush.bf16.msrb.mxu0 %v1327_v62 }
  0xa8   : > { %1093 = vmatpush.bf16.msrb.mxu1 %v1391_v0 }
  0xa9   : > { %1106 = vmatpush.bf16.msrb.mxu2 %v1455_v1 }
  0xaa   : > { %1119 = vmatpush.bf16.msrb.mxu3 %v1519_v5 }
  0xab   : > { %1081 = vmatpush.bf16.msrb.mxu0 %v1319_v11 }
  0xac   : > { %1094 = vmatpush.bf16.msrb.mxu1 %v1383_v12 }
  0xad   : > { %1107 = vmatpush.bf16.msrb.mxu2 %v1447_v13 }
  0xae   : > { %1120 = vmatpush.bf16.msrb.mxu3 %v1511_v14  ;;  %1082 = vmatmul.bf16.vlgmr.msrb.gmra.mxu0 %v2085_v61 }
  0xaf   : > { %1095 = vmatmul.bf16.vlgmr.msrb.gmra.mxu1 %v2087_v63 }
  0xb0   : > { %1108 = vmatmul.bf16.vlgmr.msrb.gmra.mxu2 %v2079_v57 }
  0xb1   : > { %1121 = vmatmul.bf16.vlgmr.msrb.gmra.mxu3 %v2083_v60 }
 0x10b   : > { %v1031_v15 = vpop.f32.mrf.mxu0 }
 0x10c   : > { %v1044_v16 = vpop.f32.mrf.mxu1 }
 0x10d   : > { %v1045_v17 = vadd.f32 %v1044_v16, %v1031_v15 }
 0x113   : > { %v1057_v18 = vpop.f32.mrf.mxu2  ;;  %v1033_v23 = vpop.f32.mrf.mxu0 }
 0x114   : > { %v1058_v19 = vadd.f32 %v1057_v18, %v1045_v17  ;;  %v1070_v20 = vpop.f32.mrf.mxu3  ;;  %v1046_v24 = vpop.f32.mrf.mxu1 }
 0x116   : > { %v1071_v22 = vadd.f32 %v1070_v20, %v1058_v19 }
 0x118   : > { %v1126_v61 = vadd.f32 %v1071_v22, %v620_v21 }
 0x11a   : > { %1128 = vst [vmem:[%s1992_s12] sm:$0xff] %v1126_v61 }
 0x11b   : > { %v1059_v26 = vpop.f32.mrf.mxu2 }
 0x11c   : > { %v1072_v63 = vpop.f32.mrf.mxu3 }
 0x12b   : > { %v1083_v27 = vpop.f32.mrf.mxu0 }
 0x12c   : > { %v1096_v57 = vpop.f32.mrf.mxu1 }
 0x12d   : > { %v1097_v28 = vadd.f32 %v1096_v57, %v1083_v27 }
 0x133   : > { %v1109_v60 = vpop.f32.mrf.mxu2  ;;  %v1085_v31 = vpop.f32.mrf.mxu0 }
 0x134   : > { %v1110_v29 = vadd.f32 %v1109_v60, %v1097_v28  ;;  %v1122_v30 = vpop.f32.mrf.mxu3  ;;  %v1098_v32 = vpop.f32.mrf.mxu1 }
 0x136   : > { %v1123_v33 = vadd.f32 %v1122_v30, %v1110_v29 }
 0x138   : > { %v1127_v34 = vadd.f32 %v1123_v33, %v621_v25  ;;  %1133 = sbr.rel (%p1568_p13) target bundleno = 329 (0x149), region = 82 }
 0x13a   : > { %1129 = vst [vmem:[%s1992_s12 + $0x8] sm:$0xff] %v1127_v34 }
 0x13b   : > { %v1111_v35 = vpop.f32.mrf.mxu2 }
 0x13c   : > { %v1124_v36 = vpop.f32.mrf.mxu3 }
 0x13d   : > { %v1134_v37 = vld [vmem:[%s1992_s12] sm:$0xff]  ;;  %v1145_v43 = vld [vmem:[%s1987_s18 + $0x8] sm:$0xff] }
 0x13e   : > { %v1136_v39 = vld [vmem:[%s592_s15] sm:$0x3] }
 0x13f   : > { %v1138_v40 = vperm.slane %v1136_v39, 0  ;;  %v1139_v41 = vperm.slane %v1136_v39, 1  ;;  %v1144_v42 = vld [vmem:[%s1987_s18] sm:$0xff] }
 0x141   : > { %v1135_v38 = vld [vmem:[%s1992_s12 + $0x8] sm:$0xff]  ;;  %v1142_v44 = vadd.f32 %v1138_v40, %v1134_v37 }
 0x142   : > { %v1143_v45 = vadd.f32 %v1139_v41, %v1135_v38 }
 0x143   : > { %v1146_v46 = vadd.f32 %v1144_v42, %v1142_v44 }
 0x144   : > { %v1147_v47 = vadd.f32 %v1145_v43, %v1143_v45 }
 0x145   : > { %v1148_v48 = vmax.f32 %v1146_v46, 0.0 }
 0x146   : > { %v1149_v49 = vmax.f32 %v1147_v47, 0.0 }
 0x147   : > { %1150 = vst [vmem:[%s1992_s12] sm:$0xff] %v1148_v48 }
 0x148   : > { %1151 = vst [vmem:[%s1992_s12 + $0x8] sm:$0xff] %v1149_v49 }
 0x149 PF: > { %s14_s21 = sadd.s32 1, %s1747_s21   ;;  %s2187_s15 = smov %s1727_s16 }
 0x14a   : > { %p11_p0 = scmp.ge.s32.totalorder %s14_s21, 20   ;;  %s2188_s16 = smov %s1826_s28 }
 0x14b   : > { %s2189_s17 = smov %s1739_s19  ;;  %s2190_s18 = smov %s1743_s20 }
 0x14c   : > { %s2191_s19 = smov %s2194_s22  ;;  %s2192_s20 = smov %s2198_s23 }
 0x14d   :  { %13 = sbr.rel (!%p11_p0) target bundleno = 4 (0x4), region = 126 }

// kernel: resnet18_16s_forward.40
= control target key start
LH: loop header
LB: loop body
LE: loop exit
PB: predicated region body
PF: predicated region fallthrough
CT: control target
= control target key end

     0   :  { %s1683_s12 = smov 0   ;;  %s1685_s13 = smov 0   ;;  %s2083_s0 = inlined_call_operand.vmem [shape: bf16[8,4608], index: 0, kind: input, shape index: {}]   ;;  %s2084_s1 = inlined_call_operand.vmem [shape: bf16[4608,512], index: 1, kind: input, shape index: {}]   ;;  %s2085_s2 = inlined_call_operand.vmem [shape: f32[1,512], index: 2, kind: input, shape index: {}]   ;;  %s2086_s3 = inlined_call_operand.vmem [shape: f32[8,512], index: 3, kind: output, shape index: {}]  }
   0x1   :  { %s1687_s14 = smov 0   ;;  %s1689_s15 = smov 0  }
   0x2   :  { %s1691_s16 = smov 0   ;;  %s1693_s17 = smov 0  }
   0x3   :  { %s1695_s18 = smov 0  }
   0x4 LB: > { %s25_s19 = sadd.s32 1, %s1652_s16  ;;  %s28_s20 = sadd.s32 1, %s1656_s17  ;;  %s1660_s18 = sphi %s1695_s18, %s13_s18   ;;  %s1656_s17 = sphi %s1693_s17, %s2092_s17   ;;  %s1652_s16 = sphi %s1691_s16, %s2091_s16   ;;  %s1648_s15 = sphi %s1689_s15, %s2090_s15   ;;  %s1644_s14 = sphi %s1687_s14, %s2089_s14   ;;  %s1640_s13 = sphi %s1685_s13, %s2088_s13   ;;  %s1636_s12 = sphi %s1683_s12, %s2087_s12  }
   0x5   : > { %p26_p0 = scmp.ge.s32.totalorder %s25_s19, 9  ;;  %p76_p1 = scmp.ne.s32.totalorder %s1640_s13, %s1636_s12 }
   0x6   : > { %p77_p2 = scmp.eq.s32.totalorder %s1660_s18, 0  ;;  %s69_s24 = sadd.s32 1, %s1640_s13 }
   0x7   : > { %s2094_s19 = smov (%p26_p0, %s25_s19), 0  ;;  %s2096_s20 = smov (!%p26_p0, %s28_s20), %s1656_s17 }
   0x8   : > { %p78_p3 = por %p77_p2, %p76_p1  ;;  %p30_p4 = scmp.ge.s32.totalorder %s2096_s20, 2 }
   0x9   : > { %s64_s21 = ssub.s32 %s1652_s16, %s2094_s19  ;;  %p1211_p6 = scmp.ge.s32.totalorder %s1660_s18, 18 }
   0xa   : > { %s2098_s20 = smov (%p30_p4, %s2096_s20), 0 }
   0xb   : > { %s65_s22 = ssub.s32 %s1656_s17, %s2098_s20  ;;  %156 = sbr.rel (%p1211_p6) target bundleno = 87 (0x57), region = 16 }
   0xc   : > { %s66_s23 = sor.u32 %s65_s22, %s64_s21 }
   0xd   : > { %p67_p5 = scmp.eq.s32.totalorder %s66_s23, 0 }
   0xf   : > { %s1734_s25 = scalar_select %p67_p5, %s1640_s13, %s69_s24  }
  0x10   : > { %172 = sbr.rel (!%p78_p3) target bundleno = 87 (0x57), region = 24  ;;  %s174_s26 = sand.u32 (%p78_p3), 1, %s1640_s13  }
  0x11   : > { %s1214_s27 = sshll.u32 (%p78_p3), %s1656_s17, 1  ;;  %s1212_s28 = sshll.u32 (%p78_p3), %s174_s26, 9 }
  0x12   : > { %s1484_s29 = sshll.u32 (%p78_p3), %s1652_s16, 8  ;;  %s1748_s8 = scalar_lea.vmem (%p78_p3), [#allocation2], %s1212_s28 }
  0x13   : > { %s180_s30 = sadd.s32 (%p78_p3), %s1484_s29, %s1214_s27 }
  0x14   : > { %s1216_s4 = sshll.u32 (%p78_p3), %s180_s30, 2 }
  0x15   : > { %s1743_s7 = scalar_lea.vmem %s2084_s1, %s1216_s4 }
  0x16   : > { %v337_v0 = vld [vmem:[%s1743_s7] sm:$0xff]  ;;  %v339_v1 = vld [vmem:[%s1743_s7 + $0x10] sm:$0xff] }
  0x17   : > { %v341_v2 = vld [vmem:[%s1743_s7 + $0x20] sm:$0xff]  ;;  %338 = vst [vmem:[%s1748_s8] sm:$0xff] %v337_v0  ;;  %v343_v3 = vld [vmem:[%s1743_s7 + $0x30] sm:$0xff] }
  0x18   : > { %340 = vst [vmem:[%s1748_s8 + $0x8] sm:$0xff] %v339_v1  ;;  %v345_v4 = vld [vmem:[%s1743_s7 + $0x40] sm:$0xff]  ;;  %v347_v5 = vld [vmem:[%s1743_s7 + $0x50] sm:$0xff] }
  0x19   : > { %342 = vst [vmem:[%s1748_s8 + $0x10] sm:$0xff] %v341_v2  ;;  %v349_v6 = vld [vmem:[%s1743_s7 + $0x60] sm:$0xff]  ;;  %v351_v7 = vld [vmem:[%s1743_s7 + $0x70] sm:$0xff] }
  0x1a   : > { %344 = vst [vmem:[%s1748_s8 + $0x18] sm:$0xff] %v343_v3  ;;  %v353_v8 = vld [vmem:[%s1743_s7 + $0x80] sm:$0xff]  ;;  %v355_v9 = vld [vmem:[%s1743_s7 + $0x90] sm:$0xff] }
  0x1b   : > { %346 = vst [vmem:[%s1748_s8 + $0x20] sm:$0xff] %v345_v4  ;;  %v357_v10 = vld [vmem:[%s1743_s7 + $0xa0] sm:$0xff]  ;;  %v359_v11 = vld [vmem:[%s1743_s7 + $0xb0] sm:$0xff] }
  0x1c   : > { %348 = vst [vmem:[%s1748_s8 + $0x28] sm:$0xff] %v347_v5  ;;  %v361_v12 = vld [vmem:[%s1743_s7 + $0xc0] sm:$0xff]  ;;  %v363_v13 = vld [vmem:[%s1743_s7 + $0xd0] sm:$0xff] }
  0x1d   : > { %350 = vst [vmem:[%s1748_s8 + $0x30] sm:$0xff] %v349_v6  ;;  %v365_v14 = vld [vmem:[%s1743_s7 + $0xe0] sm:$0xff]  ;;  %v367_v15 = vld [vmem:[%s1743_s7 + $0xf0] sm:$0xff] }
  0x1e   : > { %352 = vst [vmem:[%s1748_s8 + $0x38] sm:$0xff] %v351_v7  ;;  %v369_v16 = vld [vmem:[%s1743_s7 + $0x100] sm:$0xff]  ;;  %v371_v17 = vld [vmem:[%s1743_s7 + $0x110] sm:$0xff] }
  0x1f   : > { %354 = vst [vmem:[%s1748_s8 + $0x40] sm:$0xff] %v353_v8  ;;  %v373_v18 = vld [vmem:[%s1743_s7 + $0x120] sm:$0xff]  ;;  %v375_v19 = vld [vmem:[%s1743_s7 + $0x130] sm:$0xff] }
  0x20   : > { %356 = vst [vmem:[%s1748_s8 + $0x48] sm:$0xff] %v355_v9  ;;  %v377_v20 = vld [vmem:[%s1743_s7 + $0x140] sm:$0xff]  ;;  %v379_v21 = vld [vmem:[%s1743_s7 + $0x150] sm:$0xff] }
  0x21   : > { %358 = vst [vmem:[%s1748_s8 + $0x50] sm:$0xff] %v357_v10  ;;  %v381_v22 = vld [vmem:[%s1743_s7 + $0x160] sm:$0xff]  ;;  %v383_v23 = vld [vmem:[%s1743_s7 + $0x170] sm:$0xff] }
  0x22   : > { %360 = vst [vmem:[%s1748_s8 + $0x58] sm:$0xff] %v359_v11  ;;  %v385_v24 = vld [vmem:[%s1743_s7 + $0x180] sm:$0xff]  ;;  %v387_v25 = vld [vmem:[%s1743_s7 + $0x190] sm:$0xff] }
  0x23   : > { %362 = vst [vmem:[%s1748_s8 + $0x60] sm:$0xff] %v361_v12  ;;  %v389_v26 = vld [vmem:[%s1743_s7 + $0x1a0] sm:$0xff]  ;;  %v391_v27 = vld [vmem:[%s1743_s7 + $0x1b0] sm:$0xff] }
  0x24   : > { %364 = vst [vmem:[%s1748_s8 + $0x68] sm:$0xff] %v363_v13  ;;  %v393_v28 = vld [vmem:[%s1743_s7 + $0x1c0] sm:$0xff]  ;;  %v395_v29 = vld [vmem:[%s1743_s7 + $0x1d0] sm:$0xff] }
  0x25   : > { %366 = vst [vmem:[%s1748_s8 + $0x70] sm:$0xff] %v365_v14  ;;  %v397_v30 = vld [vmem:[%s1743_s7 + $0x1e0] sm:$0xff]  ;;  %v399_v31 = vld [vmem:[%s1743_s7 + $0x1f0] sm:$0xff] }
  0x26   : > { %368 = vst [vmem:[%s1748_s8 + $0x78] sm:$0xff] %v367_v15  ;;  %v401_v32 = vld [vmem:[%s1743_s7 + $0x200] sm:$0xff]  ;;  %v403_v33 = vld [vmem:[%s1743_s7 + $0x210] sm:$0xff] }
  0x27   : > { %370 = vst [vmem:[%s1748_s8 + $0x80] sm:$0xff] %v369_v16  ;;  %v405_v34 = vld [vmem:[%s1743_s7 + $0x220] sm:$0xff]  ;;  %v407_v35 = vld [vmem:[%s1743_s7 + $0x230] sm:$0xff] }
  0x28   : > { %372 = vst [vmem:[%s1748_s8 + $0x88] sm:$0xff] %v371_v17  ;;  %v409_v36 = vld [vmem:[%s1743_s7 + $0x240] sm:$0xff]  ;;  %v411_v37 = vld [vmem:[%s1743_s7 + $0x250] sm:$0xff] }
  0x29   : > { %374 = vst [vmem:[%s1748_s8 + $0x90] sm:$0xff] %v373_v18  ;;  %v413_v38 = vld [vmem:[%s1743_s7 + $0x260] sm:$0xff]  ;;  %v415_v39 = vld [vmem:[%s1743_s7 + $0x270] sm:$0xff] }
  0x2a   : > { %376 = vst [vmem:[%s1748_s8 + $0x98] sm:$0xff] %v375_v19  ;;  %v417_v40 = vld [vmem:[%s1743_s7 + $0x280] sm:$0xff]  ;;  %v419_v41 = vld [vmem:[%s1743_s7 + $0x290] sm:$0xff] }
  0x2b   : > { %378 = vst [vmem:[%s1748_s8 + $0xa0] sm:$0xff] %v377_v20  ;;  %v421_v42 = vld [vmem:[%s1743_s7 + $0x2a0] sm:$0xff]  ;;  %v423_v43 = vld [vmem:[%s1743_s7 + $0x2b0] sm:$0xff] }
  0x2c   : > { %380 = vst [vmem:[%s1748_s8 + $0xa8] sm:$0xff] %v379_v21  ;;  %v425_v44 = vld [vmem:[%s1743_s7 + $0x2c0] sm:$0xff]  ;;  %v427_v45 = vld [vmem:[%s1743_s7 + $0x2d0] sm:$0xff] }
  0x2d   : > { %382 = vst [vmem:[%s1748_s8 + $0xb0] sm:$0xff] %v381_v22  ;;  %v429_v46 = vld [vmem:[%s1743_s7 + $0x2e0] sm:$0xff]  ;;  %v431_v47 = vld [vmem:[%s1743_s7 + $0x2f0] sm:$0xff] }
  0x2e   : > { %384 = vst [vmem:[%s1748_s8 + $0xb8] sm:$0xff] %v383_v23  ;;  %v433_v48 = vld [vmem:[%s1743_s7 + $0x300] sm:$0xff]  ;;  %v435_v49 = vld [vmem:[%s1743_s7 + $0x310] sm:$0xff] }
  0x2f   : > { %386 = vst [vmem:[%s1748_s8 + $0xc0] sm:$0xff] %v385_v24  ;;  %v437_v50 = vld [vmem:[%s1743_s7 + $0x320] sm:$0xff]  ;;  %v439_v51 = vld [vmem:[%s1743_s7 + $0x330] sm:$0xff] }
  0x30   : > { %388 = vst [vmem:[%s1748_s8 + $0xc8] sm:$0xff] %v387_v25  ;;  %v441_v52 = vld [vmem:[%s1743_s7 + $0x340] sm:$0xff]  ;;  %v443_v53 = vld [vmem:[%s1743_s7 + $0x350] sm:$0xff] }
  0x31   : > { %390 = vst [vmem:[%s1748_s8 + $0xd0] sm:$0xff] %v389_v26  ;;  %v445_v54 = vld [vmem:[%s1743_s7 + $0x360] sm:$0xff]  ;;  %v447_v55 = vld [vmem:[%s1743_s7 + $0x370] sm:$0xff] }
  0x32   : > { %392 = vst [vmem:[%s1748_s8 + $0xd8] sm:$0xff] %v391_v27  ;;  %v449_v56 = vld [vmem:[%s1743_s7 + $0x380] sm:$0xff]  ;;  %v451_v57 = vld [vmem:[%s1743_s7 + $0x390] sm:$0xff] }
  0x33   : > { %394 = vst [vmem:[%s1748_s8 + $0xe0] sm:$0xff] %v393_v28  ;;  %v453_v58 = vld [vmem:[%s1743_s7 + $0x3a0] sm:$0xff]  ;;  %v455_v59 = vld [vmem:[%s1743_s7 + $0x3b0] sm:$0xff] }
  0x34   : > { %396 = vst [vmem:[%s1748_s8 + $0xe8] sm:$0xff] %v395_v29  ;;  %v457_v60 = vld [vmem:[%s1743_s7 + $0x3c0] sm:$0xff]  ;;  %v459_v61 = vld [vmem:[%s1743_s7 + $0x3d0] sm:$0xff] }
  0x35   : > { %398 = vst [vmem:[%s1748_s8 + $0xf0] sm:$0xff] %v397_v30  ;;  %v461_v62 = vld [vmem:[%s1743_s7 + $0x3e0] sm:$0xff]  ;;  %v463_v63 = vld [vmem:[%s1743_s7 + $0x3f0] sm:$0xff] }
  0x36   : > { %400 = vst [vmem:[%s1748_s8 + $0xf8] sm:$0xff] %v399_v31 }
  0x37   : > { %402 = vst [vmem:[%s1748_s8 + $0x100] sm:$0xff] %v401_v32 }
  0x38   : > { %404 = vst [vmem:[%s1748_s8 + $0x108] sm:$0xff] %v403_v33 }
  0x39   : > { %406 = vst [vmem:[%s1748_s8 + $0x110] sm:$0xff] %v405_v34 }
  0x3a   : > { %408 = vst [vmem:[%s1748_s8 + $0x118] sm:$0xff] %v407_v35 }
  0x3b   : > { %410 = vst [vmem:[%s1748_s8 + $0x120] sm:$0xff] %v409_v36 }
  0x3c   : > { %412 = vst [vmem:[%s1748_s8 + $0x128] sm:$0xff] %v411_v37 }
  0x3d   : > { %414 = vst [vmem:[%s1748_s8 + $0x130] sm:$0xff] %v413_v38 }
  0x3e   : > { %416 = vst [vmem:[%s1748_s8 + $0x138] sm:$0xff] %v415_v39 }
  0x3f   : > { %418 = vst [vmem:[%s1748_s8 + $0x140] sm:$0xff] %v417_v40 }
  0x40   : > { %420 = vst [vmem:[%s1748_s8 + $0x148] sm:$0xff] %v419_v41 }
  0x41   : > { %422 = vst [vmem:[%s1748_s8 + $0x150] sm:$0xff] %v421_v42 }
  0x42   : > { %424 = vst [vmem:[%s1748_s8 + $0x158] sm:$0xff] %v423_v43 }
  0x43   : > { %426 = vst [vmem:[%s1748_s8 + $0x160] sm:$0xff] %v425_v44 }
  0x44   : > { %428 = vst [vmem:[%s1748_s8 + $0x168] sm:$0xff] %v427_v45 }
  0x45   : > { %430 = vst [vmem:[%s1748_s8 + $0x170] sm:$0xff] %v429_v46 }
  0x46   : > { %432 = vst [vmem:[%s1748_s8 + $0x178] sm:$0xff] %v431_v47 }
  0x47   : > { %434 = vst [vmem:[%s1748_s8 + $0x180] sm:$0xff] %v433_v48 }
  0x48   : > { %436 = vst [vmem:[%s1748_s8 + $0x188] sm:$0xff] %v435_v49 }
  0x49   : > { %438 = vst [vmem:[%s1748_s8 + $0x190] sm:$0xff] %v437_v50 }
  0x4a   : > { %440 = vst [vmem:[%s1748_s8 + $0x198] sm:$0xff] %v439_v51 }
  0x4b   : > { %442 = vst [vmem:[%s1748_s8 + $0x1a0] sm:$0xff] %v441_v52 }
  0x4c   : > { %444 = vst [vmem:[%s1748_s8 + $0x1a8] sm:$0xff] %v443_v53 }
  0x4d   : > { %446 = vst [vmem:[%s1748_s8 + $0x1b0] sm:$0xff] %v445_v54 }
  0x4e   : > { %448 = vst [vmem:[%s1748_s8 + $0x1b8] sm:$0xff] %v447_v55 }
  0x4f   : > { %450 = vst [vmem:[%s1748_s8 + $0x1c0] sm:$0xff] %v449_v56 }
  0x50   : > { %452 = vst [vmem:[%s1748_s8 + $0x1c8] sm:$0xff] %v451_v57 }
  0x51   : > { %454 = vst [vmem:[%s1748_s8 + $0x1d0] sm:$0xff] %v453_v58 }
  0x52   : > { %456 = vst [vmem:[%s1748_s8 + $0x1d8] sm:$0xff] %v455_v59 }
  0x53   : > { %458 = vst [vmem:[%s1748_s8 + $0x1e0] sm:$0xff] %v457_v60 }
  0x54   : > { %460 = vst [vmem:[%s1748_s8 + $0x1e8] sm:$0xff] %v459_v61 }
  0x55   : > { %462 = vst [vmem:[%s1748_s8 + $0x1f0] sm:$0xff] %v461_v62 }
  0x56   : > { %464 = vst [vmem:[%s1748_s8 + $0x1f8] sm:$0xff] %v463_v63 }
  0x57 PF: > { %p1217_p7 = scmp.ge.s32.totalorder %s1660_s18, 1  ;;  %p477_p8 = scmp.lt.s32.totalorder %s1660_s18, 19 }
  0x59   : > { %p478_p9 = pnand %p1217_p7, %p477_p8 }
  0x5a   : > { %s484_s9 = sand.u32 (!%p478_p9), 1, %s1636_s12   ;;  %s1219_s10 = sshll.u32 (!%p478_p9), %s1644_s14, 2 }
  0x5b   : > { %481 = sbr.rel (%p478_p9) target bundleno = 326 (0x146), region = 66  ;;  %s1218_s11 = sshll.u32 (!%p478_p9), %s484_s9, 9 }
  0x5c   : > { %p527_p10 = scmp.lt.s32.totalorder (!%p478_p9), %s1219_s10, 35  ;;  %s1221_s21 = sshll.u32 (!%p478_p9), %s1648_s15, 1 }
  0x5d   : > { %p537_p11 = scmp.lt.s32.totalorder (!%p478_p9), %s1221_s21, 3  ;;  %s1897_s5 = scalar_lea.vmem (!%p478_p9), [#allocation2], %s1218_s11 }
  0x5e   : > { %p1224_p12 = scmp.ne.s32.totalorder (!%p478_p9), %s1644_s14, 0 }
  0x60   : > { %s2100_s10 = smov (!%p527_p10, %s1219_s10), 35  ;;  %s2102_s21 = smov (!%p537_p11, %s1221_s21), 3 }
  0x61   : > { %s1220_s22 = sshll.u32 %s2100_s10, 2  ;;  %s539_s12 = scalar_lea.vmem %s2085_s2, %s2102_s21 }
  0x62   : > { %s1883_s26 = scalar_lea.vmem %s2083_s0, %s1220_s22  ;;  %s1223_s29 = sshll.u32 %s2102_s21, 3 }
  0x63   : > { %s1895_s15 = scalar_lea.vmem %s2086_s3, %s1223_s29  ;;  %554 = sbr.rel (%p1224_p12) target bundleno = 107 (0x6b), region = 74 }
  0x68   : > { %v1662_v0 = vmov 0.0  }
  0x69   : > { %555 = vst [vmem:[%s1895_s15] sm:$0xff] %v1662_v0 }
  0x6a   : > { %556 = vst [vmem:[%s1895_s15 + $0x8] sm:$0xff] %v1662_v0 }
  0x6b PF: > { %v1283_v1 = vld [vmem:[%s1897_s5 + $0x70] sm:$0xf]  ;;  %v1500_v2 = vld [vmem:[%s1897_s5 + $0x74] sm:$0xf0]  ;;  %v1275_v12 = vld [vmem:[%s1897_s5 + $0x60] sm:$0xf] }
  0x6c   : > { %v1347_v3 = vld [vmem:[%s1897_s5 + $0xf0] sm:$0xf]  ;;  %v1284_v4 = vor.u32 %v1500_v2, %v1283_v1  ;;  %v1516_v5 = vld [vmem:[%s1897_s5 + $0xf4] sm:$0xf0]  ;;  %v1498_v14 = vld [vmem:[%s1897_s5 + $0x64] sm:$0xf0] }
  0x6d   : > { %v1411_v6 = vld [vmem:[%s1897_s5 + $0x170] sm:$0xf]  ;;  %v1532_v7 = vld [vmem:[%s1897_s5 + $0x174] sm:$0xf0]  ;;  %v1348_v8 = vor.u32 %v1516_v5, %v1347_v3  ;;  %v1339_v15 = vld [vmem:[%s1897_s5 + $0xe0] sm:$0xf]  ;;  %v1276_v17 = vor.u32 %v1498_v14, %v1275_v12 }
  0x6e   : > { %v1412_v9 = vor.u32 %v1532_v7, %v1411_v6  ;;  %v1475_v10 = vld [vmem:[%s1897_s5 + $0x1f0] sm:$0xf]  ;;  %v1548_v11 = vld [vmem:[%s1897_s5 + $0x1f4] sm:$0xf0]  ;;  %959 = vmatpush.bf16.msra.mxu0 %v1284_v4  ;;  %v1514_v16 = vld [vmem:[%s1897_s5 + $0xe4] sm:$0xf0] }
  0x6f   : > { %v1476_v13 = vor.u32 %v1548_v11, %v1475_v10  ;;  %972 = vmatpush.bf16.msra.mxu1 %v1348_v8  ;;  %v1340_v18 = vor.u32 %v1514_v16, %v1339_v15  ;;  %v1403_v19 = vld [vmem:[%s1897_s5 + $0x160] sm:$0xf]  ;;  %v1530_v20 = vld [vmem:[%s1897_s5 + $0x164] sm:$0xf0]  ;;  %v1267_v24 = vld [vmem:[%s1897_s5 + $0x50] sm:$0xf] }
  0x70   : > { %985 = vmatpush.bf16.msra.mxu2 %v1412_v9  ;;  %v1467_v21 = vld [vmem:[%s1897_s5 + $0x1e0] sm:$0xf]  ;;  %v1404_v22 = vor.u32 %v1530_v20, %v1403_v19  ;;  %v1546_v23 = vld [vmem:[%s1897_s5 + $0x1e4] sm:$0xf0]  ;;  %v1496_v25 = vld [vmem:[%s1897_s5 + $0x54] sm:$0xf0] }
  0x71   : > { %998 = vmatpush.bf16.msra.mxu3 %v1476_v13  ;;  %v1468_v26 = vor.u32 %v1546_v23, %v1467_v21  ;;  %v1331_v27 = vld [vmem:[%s1897_s5 + $0xd0] sm:$0xf]  ;;  %v1512_v28 = vld [vmem:[%s1897_s5 + $0xd4] sm:$0xf0]  ;;  %v1268_v30 = vor.u32 %v1496_v25, %v1267_v24  ;;  %v1259_v36 = vld [vmem:[%s1897_s5 + $0x40] sm:$0xf] }
  0x72   : > { %v1395_v29 = vld [vmem:[%s1897_s5 + $0x150] sm:$0xf]  ;;  %960 = vmatpush.bf16.msra.mxu0 %v1276_v17  ;;  %v1528_v31 = vld [vmem:[%s1897_s5 + $0x154] sm:$0xf0]  ;;  %v1332_v34 = vor.u32 %v1512_v28, %v1331_v27  ;;  %v1494_v37 = vld [vmem:[%s1897_s5 + $0x44] sm:$0xf0] }
  0x73   : > { %v1459_v32 = vld [vmem:[%s1897_s5 + $0x1d0] sm:$0xf]  ;;  %v1544_v33 = vld [vmem:[%s1897_s5 + $0x1d4] sm:$0xf0]  ;;  %973 = vmatpush.bf16.msra.mxu1 %v1340_v18  ;;  %v1396_v35 = vor.u32 %v1528_v31, %v1395_v29  ;;  %v1323_v38 = vld [vmem:[%s1897_s5 + $0xc0] sm:$0xf]  ;;  %v1260_v45 = vor.u32 %v1494_v37, %v1259_v36 }
  0x74   : > { %986 = vmatpush.bf16.msra.mxu2 %v1404_v22  ;;  %v1460_v39 = vor.u32 %v1544_v33, %v1459_v32  ;;  %v1510_v40 = vld [vmem:[%s1897_s5 + $0xc4] sm:$0xf0]  ;;  %v1387_v41 = vld [vmem:[%s1897_s5 + $0x140] sm:$0xf]  ;;  %v1251_v48 = vld [vmem:[%s1897_s5 + $0x30] sm:$0xf] }
  0x75   : > { %999 = vmatpush.bf16.msra.mxu3 %v1468_v26  ;;  %v1526_v42 = vld [vmem:[%s1897_s5 + $0x144] sm:$0xf0]  ;;  %v1451_v43 = vld [vmem:[%s1897_s5 + $0x1c0] sm:$0xf]  ;;  %v1324_v46 = vor.u32 %v1510_v40, %v1323_v38  ;;  %v1492_v49 = vld [vmem:[%s1897_s5 + $0x34] sm:$0xf0] }
  0x76   : > { %v1542_v44 = vld [vmem:[%s1897_s5 + $0x1c4] sm:$0xf0]  ;;  %961 = vmatpush.bf16.msra.mxu0 %v1268_v30  ;;  %v1388_v47 = vor.u32 %v1526_v42, %v1387_v41  ;;  %v1315_v50 = vld [vmem:[%s1897_s5 + $0xb0] sm:$0xf]  ;;  %v1508_v52 = vld [vmem:[%s1897_s5 + $0xb4] sm:$0xf0]  ;;  %v1252_v57 = vor.u32 %v1492_v49, %v1251_v48 }
  0x77   : > { %974 = vmatpush.bf16.msra.mxu1 %v1332_v34  ;;  %v1452_v51 = vor.u32 %v1542_v44, %v1451_v43  ;;  %v1379_v53 = vld [vmem:[%s1897_s5 + $0x130] sm:$0xf]  ;;  %v1524_v54 = vld [vmem:[%s1897_s5 + $0x134] sm:$0xf0]  ;;  %v1316_v58 = vor.u32 %v1508_v52, %v1315_v50  ;;  %v1243_v60 = vld [vmem:[%s1897_s5 + $0x20] sm:$0xf] }
  0x78   : > { %987 = vmatpush.bf16.msra.mxu2 %v1396_v35  ;;  %v1443_v55 = vld [vmem:[%s1897_s5 + $0x1b0] sm:$0xf]  ;;  %v1540_v56 = vld [vmem:[%s1897_s5 + $0x1b4] sm:$0xf0]  ;;  %v1380_v59 = vor.u32 %v1524_v54, %v1379_v53  ;;  %v1490_v61 = vld [vmem:[%s1897_s5 + $0x24] sm:$0xf0] }
  0x79   : > { %1000 = vmatpush.bf16.msra.mxu3 %v1460_v39  ;;  %v1307_v62 = vld [vmem:[%s1897_s5 + $0xa0] sm:$0xf]  ;;  %v1444_v63 = vor.u32 %v1540_v56, %v1443_v55  ;;  %v1506_v0 = vld [vmem:[%s1897_s5 + $0xa4] sm:$0xf0]  ;;  %v1244_v5 = vor.u32 %v1490_v61, %v1243_v60  ;;  %v1235_v8 = vld [vmem:[%s1897_s5 + $0x10] sm:$0xf] }
  0x7a   : > { %962 = vmatpush.bf16.msra.mxu0 %v1260_v45  ;;  %v1371_v1 = vld [vmem:[%s1897_s5 + $0x120] sm:$0xf]  ;;  %v1522_v2 = vld [vmem:[%s1897_s5 + $0x124] sm:$0xf0]  ;;  %v1308_v6 = vor.u32 %v1506_v0, %v1307_v62  ;;  %v1488_v9 = vld [vmem:[%s1897_s5 + $0x14] sm:$0xf0] }
  0x7b   : > { %975 = vmatpush.bf16.msra.mxu1 %v1324_v46  ;;  %v1435_v3 = vld [vmem:[%s1897_s5 + $0x1a0] sm:$0xf]  ;;  %v1538_v4 = vld [vmem:[%s1897_s5 + $0x1a4] sm:$0xf0]  ;;  %v1372_v7 = vor.u32 %v1522_v2, %v1371_v1  ;;  %v1299_v10 = vld [vmem:[%s1897_s5 + $0x90] sm:$0xf]  ;;  %v1236_v17 = vor.u32 %v1488_v9, %v1235_v8 }
  0x7c   : > { %988 = vmatpush.bf16.msra.mxu2 %v1388_v47  ;;  %v1436_v11 = vor.u32 %v1538_v4, %v1435_v3  ;;  %v1504_v12 = vld [vmem:[%s1897_s5 + $0x94] sm:$0xf0]  ;;  %v1363_v13 = vld [vmem:[%s1897_s5 + $0x110] sm:$0xf]  ;;  %v1227_v18 = vld [vmem:[%s1897_s5] sm:$0xf] }
  0x7d   : > { %1001 = vmatpush.bf16.msra.mxu3 %v1452_v51  ;;  %v1520_v14 = vld [vmem:[%s1897_s5 + $0x114] sm:$0xf0]  ;;  %v1427_v15 = vld [vmem:[%s1897_s5 + $0x190] sm:$0xf]  ;;  %v1486_v19 = vld [vmem:[%s1897_s5 + $0x4] sm:$0xf0]  ;;  %v1300_v21 = vor.u32 %v1504_v12, %v1299_v10 }
  0x7e   : > { %963 = vmatpush.bf16.msra.mxu0 %v1252_v57  ;;  %v1536_v16 = vld [vmem:[%s1897_s5 + $0x194] sm:$0xf0]  ;;  %v1291_v20 = vld [vmem:[%s1897_s5 + $0x80] sm:$0xf]  ;;  %v1364_v22 = vor.u32 %v1520_v14, %v1363_v13  ;;  %v1502_v23 = vld [vmem:[%s1897_s5 + $0x84] sm:$0xf0]  ;;  %v1228_v33 = vor.u32 %v1486_v19, %v1227_v18 }
  0x7f   : > { %976 = vmatpush.bf16.msra.mxu1 %v1316_v58  ;;  %v1355_v24 = vld [vmem:[%s1897_s5 + $0x100] sm:$0xf]  ;;  %v1518_v25 = vld [vmem:[%s1897_s5 + $0x104] sm:$0xf0]  ;;  %v1428_v26 = vor.u32 %v1536_v16, %v1427_v15  ;;  %v1499_v29 = vld [vmem:[%s1897_s5 + $0x74] sm:$0xf]  ;;  %v1292_v38 = vor.u32 %v1502_v23, %v1291_v20 }
  0x80   : > { %989 = vmatpush.bf16.msra.mxu2 %v1380_v59  ;;  %v1419_v27 = vld [vmem:[%s1897_s5 + $0x180] sm:$0xf]  ;;  %v1534_v28 = vld [vmem:[%s1897_s5 + $0x184] sm:$0xf0]  ;;  %v1285_v30 = vld [vmem:[%s1897_s5 + $0x78] sm:$0xf0]  ;;  %v1356_v39 = vor.u32 %v1518_v25, %v1355_v24 }
  0x81   : > { %1002 = vmatpush.bf16.msra.mxu3 %v1444_v63  ;;  %v1515_v31 = vld [vmem:[%s1897_s5 + $0xf4] sm:$0xf]  ;;  %v560_v32 = vld [vmem:[%s1883_s26 + $0x8] sm:$0xff]  ;;  %v1349_v34 = vld [vmem:[%s1897_s5 + $0xf8] sm:$0xf0]  ;;  %v1420_v43 = vor.u32 %v1534_v28, %v1419_v27  ;;  %v1288_v44 = vor.u32 %v1499_v29, %v1285_v30  ;;  %p1481_p13 = scmp.ne.s32.totalorder %s1644_s14, 8 }
  0x82   : > { %964 = vmatpush.bf16.msra.mxu0 %v1244_v5  ;;  %v1531_v35 = vld [vmem:[%s1897_s5 + $0x174] sm:$0xf]  ;;  %v1413_v36 = vld [vmem:[%s1897_s5 + $0x178] sm:$0xf0]  ;;  %v629_v37 = vunpack.c.l.b16 %v560_v32  ;;  %v630_v42 = vunpack.c.h.b16 %v560_v32  ;;  %v559_v45 = vld [vmem:[%s1883_s26] sm:$0xff]  ;;  %v1352_v46 = vor.u32 %v1515_v31, %v1349_v34 }
  0x83   : > { %977 = vmatpush.bf16.msra.mxu1 %v1308_v6  ;;  %v1547_v40 = vld [vmem:[%s1897_s5 + $0x1f4] sm:$0xf]  ;;  %v1477_v41 = vld [vmem:[%s1897_s5 + $0x1f8] sm:$0xf0]  ;;  %v1416_v47 = vor.u32 %v1531_v35, %v1413_v36  ;;  %v1497_v48 = vld [vmem:[%s1897_s5 + $0x64] sm:$0xf]  ;;  %v627_v51 = vunpack.c.l.b16 %v559_v45  ;;  %v628_v52 = vunpack.c.h.b16 %v559_v45 }
  0x84   : > { %990 = vmatpush.bf16.msra.mxu2 %v1372_v7  ;;  %v1277_v49 = vld [vmem:[%s1897_s5 + $0x68] sm:$0xf0]  ;;  %v1513_v50 = vld [vmem:[%s1897_s5 + $0xe4] sm:$0xf]  ;;  %v1480_v53 = vor.u32 %v1547_v40, %v1477_v41  ;;  %v1982_v57 = vpack.c.b16 %v629_v37, %v629_v37  ;;  %v1986_v60 = vpack.c.b16 %v630_v42, %v630_v42  ;;  %v1495_v2 = vld [vmem:[%s1897_s5 + $0x54] sm:$0xf] }
  0x85   : > { %1003 = vmatpush.bf16.msra.mxu3 %v1436_v11  ;;  %v1341_v54 = vld [vmem:[%s1897_s5 + $0xe8] sm:$0xf0]  ;;  %v1529_v55 = vld [vmem:[%s1897_s5 + $0x164] sm:$0xf]  ;;  %v1988_v61 = vpack.c.b16 %v627_v51, %v627_v51  ;;  %v1280_v62 = vor.u32 %v1497_v48, %v1277_v49  ;;  %v1990_v63 = vpack.c.b16 %v628_v52, %v628_v52  ;;  %v1269_v3 = vld [vmem:[%s1897_s5 + $0x58] sm:$0xf0] }
  0x86   : > { %965 = vmatpush.bf16.msra.mxu0 %v1236_v17  ;;  %v1405_v56 = vld [vmem:[%s1897_s5 + $0x168] sm:$0xf0]  ;;  %v1545_v58 = vld [vmem:[%s1897_s5 + $0x1e4] sm:$0xf]  ;;  %v1344_v0 = vor.u32 %v1513_v50, %v1341_v54  ;;  %v1511_v4 = vld [vmem:[%s1897_s5 + $0xd4] sm:$0xf]  ;;  %v1272_v11 = vor.u32 %v1495_v2, %v1269_v3 }
  0x87   : > { %978 = vmatpush.bf16.msra.mxu1 %v1300_v21  ;;  %v1469_v59 = vld [vmem:[%s1897_s5 + $0x1e8] sm:$0xf0]  ;;  %v1408_v1 = vor.u32 %v1529_v55, %v1405_v56  ;;  %v1333_v6 = vld [vmem:[%s1897_s5 + $0xd8] sm:$0xf0]  ;;  %v1527_v7 = vld [vmem:[%s1897_s5 + $0x154] sm:$0xf] }
  0x88   : > { %991 = vmatpush.bf16.msra.mxu2 %v1364_v22  ;;  %v1472_v5 = vor.u32 %v1545_v58, %v1469_v59  ;;  %v1397_v8 = vld [vmem:[%s1897_s5 + $0x158] sm:$0xf0]  ;;  %v1543_v9 = vld [vmem:[%s1897_s5 + $0x1d4] sm:$0xf]  ;;  %v1336_v12 = vor.u32 %v1511_v4, %v1333_v6  ;;  %v1493_v14 = vld [vmem:[%s1897_s5 + $0x44] sm:$0xf] }
  0x89   : > { %1004 = vmatpush.bf16.msra.mxu3 %v1428_v26  ;;  %v1461_v10 = vld [vmem:[%s1897_s5 + $0x1d8] sm:$0xf0]  ;;  %v1400_v13 = vor.u32 %v1527_v7, %v1397_v8  ;;  %v1261_v15 = vld [vmem:[%s1897_s5 + $0x48] sm:$0xf0]  ;;  %v1509_v16 = vld [vmem:[%s1897_s5 + $0xc4] sm:$0xf] }
  0x8a   : > { %966 = vmatpush.bf16.msra.mxu0 %v1228_v33  ;;  %v1464_v17 = vor.u32 %v1543_v9, %v1461_v10  ;;  %v1325_v18 = vld [vmem:[%s1897_s5 + $0xc8] sm:$0xf0]  ;;  %v1525_v19 = vld [vmem:[%s1897_s5 + $0x144] sm:$0xf]  ;;  %v1264_v23 = vor.u32 %v1493_v14, %v1261_v15  ;;  %v1491_v26 = vld [vmem:[%s1897_s5 + $0x34] sm:$0xf] }
  0x8b   : > { %979 = vmatpush.bf16.msra.mxu1 %v1292_v38  ;;  %v1389_v20 = vld [vmem:[%s1897_s5 + $0x148] sm:$0xf0]  ;;  %v1541_v21 = vld [vmem:[%s1897_s5 + $0x1c4] sm:$0xf]  ;;  %v1328_v24 = vor.u32 %v1509_v16, %v1325_v18  ;;  %v1253_v27 = vld [vmem:[%s1897_s5 + $0x38] sm:$0xf0] }
  0x8c   : > { %992 = vmatpush.bf16.msra.mxu2 %v1356_v39  ;;  %v1453_v22 = vld [vmem:[%s1897_s5 + $0x1c8] sm:$0xf0]  ;;  %v1392_v25 = vor.u32 %v1525_v19, %v1389_v20  ;;  %v1507_v28 = vld [vmem:[%s1897_s5 + $0xb4] sm:$0xf]  ;;  %v1317_v30 = vld [vmem:[%s1897_s5 + $0xb8] sm:$0xf0]  ;;  %v1256_v35 = vor.u32 %v1491_v26, %v1253_v27 }
  0x8d   : > { %1005 = vmatpush.bf16.msra.mxu3 %v1420_v43  ;;  %967 = vmatmul.bf16.vlgmr.msra.gmra.mxu0 %v1988_v61  ;;  %v1456_v29 = vor.u32 %v1541_v21, %v1453_v22  ;;  %v1523_v31 = vld [vmem:[%s1897_s5 + $0x134] sm:$0xf]  ;;  %v1381_v32 = vld [vmem:[%s1897_s5 + $0x138] sm:$0xf0]  ;;  %v1320_v36 = vor.u32 %v1507_v28, %v1317_v30  ;;  %v1489_v38 = vld [vmem:[%s1897_s5 + $0x24] sm:$0xf] }
  0x8e   : > { %1011 = vmatpush.bf16.msrb.mxu0 %v1288_v44  ;;  %980 = vmatmul.bf16.vlgmr.msra.gmra.mxu1 %v1990_v63  ;;  %v1539_v33 = vld [vmem:[%s1897_s5 + $0x1b4] sm:$0xf]  ;;  %v1445_v34 = vld [vmem:[%s1897_s5 + $0x1b8] sm:$0xf0]  ;;  %v1384_v37 = vor.u32 %v1523_v31, %v1381_v32  ;;  %v1245_v39 = vld [vmem:[%s1897_s5 + $0x28] sm:$0xf0] }
  0x8f   : > { %1024 = vmatpush.bf16.msrb.mxu1 %v1352_v46  ;;  %993 = vmatmul.bf16.vlgmr.msra.gmra.mxu2 %v1982_v57  ;;  %v1505_v40 = vld [vmem:[%s1897_s5 + $0xa4] sm:$0xf]  ;;  %v1448_v41 = vor.u32 %v1539_v33, %v1445_v34  ;;  %v1309_v42 = vld [vmem:[%s1897_s5 + $0xa8] sm:$0xf0]  ;;  %v1487_v50 = vld [vmem:[%s1897_s5 + $0x14] sm:$0xf] }
  0x90   : > { %1037 = vmatpush.bf16.msrb.mxu2 %v1416_v47  ;;  %1006 = vmatmul.bf16.vlgmr.msra.gmra.mxu3 %v1986_v60  ;;  %v1521_v43 = vld [vmem:[%s1897_s5 + $0x124] sm:$0xf]  ;;  %v1373_v44 = vld [vmem:[%s1897_s5 + $0x128] sm:$0xf0]  ;;  %v1248_v47 = vor.u32 %v1489_v38, %v1245_v39  ;;  %v1312_v48 = vor.u32 %v1505_v40, %v1309_v42  ;;  %v1237_v51 = vld [vmem:[%s1897_s5 + $0x18] sm:$0xf0] }
  0x91   : > { %1050 = vmatpush.bf16.msrb.mxu3 %v1480_v53  ;;  %v1537_v45 = vld [vmem:[%s1897_s5 + $0x1a4] sm:$0xf]  ;;  %v1437_v46 = vld [vmem:[%s1897_s5 + $0x1a8] sm:$0xf0]  ;;  %v1376_v49 = vor.u32 %v1521_v43, %v1373_v44  ;;  %v1503_v52 = vld [vmem:[%s1897_s5 + $0x94] sm:$0xf] }
  0x92   : > { %1012 = vmatpush.bf16.msrb.mxu0 %v1280_v62  ;;  %v1440_v53 = vor.u32 %v1537_v45, %v1437_v46  ;;  %v1301_v54 = vld [vmem:[%s1897_s5 + $0x98] sm:$0xf0]  ;;  %v1519_v55 = vld [vmem:[%s1897_s5 + $0x114] sm:$0xf]  ;;  %v1240_v62 = vor.u32 %v1487_v50, %v1237_v51  ;;  %v1485_v2 = vld [vmem:[%s1897_s5 + $0x4] sm:$0xf] }
  0x93   : > { %1025 = vmatpush.bf16.msrb.mxu1 %v1344_v0  ;;  %v1365_v56 = vld [vmem:[%s1897_s5 + $0x118] sm:$0xf0]  ;;  %v1535_v58 = vld [vmem:[%s1897_s5 + $0x194] sm:$0xf]  ;;  %v1304_v0 = vor.u32 %v1503_v52, %v1301_v54  ;;  %v1229_v3 = vld [vmem:[%s1897_s5 + $0x8] sm:$0xf0] }
  0x94   : > { %1038 = vmatpush.bf16.msrb.mxu2 %v1408_v1  ;;  %v1429_v59 = vld [vmem:[%s1897_s5 + $0x198] sm:$0xf0]  ;;  %v1368_v1 = vor.u32 %v1519_v55, %v1365_v56  ;;  %v1501_v4 = vld [vmem:[%s1897_s5 + $0x84] sm:$0xf]  ;;  %v1293_v6 = vld [vmem:[%s1897_s5 + $0x88] sm:$0xf0] }
  0x95   : > { %1051 = vmatpush.bf16.msrb.mxu3 %v1472_v5  ;;  %v1432_v5 = vor.u32 %v1535_v58, %v1429_v59  ;;  %v1517_v7 = vld [vmem:[%s1897_s5 + $0x104] sm:$0xf]  ;;  %v1357_v8 = vld [vmem:[%s1897_s5 + $0x108] sm:$0xf0] }
  0x96   : > { %1013 = vmatpush.bf16.msrb.mxu0 %v1272_v11  ;;  %v1533_v9 = vld [vmem:[%s1897_s5 + $0x184] sm:$0xf]  ;;  %v1421_v10 = vld [vmem:[%s1897_s5 + $0x188] sm:$0xf0]  ;;  %v1232_v11 = vor.u32 %v1485_v2, %v1229_v3 }
  0x97   : > { %1026 = vmatpush.bf16.msrb.mxu1 %v1336_v12  ;;  %v1296_v12 = vor.u32 %v1501_v4, %v1293_v6  ;;  %v1424_v14 = vor.u32 %v1533_v9, %v1421_v10  ;;  %v557_v21 = vld [vmem:[%s1895_s15] sm:$0xff] }
  0x98   : > { %1039 = vmatpush.bf16.msrb.mxu2 %v1400_v13  ;;  %v1360_v13 = vor.u32 %v1517_v7, %v1357_v8 }
  0x99   : > { %1052 = vmatpush.bf16.msrb.mxu3 %v1464_v17 }
  0x9a   : > { %1014 = vmatpush.bf16.msrb.mxu0 %v1264_v23 }
  0x9b   : > { %1027 = vmatpush.bf16.msrb.mxu1 %v1328_v24 }
  0x9c   : > { %1040 = vmatpush.bf16.msrb.mxu2 %v1392_v25  ;;  %v558_v25 = vld [vmem:[%s1895_s15 + $0x8] sm:$0xff] }
  0x9d   : > { %1053 = vmatpush.bf16.msrb.mxu3 %v1456_v29 }
  0x9e   : > { %1015 = vmatpush.bf16.msrb.mxu0 %v1256_v35 }
  0x9f   : > { %1028 = vmatpush.bf16.msrb.mxu1 %v1320_v36 }
  0xa0   : > { %1041 = vmatpush.bf16.msrb.mxu2 %v1384_v37 }
  0xa1   : > { %1054 = vmatpush.bf16.msrb.mxu3 %v1448_v41 }
  0xa2   : > { %1016 = vmatpush.bf16.msrb.mxu0 %v1248_v47 }
  0xa3   : > { %1029 = vmatpush.bf16.msrb.mxu1 %v1312_v48 }
  0xa4   : > { %1042 = vmatpush.bf16.msrb.mxu2 %v1376_v49 }
  0xa5   : > { %1055 = vmatpush.bf16.msrb.mxu3 %v1440_v53 }
  0xa6   : > { %1017 = vmatpush.bf16.msrb.mxu0 %v1240_v62 }
  0xa7   : > { %1030 = vmatpush.bf16.msrb.mxu1 %v1304_v0 }
  0xa8   : > { %1043 = vmatpush.bf16.msrb.mxu2 %v1368_v1 }
  0xa9   : > { %1056 = vmatpush.bf16.msrb.mxu3 %v1432_v5 }
  0xaa   : > { %1018 = vmatpush.bf16.msrb.mxu0 %v1232_v11 }
  0xab   : > { %1031 = vmatpush.bf16.msrb.mxu1 %v1296_v12 }
  0xac   : > { %1044 = vmatpush.bf16.msrb.mxu2 %v1360_v13 }
  0xad   : > { %1057 = vmatpush.bf16.msrb.mxu3 %v1424_v14  ;;  %1019 = vmatmul.bf16.vlgmr.msrb.gmra.mxu0 %v1988_v61 }
  0xae   : > { %1032 = vmatmul.bf16.vlgmr.msrb.gmra.mxu1 %v1990_v63 }
  0xaf   : > { %1045 = vmatmul.bf16.vlgmr.msrb.gmra.mxu2 %v1982_v57 }
  0xb0   : > { %1058 = vmatmul.bf16.vlgmr.msrb.gmra.mxu3 %v1986_v60 }
 0x10a   : > { %v968_v15 = vpop.f32.mrf.mxu0 }
 0x10b   : > { %v981_v16 = vpop.f32.mrf.mxu1 }
 0x10c   : > { %v982_v17 = vadd.f32 %v981_v16, %v968_v15 }
 0x112   : > { %v994_v18 = vpop.f32.mrf.mxu2  ;;  %v970_v23 = vpop.f32.mrf.mxu0 }
 0x113   : > { %v995_v19 = vadd.f32 %v994_v18, %v982_v17  ;;  %v1007_v20 = vpop.f32.mrf.mxu3  ;;  %v983_v24 = vpop.f32.mrf.mxu1 }
 0x115   : > { %v1008_v22 = vadd.f32 %v1007_v20, %v995_v19 }
 0x117   : > { %v1063_v61 = vadd.f32 %v1008_v22, %v557_v21 }
 0x119   : > { %1065 = vst [vmem:[%s1895_s15] sm:$0xff] %v1063_v61 }
 0x11a   : > { %v996_v26 = vpop.f32.mrf.mxu2 }
 0x11b   : > { %v1009_v63 = vpop.f32.mrf.mxu3 }
 0x12a   : > { %v1020_v27 = vpop.f32.mrf.mxu0 }
 0x12b   : > { %v1033_v57 = vpop.f32.mrf.mxu1 }
 0x12c   : > { %v1034_v28 = vadd.f32 %v1033_v57, %v1020_v27 }
 0x132   : > { %v1046_v60 = vpop.f32.mrf.mxu2  ;;  %v1022_v31 = vpop.f32.mrf.mxu0 }
 0x133   : > { %v1047_v29 = vadd.f32 %v1046_v60, %v1034_v28  ;;  %v1059_v30 = vpop.f32.mrf.mxu3  ;;  %v1035_v32 = vpop.f32.mrf.mxu1 }
 0x135   : > { %v1060_v33 = vadd.f32 %v1059_v30, %v1047_v29 }
 0x137   : > { %v1064_v34 = vadd.f32 %v1060_v33, %v558_v25  ;;  %1070 = sbr.rel (%p1481_p13) target bundleno = 326 (0x146), region = 78 }
 0x139   : > { %1066 = vst [vmem:[%s1895_s15 + $0x8] sm:$0xff] %v1064_v34 }
 0x13a   : > { %v1048_v35 = vpop.f32.mrf.mxu2 }
 0x13b   : > { %v1061_v36 = vpop.f32.mrf.mxu3 }
 0x13c   : > { %v1071_v37 = vld [vmem:[%s1895_s15] sm:$0xff] }
 0x13d   : > { %v1073_v39 = vld [vmem:[%s539_s12] sm:$0x3] }
 0x13e   : > { %v1075_v40 = vperm.slane %v1073_v39, 0  ;;  %v1076_v41 = vperm.slane %v1073_v39, 1 }
 0x140   : > { %v1072_v38 = vld [vmem:[%s1895_s15 + $0x8] sm:$0xff]  ;;  %v1079_v42 = vadd.f32 %v1075_v40, %v1071_v37 }
 0x141   : > { %v1080_v43 = vadd.f32 %v1076_v41, %v1072_v38 }
 0x142   : > { %v1081_v44 = vmax.f32 %v1079_v42, 0.0 }
 0x143   : > { %v1082_v45 = vmax.f32 %v1080_v43, 0.0 }
 0x144   : > { %1083 = vst [vmem:[%s1895_s15] sm:$0xff] %v1081_v44 }
 0x145   : > { %1084 = vst [vmem:[%s1895_s15 + $0x8] sm:$0xff] %v1082_v45 }
 0x146 PF: > { %s13_s18 = sadd.s32 1, %s1660_s18   ;;  %s2087_s12 = smov %s1640_s13 }
 0x147   : > { %p10_p0 = scmp.ge.s32.totalorder %s13_s18, 20   ;;  %s2088_s13 = smov %s1734_s25 }
 0x148   : > { %s2089_s14 = smov %s1652_s16  ;;  %s2090_s15 = smov %s1656_s17 }
 0x149   : > { %s2091_s16 = smov %s2094_s19  ;;  %s2092_s17 = smov %s2098_s20 }
 0x14a   :  { %12 = sbr.rel (!%p10_p0) target bundleno = 4 (0x4), region = 119 }

// kernel: resnet18_16s_forward.42
= control target key start
LH: loop header
LB: loop body
LE: loop exit
PB: predicated region body
PF: predicated region fallthrough
CT: control target
= control target key end

     0   :  { %vm18_vm0 = vcmask 130048   ;;  %v524_v42 = vmov 0.0   ;;  %s668_s1 = inlined_call_operand.vmem [shape: bf16[512,16], index: 1, kind: input, shape index: {}]   ;;  %s669_s0 = inlined_call_operand.vmem [shape: bf16[8,512], index: 0, kind: input, shape index: {}]   ;;  %s670_s2 = inlined_call_operand.vmem [shape: f32[1,16], index: 2, kind: input, shape index: {}]   ;;  %s671_s3 = inlined_call_operand.vmem [shape: f32[8,16], index: 3, kind: output, shape index: {}]  }
   0x1   :  { %v497_v0 = vld [vmem:[%s668_s1 + $0x38] sm:$0xff]  ;;  %v496_v4 = vld [vmem:[%s668_s1 + $0x30] sm:$0xff]  ;;  %v495_v8 = vld [vmem:[%s668_s1 + $0x28] sm:$0xff]  ;;  %19 = vst.msk [vmem:[%s671_s3] sm:$0xff] %vm18_vm0, %v524_v42 }
   0x2   :  { %v505_v1 = vld [vmem:[%s668_s1 + $0x78] sm:$0xff]  ;;  %293 = vmatpush.bf16.msra.mxu0 %v497_v0  ;;  %v504_v5 = vld [vmem:[%s668_s1 + $0x70] sm:$0xff]  ;;  %v503_v9 = vld [vmem:[%s668_s1 + $0x68] sm:$0xff] }
   0x3   :  { %v513_v2 = vld [vmem:[%s668_s1 + $0xb8] sm:$0xff]  ;;  %306 = vmatpush.bf16.msra.mxu1 %v505_v1  ;;  %v512_v6 = vld [vmem:[%s668_s1 + $0xb0] sm:$0xff]  ;;  %v511_v10 = vld [vmem:[%s668_s1 + $0xa8] sm:$0xff] }
   0x4   :  { %v521_v3 = vld [vmem:[%s668_s1 + $0xf8] sm:$0xff]  ;;  %319 = vmatpush.bf16.msra.mxu2 %v513_v2  ;;  %v520_v7 = vld [vmem:[%s668_s1 + $0xf0] sm:$0xff]  ;;  %v519_v11 = vld [vmem:[%s668_s1 + $0xe8] sm:$0xff] }
   0x5   :  { %332 = vmatpush.bf16.msra.mxu3 %v521_v3  ;;  %v494_v12 = vld [vmem:[%s668_s1 + $0x20] sm:$0xff]  ;;  %v493_v16 = vld [vmem:[%s668_s1 + $0x18] sm:$0xff]  ;;  %v492_v20 = vld [vmem:[%s668_s1 + $0x10] sm:$0xff] }
   0x6   :  { %294 = vmatpush.bf16.msra.mxu0 %v496_v4  ;;  %v502_v13 = vld [vmem:[%s668_s1 + $0x60] sm:$0xff]  ;;  %v501_v17 = vld [vmem:[%s668_s1 + $0x58] sm:$0xff]  ;;  %v500_v21 = vld [vmem:[%s668_s1 + $0x50] sm:$0xff] }
   0x7   :  { %307 = vmatpush.bf16.msra.mxu1 %v504_v5  ;;  %v510_v14 = vld [vmem:[%s668_s1 + $0xa0] sm:$0xff]  ;;  %v509_v18 = vld [vmem:[%s668_s1 + $0x98] sm:$0xff]  ;;  %v508_v22 = vld [vmem:[%s668_s1 + $0x90] sm:$0xff] }
   0x8   :  { %320 = vmatpush.bf16.msra.mxu2 %v512_v6  ;;  %v518_v15 = vld [vmem:[%s668_s1 + $0xe0] sm:$0xff]  ;;  %v517_v19 = vld [vmem:[%s668_s1 + $0xd8] sm:$0xff]  ;;  %v516_v23 = vld [vmem:[%s668_s1 + $0xd0] sm:$0xff] }
   0x9   :  { %333 = vmatpush.bf16.msra.mxu3 %v520_v7  ;;  %v491_v24 = vld [vmem:[%s668_s1 + $0x8] sm:$0xff]  ;;  %v21_v26 = vld [vmem:[%s669_s0] sm:$0xff] }
   0xa   :  { %295 = vmatpush.bf16.msra.mxu0 %v495_v8  ;;  %v499_v25 = vld [vmem:[%s668_s1 + $0x48] sm:$0xff]  ;;  %v89_v30 = vunpack.c.l.b16 %v21_v26  ;;  %v90_v31 = vunpack.c.h.b16 %v21_v26  ;;  %v490_v32 = vld [vmem:[%s668_s1] sm:$0xff] }
   0xb   :  { %308 = vmatpush.bf16.msra.mxu1 %v503_v9  ;;  %v507_v27 = vld [vmem:[%s668_s1 + $0x88] sm:$0xff]  ;;  %v498_v33 = vld [vmem:[%s668_s1 + $0x40] sm:$0xff] }
   0xc   :  { %321 = vmatpush.bf16.msra.mxu2 %v511_v10  ;;  %v515_v28 = vld [vmem:[%s668_s1 + $0xc8] sm:$0xff]  ;;  %v506_v36 = vld [vmem:[%s668_s1 + $0x80] sm:$0xff]  ;;  %v93_v38 = vpack.c.b16 %v89_v30, %v89_v30  ;;  %v94_v39 = vpack.c.b16 %v90_v31, %v90_v31 }
   0xd   :  { %334 = vmatpush.bf16.msra.mxu3 %v519_v11  ;;  %v22_v29 = vld [vmem:[%s669_s0 + $0x8] sm:$0xff]  ;;  %v514_v37 = vld [vmem:[%s668_s1 + $0xc0] sm:$0xff] }
   0xe   :  { %296 = vmatpush.bf16.msra.mxu0 %v494_v12  ;;  %v91_v34 = vunpack.c.l.b16 %v22_v29  ;;  %v92_v35 = vunpack.c.h.b16 %v22_v29  ;;  %v20_v51 = vld [vmem:[%s671_s3] sm:$0xff] }
   0xf   :  { %309 = vmatpush.bf16.msra.mxu1 %v502_v13  ;;  %v523_v56 = vld [vmem:[%s670_s2] ss:$0 sm:$0xff] }
  0x10   :  { %322 = vmatpush.bf16.msra.mxu2 %v510_v14  ;;  %v95_v40 = vpack.c.b16 %v91_v34, %v91_v34  ;;  %v96_v41 = vpack.c.b16 %v92_v35, %v92_v35 }
  0x11   :  { %335 = vmatpush.bf16.msra.mxu3 %v518_v15 }
  0x12   :  { %297 = vmatpush.bf16.msra.mxu0 %v493_v16 }
  0x13   :  { %310 = vmatpush.bf16.msra.mxu1 %v501_v17 }
  0x14   :  { %323 = vmatpush.bf16.msra.mxu2 %v509_v18 }
  0x15   :  { %336 = vmatpush.bf16.msra.mxu3 %v517_v19 }
  0x16   :  { %298 = vmatpush.bf16.msra.mxu0 %v492_v20 }
  0x17   :  { %311 = vmatpush.bf16.msra.mxu1 %v500_v21 }
  0x18   :  { %324 = vmatpush.bf16.msra.mxu2 %v508_v22 }
  0x19   :  { %337 = vmatpush.bf16.msra.mxu3 %v516_v23 }
  0x1a   :  { %299 = vmatpush.bf16.msra.mxu0 %v491_v24 }
  0x1b   :  { %312 = vmatpush.bf16.msra.mxu1 %v499_v25 }
  0x1c   :  { %325 = vmatpush.bf16.msra.mxu2 %v507_v27 }
  0x1d   :  { %338 = vmatpush.bf16.msra.mxu3 %v515_v28 }
  0x1e   :  { %300 = vmatpush.bf16.msra.mxu0 %v490_v32 }
  0x1f   :  { %313 = vmatpush.bf16.msra.mxu1 %v498_v33 }
  0x20   :  { %326 = vmatpush.bf16.msra.mxu2 %v506_v36 }
  0x21   :  { %339 = vmatpush.bf16.msra.mxu3 %v514_v37  ;;  %301 = vmatmul.bf16.vlgmr.msra.gmra.mxu0 %v93_v38 }
  0x22   :  { %314 = vmatmul.bf16.vlgmr.msra.gmra.mxu1 %v94_v39 }
  0x23   :  { %327 = vmatmul.bf16.vlgmr.msra.gmra.mxu2 %v95_v40 }
  0x24   :  { %340 = vmatmul.bf16.vlgmr.msra.gmra.mxu3 %v96_v41 }
  0x9e   :  { %v302_v43 = vpop.f32.mrf.mxu0 }
  0x9f   :  { %v315_v44 = vpop.f32.mrf.mxu1 }
  0xa0   :  { %v316_v45 = vadd.f32 %v315_v44, %v302_v43 }
  0xa6   :  { %v328_v46 = vpop.f32.mrf.mxu2  ;;  %v304_v49 = vpop.f32.mrf.mxu0 }
  0xa7   :  { %v341_v47 = vpop.f32.mrf.mxu3  ;;  %v329_v48 = vadd.f32 %v328_v46, %v316_v45  ;;  %v317_v50 = vpop.f32.mrf.mxu1 }
  0xa9   :  { %v342_v52 = vadd.f32 %v341_v47, %v329_v48 }
  0xab   :  { %v345_v53 = vadd.f32 %v342_v52, %v20_v51 }
  0xad   :  { %347 = vst.msk [vmem:[%s671_s3] sm:$0xff] %vm18_vm0, %v345_v53 }
  0xae   :  { %v330_v54 = vpop.f32.mrf.mxu2 }
  0xaf   :  { %v343_v55 = vpop.f32.mrf.mxu3 }
  0xb4   :  { %v351_v57 = vld [vmem:[%s671_s3] sm:$0xff] }
  0xb5   :  { %v356_v58 = vadd.f32 %v523_v56, %v351_v57 }
  0xb7   :  { %357 = vst.msk [vmem:[%s671_s3] sm:$0xff] %vm18_vm0, %v356_v58 }

// kernel: resnet18_16s_forward.43
= control target key start
LH: loop header
LB: loop body
LE: loop exit
PB: predicated region body
PF: predicated region fallthrough
CT: control target
= control target key end

     0   :  { %s969_s12 = smov 0   ;;  %s971_s13 = smov 0   ;;  %s1405_s0 = inlined_call_operand.vmem [shape: f32[1024,4], index: 0, kind: input, shape index: {}]   ;;  %s1406_s1 = inlined_call_operand.vmem [shape: f32[4,32], index: 1, kind: input, shape index: {}]   ;;  %s1407_s2 = inlined_call_operand.vmem [shape: f32[1,32], index: 2, kind: input, shape index: {}]   ;;  %s1408_s3 = inlined_call_operand.vmem [shape: f32[1024,32], index: 3, kind: output, shape index: {}]  }
   0x1   :  { %s973_s14 = smov 0  }
   0x2 LB: > { %s32_s15 = sadd.s32 1, %s942_s13  ;;  %p855_p0 = scmp.ge.s32.totalorder %s946_s14, 1  ;;  %s946_s14 = sphi %s973_s14, %s13_s14   ;;  %s942_s13 = sphi %s971_s13, %s1410_s13   ;;  %s938_s12 = sphi %s969_s12, %s1409_s12  }
   0x3   : > { %p34_p1 = scmp.ge.s32.totalorder %s32_s15, 4  ;;  %p186_p2 = scmp.lt.s32.totalorder %s946_s14, 5 }
   0x5   : > { %s1412_s15 = smov (%p34_p1, %s32_s15), 0  ;;  %p187_p3 = pnand %p855_p0, %p186_p2 }
   0x6   : > { %s856_s18 = sshll.u32 (!%p187_p3), %s938_s12, 5 }
   0x7   : > { %190 = sbr.rel (%p187_p3) target bundleno = 218 (0xda), region = 32  ;;  %p227_p4 = scmp.lt.s32.totalorder (!%p187_p3), %s856_s18, 127 }
   0xc   : > { %v355_v0 = vld [vmem:[%s1406_s1] sm:$0xf]  ;;  %vm453_vm0 = vcmask 1043456   ;;  %s1414_s18 = smov (!%p227_p4, %s856_s18), 127  ;;  %vm356_vm1 = vcmask 31744   ;;  %vm258_vm2 = vcmask 261120  }
   0xd   : > { %896 = vmatpush.msk.msra.mxu2 %vm453_vm0, %v355_v0  ;;  %897 = vmatpush.msk.msra.mxu3 %vm453_vm0, %v355_v0  ;;  %s857_s19 = sshll.u32 %s1414_s18, 3  ;;  %v948_v17 = vmov 0.0   ;;  %v1180_v48 = vld [vmem:[%s1407_s2] ss:$0 sm:$0xff] }
   0xe   : > { %860 = vmatpush.msk.msra.mxu0 %vm453_vm0, %v355_v0  ;;  %895 = vmatpush.msk.msra.mxu1 %vm453_vm0, %v355_v0  ;;  %s998_s22 = scalar_lea.vmem %s1405_s0, %s857_s19  ;;  %s1033_s25 = scalar_lea.vmem %s1408_s3, %s857_s19 }
   0xf   : > { %v339_v1 = vld [vmem:[%s998_s22 + $0x80] sm:$0xff]  ;;  %v340_v5 = vld [vmem:[%s998_s22 + $0x88] sm:$0xff]  ;;  %v341_v9 = vld [vmem:[%s998_s22 + $0x90] sm:$0xff]  ;;  %259 = vst.msk [vmem:[%s1033_s25] sm:$0xff] %vm258_vm2, %v948_v17 }
  0x10   : > { %v347_v2 = vld [vmem:[%s998_s22 + $0xc0] sm:$0xff]  ;;  %877 = vmatmul.msk.f32.vlgmr.msra.gmra.mxu2 %vm356_vm1, %v339_v1  ;;  %v348_v6 = vld [vmem:[%s998_s22 + $0xc8] sm:$0xff]  ;;  %v349_v10 = vld [vmem:[%s998_s22 + $0xd0] sm:$0xff]  ;;  %260 = vst.msk [vmem:[%s1033_s25 + $0x8] sm:$0xff] %vm258_vm2, %v948_v17 }
  0x11   : > { %v323_v3 = vld [vmem:[%s998_s22] sm:$0xff]  ;;  %885 = vmatmul.msk.f32.vlgmr.msra.gmra.mxu3 %vm356_vm1, %v347_v2  ;;  %v324_v7 = vld [vmem:[%s998_s22 + $0x8] sm:$0xff]  ;;  %v325_v11 = vld [vmem:[%s998_s22 + $0x10] sm:$0xff]  ;;  %261 = vst.msk [vmem:[%s1033_s25 + $0x10] sm:$0xff] %vm258_vm2, %v948_v17 }
  0x12   : > { %v331_v4 = vld [vmem:[%s998_s22 + $0x40] sm:$0xff]  ;;  %861 = vmatmul.msk.f32.vlgmr.msra.gmra.mxu0 %vm356_vm1, %v323_v3  ;;  %v332_v8 = vld [vmem:[%s998_s22 + $0x48] sm:$0xff]  ;;  %v333_v12 = vld [vmem:[%s998_s22 + $0x50] sm:$0xff]  ;;  %262 = vst.msk [vmem:[%s1033_s25 + $0x18] sm:$0xff] %vm258_vm2, %v948_v17 }
  0x13   : > { %869 = vmatmul.msk.f32.vlgmr.msra.gmra.mxu1 %vm356_vm1, %v331_v4  ;;  %v342_v13 = vld [vmem:[%s998_s22 + $0x98] sm:$0xff]  ;;  %v343_v18 = vld [vmem:[%s998_s22 + $0xa0] sm:$0xff]  ;;  %263 = vst.msk [vmem:[%s1033_s25 + $0x20] sm:$0xff] %vm258_vm2, %v948_v17  ;;  %v344_v22 = vld [vmem:[%s998_s22 + $0xa8] sm:$0xff] }
  0x14   : > { %v350_v14 = vld [vmem:[%s998_s22 + $0xd8] sm:$0xff]  ;;  %v351_v19 = vld [vmem:[%s998_s22 + $0xe0] sm:$0xff]  ;;  %264 = vst.msk [vmem:[%s1033_s25 + $0x28] sm:$0xff] %vm258_vm2, %v948_v17  ;;  %v352_v23 = vld [vmem:[%s998_s22 + $0xe8] sm:$0xff] }
  0x15   : > { %v326_v15 = vld [vmem:[%s998_s22 + $0x18] sm:$0xff]  ;;  %v327_v20 = vld [vmem:[%s998_s22 + $0x20] sm:$0xff]  ;;  %265 = vst.msk [vmem:[%s1033_s25 + $0x30] sm:$0xff] %vm258_vm2, %v948_v17  ;;  %v328_v24 = vld [vmem:[%s998_s22 + $0x28] sm:$0xff] }
  0x16   : > { %v334_v16 = vld [vmem:[%s998_s22 + $0x58] sm:$0xff]  ;;  %v335_v21 = vld [vmem:[%s998_s22 + $0x60] sm:$0xff]  ;;  %266 = vst.msk [vmem:[%s1033_s25 + $0x38] sm:$0xff] %vm258_vm2, %v948_v17  ;;  %v336_v25 = vld [vmem:[%s998_s22 + $0x68] sm:$0xff] }
  0x17   : > { %267 = vst.msk [vmem:[%s1033_s25 + $0x40] sm:$0xff] %vm258_vm2, %v948_v17  ;;  %v345_v26 = vld [vmem:[%s998_s22 + $0xb0] sm:$0xff]  ;;  %v346_v30 = vld [vmem:[%s998_s22 + $0xb8] sm:$0xff]  ;;  %v291_v34 = vld [vmem:[%s1033_s25] sm:$0xff] }
  0x18   : > { %878 = vmatmul.msk.f32.gmra.mxu2 %vm356_vm1, %v340_v5  ;;  %268 = vst.msk [vmem:[%s1033_s25 + $0x48] sm:$0xff] %vm258_vm2, %v948_v17  ;;  %v353_v27 = vld [vmem:[%s998_s22 + $0xf0] sm:$0xff]  ;;  %v354_v31 = vld [vmem:[%s998_s22 + $0xf8] sm:$0xff]  ;;  %v292_v46 = vld [vmem:[%s1033_s25 + $0x8] sm:$0xff] }
  0x19   : > { %886 = vmatmul.msk.f32.gmra.mxu3 %vm356_vm1, %v348_v6  ;;  %269 = vst.msk [vmem:[%s1033_s25 + $0x50] sm:$0xff] %vm258_vm2, %v948_v17  ;;  %v329_v28 = vld [vmem:[%s998_s22 + $0x30] sm:$0xff]  ;;  %v330_v32 = vld [vmem:[%s998_s22 + $0x38] sm:$0xff] }
  0x1a   : > { %862 = vmatmul.msk.f32.gmra.mxu0 %vm356_vm1, %v324_v7  ;;  %270 = vst.msk [vmem:[%s1033_s25 + $0x58] sm:$0xff] %vm258_vm2, %v948_v17  ;;  %v337_v29 = vld [vmem:[%s998_s22 + $0x70] sm:$0xff]  ;;  %v338_v33 = vld [vmem:[%s998_s22 + $0x78] sm:$0xff] }
  0x1b   : > { %870 = vmatmul.msk.f32.gmra.mxu1 %vm356_vm1, %v332_v8  ;;  %271 = vst.msk [vmem:[%s1033_s25 + $0x60] sm:$0xff] %vm258_vm2, %v948_v17  ;;  %v293_v63 = vld [vmem:[%s1033_s25 + $0x10] sm:$0xff] }
  0x1c   : > { %272 = vst.msk [vmem:[%s1033_s25 + $0x68] sm:$0xff] %vm258_vm2, %v948_v17 }
  0x1d   : > { %273 = vst.msk [vmem:[%s1033_s25 + $0x70] sm:$0xff] %vm258_vm2, %v948_v17 }
  0x1e   : > { %274 = vst.msk [vmem:[%s1033_s25 + $0x78] sm:$0xff] %vm258_vm2, %v948_v17  ;;  %v299_v35 = vld [vmem:[%s1033_s25 + $0x40] sm:$0xff] }
  0x1f   : > { %275 = vst.msk [vmem:[%s1033_s25 + $0x80] sm:$0xff] %vm258_vm2, %v948_v17  ;;  %v300_v47 = vld [vmem:[%s1033_s25 + $0x48] sm:$0xff] }
  0x20   : > { %879 = vmatmul.msk.f32.gmra.mxu2 %vm356_vm1, %v341_v9  ;;  %276 = vst.msk [vmem:[%s1033_s25 + $0x88] sm:$0xff] %vm258_vm2, %v948_v17  ;;  %v301_v4 = vld [vmem:[%s1033_s25 + $0x50] sm:$0xff] }
  0x21   : > { %887 = vmatmul.msk.f32.gmra.mxu3 %vm356_vm1, %v349_v10  ;;  %277 = vst.msk [vmem:[%s1033_s25 + $0x90] sm:$0xff] %vm258_vm2, %v948_v17 }
  0x22   : > { %863 = vmatmul.msk.f32.gmra.mxu0 %vm356_vm1, %v325_v11  ;;  %278 = vst.msk [vmem:[%s1033_s25 + $0x98] sm:$0xff] %vm258_vm2, %v948_v17 }
  0x23   : > { %871 = vmatmul.msk.f32.gmra.mxu1 %vm356_vm1, %v333_v12  ;;  %279 = vst.msk [vmem:[%s1033_s25 + $0xa0] sm:$0xff] %vm258_vm2, %v948_v17 }
  0x24   : > { %280 = vst.msk [vmem:[%s1033_s25 + $0xa8] sm:$0xff] %vm258_vm2, %v948_v17 }
  0x25   : > { %281 = vst.msk [vmem:[%s1033_s25 + $0xb0] sm:$0xff] %vm258_vm2, %v948_v17 }
  0x26   : > { %282 = vst.msk [vmem:[%s1033_s25 + $0xb8] sm:$0xff] %vm258_vm2, %v948_v17  ;;  %v307_v40 = vld [vmem:[%s1033_s25 + $0x80] sm:$0xff] }
  0x27   : > { %283 = vst.msk [vmem:[%s1033_s25 + $0xc0] sm:$0xff] %vm258_vm2, %v948_v17  ;;  %v308_v56 = vld [vmem:[%s1033_s25 + $0x88] sm:$0xff] }
  0x28   : > { %880 = vmatmul.msk.f32.gmra.mxu2 %vm356_vm1, %v342_v13  ;;  %284 = vst.msk [vmem:[%s1033_s25 + $0xc8] sm:$0xff] %vm258_vm2, %v948_v17  ;;  %v309_v12 = vld [vmem:[%s1033_s25 + $0x90] sm:$0xff] }
  0x29   : > { %888 = vmatmul.msk.f32.gmra.mxu3 %vm356_vm1, %v350_v14  ;;  %285 = vst.msk [vmem:[%s1033_s25 + $0xd0] sm:$0xff] %vm258_vm2, %v948_v17 }
  0x2a   : > { %864 = vmatmul.msk.f32.gmra.mxu0 %vm356_vm1, %v326_v15  ;;  %286 = vst.msk [vmem:[%s1033_s25 + $0xd8] sm:$0xff] %vm258_vm2, %v948_v17 }
  0x2b   : > { %872 = vmatmul.msk.f32.gmra.mxu1 %vm356_vm1, %v334_v16  ;;  %287 = vst.msk [vmem:[%s1033_s25 + $0xe0] sm:$0xff] %vm258_vm2, %v948_v17 }
  0x2c   : > { %288 = vst.msk [vmem:[%s1033_s25 + $0xe8] sm:$0xff] %vm258_vm2, %v948_v17 }
  0x2d   : > { %289 = vst.msk [vmem:[%s1033_s25 + $0xf0] sm:$0xff] %vm258_vm2, %v948_v17 }
  0x2e   : > { %290 = vst.msk [vmem:[%s1033_s25 + $0xf8] sm:$0xff] %vm258_vm2, %v948_v17  ;;  %v315_v41 = vld [vmem:[%s1033_s25 + $0xc0] sm:$0xff] }
  0x2f   : > { %v316_v57 = vld [vmem:[%s1033_s25 + $0xc8] sm:$0xff] }
  0x30   : > { %881 = vmatmul.msk.f32.gmra.mxu2 %vm356_vm1, %v343_v18  ;;  %v317_v13 = vld [vmem:[%s1033_s25 + $0xd0] sm:$0xff] }
  0x31   : > { %889 = vmatmul.msk.f32.gmra.mxu3 %vm356_vm1, %v351_v19  ;;  %v294_v19 = vld [vmem:[%s1033_s25 + $0x18] sm:$0xff] }
  0x32   : > { %865 = vmatmul.msk.f32.gmra.mxu0 %vm356_vm1, %v327_v20  ;;  %v302_v20 = vld [vmem:[%s1033_s25 + $0x58] sm:$0xff] }
  0x33   : > { %873 = vmatmul.msk.f32.gmra.mxu1 %vm356_vm1, %v335_v21 }
  0x38   : > { %882 = vmatmul.msk.f32.gmra.mxu2 %vm356_vm1, %v344_v22 }
  0x39   : > { %890 = vmatmul.msk.f32.gmra.mxu3 %vm356_vm1, %v352_v23 }
  0x3a   : > { %866 = vmatmul.msk.f32.gmra.mxu0 %vm356_vm1, %v328_v24 }
  0x3b   : > { %874 = vmatmul.msk.f32.gmra.mxu1 %vm356_vm1, %v336_v25 }
  0x40   : > { %883 = vmatmul.msk.f32.gmra.mxu2 %vm356_vm1, %v345_v26 }
  0x41   : > { %891 = vmatmul.msk.f32.gmra.mxu3 %vm356_vm1, %v353_v27 }
  0x42   : > { %867 = vmatmul.msk.f32.gmra.mxu0 %vm356_vm1, %v329_v28 }
  0x43   : > { %875 = vmatmul.msk.f32.gmra.mxu1 %vm356_vm1, %v337_v29 }
  0x48   : > { %884 = vmatmul.msk.f32.gmra.mxu2 %vm356_vm1, %v346_v30  ;;  %v310_v30 = vld [vmem:[%s1033_s25 + $0x98] sm:$0xff] }
  0x49   : > { %892 = vmatmul.msk.f32.gmra.mxu3 %vm356_vm1, %v354_v31 }
  0x4a   : > { %868 = vmatmul.msk.f32.gmra.mxu0 %vm356_vm1, %v330_v32 }
  0x4b   : > { %876 = vmatmul.msk.f32.gmra.mxu1 %vm356_vm1, %v338_v33  ;;  %v318_v33 = vld [vmem:[%s1033_s25 + $0xd8] sm:$0xff] }
  0x8f   : > { %v474_v36 = vpop.f32.mrf.mxu0 }
  0x90   : > { %v498_v37 = vpop.f32.mrf.mxu1  ;;  %v570_v38 = vadd.f32 %v474_v36, %v291_v34 }
  0x91   : > { %v578_v39 = vadd.f32 %v498_v37, %v299_v35  ;;  %v295_v37 = vld [vmem:[%s1033_s25 + $0x20] sm:$0xff] }
  0x92   : > { %603 = vst.msk [vmem:[%s1033_s25] sm:$0xff] %vm258_vm2, %v570_v38 }
  0x93   : > { %611 = vst.msk [vmem:[%s1033_s25 + $0x40] sm:$0xff] %vm258_vm2, %v578_v39  ;;  %v522_v42 = vpop.f32.mrf.mxu2 }
  0x94   : > { %v546_v43 = vpop.f32.mrf.mxu3  ;;  %v586_v44 = vadd.f32 %v522_v42, %v307_v40 }
  0x95   : > { %v594_v45 = vadd.f32 %v546_v43, %v315_v41 }
  0x96   : > { %619 = vst.msk [vmem:[%s1033_s25 + $0x80] sm:$0xff] %vm258_vm2, %v586_v44 }
  0x97   : > { %v477_v49 = vpop.f32.mrf.mxu0  ;;  %627 = vst.msk [vmem:[%s1033_s25 + $0xc0] sm:$0xff] %vm258_vm2, %v594_v45 }
  0x98   : > { %v501_v50 = vpop.f32.mrf.mxu1  ;;  %v571_v51 = vadd.f32 %v477_v49, %v292_v46 }
  0x99   : > { %v579_v52 = vadd.f32 %v501_v50, %v300_v47  ;;  %v638_v53 = vld [vmem:[%s1033_s25] sm:$0xff] }
  0x9a   : > { %v674_v54 = vadd.f32 %v1180_v48, %v638_v53  ;;  %v646_v55 = vld [vmem:[%s1033_s25 + $0x40] sm:$0xff]  ;;  %604 = vst.msk [vmem:[%s1033_s25 + $0x8] sm:$0xff] %vm258_vm2, %v571_v51 }
  0x9b   : > { %v682_v58 = vadd.f32 %v1180_v48, %v646_v55  ;;  %612 = vst.msk [vmem:[%s1033_s25 + $0x48] sm:$0xff] %vm258_vm2, %v579_v52  ;;  %v525_v59 = vpop.f32.mrf.mxu2  ;;  %v303_v47 = vld [vmem:[%s1033_s25 + $0x60] sm:$0xff] }
  0x9c   : > { %706 = vst.msk [vmem:[%s1033_s25] sm:$0xff] %vm258_vm2, %v674_v54  ;;  %v549_v60 = vpop.f32.mrf.mxu3  ;;  %v587_v61 = vadd.f32 %v525_v59, %v308_v56  ;;  %v311_v50 = vld [vmem:[%s1033_s25 + $0xa0] sm:$0xff]  ;;  %v296_v59 = vld [vmem:[%s1033_s25 + $0x28] sm:$0xff] }
  0x9d   : > { %714 = vst.msk [vmem:[%s1033_s25 + $0x40] sm:$0xff] %vm258_vm2, %v682_v58  ;;  %v595_v62 = vadd.f32 %v549_v60, %v316_v57  ;;  %v654_v0 = vld [vmem:[%s1033_s25 + $0x80] sm:$0xff]  ;;  %v304_v60 = vld [vmem:[%s1033_s25 + $0x68] sm:$0xff] }
  0x9e   : > { %v690_v1 = vadd.f32 %v1180_v48, %v654_v0  ;;  %v662_v2 = vld [vmem:[%s1033_s25 + $0xc0] sm:$0xff]  ;;  %620 = vst.msk [vmem:[%s1033_s25 + $0x88] sm:$0xff] %vm258_vm2, %v587_v61 }
  0x9f   : > { %v480_v3 = vpop.f32.mrf.mxu0  ;;  %v698_v6 = vadd.f32 %v1180_v48, %v662_v2  ;;  %628 = vst.msk [vmem:[%s1033_s25 + $0xc8] sm:$0xff] %vm258_vm2, %v595_v62  ;;  %v319_v54 = vld [vmem:[%s1033_s25 + $0xe0] sm:$0xff] }
  0xa0   : > { %v504_v5 = vpop.f32.mrf.mxu1  ;;  %v572_v7 = vadd.f32 %v480_v3, %v293_v63  ;;  %722 = vst.msk [vmem:[%s1033_s25 + $0x80] sm:$0xff] %vm258_vm2, %v690_v1 }
  0xa1   : > { %v639_v8 = vld [vmem:[%s1033_s25 + $0x8] sm:$0xff]  ;;  %730 = vst.msk [vmem:[%s1033_s25 + $0xc0] sm:$0xff] %vm258_vm2, %v698_v6  ;;  %v580_v11 = vadd.f32 %v504_v5, %v301_v4 }
  0xa2   : > { %v675_v9 = vadd.f32 %v1180_v48, %v639_v8  ;;  %v647_v10 = vld [vmem:[%s1033_s25 + $0x48] sm:$0xff]  ;;  %605 = vst.msk [vmem:[%s1033_s25 + $0x10] sm:$0xff] %vm258_vm2, %v572_v7 }
  0xa3   : > { %v683_v14 = vadd.f32 %v1180_v48, %v647_v10  ;;  %v528_v15 = vpop.f32.mrf.mxu2  ;;  %613 = vst.msk [vmem:[%s1033_s25 + $0x50] sm:$0xff] %vm258_vm2, %v580_v11  ;;  %v312_v5 = vld [vmem:[%s1033_s25 + $0xa8] sm:$0xff] }
  0xa4   : > { %707 = vst.msk [vmem:[%s1033_s25 + $0x8] sm:$0xff] %vm258_vm2, %v675_v9  ;;  %v552_v16 = vpop.f32.mrf.mxu3  ;;  %v588_v17 = vadd.f32 %v528_v15, %v309_v12  ;;  %v320_v6 = vld [vmem:[%s1033_s25 + $0xe8] sm:$0xff] }
  0xa5   : > { %715 = vst.msk [vmem:[%s1033_s25 + $0x48] sm:$0xff] %vm258_vm2, %v683_v14  ;;  %v596_v18 = vadd.f32 %v552_v16, %v317_v13  ;;  %v655_v21 = vld [vmem:[%s1033_s25 + $0x88] sm:$0xff]  ;;  %v297_v14 = vld [vmem:[%s1033_s25 + $0x30] sm:$0xff] }
  0xa6   : > { %v691_v22 = vadd.f32 %v1180_v48, %v655_v21  ;;  %v663_v23 = vld [vmem:[%s1033_s25 + $0xc8] sm:$0xff]  ;;  %621 = vst.msk [vmem:[%s1033_s25 + $0x90] sm:$0xff] %vm258_vm2, %v588_v17 }
  0xa7   : > { %v483_v24 = vpop.f32.mrf.mxu0  ;;  %v699_v26 = vadd.f32 %v1180_v48, %v663_v23  ;;  %629 = vst.msk [vmem:[%s1033_s25 + $0xd0] sm:$0xff] %vm258_vm2, %v596_v18 }
  0xa8   : > { %v507_v25 = vpop.f32.mrf.mxu1  ;;  %v573_v27 = vadd.f32 %v483_v24, %v294_v19  ;;  %723 = vst.msk [vmem:[%s1033_s25 + $0x88] sm:$0xff] %vm258_vm2, %v691_v22  ;;  %v305_v22 = vld [vmem:[%s1033_s25 + $0x70] sm:$0xff] }
  0xa9   : > { %v581_v28 = vadd.f32 %v507_v25, %v302_v20  ;;  %731 = vst.msk [vmem:[%s1033_s25 + $0xc8] sm:$0xff] %vm258_vm2, %v699_v26  ;;  %v640_v29 = vld [vmem:[%s1033_s25 + $0x10] sm:$0xff] }
  0xaa   : > { %v676_v31 = vadd.f32 %v1180_v48, %v640_v29  ;;  %606 = vst.msk [vmem:[%s1033_s25 + $0x18] sm:$0xff] %vm258_vm2, %v573_v27  ;;  %v648_v35 = vld [vmem:[%s1033_s25 + $0x50] sm:$0xff] }
  0xab   : > { %614 = vst.msk [vmem:[%s1033_s25 + $0x58] sm:$0xff] %vm258_vm2, %v581_v28  ;;  %v531_v32 = vpop.f32.mrf.mxu2  ;;  %v684_v38 = vadd.f32 %v1180_v48, %v648_v35  ;;  %v313_v26 = vld [vmem:[%s1033_s25 + $0xb0] sm:$0xff]  ;;  %v298_v35 = vld [vmem:[%s1033_s25 + $0x38] sm:$0xff] }
  0xac   : > { %v555_v34 = vpop.f32.mrf.mxu3  ;;  %708 = vst.msk [vmem:[%s1033_s25 + $0x10] sm:$0xff] %vm258_vm2, %v676_v31  ;;  %v589_v36 = vadd.f32 %v531_v32, %v310_v30  ;;  %v321_v32 = vld [vmem:[%s1033_s25 + $0xf0] sm:$0xff] }
  0xad   : > { %v656_v39 = vld [vmem:[%s1033_s25 + $0x90] sm:$0xff]  ;;  %v597_v42 = vadd.f32 %v555_v34, %v318_v33  ;;  %716 = vst.msk [vmem:[%s1033_s25 + $0x50] sm:$0xff] %vm258_vm2, %v684_v38 }
  0xae   : > { %v692_v40 = vadd.f32 %v1180_v48, %v656_v39  ;;  %v664_v41 = vld [vmem:[%s1033_s25 + $0xd0] sm:$0xff]  ;;  %622 = vst.msk [vmem:[%s1033_s25 + $0x98] sm:$0xff] %vm258_vm2, %v589_v36 }
  0xaf   : > { %v486_v43 = vpop.f32.mrf.mxu0  ;;  %v700_v45 = vadd.f32 %v1180_v48, %v664_v41  ;;  %630 = vst.msk [vmem:[%s1033_s25 + $0xd8] sm:$0xff] %vm258_vm2, %v597_v42  ;;  %v306_v41 = vld [vmem:[%s1033_s25 + $0x78] sm:$0xff] }
  0xb0   : > { %v510_v44 = vpop.f32.mrf.mxu1  ;;  %v574_v46 = vadd.f32 %v486_v43, %v295_v37  ;;  %724 = vst.msk [vmem:[%s1033_s25 + $0x90] sm:$0xff] %vm258_vm2, %v692_v40 }
  0xb1   : > { %732 = vst.msk [vmem:[%s1033_s25 + $0xd0] sm:$0xff] %vm258_vm2, %v700_v45  ;;  %v641_v49 = vld [vmem:[%s1033_s25 + $0x18] sm:$0xff]  ;;  %v582_v53 = vadd.f32 %v510_v44, %v303_v47 }
  0xb2   : > { %v677_v51 = vadd.f32 %v1180_v48, %v641_v49  ;;  %v649_v52 = vld [vmem:[%s1033_s25 + $0x58] sm:$0xff]  ;;  %607 = vst.msk [vmem:[%s1033_s25 + $0x20] sm:$0xff] %vm258_vm2, %v574_v46 }
  0xb3   : > { %v685_v55 = vadd.f32 %v1180_v48, %v649_v52  ;;  %v534_v56 = vpop.f32.mrf.mxu2  ;;  %615 = vst.msk [vmem:[%s1033_s25 + $0x60] sm:$0xff] %vm258_vm2, %v582_v53  ;;  %v314_v47 = vld [vmem:[%s1033_s25 + $0xb8] sm:$0xff] }
  0xb4   : > { %v558_v57 = vpop.f32.mrf.mxu3  ;;  %709 = vst.msk [vmem:[%s1033_s25 + $0x18] sm:$0xff] %vm258_vm2, %v677_v51  ;;  %v590_v58 = vadd.f32 %v534_v56, %v311_v50  ;;  %v322_v49 = vld [vmem:[%s1033_s25 + $0xf8] sm:$0xff] }
  0xb5   : > { %717 = vst.msk [vmem:[%s1033_s25 + $0x58] sm:$0xff] %vm258_vm2, %v685_v55  ;;  %v657_v61 = vld [vmem:[%s1033_s25 + $0x98] sm:$0xff]  ;;  %v598_v62 = vadd.f32 %v558_v57, %v319_v54 }
  0xb6   : > { %v693_v63 = vadd.f32 %v1180_v48, %v657_v61  ;;  %623 = vst.msk [vmem:[%s1033_s25 + $0xa0] sm:$0xff] %vm258_vm2, %v590_v58  ;;  %v665_v4 = vld [vmem:[%s1033_s25 + $0xd8] sm:$0xff] }
  0xb7   : > { %v489_v0 = vpop.f32.mrf.mxu0  ;;  %631 = vst.msk [vmem:[%s1033_s25 + $0xe0] sm:$0xff] %vm258_vm2, %v598_v62  ;;  %v701_v7 = vadd.f32 %v1180_v48, %v665_v4 }
  0xb8   : > { %v513_v1 = vpop.f32.mrf.mxu1  ;;  %v575_v2 = vadd.f32 %v489_v0, %v296_v59  ;;  %725 = vst.msk [vmem:[%s1033_s25 + $0x98] sm:$0xff] %vm258_vm2, %v693_v63 }
  0xb9   : > { %v583_v3 = vadd.f32 %v513_v1, %v304_v60  ;;  %v642_v8 = vld [vmem:[%s1033_s25 + $0x20] sm:$0xff]  ;;  %733 = vst.msk [vmem:[%s1033_s25 + $0xd8] sm:$0xff] %vm258_vm2, %v701_v7 }
  0xba   : > { %608 = vst.msk [vmem:[%s1033_s25 + $0x28] sm:$0xff] %vm258_vm2, %v575_v2  ;;  %v678_v9 = vadd.f32 %v1180_v48, %v642_v8  ;;  %v650_v15 = vld [vmem:[%s1033_s25 + $0x60] sm:$0xff] }
  0xbb   : > { %616 = vst.msk [vmem:[%s1033_s25 + $0x68] sm:$0xff] %vm258_vm2, %v583_v3  ;;  %v537_v10 = vpop.f32.mrf.mxu2  ;;  %v686_v16 = vadd.f32 %v1180_v48, %v650_v15 }
  0xbc   : > { %v561_v11 = vpop.f32.mrf.mxu3  ;;  %v591_v12 = vadd.f32 %v537_v10, %v312_v5  ;;  %710 = vst.msk [vmem:[%s1033_s25 + $0x20] sm:$0xff] %vm258_vm2, %v678_v9 }
  0xbd   : > { %v599_v13 = vadd.f32 %v561_v11, %v320_v6  ;;  %v658_v17 = vld [vmem:[%s1033_s25 + $0xa0] sm:$0xff]  ;;  %718 = vst.msk [vmem:[%s1033_s25 + $0x60] sm:$0xff] %vm258_vm2, %v686_v16 }
  0xbe   : > { %624 = vst.msk [vmem:[%s1033_s25 + $0xa8] sm:$0xff] %vm258_vm2, %v591_v12  ;;  %v694_v20 = vadd.f32 %v1180_v48, %v658_v17  ;;  %v666_v23 = vld [vmem:[%s1033_s25 + $0xe0] sm:$0xff] }
  0xbf   : > { %v492_v18 = vpop.f32.mrf.mxu0  ;;  %632 = vst.msk [vmem:[%s1033_s25 + $0xe8] sm:$0xff] %vm258_vm2, %v599_v13  ;;  %v702_v24 = vadd.f32 %v1180_v48, %v666_v23 }
  0xc0   : > { %v516_v19 = vpop.f32.mrf.mxu1  ;;  %v576_v21 = vadd.f32 %v492_v18, %v297_v14  ;;  %726 = vst.msk [vmem:[%s1033_s25 + $0xa0] sm:$0xff] %vm258_vm2, %v694_v20 }
  0xc1   : > { %v643_v25 = vld [vmem:[%s1033_s25 + $0x28] sm:$0xff]  ;;  %v584_v29 = vadd.f32 %v516_v19, %v305_v22  ;;  %734 = vst.msk [vmem:[%s1033_s25 + $0xe0] sm:$0xff] %vm258_vm2, %v702_v24 }
  0xc2   : > { %v679_v27 = vadd.f32 %v1180_v48, %v643_v25  ;;  %v651_v28 = vld [vmem:[%s1033_s25 + $0x68] sm:$0xff]  ;;  %609 = vst.msk [vmem:[%s1033_s25 + $0x30] sm:$0xff] %vm258_vm2, %v576_v21 }
  0xc3   : > { %v687_v30 = vadd.f32 %v1180_v48, %v651_v28  ;;  %v540_v31 = vpop.f32.mrf.mxu2  ;;  %617 = vst.msk [vmem:[%s1033_s25 + $0x70] sm:$0xff] %vm258_vm2, %v584_v29 }
  0xc4   : > { %v564_v33 = vpop.f32.mrf.mxu3  ;;  %711 = vst.msk [vmem:[%s1033_s25 + $0x28] sm:$0xff] %vm258_vm2, %v679_v27  ;;  %v592_v34 = vadd.f32 %v540_v31, %v313_v26 }
  0xc5   : > { %719 = vst.msk [vmem:[%s1033_s25 + $0x68] sm:$0xff] %vm258_vm2, %v687_v30  ;;  %v659_v36 = vld [vmem:[%s1033_s25 + $0xa8] sm:$0xff]  ;;  %v600_v39 = vadd.f32 %v564_v33, %v321_v32 }
  0xc6   : > { %v695_v37 = vadd.f32 %v1180_v48, %v659_v36  ;;  %v667_v38 = vld [vmem:[%s1033_s25 + $0xe8] sm:$0xff]  ;;  %625 = vst.msk [vmem:[%s1033_s25 + $0xb0] sm:$0xff] %vm258_vm2, %v592_v34 }
  0xc7   : > { %v495_v40 = vpop.f32.mrf.mxu0  ;;  %v703_v43 = vadd.f32 %v1180_v48, %v667_v38  ;;  %633 = vst.msk [vmem:[%s1033_s25 + $0xf0] sm:$0xff] %vm258_vm2, %v600_v39 }
  0xc8   : > { %v519_v42 = vpop.f32.mrf.mxu1  ;;  %v577_v44 = vadd.f32 %v495_v40, %v298_v35  ;;  %727 = vst.msk [vmem:[%s1033_s25 + $0xa8] sm:$0xff] %vm258_vm2, %v695_v37 }
  0xc9   : > { %735 = vst.msk [vmem:[%s1033_s25 + $0xe8] sm:$0xff] %vm258_vm2, %v703_v43  ;;  %v644_v45 = vld [vmem:[%s1033_s25 + $0x30] sm:$0xff]  ;;  %v585_v46 = vadd.f32 %v519_v42, %v306_v41 }
  0xca   : > { %v680_v50 = vadd.f32 %v1180_v48, %v644_v45  ;;  %610 = vst.msk [vmem:[%s1033_s25 + $0x38] sm:$0xff] %vm258_vm2, %v577_v44  ;;  %v652_v55 = vld [vmem:[%s1033_s25 + $0x70] sm:$0xff] }
  0xcb   : > { %v543_v51 = vpop.f32.mrf.mxu2  ;;  %618 = vst.msk [vmem:[%s1033_s25 + $0x78] sm:$0xff] %vm258_vm2, %v585_v46  ;;  %v688_v56 = vadd.f32 %v1180_v48, %v652_v55 }
  0xcc   : > { %v567_v52 = vpop.f32.mrf.mxu3  ;;  %712 = vst.msk [vmem:[%s1033_s25 + $0x30] sm:$0xff] %vm258_vm2, %v680_v50  ;;  %v593_v53 = vadd.f32 %v543_v51, %v314_v47 }
  0xcd   : > { %v601_v54 = vadd.f32 %v567_v52, %v322_v49  ;;  %v660_v57 = vld [vmem:[%s1033_s25 + $0xb0] sm:$0xff]  ;;  %720 = vst.msk [vmem:[%s1033_s25 + $0x70] sm:$0xff] %vm258_vm2, %v688_v56 }
  0xce   : > { %626 = vst.msk [vmem:[%s1033_s25 + $0xb8] sm:$0xff] %vm258_vm2, %v593_v53  ;;  %v696_v58 = vadd.f32 %v1180_v48, %v660_v57  ;;  %v668_v59 = vld [vmem:[%s1033_s25 + $0xf0] sm:$0xff] }
  0xcf   : > { %634 = vst.msk [vmem:[%s1033_s25 + $0xf8] sm:$0xff] %vm258_vm2, %v601_v54  ;;  %v704_v60 = vadd.f32 %v1180_v48, %v668_v59 }
  0xd0   : > { %728 = vst.msk [vmem:[%s1033_s25 + $0xb0] sm:$0xff] %vm258_vm2, %v696_v58 }
  0xd1   : > { %v645_v61 = vld [vmem:[%s1033_s25 + $0x38] sm:$0xff]  ;;  %736 = vst.msk [vmem:[%s1033_s25 + $0xf0] sm:$0xff] %vm258_vm2, %v704_v60 }
  0xd2   : > { %v681_v62 = vadd.f32 %v1180_v48, %v645_v61  ;;  %v653_v63 = vld [vmem:[%s1033_s25 + $0x78] sm:$0xff] }
  0xd3   : > { %v689_v0 = vadd.f32 %v1180_v48, %v653_v63 }
  0xd4   : > { %713 = vst.msk [vmem:[%s1033_s25 + $0x38] sm:$0xff] %vm258_vm2, %v681_v62 }
  0xd5   : > { %v661_v1 = vld [vmem:[%s1033_s25 + $0xb8] sm:$0xff]  ;;  %721 = vst.msk [vmem:[%s1033_s25 + $0x78] sm:$0xff] %vm258_vm2, %v689_v0 }
  0xd6   : > { %v697_v2 = vadd.f32 %v1180_v48, %v661_v1  ;;  %v669_v3 = vld [vmem:[%s1033_s25 + $0xf8] sm:$0xff] }
  0xd7   : > { %v705_v4 = vadd.f32 %v1180_v48, %v669_v3 }
  0xd8   : > { %729 = vst.msk [vmem:[%s1033_s25 + $0xb8] sm:$0xff] %vm258_vm2, %v697_v2 }
  0xd9   : > { %737 = vst.msk [vmem:[%s1033_s25 + $0xf8] sm:$0xff] %vm258_vm2, %v705_v4 }
  0xda PF: > { %s13_s14 = sadd.s32 1, %s946_s14   ;;  %s1409_s12 = smov %s942_s13 }
  0xdb   : > { %p10_p5 = scmp.ge.s32.totalorder %s13_s14, 6   ;;  %s1410_s13 = smov %s1412_s15 }
  0xdd   :  { %12 = sbr.rel (!%p10_p5) target bundleno = 2 (0x2), region = 76 }

</bundles_post_ra>
